<compile_context>
chip_gen: v7x
topology: tpu7x:2x2x1
jax: 0.10.0
libtpu: 0.0.40
codegen_flags: <defaults>
</compile_context>

<pallas_src>
import jax
import jax.numpy as jnp
from jax.experimental import pallas as pl
from jax.experimental.pallas import tpu as pltpu

DIMS  = [429, 2048, 1024, 512, 256, 128, 64, 39]      # true layer widths
PDIMS = [512, 2048, 1024, 512, 256, 128, 128, 128]    # lane-padded (mult. of 128)
EPS = 1e-5                                            # BatchNorm1d default eps


def _round_up(a, m):
    return (a + m - 1) // m * m


def _choose_tiling(batch, max_tb):
    """Pick (tb, pb) with tb a sublane multiple, minimal dead-row padding."""
    pb8 = _round_up(batch, 8)
    n_steps = -(-pb8 // max_tb)                    # ceil-div
    tb = _round_up(-(-pb8 // n_steps), 8)
    return tb, n_steps * tb


def _vmem_limit_bytes():
    """~48 MiB on v7x (64 MiB physical), ~96 MiB on v5e/v6e (128 MiB)."""
    try:
        cap = pltpu.get_tpu_info().vmem_capacity_bytes
    except Exception:
        cap = 64 * 1024 * 1024                     # conservative (v7x) fallback
    return int(min(96 * 1024 * 1024, cap * 3 // 4))


def _resident_spec(shape):
    """Constant-index-map parameter block: single VMEM buffer if supported."""
    try:
        return pl.BlockSpec(shape, lambda i: (0, 0), pipeline_mode=pl.Buffered(1))
    except TypeError:                               # jax without pipeline_mode kwarg
        return pl.BlockSpec(shape, lambda i: (0, 0))


def net3_kernel(x_ref, *refs):
    """refs = (W, scale, shift) x 6 hidden layers, (W, bias) out layer, out_ref."""
    out_ref = refs[-1]
    params = refs[:-1]

    h = x_ref[...]                                        # bf16 activations
    for layer in range(6):
        w = params[3 * layer]                             # bf16 (in_p, out_p)
        s = params[3 * layer + 1]                         # f32  (1, out_p) BN scale
        t = params[3 * layer + 2]                         # f32  (1, out_p) bias+BN shift
        z = jnp.dot(h, w[...], preferred_element_type=jnp.float32)   # MXU, f32 acc
        z = z * s[...] + t[...]                           # f32 epilogue (VPU)
        h = jnp.maximum(z, 0.0).astype(jnp.bfloat16)      # ReLU, carry bf16
    w, b = params[18], params[19]
    out_ref[...] = jnp.dot(h, w[...], preferred_element_type=jnp.float32) + b[...]


def net3_forward(x, padded_params, *, max_tb=256):
    """x: (B, 429) f32 -> (B, 39) f32 (eval-mode Net3 forward)."""
    B = x.shape[0]
    tb, pb = _choose_tiling(B, max_tb)

    xp = jnp.zeros((pb, PDIMS[0]), jnp.bfloat16)
    xp = xp.at[:B, :DIMS[0]].set(x.astype(jnp.bfloat16))

    flat = [p for group in padded_params for p in group]

    in_specs = [pl.BlockSpec((tb, PDIMS[0]), lambda i: (i, 0))]     # activations: tiled
    for li in range(6):                                             # hidden layers: resident
        in_specs.append(_resident_spec((PDIMS[li], PDIMS[li + 1])))  # W
        in_specs.append(_resident_spec((1, PDIMS[li + 1])))          # BN scale
        in_specs.append(_resident_spec((1, PDIMS[li + 1])))          # shift
    in_specs.append(_resident_spec((PDIMS[6], PDIMS[7])))            # out W
    in_specs.append(_resident_spec((1, PDIMS[7])))                   # out bias

    out_padded = pl.pallas_call(
        net3_kernel,
        out_shape=jax.ShapeDtypeStruct((pb, PDIMS[-1]), jnp.float32),
        grid=(pb // tb,),
        in_specs=in_specs,
        out_specs=pl.BlockSpec((tb, PDIMS[-1]), lambda i: (i, 0)),
        compiler_params=pltpu.CompilerParams(
            dimension_semantics=("parallel",),
            vmem_limit_bytes=_vmem_limit_bytes()),
    )(xp, *flat)
    return out_padded[:B, :DIMS[-1]]


def init_params(key):
    """Deterministic synthetic parameters matching Net3.__init__ shapes."""
    layers, bns = [], []
    for i in range(7):
        fan_in, fan_out = DIMS[i], DIMS[i + 1]
        key, k1, k2 = jax.random.split(key, 3)
        bound = 1.0 / float(fan_in) ** 0.5
        W = jax.random.uniform(k1, (fan_out, fan_in), jnp.float32, -bound, bound)
        b = jax.random.uniform(k2, (fan_out,), jnp.float32, -bound, bound)
        layers.append((W, b))
    for i in range(6):
        n = DIMS[i + 1]
        key, k1, k2, k3, k4 = jax.random.split(key, 5)
        gamma = 1.0 + 0.1 * jax.random.normal(k1, (n,), jnp.float32)
        beta = 0.1 * jax.random.normal(k2, (n,), jnp.float32)
        mean = 0.1 * jax.random.normal(k3, (n,), jnp.float32)
        var = jnp.abs(jax.random.normal(k4, (n,), jnp.float32)) + 0.5
        bns.append((gamma, beta, mean, var))
    return layers, bns


def pad_params(layers, bns):
    """Transpose to (in, out), pad to lane multiples, cast weights to bf16.

    Eval-mode BatchNorm is expressed as a per-column f32 scale/shift applied
    in the kernel epilogue (keeps bf16 weight quantization unamplified):
        y = (h @ W^T) * s + shift,  s = gamma/sqrt(var+eps),
        shift = b*s + beta - mean*s
    """
    padded = []
    for i in range(7):
        W, b = layers[i]
        in_p, out_p = PDIMS[i], PDIMS[i + 1]
        Wp = jnp.zeros((in_p, out_p), jnp.bfloat16)
        Wp = Wp.at[:DIMS[i], :DIMS[i + 1]].set(W.T.astype(jnp.bfloat16))
        if i < 6:
            gamma, beta, mean, var = bns[i]
            s = gamma / jnp.sqrt(var + EPS)
            shift = b * s + (beta - mean * s)
            sp = jnp.zeros((1, out_p), jnp.float32).at[0, :DIMS[i + 1]].set(s)
            tp = jnp.zeros((1, out_p), jnp.float32).at[0, :DIMS[i + 1]].set(shift)
            padded.append((Wp, sp, tp))
        else:
            bp = jnp.zeros((1, out_p), jnp.float32).at[0, :DIMS[i + 1]].set(b)
            padded.append((Wp, bp))
    return padded


def net3_ref(x, layers, bns):
    """Pure-JAX f32 reference (eval-mode), mirroring the PyTorch forward."""
    h = x
    for i in range(6):
        W, b = layers[i]
        gamma, beta, mean, var = bns[i]
        z = h @ W.T + b
        z = (z - mean) / jnp.sqrt(var + EPS) * gamma + beta   # BN1d (eval)
        h = jnp.maximum(z, 0.0)                               # ReLU (dropout = id)
    W, b = layers[6]
    return h @ W.T + b


if __name__ == "__main__":
    key = jax.random.PRNGKey(0)
    key, kx, kp = jax.random.split(key, 3)

    batch = 8
    x = jax.random.normal(kx, (batch, DIMS[0]), jnp.float32)   # (8, 429)

    layers, bns = init_params(kp)
    padded = pad_params(layers, bns)

    out = net3_forward(x, padded)
    out = jax.block_until_ready(out)

    ref = jax.block_until_ready(net3_ref(x, layers, bns))
    assert out.shape == (batch, DIMS[-1]), out.shape
    max_err = float(jnp.max(jnp.abs(out - ref)))
    assert jnp.allclose(out, ref, rtol=1e-2, atol=2e-2), max_err   # bf16-weight tolerance

    print("KERNEL_OK")
</pallas_src>

<mosaic_0001>
module attributes {stable_mosaic.version = 11 : i64} {
  func.func @net3_kernel(%arg0: i32, %arg1: memref<8x512xbf16, #tpu.memory_space<vmem>>, %arg2: memref<512x2048xbf16, #tpu.memory_space<vmem>>, %arg3: memref<1x2048xf32, #tpu.memory_space<vmem>>, %arg4: memref<1x2048xf32, #tpu.memory_space<vmem>>, %arg5: memref<2048x1024xbf16, #tpu.memory_space<vmem>>, %arg6: memref<1x1024xf32, #tpu.memory_space<vmem>>, %arg7: memref<1x1024xf32, #tpu.memory_space<vmem>>, %arg8: memref<1024x512xbf16, #tpu.memory_space<vmem>>, %arg9: memref<1x512xf32, #tpu.memory_space<vmem>>, %arg10: memref<1x512xf32, #tpu.memory_space<vmem>>, %arg11: memref<512x256xbf16, #tpu.memory_space<vmem>>, %arg12: memref<1x256xf32, #tpu.memory_space<vmem>>, %arg13: memref<1x256xf32, #tpu.memory_space<vmem>>, %arg14: memref<256x128xbf16, #tpu.memory_space<vmem>>, %arg15: memref<1x128xf32, #tpu.memory_space<vmem>>, %arg16: memref<1x128xf32, #tpu.memory_space<vmem>>, %arg17: memref<128x128xbf16, #tpu.memory_space<vmem>>, %arg18: memref<1x128xf32, #tpu.memory_space<vmem>>, %arg19: memref<1x128xf32, #tpu.memory_space<vmem>>, %arg20: memref<128x128xbf16, #tpu.memory_space<vmem>>, %arg21: memref<1x128xf32, #tpu.memory_space<vmem>>, %arg22: memref<8x128xf32, #tpu.memory_space<vmem>>) attributes {dimension_semantics = [#tpu.dimension_semantics<parallel>], iteration_bounds = array<i64: 1>, scalar_prefetch = 0 : i64, scratch_operands = 0 : i64, tpu.core_type = #tpu.core_type<tc>, window_params = [{transform_indices = @transform_0, window_bounds = array<i64: 8, 512>}, {pipeline_mode = #tpu.pipeline_mode<synchronous>, transform_indices = @transform_1, window_bounds = array<i64: 512, 2048>}, {pipeline_mode = #tpu.pipeline_mode<synchronous>, transform_indices = @transform_2, window_bounds = array<i64: 1, 2048>}, {pipeline_mode = #tpu.pipeline_mode<synchronous>, transform_indices = @transform_3, window_bounds = array<i64: 1, 2048>}, {pipeline_mode = #tpu.pipeline_mode<synchronous>, transform_indices = @transform_4, window_bounds = array<i64: 2048, 1024>}, {pipeline_mode = #tpu.pipeline_mode<synchronous>, transform_indices = @transform_5, window_bounds = array<i64: 1, 1024>}, {pipeline_mode = #tpu.pipeline_mode<synchronous>, transform_indices = @transform_6, window_bounds = array<i64: 1, 1024>}, {pipeline_mode = #tpu.pipeline_mode<synchronous>, transform_indices = @transform_7, window_bounds = array<i64: 1024, 512>}, {pipeline_mode = #tpu.pipeline_mode<synchronous>, transform_indices = @transform_8, window_bounds = array<i64: 1, 512>}, {pipeline_mode = #tpu.pipeline_mode<synchronous>, transform_indices = @transform_9, window_bounds = array<i64: 1, 512>}, {pipeline_mode = #tpu.pipeline_mode<synchronous>, transform_indices = @transform_10, window_bounds = array<i64: 512, 256>}, {pipeline_mode = #tpu.pipeline_mode<synchronous>, transform_indices = @transform_11, window_bounds = array<i64: 1, 256>}, {pipeline_mode = #tpu.pipeline_mode<synchronous>, transform_indices = @transform_12, window_bounds = array<i64: 1, 256>}, {pipeline_mode = #tpu.pipeline_mode<synchronous>, transform_indices = @transform_13, window_bounds = array<i64: 256, 128>}, {pipeline_mode = #tpu.pipeline_mode<synchronous>, transform_indices = @transform_14, window_bounds = array<i64: 1, 128>}, {pipeline_mode = #tpu.pipeline_mode<synchronous>, transform_indices = @transform_15, window_bounds = array<i64: 1, 128>}, {pipeline_mode = #tpu.pipeline_mode<synchronous>, transform_indices = @transform_16, window_bounds = array<i64: 128, 128>}, {pipeline_mode = #tpu.pipeline_mode<synchronous>, transform_indices = @transform_17, window_bounds = array<i64: 1, 128>}, {pipeline_mode = #tpu.pipeline_mode<synchronous>, transform_indices = @transform_18, window_bounds = array<i64: 1, 128>}, {pipeline_mode = #tpu.pipeline_mode<synchronous>, transform_indices = @transform_19, window_bounds = array<i64: 128, 128>}, {pipeline_mode = #tpu.pipeline_mode<synchronous>, transform_indices = @transform_20, window_bounds = array<i64: 1, 128>}, {transform_indices = @transform_21, window_bounds = array<i64: 8, 128>}]} {
    %c0 = arith.constant 0 : index
    %c0_0 = arith.constant 0 : index
    %0 = vector.load %arg1[%c0, %c0_0] : memref<8x512xbf16, #tpu.memory_space<vmem>>, vector<8x512xbf16>
    %c0_1 = arith.constant 0 : index
    %c0_2 = arith.constant 0 : index
    %1 = vector.load %arg2[%c0_1, %c0_2] : memref<512x2048xbf16, #tpu.memory_space<vmem>>, vector<512x2048xbf16>
    %cst = arith.constant dense<0.000000e+00> : vector<8x2048xf32>
    %2 = tpu.matmul %0, %1, %cst {dimension_numbers = #tpu.dot_dimension_numbers<[1], [0], [0], [1], [0, 0, 1, 1], [], []>} : vector<8x512xbf16>, vector<512x2048xbf16>, vector<8x2048xf32> -> vector<8x2048xf32>
    %c0_3 = arith.constant 0 : index
    %c0_4 = arith.constant 0 : index
    %3 = vector.load %arg3[%c0_3, %c0_4] : memref<1x2048xf32, #tpu.memory_space<vmem>>, vector<1x2048xf32>
    %4 = vector.broadcast %3 : vector<1x2048xf32> to vector<8x2048xf32>
    %5 = arith.mulf %2, %4 : vector<8x2048xf32>
    %c0_5 = arith.constant 0 : index
    %c0_6 = arith.constant 0 : index
    %6 = vector.load %arg4[%c0_5, %c0_6] : memref<1x2048xf32, #tpu.memory_space<vmem>>, vector<1x2048xf32>
    %7 = vector.broadcast %6 : vector<1x2048xf32> to vector<8x2048xf32>
    %8 = arith.addf %5, %7 : vector<8x2048xf32>
    %cst_7 = arith.constant 0.000000e+00 : f32
    %9 = vector.broadcast %cst_7 : f32 to vector<8x2048xf32>
    %10 = arith.maximumf %8, %9 : vector<8x2048xf32>
    %11 = arith.truncf %10 : vector<8x2048xf32> to vector<8x2048xbf16>
    %c0_8 = arith.constant 0 : index
    %c0_9 = arith.constant 0 : index
    %12 = vector.load %arg5[%c0_8, %c0_9] : memref<2048x1024xbf16, #tpu.memory_space<vmem>>, vector<2048x1024xbf16>
    %cst_10 = arith.constant dense<0.000000e+00> : vector<8x1024xf32>
    %13 = tpu.matmul %11, %12, %cst_10 {dimension_numbers = #tpu.dot_dimension_numbers<[1], [0], [0], [1], [0, 0, 1, 1], [], []>} : vector<8x2048xbf16>, vector<2048x1024xbf16>, vector<8x1024xf32> -> vector<8x1024xf32>
    %c0_11 = arith.constant 0 : index
    %c0_12 = arith.constant 0 : index
    %14 = vector.load %arg6[%c0_11, %c0_12] : memref<1x1024xf32, #tpu.memory_space<vmem>>, vector<1x1024xf32>
    %15 = vector.broadcast %14 : vector<1x1024xf32> to vector<8x1024xf32>
    %16 = arith.mulf %13, %15 : vector<8x1024xf32>
    %c0_13 = arith.constant 0 : index
    %c0_14 = arith.constant 0 : index
    %17 = vector.load %arg7[%c0_13, %c0_14] : memref<1x1024xf32, #tpu.memory_space<vmem>>, vector<1x1024xf32>
    %18 = vector.broadcast %17 : vector<1x1024xf32> to vector<8x1024xf32>
    %19 = arith.addf %16, %18 : vector<8x1024xf32>
    %cst_15 = arith.constant 0.000000e+00 : f32
    %20 = vector.broadcast %cst_15 : f32 to vector<8x1024xf32>
    %21 = arith.maximumf %19, %20 : vector<8x1024xf32>
    %22 = arith.truncf %21 : vector<8x1024xf32> to vector<8x1024xbf16>
    %c0_16 = arith.constant 0 : index
    %c0_17 = arith.constant 0 : index
    %23 = vector.load %arg8[%c0_16, %c0_17] : memref<1024x512xbf16, #tpu.memory_space<vmem>>, vector<1024x512xbf16>
    %cst_18 = arith.constant dense<0.000000e+00> : vector<8x512xf32>
    %24 = tpu.matmul %22, %23, %cst_18 {dimension_numbers = #tpu.dot_dimension_numbers<[1], [0], [0], [1], [0, 0, 1, 1], [], []>} : vector<8x1024xbf16>, vector<1024x512xbf16>, vector<8x512xf32> -> vector<8x512xf32>
    %c0_19 = arith.constant 0 : index
    %c0_20 = arith.constant 0 : index
    %25 = vector.load %arg9[%c0_19, %c0_20] : memref<1x512xf32, #tpu.memory_space<vmem>>, vector<1x512xf32>
    %26 = vector.broadcast %25 : vector<1x512xf32> to vector<8x512xf32>
    %27 = arith.mulf %24, %26 : vector<8x512xf32>
    %c0_21 = arith.constant 0 : index
    %c0_22 = arith.constant 0 : index
    %28 = vector.load %arg10[%c0_21, %c0_22] : memref<1x512xf32, #tpu.memory_space<vmem>>, vector<1x512xf32>
    %29 = vector.broadcast %28 : vector<1x512xf32> to vector<8x512xf32>
    %30 = arith.addf %27, %29 : vector<8x512xf32>
    %cst_23 = arith.constant 0.000000e+00 : f32
    %31 = vector.broadcast %cst_23 : f32 to vector<8x512xf32>
    %32 = arith.maximumf %30, %31 : vector<8x512xf32>
    %33 = arith.truncf %32 : vector<8x512xf32> to vector<8x512xbf16>
    %c0_24 = arith.constant 0 : index
    %c0_25 = arith.constant 0 : index
    %34 = vector.load %arg11[%c0_24, %c0_25] : memref<512x256xbf16, #tpu.memory_space<vmem>>, vector<512x256xbf16>
    %cst_26 = arith.constant dense<0.000000e+00> : vector<8x256xf32>
    %35 = tpu.matmul %33, %34, %cst_26 {dimension_numbers = #tpu.dot_dimension_numbers<[1], [0], [0], [1], [0, 0, 1, 1], [], []>} : vector<8x512xbf16>, vector<512x256xbf16>, vector<8x256xf32> -> vector<8x256xf32>
    %c0_27 = arith.constant 0 : index
    %c0_28 = arith.constant 0 : index
    %36 = vector.load %arg12[%c0_27, %c0_28] : memref<1x256xf32, #tpu.memory_space<vmem>>, vector<1x256xf32>
    %37 = vector.broadcast %36 : vector<1x256xf32> to vector<8x256xf32>
    %38 = arith.mulf %35, %37 : vector<8x256xf32>
    %c0_29 = arith.constant 0 : index
    %c0_30 = arith.constant 0 : index
    %39 = vector.load %arg13[%c0_29, %c0_30] : memref<1x256xf32, #tpu.memory_space<vmem>>, vector<1x256xf32>
    %40 = vector.broadcast %39 : vector<1x256xf32> to vector<8x256xf32>
    %41 = arith.addf %38, %40 : vector<8x256xf32>
    %cst_31 = arith.constant 0.000000e+00 : f32
    %42 = vector.broadcast %cst_31 : f32 to vector<8x256xf32>
    %43 = arith.maximumf %41, %42 : vector<8x256xf32>
    %44 = arith.truncf %43 : vector<8x256xf32> to vector<8x256xbf16>
    %c0_32 = arith.constant 0 : index
    %c0_33 = arith.constant 0 : index
    %45 = vector.load %arg14[%c0_32, %c0_33] : memref<256x128xbf16, #tpu.memory_space<vmem>>, vector<256x128xbf16>
    %cst_34 = arith.constant dense<0.000000e+00> : vector<8x128xf32>
    %46 = tpu.matmul %44, %45, %cst_34 {dimension_numbers = #tpu.dot_dimension_numbers<[1], [0], [0], [1], [0, 0, 1, 1], [], []>} : vector<8x256xbf16>, vector<256x128xbf16>, vector<8x128xf32> -> vector<8x128xf32>
    %c0_35 = arith.constant 0 : index
    %c0_36 = arith.constant 0 : index
    %47 = vector.load %arg15[%c0_35, %c0_36] : memref<1x128xf32, #tpu.memory_space<vmem>>, vector<1x128xf32>
    %48 = vector.broadcast %47 : vector<1x128xf32> to vector<8x128xf32>
    %49 = arith.mulf %46, %48 : vector<8x128xf32>
    %c0_37 = arith.constant 0 : index
    %c0_38 = arith.constant 0 : index
    %50 = vector.load %arg16[%c0_37, %c0_38] : memref<1x128xf32, #tpu.memory_space<vmem>>, vector<1x128xf32>
    %51 = vector.broadcast %50 : vector<1x128xf32> to vector<8x128xf32>
    %52 = arith.addf %49, %51 : vector<8x128xf32>
    %cst_39 = arith.constant 0.000000e+00 : f32
    %53 = vector.broadcast %cst_39 : f32 to vector<8x128xf32>
    %54 = arith.maximumf %52, %53 : vector<8x128xf32>
    %55 = arith.truncf %54 : vector<8x128xf32> to vector<8x128xbf16>
    %c0_40 = arith.constant 0 : index
    %c0_41 = arith.constant 0 : index
    %56 = vector.load %arg17[%c0_40, %c0_41] : memref<128x128xbf16, #tpu.memory_space<vmem>>, vector<128x128xbf16>
    %cst_42 = arith.constant dense<0.000000e+00> : vector<8x128xf32>
    %57 = tpu.matmul %55, %56, %cst_42 {dimension_numbers = #tpu.dot_dimension_numbers<[1], [0], [0], [1], [0, 0, 1, 1], [], []>} : vector<8x128xbf16>, vector<128x128xbf16>, vector<8x128xf32> -> vector<8x128xf32>
    %c0_43 = arith.constant 0 : index
    %c0_44 = arith.constant 0 : index
    %58 = vector.load %arg18[%c0_43, %c0_44] : memref<1x128xf32, #tpu.memory_space<vmem>>, vector<1x128xf32>
    %59 = vector.broadcast %58 : vector<1x128xf32> to vector<8x128xf32>
    %60 = arith.mulf %57, %59 : vector<8x128xf32>
    %c0_45 = arith.constant 0 : index
    %c0_46 = arith.constant 0 : index
    %61 = vector.load %arg19[%c0_45, %c0_46] : memref<1x128xf32, #tpu.memory_space<vmem>>, vector<1x128xf32>
    %62 = vector.broadcast %61 : vector<1x128xf32> to vector<8x128xf32>
    %63 = arith.addf %60, %62 : vector<8x128xf32>
    %cst_47 = arith.constant 0.000000e+00 : f32
    %64 = vector.broadcast %cst_47 : f32 to vector<8x128xf32>
    %65 = arith.maximumf %63, %64 : vector<8x128xf32>
    %66 = arith.truncf %65 : vector<8x128xf32> to vector<8x128xbf16>
    %c0_48 = arith.constant 0 : index
    %c0_49 = arith.constant 0 : index
    %67 = vector.load %arg20[%c0_48, %c0_49] : memref<128x128xbf16, #tpu.memory_space<vmem>>, vector<128x128xbf16>
    %cst_50 = arith.constant dense<0.000000e+00> : vector<8x128xf32>
    %68 = tpu.matmul %66, %67, %cst_50 {dimension_numbers = #tpu.dot_dimension_numbers<[1], [0], [0], [1], [0, 0, 1, 1], [], []>} : vector<8x128xbf16>, vector<128x128xbf16>, vector<8x128xf32> -> vector<8x128xf32>
    %c0_51 = arith.constant 0 : index
    %c0_52 = arith.constant 0 : index
    %69 = vector.load %arg21[%c0_51, %c0_52] : memref<1x128xf32, #tpu.memory_space<vmem>>, vector<1x128xf32>
    %70 = vector.broadcast %69 : vector<1x128xf32> to vector<8x128xf32>
    %71 = arith.addf %68, %70 : vector<8x128xf32>
    %c0_53 = arith.constant 0 : index
    %c0_54 = arith.constant 0 : index
    %72 = vector.load %arg22[%c0_53, %c0_54] : memref<8x128xf32, #tpu.memory_space<vmem>>, vector<8x128xf32>
    tpu.vector_store %arg22[%c0_53, %c0_54], %71 {strides = array<i32>} : memref<8x128xf32, #tpu.memory_space<vmem>>, vector<8x128xf32>,
    return
  }
  func.func @transform_0(%arg0: i32) -> (i32, i32) {
    %c0_i32 = arith.constant 0 : i32
    %c0_i32_0 = arith.constant 0 : i32
    return %arg0, %c0_i32 : i32, i32
  }
  func.func @transform_1(%arg0: i32) -> (i32, i32) {
    %c0_i32 = arith.constant 0 : i32
    %c0_i32_0 = arith.constant 0 : i32
    %c0_i32_1 = arith.constant 0 : i32
    return %c0_i32, %c0_i32_0 : i32, i32
  }
  func.func @transform_2(%arg0: i32) -> (i32, i32) {
    %c0_i32 = arith.constant 0 : i32
    %c0_i32_0 = arith.constant 0 : i32
    %c0_i32_1 = arith.constant 0 : i32
    return %c0_i32, %c0_i32_0 : i32, i32
  }
  func.func @transform_3(%arg0: i32) -> (i32, i32) {
    %c0_i32 = arith.constant 0 : i32
    %c0_i32_0 = arith.constant 0 : i32
    %c0_i32_1 = arith.constant 0 : i32
    return %c0_i32, %c0_i32_0 : i32, i32
  }
  func.func @transform_4(%arg0: i32) -> (i32, i32) {
    %c0_i32 = arith.constant 0 : i32
    %c0_i32_0 = arith.constant 0 : i32
    %c0_i32_1 = arith.constant 0 : i32
    return %c0_i32, %c0_i32_0 : i32, i32
  }
  func.func @transform_5(%arg0: i32) -> (i32, i32) {
    %c0_i32 = arith.constant 0 : i32
    %c0_i32_0 = arith.constant 0 : i32
    %c0_i32_1 = arith.constant 0 : i32
    return %c0_i32, %c0_i32_0 : i32, i32
  }
  func.func @transform_6(%arg0: i32) -> (i32, i32) {
    %c0_i32 = arith.constant 0 : i32
    %c0_i32_0 = arith.constant 0 : i32
    %c0_i32_1 = arith.constant 0 : i32
    return %c0_i32, %c0_i32_0 : i32, i32
  }
  func.func @transform_7(%arg0: i32) -> (i32, i32) {
    %c0_i32 = arith.constant 0 : i32
    %c0_i32_0 = arith.constant 0 : i32
    %c0_i32_1 = arith.constant 0 : i32
    return %c0_i32, %c0_i32_0 : i32, i32
  }
  func.func @transform_8(%arg0: i32) -> (i32, i32) {
    %c0_i32 = arith.constant 0 : i32
    %c0_i32_0 = arith.constant 0 : i32
    %c0_i32_1 = arith.constant 0 : i32
    return %c0_i32, %c0_i32_0 : i32, i32
  }
  func.func @transform_9(%arg0: i32) -> (i32, i32) {
    %c0_i32 = arith.constant 0 : i32
    %c0_i32_0 = arith.constant 0 : i32
    %c0_i32_1 = arith.constant 0 : i32
    return %c0_i32, %c0_i32_0 : i32, i32
  }
  func.func @transform_10(%arg0: i32) -> (i32, i32) {
    %c0_i32 = arith.constant 0 : i32
    %c0_i32_0 = arith.constant 0 : i32
    %c0_i32_1 = arith.constant 0 : i32
    return %c0_i32, %c0_i32_0 : i32, i32
  }
  func.func @transform_11(%arg0: i32) -> (i32, i32) {
    %c0_i32 = arith.constant 0 : i32
    %c0_i32_0 = arith.constant 0 : i32
    %c0_i32_1 = arith.constant 0 : i32
    return %c0_i32, %c0_i32_0 : i32, i32
  }
  func.func @transform_12(%arg0: i32) -> (i32, i32) {
    %c0_i32 = arith.constant 0 : i32
    %c0_i32_0 = arith.constant 0 : i32
    %c0_i32_1 = arith.constant 0 : i32
    return %c0_i32, %c0_i32_0 : i32, i32
  }
  func.func @transform_13(%arg0: i32) -> (i32, i32) {
    %c0_i32 = arith.constant 0 : i32
    %c0_i32_0 = arith.constant 0 : i32
    %c0_i32_1 = arith.constant 0 : i32
    return %c0_i32, %c0_i32_0 : i32, i32
  }
  func.func @transform_14(%arg0: i32) -> (i32, i32) {
    %c0_i32 = arith.constant 0 : i32
    %c0_i32_0 = arith.constant 0 : i32
    %c0_i32_1 = arith.constant 0 : i32
    return %c0_i32, %c0_i32_0 : i32, i32
  }
  func.func @transform_15(%arg0: i32) -> (i32, i32) {
    %c0_i32 = arith.constant 0 : i32
    %c0_i32_0 = arith.constant 0 : i32
    %c0_i32_1 = arith.constant 0 : i32
    return %c0_i32, %c0_i32_0 : i32, i32
  }
  func.func @transform_16(%arg0: i32) -> (i32, i32) {
    %c0_i32 = arith.constant 0 : i32
    %c0_i32_0 = arith.constant 0 : i32
    %c0_i32_1 = arith.constant 0 : i32
    return %c0_i32, %c0_i32_0 : i32, i32
  }
  func.func @transform_17(%arg0: i32) -> (i32, i32) {
    %c0_i32 = arith.constant 0 : i32
    %c0_i32_0 = arith.constant 0 : i32
    %c0_i32_1 = arith.constant 0 : i32
    return %c0_i32, %c0_i32_0 : i32, i32
  }
  func.func @transform_18(%arg0: i32) -> (i32, i32) {
    %c0_i32 = arith.constant 0 : i32
    %c0_i32_0 = arith.constant 0 : i32
    %c0_i32_1 = arith.constant 0 : i32
    return %c0_i32, %c0_i32_0 : i32, i32
  }
  func.func @transform_19(%arg0: i32) -> (i32, i32) {
    %c0_i32 = arith.constant 0 : i32
    %c0_i32_0 = arith.constant 0 : i32
    %c0_i32_1 = arith.constant 0 : i32
    return %c0_i32, %c0_i32_0 : i32, i32
  }
  func.func @transform_20(%arg0: i32) -> (i32, i32) {
    %c0_i32 = arith.constant 0 : i32
    %c0_i32_0 = arith.constant 0 : i32
    %c0_i32_1 = arith.constant 0 : i32
    return %c0_i32, %c0_i32_0 : i32, i32
  }
  func.func @transform_21(%arg0: i32) -> (i32, i32) {
    %c0_i32 = arith.constant 0 : i32
    %c0_i32_0 = arith.constant 0 : i32
    return %arg0, %c0_i32 : i32, i32
  }
}

</mosaic_0001>

<bundles_post_ra>
// kernel: tpu_custom_call.1
= control target key start
LH: loop header
LB: loop body
LE: loop exit
PB: predicated region body
PF: predicated region fallthrough
CT: control target
= control target key end

     0   :  { %s18756_s0 = inlined_call_operand.hbm [shape: bf16[8,512], index: 0, kind: input, shape index: {}]   ;;  %s18757_s1 = inlined_call_operand.hbm [shape: bf16[512,2048], index: 1, kind: input, shape index: {}]   ;;  %s18758_s2 = inlined_call_operand.hbm [shape: f32[1,2048], index: 2, kind: input, shape index: {}]   ;;  %s18759_s3 = inlined_call_operand.hbm [shape: f32[1,2048], index: 3, kind: input, shape index: {}]   ;;  %s18760_s4 = inlined_call_operand.hbm [shape: bf16[2048,1024], index: 4, kind: input, shape index: {}]   ;;  %s18761_s5 = inlined_call_operand.hbm [shape: f32[1,1024], index: 5, kind: input, shape index: {}]   ;;  %s18762_s6 = inlined_call_operand.hbm [shape: f32[1,1024], index: 6, kind: input, shape index: {}]   ;;  %s18763_s7 = inlined_call_operand.hbm [shape: bf16[1024,512], index: 7, kind: input, shape index: {}]   ;;  %s18764_s8 = inlined_call_operand.hbm [shape: f32[1,512], index: 8, kind: input, shape index: {}]   ;;  %s18765_s9 = inlined_call_operand.hbm [shape: f32[1,512], index: 9, kind: input, shape index: {}]   ;;  %s18766_s10 = inlined_call_operand.hbm [shape: bf16[512,256], index: 10, kind: input, shape index: {}]   ;;  %s18767_s11 = inlined_call_operand.hbm [shape: f32[1,256], index: 11, kind: input, shape index: {}]   ;;  %s18768_s12 = inlined_call_operand.hbm [shape: f32[1,256], index: 12, kind: input, shape index: {}]   ;;  %s18769_s13 = inlined_call_operand.hbm [shape: bf16[256,128], index: 13, kind: input, shape index: {}]   ;;  %s18770_s14 = inlined_call_operand.hbm [shape: f32[1,128], index: 14, kind: input, shape index: {}]   ;;  %s18771_s15 = inlined_call_operand.hbm [shape: f32[1,128], index: 15, kind: input, shape index: {}]   ;;  %s18772_s16 = inlined_call_operand.hbm [shape: bf16[128,128], index: 16, kind: input, shape index: {}]   ;;  %s18773_s17 = inlined_call_operand.hbm [shape: f32[1,128], index: 17, kind: input, shape index: {}]   ;;  %s18774_s18 = inlined_call_operand.hbm [shape: f32[1,128], index: 18, kind: input, shape index: {}]   ;;  %s18775_s19 = inlined_call_operand.hbm [shape: bf16[128,128], index: 19, kind: input, shape index: {}]   ;;  %s18776_s20 = inlined_call_operand.hbm [shape: f32[1,128], index: 20, kind: input, shape index: {}]   ;;  %s18777_s21 = inlined_call_operand.hbm [shape: f32[8,128], index: 21, kind: output, shape index: {}]  }
   0x1   :  { %18787 = sst [smem:[#allocation48_spill]] %s18756_s0 }
   0x2   :  { %18788 = sst [smem:[#allocation49_spill]] %s18757_s1 }
   0x3   :  { %18789 = sst [smem:[#allocation50_spill]] %s18758_s2 }
   0x4   :  { %18790 = sst [smem:[#allocation51_spill]] %s18759_s3 }
   0x5   :  { %18791 = sst [smem:[#allocation52_spill]] %s18760_s4 }
   0x6   :  { %18792 = sst [smem:[#allocation53_spill]] %s18761_s5 }
   0x7   :  { %18793 = sst [smem:[#allocation54_spill]] %s18774_s18 }
   0x8   :  { %18794 = sst [smem:[#allocation55_spill]] %s18776_s20 }
   0x9   :  { %18795 = sst [smem:[#allocation56_spill]] %s18777_s21 }
   0xa   :  { %26 = vsyncpa [#allocation3], 0 }
   0xb   :  { %27 = vsyncpa [#allocation6], 0 }
   0xc   :  { %28 = vsyncpa [#allocation9], 0 }
   0xd   :  { %29 = vsyncpa [#allocation12], 0 }
   0xe   :  { %30 = vsyncpa [#allocation15], 0 }
   0xf   :  { %31 = vsyncpa [#allocation18], 0 }
  0x10   :  { %32 = vsyncpa [#allocation21], 0 }
  0x11   :  { %33 = vsyncpa [#allocation24], 0 }
  0x12   :  { %34 = vsyncpa [#allocation27], 0 }
  0x13   :  { %35 = vsyncpa [#allocation30], 0 }
  0x14   :  { %36 = vsyncpa [#allocation33], 0 }
  0x15   :  { %37 = vsyncpa [#allocation4], 0  ;;  %s17953_s2 = smov [#allocation5]   ;;  %s18796_s3 = sld [smem:[#allocation49_spill]] }
  0x16   :  { %s53_s25 = sshll.u32 %s17953_s2, 4  ;;  %s54_s25 = int_to_ptr.vmem [resolvable:$true] %s53_s25 }
  0x1b   :  { %s17445_s28 = scalar_lea.hbm %s18796_s3, 65536 }
  0x1c   :  { %p17446_p0 = scmp.ne.s32.totalorder %s18796_s3, %s17445_s28  ;;  %p17449_p1 = scmp.lt.u32.totalorder %s17445_s28, %s18796_s3 }
  0x1e   :  { %p17451_p2 = pnand %p17449_p1, %p17446_p0 }
  0x20   :  { %17454 = shalt.err (!%p17451_p2)
}
  0x21   :  { %s17455_s5 = scalar_lea.vmem %s54_s25, 65536  ;;  %p17460_p4 = scmp.lt.s32.totalorder %s54_s25, %s54_s25 }
  0x22   :  { %p17456_p3 = scmp.ne.s32.totalorder %s54_s25, %s17455_s5  ;;  %p17461_p5 = scmp.lt.s32.totalorder %s17455_s5, %s17455_s5 }
  0x24   :  { %p17462_p6 = por %p17461_p5, %p17460_p4 }
  0x26   :  { %p17463_p7 = pnand %p17462_p6, %p17456_p3 }
  0x28   :  { %17466 = shalt.err (!%p17463_p7)
}
  0x29   :  { %s17954_s22 = smov 1024   ;;  %s17955_s23 = smov 64  }
  0x2a   :  { %59 = dma.hbm_to_vmem [thread:$0]  %s18796_s3, 65536, %s54_s25, [#allocation6], %s17954_s22, %s17954_s22, %s17955_s23  }
  0x2b   :  { %s17956_s2 = smov [#allocation8]   ;;  %s17957_s27 = smov [#allocation11]  }
  0x2c   :  { %s76_s26 = sshll.u32 %s17956_s2, 4  ;;  %s98_s28 = sshll.u32 %s17957_s27, 4  ;;  %s77_s26 = int_to_ptr.vmem [resolvable:$true] %s76_s26  ;;  %s99_s28 = int_to_ptr.vmem [resolvable:$true] %s98_s28 }
  0x2d   :  { %s18797_s4 = sld [smem:[#allocation51_spill]] }
  0x33   :  { %s17467_s30 = scalar_lea.hbm %s18797_s4, 256 }
  0x34   :  { %p17468_p8 = scmp.ne.s32.totalorder %s18797_s4, %s17467_s30  ;;  %p17471_p9 = scmp.lt.u32.totalorder %s17467_s30, %s18797_s4 }
  0x36   :  { %p17473_p10 = pnand %p17471_p9, %p17468_p8 }
  0x38   :  { %17476 = shalt.err (!%p17473_p10)
}
  0x39   :  { %s17477_s25 = scalar_lea.vmem %s77_s26, 256  ;;  %p17482_p12 = scmp.lt.s32.totalorder %s77_s26, %s77_s26 }
  0x3a   :  { %p17478_p11 = scmp.ne.s32.totalorder %s77_s26, %s17477_s25  ;;  %p17483_p13 = scmp.lt.s32.totalorder %s17477_s25, %s17477_s25 }
  0x3c   :  { %p17484_p0 = por %p17483_p13, %p17482_p12 }
  0x3e   :  { %p17485_p1 = pnand %p17484_p0, %p17478_p11 }
  0x40   :  { %17488 = shalt.err (!%p17485_p1)
}
  0x41   :  { %79 = dma.hbm_to_vmem [thread:$0]  %s18797_s4, 256, %s77_s26, [#allocation9]  }
  0x42   :  { %s18798_s24 = sld [smem:[#allocation53_spill]] }
  0x48   :  { %s17489_s2 = scalar_lea.hbm %s18798_s24, 128 }
  0x49   :  { %p17490_p2 = scmp.ne.s32.totalorder %s18798_s24, %s17489_s2  ;;  %p17493_p3 = scmp.lt.u32.totalorder %s17489_s2, %s18798_s24 }
  0x4b   :  { %p17495_p4 = pnand %p17493_p3, %p17490_p2 }
  0x4d   :  { %17498 = shalt.err (!%p17495_p4)
}
  0x4e   :  { %s17499_s0 = scalar_lea.vmem %s99_s28, 128  ;;  %p17504_p6 = scmp.lt.s32.totalorder %s99_s28, %s99_s28 }
  0x4f   :  { %p17500_p5 = scmp.ne.s32.totalorder %s99_s28, %s17499_s0  ;;  %p17505_p7 = scmp.lt.s32.totalorder %s17499_s0, %s17499_s0 }
  0x51   :  { %p17506_p8 = por %p17505_p7, %p17504_p6 }
  0x53   :  { %p17507_p9 = pnand %p17506_p8, %p17500_p5 }
  0x55   :  { %17510 = shalt.err (!%p17507_p9)
}
  0x56   :  { %101 = dma.hbm_to_vmem [thread:$0]  %s18798_s24, 128, %s99_s28, [#allocation12]  }
  0x57   :  { %s17958_s30 = smov [#allocation14]   ;;  %s17511_s22 = scalar_lea.hbm %s18763_s7, 32768 }
  0x58   :  { %s117_s5 = sshll.u32 %s17958_s30, 4  ;;  %p17512_p10 = scmp.ne.s32.totalorder %s18763_s7, %s17511_s22  ;;  %s118_s5 = int_to_ptr.vmem [resolvable:$true] %s117_s5 }
  0x59   :  { %p17515_p11 = scmp.lt.u32.totalorder %s17511_s22, %s18763_s7 }
  0x5b   :  { %p17517_p12 = pnand %p17515_p11, %p17512_p10 }
  0x5d   :  { %17520 = shalt.err (!%p17517_p12)
}
  0x5e   :  { %s17521_s20 = scalar_lea.vmem %s118_s5, 32768  ;;  %p17526_p0 = scmp.lt.s32.totalorder %s118_s5, %s118_s5 }
  0x5f   :  { %p17522_p13 = scmp.ne.s32.totalorder %s118_s5, %s17521_s20  ;;  %p17527_p1 = scmp.lt.s32.totalorder %s17521_s20, %s17521_s20 }
  0x61   :  { %p17528_p2 = por %p17527_p1, %p17526_p0 }
  0x63   :  { %p17529_p3 = pnand %p17528_p2, %p17522_p13 }
  0x65   :  { %17532 = shalt.err (!%p17529_p3)
}
  0x66   :  { %s17959_s28 = smov 256   ;;  %s17960_s24 = smov 16  }
  0x67   :  { %123 = dma.hbm_to_vmem [thread:$0]  %s18763_s7, 32768, %s118_s5, [#allocation15], %s17959_s28, %s17959_s28, %s17960_s24  }
  0x68   :  { %s17961_s0 = smov [#allocation17]   ;;  %s17962_s4 = smov [#allocation20]  }
  0x69   :  { %s140_s26 = sshll.u32 %s17961_s0, 4  ;;  %s162_s30 = sshll.u32 %s17962_s4, 4  ;;  %s141_s26 = int_to_ptr.vmem [resolvable:$true] %s140_s26  ;;  %s163_s30 = int_to_ptr.vmem [resolvable:$true] %s162_s30 }
  0x6a   :  { %s17533_s22 = scalar_lea.hbm %s18765_s9, 64 }
  0x6b   :  { %p17534_p4 = scmp.ne.s32.totalorder %s18765_s9, %s17533_s22  ;;  %p17537_p5 = scmp.lt.u32.totalorder %s17533_s22, %s18765_s9 }
  0x6d   :  { %p17539_p6 = pnand %p17537_p5, %p17534_p4 }
  0x6f   :  { %17542 = shalt.err (!%p17539_p6)
}
  0x70   :  { %s17543_s7 = scalar_lea.vmem %s141_s26, 64  ;;  %p17548_p8 = scmp.lt.s32.totalorder %s141_s26, %s141_s26 }
  0x71   :  { %p17544_p7 = scmp.ne.s32.totalorder %s141_s26, %s17543_s7  ;;  %p17549_p9 = scmp.lt.s32.totalorder %s17543_s7, %s17543_s7 }
  0x73   :  { %p17550_p10 = por %p17549_p9, %p17548_p8 }
  0x75   :  { %p17551_p11 = pnand %p17550_p10, %p17544_p7 }
  0x77   :  { %17554 = shalt.err (!%p17551_p11)
}
  0x78   :  { %143 = dma.hbm_to_vmem [thread:$0]  %s18765_s9, 64, %s141_s26, [#allocation18]  }
  0x79   :  { %s17555_s27 = scalar_lea.hbm %s18767_s11, 32 }
  0x7a   :  { %p17556_p12 = scmp.ne.s32.totalorder %s18767_s11, %s17555_s27  ;;  %p17559_p13 = scmp.lt.u32.totalorder %s17555_s27, %s18767_s11 }
  0x7c   :  { %p17561_p0 = pnand %p17559_p13, %p17556_p12 }
  0x7e   :  { %17564 = shalt.err (!%p17561_p0)
}
  0x7f   :  { %s17565_s3 = scalar_lea.vmem %s163_s30, 32  ;;  %p17570_p2 = scmp.lt.s32.totalorder %s163_s30, %s163_s30 }
  0x80   :  { %p17566_p1 = scmp.ne.s32.totalorder %s163_s30, %s17565_s3  ;;  %p17571_p3 = scmp.lt.s32.totalorder %s17565_s3, %s17565_s3 }
  0x82   :  { %p17572_p4 = por %p17571_p3, %p17570_p2 }
  0x84   :  { %p17573_p5 = pnand %p17572_p4, %p17566_p1 }
  0x86   :  { %17576 = shalt.err (!%p17573_p5)
}
  0x87   :  { %165 = dma.hbm_to_vmem [thread:$0]  %s18767_s11, 32, %s163_s30, [#allocation21]  }
  0x88   :  { %s17963_s22 = smov [#allocation23]   ;;  %s17964_s1 = smov [#allocation26]  }
  0x89   :  { %s181_s21 = sshll.u32 %s17963_s22, 4  ;;  %s204_s2 = sshll.u32 %s17964_s1, 4  ;;  %s182_s21 = int_to_ptr.vmem [resolvable:$true] %s181_s21  ;;  %s205_s2 = int_to_ptr.vmem [resolvable:$true] %s204_s2 }
  0x8a   :  { %s17577_s5 = scalar_lea.hbm %s18769_s13, 2048 }
  0x8b   :  { %p17578_p6 = scmp.ne.s32.totalorder %s18769_s13, %s17577_s5  ;;  %p17581_p7 = scmp.lt.u32.totalorder %s17577_s5, %s18769_s13 }
  0x8d   :  { %p17583_p8 = pnand %p17581_p7, %p17578_p6 }
  0x8f   :  { %17586 = shalt.err (!%p17583_p8)
}
  0x90   :  { %s17587_s11 = scalar_lea.vmem %s182_s21, 2048  ;;  %p17592_p10 = scmp.lt.s32.totalorder %s182_s21, %s182_s21 }
  0x91   :  { %p17588_p9 = scmp.ne.s32.totalorder %s182_s21, %s17587_s11  ;;  %p17593_p11 = scmp.lt.s32.totalorder %s17587_s11, %s17587_s11 }
  0x93   :  { %p17594_p12 = por %p17593_p11, %p17592_p10 }
  0x95   :  { %p17595_p13 = pnand %p17594_p12, %p17588_p9 }
  0x97   :  { %17598 = shalt.err (!%p17595_p13)
}
  0x98   :  { %s17965_s30 = smov 4   ;;  %s17599_s3 = scalar_lea.hbm %s18771_s15, 16 }
  0x99   :  { %187 = dma.hbm_to_vmem [thread:$0]  %s18769_s13, 2048, %s182_s21, [#allocation24], %s17955_s23, %s17955_s23, %s17965_s30  }
  0x9a   :  { %p17600_p0 = scmp.ne.s32.totalorder %s18771_s15, %s17599_s3  ;;  %p17603_p1 = scmp.lt.u32.totalorder %s17599_s3, %s18771_s15 }
  0x9c   :  { %p17605_p2 = pnand %p17603_p1, %p17600_p0 }
  0x9e   :  { %17608 = shalt.err (!%p17605_p2)
}
  0x9f   :  { %s17609_s18 = scalar_lea.vmem %s205_s2, 16  ;;  %s17613_s7 = scalar_lea.vmem %s205_s2, 32 }
  0xa0   :  { %p17610_p3 = scmp.ne.s32.totalorder %s205_s2, %s17609_s18  ;;  %p17614_p4 = scmp.lt.s32.totalorder %s205_s2, %s205_s2 }
  0xa1   :  { %p17615_p5 = scmp.lt.s32.totalorder %s17613_s7, %s17609_s18 }
  0xa3   :  { %p17616_p6 = por %p17615_p5, %p17614_p4 }
  0xa5   :  { %p17617_p7 = pnand %p17616_p6, %p17610_p3 }
  0xa7   :  { %17620 = shalt.err (!%p17617_p7)
}
  0xa8   :  { %207 = dma.hbm_to_vmem [thread:$0]  %s18771_s15, 16, %s205_s2, [#allocation27]  }
  0xa9   :  { %s17966_s5 = smov [#allocation29]   ;;  %s17967_s28 = smov [#allocation32]  }
  0xaa   :  { %s226_s20 = sshll.u32 %s17966_s5, 4  ;;  %s245_s24 = sshll.u32 %s17967_s28, 4  ;;  %s227_s20 = int_to_ptr.vmem [resolvable:$true] %s226_s20  ;;  %s246_s24 = int_to_ptr.vmem [resolvable:$true] %s245_s24 }
  0xab   :  { %s17621_s29 = scalar_lea.hbm %s18773_s17, 16 }
  0xac   :  { %p17622_p8 = scmp.ne.s32.totalorder %s18773_s17, %s17621_s29  ;;  %p17625_p9 = scmp.lt.u32.totalorder %s17621_s29, %s18773_s17 }
  0xae   :  { %p17627_p10 = pnand %p17625_p9, %p17622_p8 }
  0xb0   :  { %17630 = shalt.err (!%p17627_p10)
}
  0xb1   :  { %s17631_s15 = scalar_lea.vmem %s227_s20, 16  ;;  %s17635_s2 = scalar_lea.vmem %s227_s20, 32 }
  0xb2   :  { %p17632_p11 = scmp.ne.s32.totalorder %s227_s20, %s17631_s15  ;;  %p17636_p12 = scmp.lt.s32.totalorder %s227_s20, %s227_s20 }
  0xb3   :  { %p17637_p13 = scmp.lt.s32.totalorder %s17635_s2, %s17631_s15 }
  0xb5   :  { %p17638_p0 = por %p17637_p13, %p17636_p12 }
  0xb7   :  { %p17639_p1 = pnand %p17638_p0, %p17632_p11 }
  0xb9   :  { %17642 = shalt.err (!%p17639_p1)
}
  0xba   :  { %229 = dma.hbm_to_vmem [thread:$0]  %s18773_s17, 16, %s227_s20, [#allocation30]  }
  0xbb   :  { %s17643_s18 = scalar_lea.hbm %s18775_s19, 1024 }
  0xbc   :  { %p17644_p2 = scmp.ne.s32.totalorder %s18775_s19, %s17643_s18  ;;  %p17647_p3 = scmp.lt.u32.totalorder %s17643_s18, %s18775_s19 }
  0xbe   :  { %p17649_p4 = pnand %p17647_p3, %p17644_p2 }
  0xc0   :  { %17652 = shalt.err (!%p17649_p4)
}
  0xc1   :  { %s17653_s28 = scalar_lea.vmem %s246_s24, 1024  ;;  %p17658_p6 = scmp.lt.s32.totalorder %s246_s24, %s246_s24 }
  0xc2   :  { %p17654_p5 = scmp.ne.s32.totalorder %s246_s24, %s17653_s28  ;;  %p17659_p7 = scmp.lt.s32.totalorder %s17653_s28, %s17653_s28 }
  0xc4   :  { %p17660_p8 = por %p17659_p7, %p17658_p6 }
  0xc6   :  { %p17661_p9 = pnand %p17660_p8, %p17654_p5 }
  0xc8   :  { %17664 = shalt.err (!%p17661_p9)
}
  0xc9   :  { %251 = dma.hbm_to_vmem [thread:$0]  %s18775_s19, 1024, %s246_s24, [#allocation33], %s17955_s23, %s17955_s23, %s17965_s30  }
  0xca   :  { %s17968_s27 = smov [#allocation2]   ;;  %s17969_s29 = smov [#allocation7]  }
  0xcb   :  { %s44_s11 = sshll.u32 %s17968_s27, 4  ;;  %s66_s0 = sshll.u32 %s17969_s29, 4  ;;  %s45_s11 = int_to_ptr.vmem [resolvable:$true] %s44_s11  ;;  %s67_s0 = int_to_ptr.vmem [resolvable:$true] %s66_s0 }
  0xcc   :  { %s18799_s3 = sld [smem:[#allocation48_spill]] }
  0xd2   :  { %s17665_s15 = scalar_lea.hbm %s18799_s3, 256 }
  0xd3   :  { %p17666_p10 = scmp.ne.s32.totalorder %s18799_s3, %s17665_s15  ;;  %p17669_p11 = scmp.lt.u32.totalorder %s17665_s15, %s18799_s3 }
  0xd5   :  { %p17671_p12 = pnand %p17669_p11, %p17666_p10 }
  0xd7   :  { %17674 = shalt.err (!%p17671_p12)
}
  0xd8   :  { %s17675_s19 = scalar_lea.vmem %s45_s11, 256  ;;  %p17680_p0 = scmp.lt.s32.totalorder %s45_s11, %s45_s11 }
  0xd9   :  { %p17676_p13 = scmp.ne.s32.totalorder %s45_s11, %s17675_s19  ;;  %p17681_p1 = scmp.lt.s32.totalorder %s17675_s19, %s17675_s19 }
  0xdb   :  { %p17682_p2 = por %p17681_p1, %p17680_p0 }
  0xdd   :  { %p17683_p3 = pnand %p17682_p2, %p17676_p13 }
  0xdf   :  { %17686 = shalt.err (!%p17683_p3)
}
  0xe0   :  { %47 = dma.hbm_to_vmem [thread:$0]  %s18799_s3, 256, %s45_s11, [#allocation3]  }
  0xe1   :  { %s18800_s13 = sld [smem:[#allocation50_spill]] }
  0xe7   :  { %s17687_s21 = scalar_lea.hbm %s18800_s13, 256 }
  0xe8   :  { %p17688_p4 = scmp.ne.s32.totalorder %s18800_s13, %s17687_s21  ;;  %p17691_p5 = scmp.lt.u32.totalorder %s17687_s21, %s18800_s13 }
  0xea   :  { %p17693_p6 = pnand %p17691_p5, %p17688_p4 }
  0xec   :  { %17696 = shalt.err (!%p17693_p6)
}
  0xed   :  { %s17697_s27 = scalar_lea.vmem %s67_s0, 256  ;;  %p17702_p8 = scmp.lt.s32.totalorder %s67_s0, %s67_s0 }
  0xee   :  { %p17698_p7 = scmp.ne.s32.totalorder %s67_s0, %s17697_s27  ;;  %p17703_p9 = scmp.lt.s32.totalorder %s17697_s27, %s17697_s27 }
  0xf0   :  { %p17704_p10 = por %p17703_p9, %p17702_p8 }
  0xf2   :  { %p17705_p11 = pnand %p17704_p10, %p17698_p7 }
  0xf4   :  { %17708 = shalt.err (!%p17705_p11)
}
  0xf5   :  { %69 = dma.hbm_to_vmem [thread:$0]  %s18800_s13, 256, %s67_s0, [#allocation6]  }
  0xf6   :  { %s17970_s4 = smov [#allocation10]   ;;  %s18801_s2 = sld [smem:[#allocation52_spill]] }
  0xf7   :  { %s85_s25 = sshll.u32 %s17970_s4, 4  ;;  %s86_s25 = int_to_ptr.vmem [resolvable:$true] %s85_s25 }
  0xfc   :  { %s17709_s9 = scalar_lea.hbm %s18801_s2, 131072 }
  0xfd   :  { %p17710_p12 = scmp.ne.s32.totalorder %s18801_s2, %s17709_s9  ;;  %p17713_p13 = scmp.lt.u32.totalorder %s17709_s9, %s18801_s2 }
  0xff   :  { %p17715_p0 = pnand %p17713_p13, %p17710_p12 }
 0x101   :  { %17718 = shalt.err (!%p17715_p0)
}
 0x102   :  { %s17719_s1 = scalar_lea.vmem %s86_s25, 131072  ;;  %p17724_p2 = scmp.lt.s32.totalorder %s86_s25, %s86_s25 }
 0x103   :  { %p17720_p1 = scmp.ne.s32.totalorder %s86_s25, %s17719_s1  ;;  %p17725_p3 = scmp.lt.s32.totalorder %s17719_s1, %s17719_s1 }
 0x105   :  { %p17726_p4 = por %p17725_p3, %p17724_p2 }
 0x107   :  { %p17727_p5 = pnand %p17726_p4, %p17720_p1 }
 0x109   :  { %17730 = shalt.err (!%p17727_p5)
}
 0x10a   :  { %s17971_s0 = smov 512   ;;  %s17972_s18 = smov 32  }
 0x10b   :  { %91 = dma.hbm_to_vmem [thread:$0]  %s18801_s2, 131072, %s86_s25, [#allocation9], %s17971_s0, %s17971_s0, %s17972_s18  }
 0x10c   :  { %s17973_s21 = smov [#allocation13]   ;;  %s17974_s28 = smov [#allocation16]  }
 0x10d   :  { %s108_s5 = sshll.u32 %s17973_s21, 4  ;;  %s130_s17 = sshll.u32 %s17974_s28, 4  ;;  %s109_s5 = int_to_ptr.vmem [resolvable:$true] %s108_s5  ;;  %s131_s17 = int_to_ptr.vmem [resolvable:$true] %s130_s17 }
 0x10e   :  { %s17731_s11 = scalar_lea.hbm %s18762_s6, 128 }
 0x10f   :  { %p17732_p6 = scmp.ne.s32.totalorder %s18762_s6, %s17731_s11  ;;  %p17735_p7 = scmp.lt.u32.totalorder %s17731_s11, %s18762_s6 }
 0x111   :  { %p17737_p8 = pnand %p17735_p7, %p17732_p6 }
 0x113   :  { %17740 = shalt.err (!%p17737_p8)
}
 0x114   :  { %s17741_s25 = scalar_lea.vmem %s109_s5, 128  ;;  %p17746_p10 = scmp.lt.s32.totalorder %s109_s5, %s109_s5 }
 0x115   :  { %p17742_p9 = scmp.ne.s32.totalorder %s109_s5, %s17741_s25  ;;  %p17747_p11 = scmp.lt.s32.totalorder %s17741_s25, %s17741_s25 }
 0x117   :  { %p17748_p12 = por %p17747_p11, %p17746_p10 }
 0x119   :  { %p17749_p13 = pnand %p17748_p12, %p17742_p9 }
 0x11b   :  { %17752 = shalt.err (!%p17749_p13)
}
 0x11c   :  { %111 = dma.hbm_to_vmem [thread:$0]  %s18762_s6, 128, %s109_s5, [#allocation12]  }
 0x11d   :  { %s17753_s19 = scalar_lea.hbm %s18764_s8, 64 }
 0x11e   :  { %p17754_p0 = scmp.ne.s32.totalorder %s18764_s8, %s17753_s19  ;;  %p17757_p1 = scmp.lt.u32.totalorder %s17753_s19, %s18764_s8 }
 0x120   :  { %p17759_p2 = pnand %p17757_p1, %p17754_p0 }
 0x122   :  { %17762 = shalt.err (!%p17759_p2)
}
 0x123   :  { %s17763_s7 = scalar_lea.vmem %s131_s17, 64  ;;  %p17768_p4 = scmp.lt.s32.totalorder %s131_s17, %s131_s17 }
 0x124   :  { %p17764_p3 = scmp.ne.s32.totalorder %s131_s17, %s17763_s7  ;;  %p17769_p5 = scmp.lt.s32.totalorder %s17763_s7, %s17763_s7 }
 0x126   :  { %p17770_p6 = por %p17769_p5, %p17768_p4 }
 0x128   :  { %p17771_p7 = pnand %p17770_p6, %p17764_p3 }
 0x12a   :  { %17774 = shalt.err (!%p17771_p7)
}
 0x12b   :  { %133 = dma.hbm_to_vmem [thread:$0]  %s18764_s8, 64, %s131_s17, [#allocation15]  }
 0x12c   :  { %s17975_s21 = smov [#allocation19]   ;;  %s17775_s27 = scalar_lea.hbm %s18766_s10, 8192 }
 0x12d   :  { %s149_s5 = sshll.u32 %s17975_s21, 4  ;;  %p17776_p8 = scmp.ne.s32.totalorder %s18766_s10, %s17775_s27  ;;  %s150_s5 = int_to_ptr.vmem [resolvable:$true] %s149_s5 }
 0x12e   :  { %p17779_p9 = scmp.lt.u32.totalorder %s17775_s27, %s18766_s10 }
 0x130   :  { %p17781_p10 = pnand %p17779_p9, %p17776_p8 }
 0x132   :  { %17784 = shalt.err (!%p17781_p10)
}
 0x133   :  { %s17785_s15 = scalar_lea.vmem %s150_s5, 8192  ;;  %p17790_p12 = scmp.lt.s32.totalorder %s150_s5, %s150_s5 }
 0x134   :  { %p17786_p11 = scmp.ne.s32.totalorder %s150_s5, %s17785_s15  ;;  %p17791_p13 = scmp.lt.s32.totalorder %s17785_s15, %s17785_s15 }
 0x136   :  { %p17792_p0 = por %p17791_p13, %p17790_p12 }
 0x138   :  { %p17793_p1 = pnand %p17792_p0, %p17786_p11 }
 0x13a   :  { %17796 = shalt.err (!%p17793_p1)
}
 0x13b   :  { %s17976_s8 = smov 128   ;;  %s17977_s17 = smov 8  }
 0x13c   :  { %155 = dma.hbm_to_vmem [thread:$0]  %s18766_s10, 8192, %s150_s5, [#allocation18], %s17976_s8, %s17976_s8, %s17977_s17  }
 0x13d   :  { %s17978_s9 = smov [#allocation22]   ;;  %s17979_s22 = smov [#allocation25]  }
 0x13e   :  { %s172_s26 = sshll.u32 %s17978_s9, 4  ;;  %s194_s19 = sshll.u32 %s17979_s22, 4  ;;  %s173_s26 = int_to_ptr.vmem [resolvable:$true] %s172_s26  ;;  %s195_s19 = int_to_ptr.vmem [resolvable:$true] %s194_s19 }
 0x13f   :  { %s17797_s0 = scalar_lea.hbm %s18768_s12, 32 }
 0x140   :  { %p17798_p2 = scmp.ne.s32.totalorder %s18768_s12, %s17797_s0  ;;  %p17801_p3 = scmp.lt.u32.totalorder %s17797_s0, %s18768_s12 }
 0x142   :  { %p17803_p4 = pnand %p17801_p3, %p17798_p2 }
 0x144   :  { %17806 = shalt.err (!%p17803_p4)
}
 0x145   :  { %s17807_s10 = scalar_lea.vmem %s173_s26, 32  ;;  %p17812_p6 = scmp.lt.s32.totalorder %s173_s26, %s173_s26 }
 0x146   :  { %p17808_p5 = scmp.ne.s32.totalorder %s173_s26, %s17807_s10  ;;  %p17813_p7 = scmp.lt.s32.totalorder %s17807_s10, %s17807_s10 }
 0x148   :  { %p17814_p8 = por %p17813_p7, %p17812_p6 }
 0x14a   :  { %p17815_p9 = pnand %p17814_p8, %p17808_p5 }
 0x14c   :  { %17818 = shalt.err (!%p17815_p9)
}
 0x14d   :  { %175 = dma.hbm_to_vmem [thread:$0]  %s18768_s12, 32, %s173_s26, [#allocation21]  }
 0x14e   :  { %s17819_s27 = scalar_lea.hbm %s18770_s14, 16 }
 0x14f   :  { %p17820_p10 = scmp.ne.s32.totalorder %s18770_s14, %s17819_s27  ;;  %p17823_p11 = scmp.lt.u32.totalorder %s17819_s27, %s18770_s14 }
 0x151   :  { %p17825_p12 = pnand %p17823_p11, %p17820_p10 }
 0x153   :  { %17828 = shalt.err (!%p17825_p12)
}
 0x154   :  { %s17829_s15 = scalar_lea.vmem %s195_s19, 16  ;;  %s17833_s8 = scalar_lea.vmem %s195_s19, 32 }
 0x155   :  { %p17830_p13 = scmp.ne.s32.totalorder %s195_s19, %s17829_s15  ;;  %p17834_p0 = scmp.lt.s32.totalorder %s195_s19, %s195_s19 }
 0x156   :  { %p17835_p1 = scmp.lt.s32.totalorder %s17833_s8, %s17829_s15 }
 0x158   :  { %p17836_p2 = por %p17835_p1, %p17834_p0 }
 0x15a   :  { %p17837_p3 = pnand %p17836_p2, %p17830_p13 }
 0x15c   :  { %17840 = shalt.err (!%p17837_p3)
}
 0x15d   :  { %197 = dma.hbm_to_vmem [thread:$0]  %s18770_s14, 16, %s195_s19, [#allocation24]  }
 0x15e   :  { %s17980_s25 = smov [#allocation28]   ;;  %s17981_s9 = smov [#allocation31]  }
 0x15f   :  { %s213_s2 = sshll.u32 %s17980_s25, 4  ;;  %s236_s26 = sshll.u32 %s17981_s9, 4  ;;  %s214_s2 = int_to_ptr.vmem [resolvable:$true] %s213_s2  ;;  %s237_s26 = int_to_ptr.vmem [resolvable:$true] %s236_s26 }
 0x160   :  { %s17841_s1 = scalar_lea.hbm %s18772_s16, 1024 }
 0x161   :  { %p17842_p4 = scmp.ne.s32.totalorder %s18772_s16, %s17841_s1  ;;  %p17845_p5 = scmp.lt.u32.totalorder %s17841_s1, %s18772_s16 }
 0x163   :  { %p17847_p6 = pnand %p17845_p5, %p17842_p4 }
 0x165   :  { %17850 = shalt.err (!%p17847_p6)
}
 0x166   :  { %s17851_s14 = scalar_lea.vmem %s214_s2, 1024  ;;  %p17856_p8 = scmp.lt.s32.totalorder %s214_s2, %s214_s2 }
 0x167   :  { %p17852_p7 = scmp.ne.s32.totalorder %s214_s2, %s17851_s14  ;;  %p17857_p9 = scmp.lt.s32.totalorder %s17851_s14, %s17851_s14 }
 0x169   :  { %p17858_p10 = por %p17857_p9, %p17856_p8 }
 0x16b   :  { %p17859_p11 = pnand %p17858_p10, %p17852_p7 }
 0x16d   :  { %17862 = shalt.err (!%p17859_p11)
}
 0x16e   :  { %219 = dma.hbm_to_vmem [thread:$0]  %s18772_s16, 1024, %s214_s2, [#allocation27], %s17955_s23, %s17955_s23, %s17965_s30  }
 0x16f   :  { %s18802_s5 = sld [smem:[#allocation54_spill]] }
 0x175   :  { %s17863_s28 = scalar_lea.hbm %s18802_s5, 16 }
 0x176   :  { %p17864_p12 = scmp.ne.s32.totalorder %s18802_s5, %s17863_s28  ;;  %p17867_p13 = scmp.lt.u32.totalorder %s17863_s28, %s18802_s5 }
 0x178   :  { %p17869_p0 = pnand %p17867_p13, %p17864_p12 }
 0x17a   :  { %17872 = shalt.err (!%p17869_p0)
}
 0x17b   :  { %s17873_s4 = scalar_lea.vmem %s237_s26, 16  ;;  %s17877_s3 = scalar_lea.vmem %s237_s26, 32 }
 0x17c   :  { %p17874_p1 = scmp.ne.s32.totalorder %s237_s26, %s17873_s4  ;;  %p17878_p2 = scmp.lt.s32.totalorder %s237_s26, %s237_s26 }
 0x17d   :  { %p17879_p3 = scmp.lt.s32.totalorder %s17877_s3, %s17873_s4 }
 0x17f   :  { %p17880_p4 = por %p17879_p3, %p17878_p2 }
 0x181   :  { %p17881_p5 = pnand %p17880_p4, %p17874_p1 }
 0x183   :  { %17884 = shalt.err (!%p17881_p5)
}
 0x184   :  { %239 = dma.hbm_to_vmem [thread:$0]  %s18802_s5, 16, %s237_s26, [#allocation30]  }
 0x185   :  { %s17982_s30 = smov [#allocation34]   ;;  %s18803_s17 = sld [smem:[#allocation55_spill]] }
 0x186   :  { %s258_s15 = sshll.u32 %s17982_s30, 4  ;;  %s259_s15 = int_to_ptr.vmem [resolvable:$true] %s258_s15 }
 0x18b   :  { %s17885_s25 = scalar_lea.hbm %s18803_s17, 16 }
 0x18c   :  { %p17886_p6 = scmp.ne.s32.totalorder %s18803_s17, %s17885_s25  ;;  %p17889_p7 = scmp.lt.u32.totalorder %s17885_s25, %s18803_s17 }
 0x18e   :  { %p17891_p8 = pnand %p17889_p7, %p17886_p6 }
 0x190   :  { %17894 = shalt.err (!%p17891_p8)
}
 0x191   :  { %s17895_s1 = scalar_lea.vmem %s259_s15, 16  ;;  %s17899_s26 = scalar_lea.vmem %s259_s15, 32 }
 0x192   :  { %p17896_p9 = scmp.ne.s32.totalorder %s259_s15, %s17895_s1  ;;  %p17900_p10 = scmp.lt.s32.totalorder %s259_s15, %s259_s15 }
 0x193   :  { %p17901_p11 = scmp.lt.s32.totalorder %s17899_s26, %s17895_s1 }
 0x195   :  { %p17902_p12 = por %p17901_p11, %p17900_p10 }
 0x197   :  { %p17903_p13 = pnand %p17902_p12, %p17896_p9 }
 0x199   :  { %17906 = shalt.err (!%p17903_p13)
}
 0x19a   :  { %261 = dma.hbm_to_vmem [thread:$0]  %s18803_s17, 16, %s259_s15, [#allocation33]  }
 0x19b   :  { %17929 = dma.done.wait [#allocation3], 256  }
 0x19c   :  { %17930 = vsyncadd [#allocation3], 4294967040 }
 0x19d   :  { %17931 = dma.done.wait [#allocation6], 65792  }
 0x19e   :  { %17932 = vsyncadd [#allocation6], 4294901504 }
 0x19f   :  { %17933 = dma.done.wait [#allocation9], 131328  }
 0x1a0   :  { %17934 = vsyncadd [#allocation9], 4294835968 }
 0x1a1   :  { %17935 = dma.done.wait [#allocation12], 256  }
 0x1a2   :  { %17936 = vsyncadd [#allocation12], 4294967040 }
 0x1a3   :  { %17937 = dma.done.wait [#allocation15], 32832  }
 0x1a4   :  { %17938 = vsyncadd [#allocation15], 4294934464 }
 0x1a5   :  { %17939 = dma.done.wait [#allocation18], 8256  }
 0x1a6   :  { %17940 = vsyncadd [#allocation18], 4294959040 }
 0x1a7   :  { %17941 = dma.done.wait [#allocation21], 64  }
 0x1a8   :  { %17942 = vsyncadd [#allocation21], 4294967232 }
 0x1a9   :  { %17943 = dma.done.wait [#allocation24], 2064  }
 0x1aa   :  { %17944 = vsyncadd [#allocation24], 4294965232 }
 0x1ab   :  { %17945 = dma.done.wait [#allocation27], 1040  }
 0x1ac   :  { %17946 = vsyncadd [#allocation27], 4294966256 }
 0x1ad   :  { %17947 = dma.done.wait [#allocation30], 32  }
 0x1ae   :  { %17948 = vsyncadd [#allocation30], 4294967264 }
 0x1af   :  { %17949 = dma.done.wait [#allocation33], 1040  }
 0x1b0   :  { %17950 = vsyncadd [#allocation33], 4294966256  ;;  %v328_v0 = vld [vmem:[#allocation5] sm:$0xff]  ;;  %v329_v2 = vld [vmem:[#allocation5 + $0x8] sm:$0xff]  ;;  %vm17984_vm0 = vmmov 0   ;;  %s17985_s7 = smov [#allocation35]  }
 0x1b1   :  { %v336_v1 = vld [vmem:[#allocation5 + $0x40] sm:$0xff]  ;;  %v337_v4 = vld [vmem:[#allocation5 + $0x48] sm:$0xff]  ;;  %v18358_v53 = vld [vmem:[#allocation2] sm:$0xff]  ;;  %s14722_s6 = sshll.u32 %s17985_s7, 4  ;;  %s14723_s6 = int_to_ptr.vmem [resolvable:$true] %s14722_s6 }
 0x1b2   :  { %v14746_v3 = vcombine.high %v328_v0, %v336_v1  ;;  %v14745_v5 = vcombine.low %v328_v0, %v336_v1  ;;  %v344_v6 = vld [vmem:[#allocation5 + $0x80] sm:$0xff]  ;;  %v14748_v8 = vcombine.high %v329_v2, %v337_v4  ;;  %v14747_v9 = vcombine.low %v329_v2, %v337_v4  ;;  %v345_v11 = vld [vmem:[#allocation5 + $0x88] sm:$0xff]  ;;  %s17907_s14 = scalar_lea.vmem %s14723_s6, 128  ;;  %p17912_p1 = scmp.lt.s32.totalorder %s14723_s6, %s14723_s6 }
 0x1b3   :  { %v352_v7 = vld [vmem:[#allocation5 + $0xc0] sm:$0xff]  ;;  %v353_v12 = vld [vmem:[#allocation5 + $0xc8] sm:$0xff]  ;;  %v18362_v57 = vcombine.high %v18358_v53, %v18358_v53  ;;  %p17908_p0 = scmp.ne.s32.totalorder %s14723_s6, %s17907_s14  ;;  %p17913_p2 = scmp.lt.s32.totalorder %s17907_s14, %s17907_s14 }
 0x1b4   :  { %v14762_v10 = vcombine.high %v344_v6, %v352_v7  ;;  %v360_v13 = vld [vmem:[#allocation5 + $0x100] sm:$0xff]  ;;  %3414 = vmatprep.subr.bf16.mxu0 %v14746_v3  ;;  %v14764_v14 = vcombine.high %v345_v11, %v353_v12  ;;  %v361_v16 = vld [vmem:[#allocation5 + $0x108] sm:$0xff]  ;;  %3496 = vmatprep.subr.bf16.mxu1 %v14748_v8  ;;  %v14761_v18 = vcombine.low %v344_v6, %v352_v7 }
 0x1b5   :  { %v368_v15 = vld [vmem:[#allocation5 + $0x140] sm:$0xff]  ;;  %v369_v17 = vld [vmem:[#allocation5 + $0x148] sm:$0xff]  ;;  %3415 = vmatpush1.bf16.msra.mxu0 %v14745_v5  ;;  %3497 = vmatpush1.bf16.msra.mxu1 %v14747_v9  ;;  %v14763_v19 = vcombine.low %v345_v11, %v353_v12  ;;  %p17914_p3 = por %p17913_p2, %p17912_p1 }
 0x1b6   :  { %3416 = vmatprep.subr.bf16.mxu0 %v14762_v10  ;;  %v14778_v20 = vcombine.high %v360_v13, %v368_v15  ;;  %3498 = vmatprep.subr.bf16.mxu1 %v14764_v14  ;;  %v14780_v21 = vcombine.high %v361_v16, %v369_v17  ;;  %v376_v22 = vld [vmem:[#allocation5 + $0x180] sm:$0xff]  ;;  %v377_v24 = vld [vmem:[#allocation5 + $0x188] sm:$0xff]  ;;  %v14777_v26 = vcombine.low %v360_v13, %v368_v15 }
 0x1b7   :  { %v384_v23 = vld [vmem:[#allocation5 + $0x1c0] sm:$0xff]  ;;  %v385_v25 = vld [vmem:[#allocation5 + $0x1c8] sm:$0xff]  ;;  %v14779_v27 = vcombine.low %v361_v16, %v369_v17  ;;  %3446 = vmatprep.mubr.bf16.mxu0 %v18362_v57  ;;  %3528 = vmatprep.mubr.bf16.mxu1 %v18362_v57  ;;  %p17915_p4 = pnand %p17914_p3, %p17908_p0 }
 0x1b8   :  { %v14794_v28 = vcombine.high %v376_v22, %v384_v23  ;;  %v14796_v29 = vcombine.high %v377_v24, %v385_v25  ;;  %v392_v30 = vld [vmem:[#allocation5 + $0x200] sm:$0xff]  ;;  %v393_v32 = vld [vmem:[#allocation5 + $0x208] sm:$0xff]  ;;  %v14793_v34 = vcombine.low %v376_v22, %v384_v23  ;;  %v14795_v35 = vcombine.low %v377_v24, %v385_v25 }
 0x1b9   :  { %3417 = vmatpush1.bf16.msra.mxu0 %v14761_v18  ;;  %3499 = vmatpush1.bf16.msra.mxu1 %v14763_v19  ;;  %v400_v31 = vld [vmem:[#allocation5 + $0x240] sm:$0xff]  ;;  %v401_v33 = vld [vmem:[#allocation5 + $0x248] sm:$0xff] }
 0x1ba   :  { %3418 = vmatprep.subr.bf16.mxu0 %v14778_v20  ;;  %3500 = vmatprep.subr.bf16.mxu1 %v14780_v21  ;;  %v14810_v36 = vcombine.high %v392_v30, %v400_v31  ;;  %v14812_v37 = vcombine.high %v393_v32, %v401_v33  ;;  %v408_v38 = vld [vmem:[#allocation5 + $0x280] sm:$0xff]  ;;  %v409_v40 = vld [vmem:[#allocation5 + $0x288] sm:$0xff]  ;;  %v14809_v42 = vcombine.low %v392_v30, %v400_v31 }
 0x1bb   :  { %v416_v39 = vld [vmem:[#allocation5 + $0x2c0] sm:$0xff]  ;;  %v417_v41 = vld [vmem:[#allocation5 + $0x2c8] sm:$0xff]  ;;  %v14811_v43 = vcombine.low %v393_v32, %v401_v33 }
 0x1bc   :  { %v14826_v44 = vcombine.high %v408_v38, %v416_v39  ;;  %v14828_v45 = vcombine.high %v409_v40, %v417_v41  ;;  %v424_v46 = vld [vmem:[#allocation5 + $0x300] sm:$0xff]  ;;  %v425_v48 = vld [vmem:[#allocation5 + $0x308] sm:$0xff]  ;;  %v14825_v50 = vcombine.low %v408_v38, %v416_v39  ;;  %v14827_v51 = vcombine.low %v409_v40, %v417_v41 }
 0x1bd   :  { %3419 = vmatpush1.bf16.msra.mxu0 %v14777_v26  ;;  %3501 = vmatpush1.bf16.msra.mxu1 %v14779_v27  ;;  %v432_v47 = vld [vmem:[#allocation5 + $0x340] sm:$0xff]  ;;  %v433_v49 = vld [vmem:[#allocation5 + $0x348] sm:$0xff] }
 0x1be   :  { %3420 = vmatprep.subr.bf16.mxu0 %v14794_v28  ;;  %3502 = vmatprep.subr.bf16.mxu1 %v14796_v29  ;;  %v14842_v52 = vcombine.high %v424_v46, %v432_v47  ;;  %v14844_v54 = vcombine.high %v425_v48, %v433_v49  ;;  %v440_v55 = vld [vmem:[#allocation5 + $0x380] sm:$0xff]  ;;  %v441_v58 = vld [vmem:[#allocation5 + $0x388] sm:$0xff]  ;;  %v14841_v60 = vcombine.low %v424_v46, %v432_v47 }
 0x1bf   :  { %v448_v56 = vld [vmem:[#allocation5 + $0x3c0] sm:$0xff]  ;;  %v449_v59 = vld [vmem:[#allocation5 + $0x3c8] sm:$0xff]  ;;  %v14843_v61 = vcombine.low %v425_v48, %v433_v49 }
 0x1c0   :  { %v14858_v62 = vcombine.high %v440_v55, %v448_v56  ;;  %v14860_v63 = vcombine.high %v441_v58, %v449_v59  ;;  %v456_v0 = vld [vmem:[#allocation5 + $0x400] sm:$0xff]  ;;  %v457_v2 = vld [vmem:[#allocation5 + $0x408] sm:$0xff]  ;;  %v14857_v4 = vcombine.low %v440_v55, %v448_v56  ;;  %v14859_v5 = vcombine.low %v441_v58, %v449_v59 }
 0x1c1   :  { %3421 = vmatpush1.bf16.msra.mxu0 %v14793_v34  ;;  %3503 = vmatpush1.bf16.msra.mxu1 %v14795_v35  ;;  %v464_v1 = vld [vmem:[#allocation5 + $0x440] sm:$0xff]  ;;  %v465_v3 = vld [vmem:[#allocation5 + $0x448] sm:$0xff] }
 0x1c2   :  { %3422 = vmatprep.subr.bf16.mxu0 %v14810_v36  ;;  %3504 = vmatprep.subr.bf16.mxu1 %v14812_v37  ;;  %v14874_v6 = vcombine.high %v456_v0, %v464_v1  ;;  %v14876_v7 = vcombine.high %v457_v2, %v465_v3  ;;  %v472_v8 = vld [vmem:[#allocation5 + $0x480] sm:$0xff]  ;;  %v473_v10 = vld [vmem:[#allocation5 + $0x488] sm:$0xff]  ;;  %v14873_v12 = vcombine.low %v456_v0, %v464_v1 }
 0x1c3   :  { %v480_v9 = vld [vmem:[#allocation5 + $0x4c0] sm:$0xff]  ;;  %v481_v11 = vld [vmem:[#allocation5 + $0x4c8] sm:$0xff]  ;;  %v14875_v13 = vcombine.low %v457_v2, %v465_v3 }
 0x1c4   :  { %v14890_v14 = vcombine.high %v472_v8, %v480_v9  ;;  %v14892_v15 = vcombine.high %v473_v10, %v481_v11  ;;  %v488_v16 = vld [vmem:[#allocation5 + $0x500] sm:$0xff]  ;;  %v489_v18 = vld [vmem:[#allocation5 + $0x508] sm:$0xff]  ;;  %v14889_v20 = vcombine.low %v472_v8, %v480_v9  ;;  %v14891_v21 = vcombine.low %v473_v10, %v481_v11 }
 0x1c5   :  { %3423 = vmatpush1.bf16.msra.mxu0 %v14809_v42  ;;  %3505 = vmatpush1.bf16.msra.mxu1 %v14811_v43  ;;  %v496_v17 = vld [vmem:[#allocation5 + $0x540] sm:$0xff]  ;;  %v497_v19 = vld [vmem:[#allocation5 + $0x548] sm:$0xff] }
 0x1c6   :  { %3424 = vmatprep.subr.bf16.mxu0 %v14826_v44  ;;  %3506 = vmatprep.subr.bf16.mxu1 %v14828_v45  ;;  %v14906_v22 = vcombine.high %v488_v16, %v496_v17  ;;  %v14908_v23 = vcombine.high %v489_v18, %v497_v19  ;;  %v504_v24 = vld [vmem:[#allocation5 + $0x580] sm:$0xff]  ;;  %v505_v26 = vld [vmem:[#allocation5 + $0x588] sm:$0xff]  ;;  %v14905_v28 = vcombine.low %v488_v16, %v496_v17 }
 0x1c7   :  { %v512_v25 = vld [vmem:[#allocation5 + $0x5c0] sm:$0xff]  ;;  %v513_v27 = vld [vmem:[#allocation5 + $0x5c8] sm:$0xff]  ;;  %v14907_v29 = vcombine.low %v489_v18, %v497_v19 }
 0x1c8   :  { %v14922_v30 = vcombine.high %v504_v24, %v512_v25  ;;  %v14924_v31 = vcombine.high %v505_v26, %v513_v27  ;;  %v520_v32 = vld [vmem:[#allocation5 + $0x600] sm:$0xff]  ;;  %v521_v34 = vld [vmem:[#allocation5 + $0x608] sm:$0xff]  ;;  %v14921_v36 = vcombine.low %v504_v24, %v512_v25  ;;  %v14923_v37 = vcombine.low %v505_v26, %v513_v27 }
 0x1c9   :  { %3425 = vmatpush1.bf16.msra.mxu0 %v14825_v50  ;;  %3507 = vmatpush1.bf16.msra.mxu1 %v14827_v51  ;;  %v528_v33 = vld [vmem:[#allocation5 + $0x640] sm:$0xff]  ;;  %v529_v35 = vld [vmem:[#allocation5 + $0x648] sm:$0xff] }
 0x1ca   :  { %3426 = vmatprep.subr.bf16.mxu0 %v14842_v52  ;;  %3508 = vmatprep.subr.bf16.mxu1 %v14844_v54  ;;  %v14938_v38 = vcombine.high %v520_v32, %v528_v33  ;;  %v14940_v39 = vcombine.high %v521_v34, %v529_v35  ;;  %v536_v40 = vld [vmem:[#allocation5 + $0x680] sm:$0xff]  ;;  %v537_v42 = vld [vmem:[#allocation5 + $0x688] sm:$0xff]  ;;  %v14937_v44 = vcombine.low %v520_v32, %v528_v33 }
 0x1cb   :  { %v544_v41 = vld [vmem:[#allocation5 + $0x6c0] sm:$0xff]  ;;  %v545_v43 = vld [vmem:[#allocation5 + $0x6c8] sm:$0xff]  ;;  %v14939_v45 = vcombine.low %v521_v34, %v529_v35 }
 0x1cc   :  { %v14954_v46 = vcombine.high %v536_v40, %v544_v41  ;;  %v14956_v47 = vcombine.high %v537_v42, %v545_v43  ;;  %v552_v48 = vld [vmem:[#allocation5 + $0x700] sm:$0xff]  ;;  %v553_v50 = vld [vmem:[#allocation5 + $0x708] sm:$0xff]  ;;  %v14953_v52 = vcombine.low %v536_v40, %v544_v41  ;;  %v14955_v54 = vcombine.low %v537_v42, %v545_v43 }
 0x1cd   :  { %3427 = vmatpush1.bf16.msra.mxu0 %v14841_v60  ;;  %3509 = vmatpush1.bf16.msra.mxu1 %v14843_v61  ;;  %v560_v49 = vld [vmem:[#allocation5 + $0x740] sm:$0xff]  ;;  %v561_v51 = vld [vmem:[#allocation5 + $0x748] sm:$0xff] }
 0x1ce   :  { %3428 = vmatprep.subr.bf16.mxu0 %v14858_v62  ;;  %3510 = vmatprep.subr.bf16.mxu1 %v14860_v63  ;;  %v14970_v55 = vcombine.high %v552_v48, %v560_v49  ;;  %v14972_v56 = vcombine.high %v553_v50, %v561_v51  ;;  %v568_v58 = vld [vmem:[#allocation5 + $0x780] sm:$0xff]  ;;  %v569_v60 = vld [vmem:[#allocation5 + $0x788] sm:$0xff]  ;;  %v14969_v62 = vcombine.low %v552_v48, %v560_v49 }
 0x1cf   :  { %v576_v59 = vld [vmem:[#allocation5 + $0x7c0] sm:$0xff]  ;;  %v577_v61 = vld [vmem:[#allocation5 + $0x7c8] sm:$0xff]  ;;  %v14971_v63 = vcombine.low %v553_v50, %v561_v51 }
 0x1d0   :  { %v14986_v0 = vcombine.high %v568_v58, %v576_v59  ;;  %v14988_v1 = vcombine.high %v569_v60, %v577_v61  ;;  %v584_v2 = vld [vmem:[#allocation5 + $0x800] sm:$0xff] }
 0x1d1   :  { %3429 = vmatpush1.bf16.msra.mxu0 %v14857_v4  ;;  %3511 = vmatpush1.bf16.msra.mxu1 %v14859_v5  ;;  %v592_v3 = vld [vmem:[#allocation5 + $0x840] sm:$0xff]  ;;  %v585_v4 = vld [vmem:[#allocation5 + $0x808] sm:$0xff] }
 0x1d2   :  { %3430 = vmatprep.subr.bf16.mxu0 %v14874_v6  ;;  %3512 = vmatprep.subr.bf16.mxu1 %v14876_v7  ;;  %v593_v5 = vld [vmem:[#allocation5 + $0x848] sm:$0xff]  ;;  %v14985_v6 = vcombine.low %v568_v58, %v576_v59  ;;  %v14987_v7 = vcombine.low %v569_v60, %v577_v61  ;;  %v15002_v8 = vcombine.high %v584_v2, %v592_v3  ;;  %v600_v10 = vld [vmem:[#allocation5 + $0x880] sm:$0xff] }
 0x1d3   :  { %v15004_v9 = vcombine.high %v585_v4, %v593_v5  ;;  %v608_v11 = vld [vmem:[#allocation5 + $0x8c0] sm:$0xff]  ;;  %v15001_v16 = vcombine.low %v584_v2, %v592_v3  ;;  %v15003_v17 = vcombine.low %v585_v4, %v593_v5 }
 0x1d4   :  { %v15018_v18 = vcombine.high %v600_v10, %v608_v11  ;;  %v616_v19 = vld [vmem:[#allocation5 + $0x900] sm:$0xff]  ;;  %v15017_v24 = vcombine.low %v600_v10, %v608_v11 }
 0x1d5   :  { %3431 = vmatpush1.bf16.msra.mxu0 %v14873_v12  ;;  %3513 = vmatpush1.bf16.msra.mxu1 %v14875_v13  ;;  %v18368_v12 = vcombine.low %v18358_v53, %v18358_v53  ;;  %v601_v13 = vld [vmem:[#allocation5 + $0x888] sm:$0xff]  ;;  %v632_v27 = vld [vmem:[#allocation5 + $0x980] sm:$0xff] }
 0x1d6   :  { %3432 = vmatprep.subr.bf16.mxu0 %v14890_v14  ;;  %3514 = vmatprep.subr.bf16.mxu1 %v14892_v15  ;;  %v609_v14 = vld [vmem:[#allocation5 + $0x8c8] sm:$0xff]  ;;  %v18370_v15 = vld [vmem:[#allocation2 + $0x8] sm:$0xff]  ;;  %v648_v35 = vld [vmem:[#allocation5 + $0xa00] sm:$0xff] }
 0x1d7   :  { %v18374_v53 = vcombine.high %v18370_v15, %v18370_v15  ;;  %v15019_v25 = vcombine.low %v601_v13, %v609_v14  ;;  %v664_v43 = vld [vmem:[#allocation5 + $0xa80] sm:$0xff] }
 0x1d8   :  { %v680_v51 = vld [vmem:[#allocation5 + $0xb00] sm:$0xff] }
 0x1d9   :  { %3433 = vmatpush1.bf16.msra.mxu0 %v14889_v20  ;;  %3515 = vmatpush1.bf16.msra.mxu1 %v14891_v21  ;;  %v624_v20 = vld [vmem:[#allocation5 + $0x940] sm:$0xff]  ;;  %v617_v21 = vld [vmem:[#allocation5 + $0x908] sm:$0xff] }
 0x1da   :  { %3434 = vmatprep.subr.bf16.mxu0 %v14906_v22  ;;  %3516 = vmatprep.subr.bf16.mxu1 %v14908_v23  ;;  %v15020_v22 = vcombine.high %v601_v13, %v609_v14  ;;  %v625_v23 = vld [vmem:[#allocation5 + $0x948] sm:$0xff]  ;;  %v15034_v26 = vcombine.high %v616_v19, %v624_v20  ;;  %v15033_v32 = vcombine.low %v616_v19, %v624_v20  ;;  %v696_v61 = vld [vmem:[#allocation5 + $0xb80] sm:$0xff] }
 0x1db   :  { %v15035_v33 = vcombine.low %v617_v21, %v625_v23  ;;  %v712_v5 = vld [vmem:[#allocation5 + $0xc00] sm:$0xff]  ;;  %v737_v19 = vld [vmem:[#allocation5 + $0xcc8] sm:$0xff] }
 0x1dc   :  { %v728_v14 = vld [vmem:[#allocation5 + $0xc80] sm:$0xff] }
 0x1dd   :  { %3435 = vmatpush1.bf16.msra.mxu0 %v14905_v28  ;;  %3517 = vmatpush1.bf16.msra.mxu1 %v14907_v29  ;;  %v640_v28 = vld [vmem:[#allocation5 + $0x9c0] sm:$0xff]  ;;  %v633_v29 = vld [vmem:[#allocation5 + $0x988] sm:$0xff] }
 0x1de   :  { %3436 = vmatprep.subr.bf16.mxu0 %v14922_v30  ;;  %3518 = vmatprep.subr.bf16.mxu1 %v14924_v31  ;;  %v15036_v30 = vcombine.high %v617_v21, %v625_v23  ;;  %v641_v31 = vld [vmem:[#allocation5 + $0x9c8] sm:$0xff]  ;;  %v15050_v34 = vcombine.high %v632_v27, %v640_v28  ;;  %v15049_v40 = vcombine.low %v632_v27, %v640_v28  ;;  %v744_v23 = vld [vmem:[#allocation5 + $0xd00] sm:$0xff] }
 0x1df   :  { %v15051_v41 = vcombine.low %v633_v29, %v641_v31  ;;  %v753_v27 = vld [vmem:[#allocation5 + $0xd48] sm:$0xff] }
 0x1e1   :  { %3437 = vmatpush1.bf16.msra.mxu0 %v14921_v36  ;;  %3519 = vmatpush1.bf16.msra.mxu1 %v14923_v37  ;;  %v656_v36 = vld [vmem:[#allocation5 + $0xa40] sm:$0xff]  ;;  %v649_v37 = vld [vmem:[#allocation5 + $0xa08] sm:$0xff] }
 0x1e2   :  { %3438 = vmatprep.subr.bf16.mxu0 %v14938_v38  ;;  %3520 = vmatprep.subr.bf16.mxu1 %v14940_v39  ;;  %v15052_v38 = vcombine.high %v633_v29, %v641_v31  ;;  %v657_v39 = vld [vmem:[#allocation5 + $0xa48] sm:$0xff]  ;;  %v15066_v42 = vcombine.high %v648_v35, %v656_v36  ;;  %v15065_v48 = vcombine.low %v648_v35, %v656_v36  ;;  %v760_v31 = vld [vmem:[#allocation5 + $0xd80] sm:$0xff] }
 0x1e3   :  { %v15067_v49 = vcombine.low %v649_v37, %v657_v39  ;;  %v769_v35 = vld [vmem:[#allocation5 + $0xdc8] sm:$0xff] }
 0x1e5   :  { %3439 = vmatpush1.bf16.msra.mxu0 %v14937_v44  ;;  %3521 = vmatpush1.bf16.msra.mxu1 %v14939_v45  ;;  %v672_v44 = vld [vmem:[#allocation5 + $0xac0] sm:$0xff]  ;;  %v665_v45 = vld [vmem:[#allocation5 + $0xa88] sm:$0xff] }
 0x1e6   :  { %3440 = vmatprep.subr.bf16.mxu0 %v14954_v46  ;;  %3522 = vmatprep.subr.bf16.mxu1 %v14956_v47  ;;  %v15068_v46 = vcombine.high %v649_v37, %v657_v39  ;;  %v673_v47 = vld [vmem:[#allocation5 + $0xac8] sm:$0xff]  ;;  %v15082_v50 = vcombine.high %v664_v43, %v672_v44  ;;  %v15081_v58 = vcombine.low %v664_v43, %v672_v44  ;;  %v776_v39 = vld [vmem:[#allocation5 + $0xe00] sm:$0xff] }
 0x1e7   :  { %v15083_v59 = vcombine.low %v665_v45, %v673_v47  ;;  %v785_v43 = vld [vmem:[#allocation5 + $0xe48] sm:$0xff] }
 0x1e9   :  { %3441 = vmatpush1.bf16.msra.mxu0 %v14953_v52  ;;  %3523 = vmatpush1.bf16.msra.mxu1 %v14955_v54  ;;  %v688_v52 = vld [vmem:[#allocation5 + $0xb40] sm:$0xff]  ;;  %v681_v54 = vld [vmem:[#allocation5 + $0xb08] sm:$0xff] }
 0x1ea   :  { %3442 = vmatprep.subr.bf16.mxu0 %v14970_v55  ;;  %3524 = vmatprep.subr.bf16.mxu1 %v14972_v56  ;;  %v15084_v55 = vcombine.high %v665_v45, %v673_v47  ;;  %v689_v56 = vld [vmem:[#allocation5 + $0xb48] sm:$0xff]  ;;  %v15098_v60 = vcombine.high %v680_v51, %v688_v52  ;;  %v15097_v2 = vcombine.low %v680_v51, %v688_v52  ;;  %v792_v47 = vld [vmem:[#allocation5 + $0xe80] sm:$0xff] }
 0x1eb   :  { %v15099_v3 = vcombine.low %v681_v54, %v689_v56  ;;  %v801_v51 = vld [vmem:[#allocation5 + $0xec8] sm:$0xff] }
 0x1ed   :  { %3443 = vmatpush1.bf16.msra.mxu0 %v14969_v62  ;;  %3525 = vmatpush1.bf16.msra.mxu1 %v14971_v63  ;;  %v704_v62 = vld [vmem:[#allocation5 + $0xbc0] sm:$0xff]  ;;  %v697_v63 = vld [vmem:[#allocation5 + $0xb88] sm:$0xff] }
 0x1ee   :  { %3444 = vmatprep.subr.bf16.mxu0 %v14986_v0  ;;  %3526 = vmatprep.subr.bf16.mxu1 %v14988_v1  ;;  %v15100_v0 = vcombine.high %v681_v54, %v689_v56  ;;  %v705_v1 = vld [vmem:[#allocation5 + $0xbc8] sm:$0xff]  ;;  %v15114_v4 = vcombine.high %v696_v61, %v704_v62  ;;  %v15113_v10 = vcombine.low %v696_v61, %v704_v62  ;;  %v808_v56 = vld [vmem:[#allocation5 + $0xf00] sm:$0xff] }
 0x1ef   :  { %v15115_v11 = vcombine.low %v697_v63, %v705_v1  ;;  %v817_v61 = vld [vmem:[#allocation5 + $0xf48] sm:$0xff] }
 0x1f1   :  { %3445 = vmatpush1.bf16.msra.mxu0 %v14985_v6  ;;  %3527 = vmatpush1.bf16.msra.mxu1 %v14987_v7  ;;  %v720_v6 = vld [vmem:[#allocation5 + $0xc40] sm:$0xff]  ;;  %v713_v7 = vld [vmem:[#allocation5 + $0xc08] sm:$0xff] }
 0x1f2   :  { %3455 = vmatprep.subr.bf16.mxu0 %v15002_v8  ;;  %3537 = vmatprep.subr.bf16.mxu1 %v15004_v9  ;;  %v15116_v8 = vcombine.high %v697_v63, %v705_v1  ;;  %v721_v9 = vld [vmem:[#allocation5 + $0xc48] sm:$0xff]  ;;  %v15130_v13 = vcombine.high %v712_v5, %v720_v6  ;;  %v15129_v20 = vcombine.low %v712_v5, %v720_v6  ;;  %v824_v1 = vld [vmem:[#allocation5 + $0xf80] sm:$0xff] }
 0x1f3   :  { %v15131_v21 = vcombine.low %v713_v7, %v721_v9  ;;  %v833_v5 = vld [vmem:[#allocation5 + $0xfc8] sm:$0xff] }
 0x1f4   :  { %3447 = vmatmul.mubr.bf16.vlgmr.msra.gmra.mrb[0].mxu0 %v18368_v12  ;;  %3529 = vmatmul.mubr.bf16.vlgmr.msra.gmra.mrb[0].mxu1 %v18368_v12 }
 0x1f5   :  { %3456 = vmatpush1.bf16.msra.mxu0 %v15001_v16  ;;  %3538 = vmatpush1.bf16.msra.mxu1 %v15003_v17  ;;  %v736_v16 = vld [vmem:[#allocation5 + $0xcc0] sm:$0xff]  ;;  %v729_v17 = vld [vmem:[#allocation5 + $0xc88] sm:$0xff] }
 0x1f6   :  { %3457 = vmatprep.subr.bf16.mxu0 %v15018_v18  ;;  %3539 = vmatprep.subr.bf16.mxu1 %v15020_v22  ;;  %v15132_v18 = vcombine.high %v713_v7, %v721_v9  ;;  %v15146_v22 = vcombine.high %v728_v14, %v736_v16  ;;  %v15145_v28 = vcombine.low %v728_v14, %v736_v16  ;;  %v330_v9 = vld [vmem:[#allocation5 + $0x10] sm:$0xff]  ;;  %v339_v14 = vld [vmem:[#allocation5 + $0x58] sm:$0xff] }
 0x1f7   :  { %3487 = vmatprep.mubr.bf16.mxu0 %v18374_v53  ;;  %3569 = vmatprep.mubr.bf16.mxu1 %v18374_v53  ;;  %v15147_v29 = vcombine.low %v729_v17, %v737_v19 }
 0x1f9   :  { %3458 = vmatpush1.bf16.msra.mxu0 %v15017_v24  ;;  %3540 = vmatpush1.bf16.msra.mxu1 %v15019_v25  ;;  %v752_v24 = vld [vmem:[#allocation5 + $0xd40] sm:$0xff]  ;;  %v745_v25 = vld [vmem:[#allocation5 + $0xd08] sm:$0xff] }
 0x1fa   :  { %3459 = vmatprep.subr.bf16.mxu0 %v15034_v26  ;;  %3541 = vmatprep.subr.bf16.mxu1 %v15036_v30  ;;  %v15148_v26 = vcombine.high %v729_v17, %v737_v19  ;;  %v15162_v30 = vcombine.high %v744_v23, %v752_v24  ;;  %v15161_v36 = vcombine.low %v744_v23, %v752_v24  ;;  %v346_v19 = vld [vmem:[#allocation5 + $0x90] sm:$0xff]  ;;  %v355_v23 = vld [vmem:[#allocation5 + $0xd8] sm:$0xff] }
 0x1fb   :  { %v15163_v37 = vcombine.low %v745_v25, %v753_v27  ;;  %v18382_v24 = vcombine.low %v18370_v15, %v18370_v15 }
 0x1fd   :  { %3460 = vmatpush1.bf16.msra.mxu0 %v15033_v32  ;;  %3542 = vmatpush1.bf16.msra.mxu1 %v15035_v33  ;;  %v768_v32 = vld [vmem:[#allocation5 + $0xdc0] sm:$0xff]  ;;  %v761_v33 = vld [vmem:[#allocation5 + $0xd88] sm:$0xff] }
 0x1fe   :  { %3461 = vmatprep.subr.bf16.mxu0 %v15050_v34  ;;  %3543 = vmatprep.subr.bf16.mxu1 %v15052_v38  ;;  %v15164_v34 = vcombine.high %v745_v25, %v753_v27  ;;  %v15178_v38 = vcombine.high %v760_v31, %v768_v32  ;;  %v15177_v44 = vcombine.low %v760_v31, %v768_v32  ;;  %v371_v32 = vld [vmem:[#allocation5 + $0x158] sm:$0xff] }
 0x1ff   :  { %v15179_v45 = vcombine.low %v761_v33, %v769_v35 }
 0x201   :  { %3462 = vmatpush1.bf16.msra.mxu0 %v15049_v40  ;;  %3544 = vmatpush1.bf16.msra.mxu1 %v15051_v41  ;;  %v784_v40 = vld [vmem:[#allocation5 + $0xe40] sm:$0xff]  ;;  %v777_v41 = vld [vmem:[#allocation5 + $0xe08] sm:$0xff] }
 0x202   :  { %3463 = vmatprep.subr.bf16.mxu0 %v15066_v42  ;;  %3545 = vmatprep.subr.bf16.mxu1 %v15068_v46  ;;  %v15180_v42 = vcombine.high %v761_v33, %v769_v35  ;;  %v15194_v46 = vcombine.high %v776_v39, %v784_v40  ;;  %v15193_v52 = vcombine.low %v776_v39, %v784_v40  ;;  %v378_v35 = vld [vmem:[#allocation5 + $0x190] sm:$0xff]  ;;  %v387_v39 = vld [vmem:[#allocation5 + $0x1d8] sm:$0xff] }
 0x203   :  { %v15195_v54 = vcombine.low %v777_v41, %v785_v43 }
 0x205   :  { %3464 = vmatpush1.bf16.msra.mxu0 %v15065_v48  ;;  %3546 = vmatpush1.bf16.msra.mxu1 %v15067_v49  ;;  %v800_v48 = vld [vmem:[#allocation5 + $0xec0] sm:$0xff]  ;;  %v793_v49 = vld [vmem:[#allocation5 + $0xe88] sm:$0xff] }
 0x206   :  { %3465 = vmatprep.subr.bf16.mxu0 %v15082_v50  ;;  %3547 = vmatprep.subr.bf16.mxu1 %v15084_v55  ;;  %v15196_v50 = vcombine.high %v777_v41, %v785_v43  ;;  %v15210_v55 = vcombine.high %v792_v47, %v800_v48  ;;  %v15209_v62 = vcombine.low %v792_v47, %v800_v48  ;;  %v394_v43 = vld [vmem:[#allocation5 + $0x210] sm:$0xff]  ;;  %v403_v47 = vld [vmem:[#allocation5 + $0x258] sm:$0xff] }
 0x207   :  { %v15211_v63 = vcombine.low %v793_v49, %v801_v51 }
 0x209   :  { %3466 = vmatpush1.bf16.msra.mxu0 %v15081_v58  ;;  %3548 = vmatpush1.bf16.msra.mxu1 %v15083_v59  ;;  %v816_v58 = vld [vmem:[#allocation5 + $0xf40] sm:$0xff]  ;;  %v809_v59 = vld [vmem:[#allocation5 + $0xf08] sm:$0xff] }
 0x20a   :  { %3467 = vmatprep.subr.bf16.mxu0 %v15098_v60  ;;  %3549 = vmatprep.subr.bf16.mxu1 %v15100_v0  ;;  %v15212_v60 = vcombine.high %v793_v49, %v801_v51  ;;  %v15226_v0 = vcombine.high %v808_v56, %v816_v58  ;;  %v15225_v6 = vcombine.low %v808_v56, %v816_v58  ;;  %v410_v51 = vld [vmem:[#allocation5 + $0x290] sm:$0xff]  ;;  %v419_v56 = vld [vmem:[#allocation5 + $0x2d8] sm:$0xff] }
 0x20b   :  { %v15227_v7 = vcombine.low %v809_v59, %v817_v61 }
 0x20d   :  { %3468 = vmatpush1.bf16.msra.mxu0 %v15097_v2  ;;  %3550 = vmatpush1.bf16.msra.mxu1 %v15099_v3  ;;  %v832_v2 = vld [vmem:[#allocation5 + $0xfc0] sm:$0xff]  ;;  %v825_v3 = vld [vmem:[#allocation5 + $0xf88] sm:$0xff] }
 0x20e   :  { %3469 = vmatprep.subr.bf16.mxu0 %v15114_v4  ;;  %3551 = vmatprep.subr.bf16.mxu1 %v15116_v8  ;;  %v15228_v4 = vcombine.high %v809_v59, %v817_v61  ;;  %v15242_v8 = vcombine.high %v824_v1, %v832_v2  ;;  %v15241_v16 = vcombine.low %v824_v1, %v832_v2  ;;  %v426_v61 = vld [vmem:[#allocation5 + $0x310] sm:$0xff]  ;;  %v435_v1 = vld [vmem:[#allocation5 + $0x358] sm:$0xff] }
 0x20f   :  { %v15243_v17 = vcombine.low %v825_v3, %v833_v5 }
 0x211   :  { %3470 = vmatpush1.bf16.msra.mxu0 %v15113_v10  ;;  %3552 = vmatpush1.bf16.msra.mxu1 %v15115_v11  ;;  %v338_v10 = vld [vmem:[#allocation5 + $0x50] sm:$0xff]  ;;  %v331_v11 = vld [vmem:[#allocation5 + $0x18] sm:$0xff] }
 0x212   :  { %3471 = vmatprep.subr.bf16.mxu0 %v15130_v13  ;;  %3553 = vmatprep.subr.bf16.mxu1 %v15132_v18  ;;  %v15244_v13 = vcombine.high %v825_v3, %v833_v5  ;;  %v14750_v18 = vcombine.high %v330_v9, %v338_v10  ;;  %v14749_v25 = vcombine.low %v330_v9, %v338_v10  ;;  %v442_v5 = vld [vmem:[#allocation5 + $0x390] sm:$0xff]  ;;  %v451_v9 = vld [vmem:[#allocation5 + $0x3d8] sm:$0xff] }
 0x215   :  { %3472 = vmatpush1.bf16.msra.mxu0 %v15129_v20  ;;  %3554 = vmatpush1.bf16.msra.mxu1 %v15131_v21  ;;  %v354_v20 = vld [vmem:[#allocation5 + $0xd0] sm:$0xff]  ;;  %v347_v21 = vld [vmem:[#allocation5 + $0x98] sm:$0xff] }
 0x216   :  { %3473 = vmatprep.subr.bf16.mxu0 %v15146_v22  ;;  %3555 = vmatprep.subr.bf16.mxu1 %v15148_v26  ;;  %v14752_v22 = vcombine.high %v331_v11, %v339_v14  ;;  %v14751_v26 = vcombine.low %v331_v11, %v339_v14  ;;  %v14766_v27 = vcombine.high %v346_v19, %v354_v20  ;;  %v458_v14 = vld [vmem:[#allocation5 + $0x410] sm:$0xff] }
 0x217   :  { %v14768_v31 = vcombine.high %v347_v21, %v355_v23  ;;  %v14765_v33 = vcombine.low %v346_v19, %v354_v20  ;;  %v14767_v15 = vcombine.low %v347_v21, %v355_v23  ;;  %v467_v19 = vld [vmem:[#allocation5 + $0x458] sm:$0xff]  ;;  %v474_v23 = vld [vmem:[#allocation5 + $0x490] sm:$0xff] }
 0x219   :  { %3474 = vmatpush1.bf16.msra.mxu0 %v15145_v28  ;;  %3556 = vmatpush1.bf16.msra.mxu1 %v15147_v29  ;;  %v362_v28 = vld [vmem:[#allocation5 + $0x110] sm:$0xff] }
 0x21a   :  { %3475 = vmatprep.subr.bf16.mxu0 %v15162_v30  ;;  %3557 = vmatprep.subr.bf16.mxu1 %v15164_v34  ;;  %v370_v29 = vld [vmem:[#allocation5 + $0x150] sm:$0xff]  ;;  %v363_v30 = vld [vmem:[#allocation5 + $0x118] sm:$0xff] }
 0x21b   :  { %v14782_v34 = vcombine.high %v362_v28, %v370_v29  ;;  %v14781_v40 = vcombine.low %v362_v28, %v370_v29  ;;  %v14783_v41 = vcombine.low %v363_v30, %v371_v32  ;;  %v483_v28 = vld [vmem:[#allocation5 + $0x4d8] sm:$0xff] }
 0x21d   :  { %3476 = vmatpush1.bf16.msra.mxu0 %v15161_v36  ;;  %3558 = vmatpush1.bf16.msra.mxu1 %v15163_v37  ;;  %v386_v36 = vld [vmem:[#allocation5 + $0x1d0] sm:$0xff]  ;;  %v379_v37 = vld [vmem:[#allocation5 + $0x198] sm:$0xff] }
 0x21e   :  { %3477 = vmatprep.subr.bf16.mxu0 %v15178_v38  ;;  %3559 = vmatprep.subr.bf16.mxu1 %v15180_v42  ;;  %v14784_v38 = vcombine.high %v363_v30, %v371_v32  ;;  %v14798_v42 = vcombine.high %v378_v35, %v386_v36  ;;  %v14797_v48 = vcombine.low %v378_v35, %v386_v36  ;;  %v490_v32 = vld [vmem:[#allocation5 + $0x510] sm:$0xff]  ;;  %v499_v35 = vld [vmem:[#allocation5 + $0x558] sm:$0xff] }
 0x21f   :  { %v14799_v49 = vcombine.low %v379_v37, %v387_v39 }
 0x221   :  { %3478 = vmatpush1.bf16.msra.mxu0 %v15177_v44  ;;  %3560 = vmatpush1.bf16.msra.mxu1 %v15179_v45  ;;  %v402_v44 = vld [vmem:[#allocation5 + $0x250] sm:$0xff]  ;;  %v395_v45 = vld [vmem:[#allocation5 + $0x218] sm:$0xff] }
 0x222   :  { %3479 = vmatprep.subr.bf16.mxu0 %v15194_v46  ;;  %3561 = vmatprep.subr.bf16.mxu1 %v15196_v50  ;;  %v14800_v46 = vcombine.high %v379_v37, %v387_v39  ;;  %v14814_v50 = vcombine.high %v394_v43, %v402_v44  ;;  %v14813_v58 = vcombine.low %v394_v43, %v402_v44  ;;  %v506_v39 = vld [vmem:[#allocation5 + $0x590] sm:$0xff]  ;;  %v515_v43 = vld [vmem:[#allocation5 + $0x5d8] sm:$0xff] }
 0x223   :  { %v14815_v59 = vcombine.low %v395_v45, %v403_v47 }
 0x225   :  { %3480 = vmatpush1.bf16.msra.mxu0 %v15193_v52  ;;  %3562 = vmatpush1.bf16.msra.mxu1 %v15195_v54  ;;  %v418_v52 = vld [vmem:[#allocation5 + $0x2d0] sm:$0xff]  ;;  %v411_v54 = vld [vmem:[#allocation5 + $0x298] sm:$0xff] }
 0x226   :  { %3481 = vmatprep.subr.bf16.mxu0 %v15210_v55  ;;  %3563 = vmatprep.subr.bf16.mxu1 %v15212_v60  ;;  %v14816_v55 = vcombine.high %v395_v45, %v403_v47  ;;  %v14830_v60 = vcombine.high %v410_v51, %v418_v52  ;;  %v14829_v2 = vcombine.low %v410_v51, %v418_v52  ;;  %v522_v47 = vld [vmem:[#allocation5 + $0x610] sm:$0xff]  ;;  %v531_v51 = vld [vmem:[#allocation5 + $0x658] sm:$0xff] }
 0x227   :  { %v14831_v3 = vcombine.low %v411_v54, %v419_v56 }
 0x229   :  { %3482 = vmatpush1.bf16.msra.mxu0 %v15209_v62  ;;  %3564 = vmatpush1.bf16.msra.mxu1 %v15211_v63  ;;  %v434_v62 = vld [vmem:[#allocation5 + $0x350] sm:$0xff]  ;;  %v427_v63 = vld [vmem:[#allocation5 + $0x318] sm:$0xff] }
 0x22a   :  { %3483 = vmatprep.subr.bf16.mxu0 %v15226_v0  ;;  %3565 = vmatprep.subr.bf16.mxu1 %v15228_v4  ;;  %v14832_v0 = vcombine.high %v411_v54, %v419_v56  ;;  %v14846_v4 = vcombine.high %v426_v61, %v434_v62  ;;  %v14845_v10 = vcombine.low %v426_v61, %v434_v62  ;;  %v538_v56 = vld [vmem:[#allocation5 + $0x690] sm:$0xff]  ;;  %v547_v61 = vld [vmem:[#allocation5 + $0x6d8] sm:$0xff] }
 0x22b   :  { %v14847_v11 = vcombine.low %v427_v63, %v435_v1 }
 0x22d   :  { %3484 = vmatpush1.bf16.msra.mxu0 %v15225_v6  ;;  %3566 = vmatpush1.bf16.msra.mxu1 %v15227_v7  ;;  %v450_v6 = vld [vmem:[#allocation5 + $0x3d0] sm:$0xff]  ;;  %v443_v7 = vld [vmem:[#allocation5 + $0x398] sm:$0xff] }
 0x22e   :  { %3485 = vmatprep.subr.bf16.mxu0 %v15242_v8  ;;  %3567 = vmatprep.subr.bf16.mxu1 %v15244_v13  ;;  %v14848_v8 = vcombine.high %v427_v63, %v435_v1  ;;  %v14862_v13 = vcombine.high %v442_v5, %v450_v6  ;;  %v14861_v20 = vcombine.low %v442_v5, %v450_v6  ;;  %v554_v1 = vld [vmem:[#allocation5 + $0x710] sm:$0xff]  ;;  %v563_v5 = vld [vmem:[#allocation5 + $0x758] sm:$0xff] }
 0x22f   :  { %v14863_v21 = vcombine.low %v443_v7, %v451_v9 }
 0x231   :  { %3486 = vmatpush1.bf16.msra.mxu0 %v15241_v16  ;;  %3568 = vmatpush1.bf16.msra.mxu1 %v15243_v17  ;;  %v466_v16 = vld [vmem:[#allocation5 + $0x450] sm:$0xff]  ;;  %v459_v17 = vld [vmem:[#allocation5 + $0x418] sm:$0xff] }
 0x232   :  { %3578 = vmatprep.subr.bf16.mxu0 %v14750_v18  ;;  %3660 = vmatprep.subr.bf16.mxu1 %v14752_v22  ;;  %v14864_v18 = vcombine.high %v443_v7, %v451_v9  ;;  %v14878_v22 = vcombine.high %v458_v14, %v466_v16  ;;  %v14877_v29 = vcombine.low %v458_v14, %v466_v16  ;;  %v570_v9 = vld [vmem:[#allocation5 + $0x790] sm:$0xff]  ;;  %v579_v14 = vld [vmem:[#allocation5 + $0x7d8] sm:$0xff] }
 0x233   :  { %v14879_v30 = vcombine.low %v459_v17, %v467_v19 }
 0x234   :  { %3488 = vmatmul.mubr.bf16.vlgmr.msra.gmra.mrb[0].mxu0 %v18382_v24  ;;  %3570 = vmatmul.mubr.bf16.vlgmr.msra.gmra.mrb[0].mxu1 %v18382_v24 }
 0x235   :  { %3579 = vmatpush1.bf16.msra.mxu0 %v14749_v25  ;;  %3661 = vmatpush1.bf16.msra.mxu1 %v14751_v26  ;;  %v482_v25 = vld [vmem:[#allocation5 + $0x4d0] sm:$0xff]  ;;  %v475_v26 = vld [vmem:[#allocation5 + $0x498] sm:$0xff] }
 0x236   :  { %3580 = vmatprep.subr.bf16.mxu0 %v14766_v27  ;;  %3662 = vmatprep.subr.bf16.mxu1 %v14768_v31  ;;  %v14880_v27 = vcombine.high %v459_v17, %v467_v19  ;;  %v14894_v31 = vcombine.high %v474_v23, %v482_v25  ;;  %v14893_v36 = vcombine.low %v474_v23, %v482_v25  ;;  %v586_v19 = vld [vmem:[#allocation5 + $0x810] sm:$0xff]  ;;  %v595_v23 = vld [vmem:[#allocation5 + $0x858] sm:$0xff] }
 0x237   :  { %3610 = vmatprep.mubr.bf16.mxu0 %v18362_v57  ;;  %3692 = vmatprep.mubr.bf16.mxu1 %v18362_v57  ;;  %v14895_v37 = vcombine.low %v475_v26, %v483_v28 }
 0x239   :  { %3581 = vmatpush1.bf16.msra.mxu0 %v14765_v33  ;;  %3663 = vmatpush1.bf16.msra.mxu1 %v14767_v15  ;;  %v498_v33 = vld [vmem:[#allocation5 + $0x550] sm:$0xff]  ;;  %v491_v15 = vld [vmem:[#allocation5 + $0x518] sm:$0xff] }
 0x23a   :  { %3582 = vmatprep.subr.bf16.mxu0 %v14782_v34  ;;  %3664 = vmatprep.subr.bf16.mxu1 %v14784_v38  ;;  %v14896_v34 = vcombine.high %v475_v26, %v483_v28  ;;  %v14910_v38 = vcombine.high %v490_v32, %v498_v33  ;;  %v14909_v44 = vcombine.low %v490_v32, %v498_v33  ;;  %v602_v28 = vld [vmem:[#allocation5 + $0x890] sm:$0xff]  ;;  %v611_v32 = vld [vmem:[#allocation5 + $0x8d8] sm:$0xff] }
 0x23b   :  { %v14911_v45 = vcombine.low %v491_v15, %v499_v35 }
 0x23d   :  { %3583 = vmatpush1.bf16.msra.mxu0 %v14781_v40  ;;  %3665 = vmatpush1.bf16.msra.mxu1 %v14783_v41  ;;  %v514_v40 = vld [vmem:[#allocation5 + $0x5d0] sm:$0xff]  ;;  %v507_v41 = vld [vmem:[#allocation5 + $0x598] sm:$0xff] }
 0x23e   :  { %3584 = vmatprep.subr.bf16.mxu0 %v14798_v42  ;;  %3666 = vmatprep.subr.bf16.mxu1 %v14800_v46  ;;  %v14912_v42 = vcombine.high %v491_v15, %v499_v35  ;;  %v14926_v46 = vcombine.high %v506_v39, %v514_v40  ;;  %v14925_v52 = vcombine.low %v506_v39, %v514_v40  ;;  %v618_v35 = vld [vmem:[#allocation5 + $0x910] sm:$0xff]  ;;  %v627_v39 = vld [vmem:[#allocation5 + $0x958] sm:$0xff] }
 0x23f   :  { %v14927_v54 = vcombine.low %v507_v41, %v515_v43 }
 0x241   :  { %3585 = vmatpush1.bf16.msra.mxu0 %v14797_v48  ;;  %3667 = vmatpush1.bf16.msra.mxu1 %v14799_v49  ;;  %v530_v48 = vld [vmem:[#allocation5 + $0x650] sm:$0xff]  ;;  %v523_v49 = vld [vmem:[#allocation5 + $0x618] sm:$0xff] }
 0x242   :  { %3586 = vmatprep.subr.bf16.mxu0 %v14814_v50  ;;  %3668 = vmatprep.subr.bf16.mxu1 %v14816_v55  ;;  %v14928_v50 = vcombine.high %v507_v41, %v515_v43  ;;  %v14942_v55 = vcombine.high %v522_v47, %v530_v48  ;;  %v14941_v62 = vcombine.low %v522_v47, %v530_v48  ;;  %v634_v43 = vld [vmem:[#allocation5 + $0x990] sm:$0xff]  ;;  %v643_v47 = vld [vmem:[#allocation5 + $0x9d8] sm:$0xff] }
 0x243   :  { %v14943_v63 = vcombine.low %v523_v49, %v531_v51 }
 0x245   :  { %3587 = vmatpush1.bf16.msra.mxu0 %v14813_v58  ;;  %3669 = vmatpush1.bf16.msra.mxu1 %v14815_v59  ;;  %v546_v58 = vld [vmem:[#allocation5 + $0x6d0] sm:$0xff]  ;;  %v539_v59 = vld [vmem:[#allocation5 + $0x698] sm:$0xff] }
 0x246   :  { %3588 = vmatprep.subr.bf16.mxu0 %v14830_v60  ;;  %3670 = vmatprep.subr.bf16.mxu1 %v14832_v0  ;;  %v14944_v60 = vcombine.high %v523_v49, %v531_v51  ;;  %v14958_v0 = vcombine.high %v538_v56, %v546_v58  ;;  %v14957_v6 = vcombine.low %v538_v56, %v546_v58  ;;  %v650_v51 = vld [vmem:[#allocation5 + $0xa10] sm:$0xff]  ;;  %v659_v56 = vld [vmem:[#allocation5 + $0xa58] sm:$0xff] }
 0x247   :  { %v14959_v7 = vcombine.low %v539_v59, %v547_v61 }
 0x249   :  { %3589 = vmatpush1.bf16.msra.mxu0 %v14829_v2  ;;  %3671 = vmatpush1.bf16.msra.mxu1 %v14831_v3  ;;  %v562_v2 = vld [vmem:[#allocation5 + $0x750] sm:$0xff]  ;;  %v555_v3 = vld [vmem:[#allocation5 + $0x718] sm:$0xff] }
 0x24a   :  { %3590 = vmatprep.subr.bf16.mxu0 %v14846_v4  ;;  %3672 = vmatprep.subr.bf16.mxu1 %v14848_v8  ;;  %v14960_v4 = vcombine.high %v539_v59, %v547_v61  ;;  %v14974_v8 = vcombine.high %v554_v1, %v562_v2  ;;  %v14973_v16 = vcombine.low %v554_v1, %v562_v2  ;;  %v666_v61 = vld [vmem:[#allocation5 + $0xa90] sm:$0xff]  ;;  %v675_v1 = vld [vmem:[#allocation5 + $0xad8] sm:$0xff] }
 0x24b   :  { %v14975_v17 = vcombine.low %v555_v3, %v563_v5 }
 0x24d   :  { %3591 = vmatpush1.bf16.msra.mxu0 %v14845_v10  ;;  %3673 = vmatpush1.bf16.msra.mxu1 %v14847_v11  ;;  %v578_v10 = vld [vmem:[#allocation5 + $0x7d0] sm:$0xff]  ;;  %v571_v11 = vld [vmem:[#allocation5 + $0x798] sm:$0xff] }
 0x24e   :  { %3592 = vmatprep.subr.bf16.mxu0 %v14862_v13  ;;  %3674 = vmatprep.subr.bf16.mxu1 %v14864_v18  ;;  %v14976_v13 = vcombine.high %v555_v3, %v563_v5  ;;  %v14990_v18 = vcombine.high %v570_v9, %v578_v10  ;;  %v14989_v25 = vcombine.low %v570_v9, %v578_v10  ;;  %v682_v5 = vld [vmem:[#allocation5 + $0xb10] sm:$0xff]  ;;  %v691_v9 = vld [vmem:[#allocation5 + $0xb58] sm:$0xff] }
 0x24f   :  { %v14991_v26 = vcombine.low %v571_v11, %v579_v14 }
 0x251   :  { %3593 = vmatpush1.bf16.msra.mxu0 %v14861_v20  ;;  %3675 = vmatpush1.bf16.msra.mxu1 %v14863_v21  ;;  %v594_v20 = vld [vmem:[#allocation5 + $0x850] sm:$0xff]  ;;  %v587_v21 = vld [vmem:[#allocation5 + $0x818] sm:$0xff] }
 0x252   :  { %3594 = vmatprep.subr.bf16.mxu0 %v14878_v22  ;;  %3676 = vmatprep.subr.bf16.mxu1 %v14880_v27  ;;  %v14992_v22 = vcombine.high %v571_v11, %v579_v14  ;;  %v15006_v27 = vcombine.high %v586_v19, %v594_v20  ;;  %v15005_v33 = vcombine.low %v586_v19, %v594_v20  ;;  %v698_v14 = vld [vmem:[#allocation5 + $0xb90] sm:$0xff]  ;;  %v707_v19 = vld [vmem:[#allocation5 + $0xbd8] sm:$0xff] }
 0x253   :  { %v15007_v15 = vcombine.low %v587_v21, %v595_v23 }
 0x255   :  { %3595 = vmatpush1.bf16.msra.mxu0 %v14877_v29  ;;  %3677 = vmatpush1.bf16.msra.mxu1 %v14879_v30  ;;  %v610_v29 = vld [vmem:[#allocation5 + $0x8d0] sm:$0xff]  ;;  %v603_v30 = vld [vmem:[#allocation5 + $0x898] sm:$0xff] }
 0x256   :  { %3596 = vmatprep.subr.bf16.mxu0 %v14894_v31  ;;  %3678 = vmatprep.subr.bf16.mxu1 %v14896_v34  ;;  %v15008_v31 = vcombine.high %v587_v21, %v595_v23  ;;  %v15022_v34 = vcombine.high %v602_v28, %v610_v29  ;;  %v15021_v40 = vcombine.low %v602_v28, %v610_v29  ;;  %v714_v23 = vld [vmem:[#allocation5 + $0xc10] sm:$0xff]  ;;  %v723_v28 = vld [vmem:[#allocation5 + $0xc58] sm:$0xff] }
 0x257   :  { %v15023_v41 = vcombine.low %v603_v30, %v611_v32 }
 0x259   :  { %3597 = vmatpush1.bf16.msra.mxu0 %v14893_v36  ;;  %3679 = vmatpush1.bf16.msra.mxu1 %v14895_v37  ;;  %v626_v36 = vld [vmem:[#allocation5 + $0x950] sm:$0xff]  ;;  %v619_v37 = vld [vmem:[#allocation5 + $0x918] sm:$0xff] }
 0x25a   :  { %3598 = vmatprep.subr.bf16.mxu0 %v14910_v38  ;;  %3680 = vmatprep.subr.bf16.mxu1 %v14912_v42  ;;  %v15024_v38 = vcombine.high %v603_v30, %v611_v32  ;;  %v15038_v42 = vcombine.high %v618_v35, %v626_v36  ;;  %v15037_v48 = vcombine.low %v618_v35, %v626_v36  ;;  %v730_v32 = vld [vmem:[#allocation5 + $0xc90] sm:$0xff]  ;;  %v739_v35 = vld [vmem:[#allocation5 + $0xcd8] sm:$0xff] }
 0x25b   :  { %v15039_v49 = vcombine.low %v619_v37, %v627_v39 }
 0x25d   :  { %3599 = vmatpush1.bf16.msra.mxu0 %v14909_v44  ;;  %3681 = vmatpush1.bf16.msra.mxu1 %v14911_v45  ;;  %v642_v44 = vld [vmem:[#allocation5 + $0x9d0] sm:$0xff]  ;;  %v635_v45 = vld [vmem:[#allocation5 + $0x998] sm:$0xff] }
 0x25e   :  { %3600 = vmatprep.subr.bf16.mxu0 %v14926_v46  ;;  %3682 = vmatprep.subr.bf16.mxu1 %v14928_v50  ;;  %v15040_v46 = vcombine.high %v619_v37, %v627_v39  ;;  %v15054_v50 = vcombine.high %v634_v43, %v642_v44  ;;  %v15053_v58 = vcombine.low %v634_v43, %v642_v44  ;;  %v746_v39 = vld [vmem:[#allocation5 + $0xd10] sm:$0xff]  ;;  %v755_v43 = vld [vmem:[#allocation5 + $0xd58] sm:$0xff] }
 0x25f   :  { %v15055_v59 = vcombine.low %v635_v45, %v643_v47 }
 0x261   :  { %3601 = vmatpush1.bf16.msra.mxu0 %v14925_v52  ;;  %3683 = vmatpush1.bf16.msra.mxu1 %v14927_v54  ;;  %v658_v52 = vld [vmem:[#allocation5 + $0xa50] sm:$0xff]  ;;  %v651_v54 = vld [vmem:[#allocation5 + $0xa18] sm:$0xff] }
 0x262   :  { %3602 = vmatprep.subr.bf16.mxu0 %v14942_v55  ;;  %3684 = vmatprep.subr.bf16.mxu1 %v14944_v60  ;;  %v15056_v55 = vcombine.high %v635_v45, %v643_v47  ;;  %v15070_v60 = vcombine.high %v650_v51, %v658_v52  ;;  %v15069_v2 = vcombine.low %v650_v51, %v658_v52  ;;  %v762_v47 = vld [vmem:[#allocation5 + $0xd90] sm:$0xff]  ;;  %v771_v51 = vld [vmem:[#allocation5 + $0xdd8] sm:$0xff] }
 0x263   :  { %v15071_v3 = vcombine.low %v651_v54, %v659_v56 }
 0x265   :  { %3603 = vmatpush1.bf16.msra.mxu0 %v14941_v62  ;;  %3685 = vmatpush1.bf16.msra.mxu1 %v14943_v63  ;;  %v674_v62 = vld [vmem:[#allocation5 + $0xad0] sm:$0xff]  ;;  %v667_v63 = vld [vmem:[#allocation5 + $0xa98] sm:$0xff] }
 0x266   :  { %3604 = vmatprep.subr.bf16.mxu0 %v14958_v0  ;;  %3686 = vmatprep.subr.bf16.mxu1 %v14960_v4  ;;  %v15072_v0 = vcombine.high %v651_v54, %v659_v56  ;;  %v15086_v4 = vcombine.high %v666_v61, %v674_v62  ;;  %v15085_v10 = vcombine.low %v666_v61, %v674_v62  ;;  %v778_v56 = vld [vmem:[#allocation5 + $0xe10] sm:$0xff]  ;;  %v787_v61 = vld [vmem:[#allocation5 + $0xe58] sm:$0xff] }
 0x267   :  { %v15087_v11 = vcombine.low %v667_v63, %v675_v1 }
 0x269   :  { %3605 = vmatpush1.bf16.msra.mxu0 %v14957_v6  ;;  %3687 = vmatpush1.bf16.msra.mxu1 %v14959_v7  ;;  %v690_v6 = vld [vmem:[#allocation5 + $0xb50] sm:$0xff]  ;;  %v683_v7 = vld [vmem:[#allocation5 + $0xb18] sm:$0xff] }
 0x26a   :  { %3606 = vmatprep.subr.bf16.mxu0 %v14974_v8  ;;  %3688 = vmatprep.subr.bf16.mxu1 %v14976_v13  ;;  %v15088_v8 = vcombine.high %v667_v63, %v675_v1  ;;  %v15102_v13 = vcombine.high %v682_v5, %v690_v6  ;;  %v15101_v20 = vcombine.low %v682_v5, %v690_v6  ;;  %v794_v1 = vld [vmem:[#allocation5 + $0xe90] sm:$0xff]  ;;  %v803_v5 = vld [vmem:[#allocation5 + $0xed8] sm:$0xff] }
 0x26b   :  { %v15103_v21 = vcombine.low %v683_v7, %v691_v9 }
 0x26d   :  { %3607 = vmatpush1.bf16.msra.mxu0 %v14973_v16  ;;  %3689 = vmatpush1.bf16.msra.mxu1 %v14975_v17  ;;  %v15104_v16 = vcombine.high %v683_v7, %v691_v9  ;;  %v706_v17 = vld [vmem:[#allocation5 + $0xbd0] sm:$0xff] }
 0x26e   :  { %3608 = vmatprep.subr.bf16.mxu0 %v14990_v18  ;;  %3690 = vmatprep.subr.bf16.mxu1 %v14992_v22  ;;  %v699_v18 = vld [vmem:[#allocation5 + $0xb98] sm:$0xff]  ;;  %v15118_v22 = vcombine.high %v698_v14, %v706_v17  ;;  %v15117_v29 = vcombine.low %v698_v14, %v706_v17  ;;  %v810_v9 = vld [vmem:[#allocation5 + $0xf10] sm:$0xff] }
 0x26f   :  { %v15119_v30 = vcombine.low %v699_v18, %v707_v19  ;;  %v819_v14 = vld [vmem:[#allocation5 + $0xf58] sm:$0xff] }
 0x271   :  { %3609 = vmatpush1.bf16.msra.mxu0 %v14989_v25  ;;  %3691 = vmatpush1.bf16.msra.mxu1 %v14991_v26  ;;  %v722_v25 = vld [vmem:[#allocation5 + $0xc50] sm:$0xff]  ;;  %v715_v26 = vld [vmem:[#allocation5 + $0xc18] sm:$0xff] }
 0x272   :  { %3619 = vmatprep.subr.bf16.mxu0 %v15006_v27  ;;  %3701 = vmatprep.subr.bf16.mxu1 %v15008_v31  ;;  %v15120_v27 = vcombine.high %v699_v18, %v707_v19  ;;  %v15134_v31 = vcombine.high %v714_v23, %v722_v25  ;;  %v15133_v36 = vcombine.low %v714_v23, %v722_v25  ;;  %v826_v19 = vld [vmem:[#allocation5 + $0xf90] sm:$0xff]  ;;  %v835_v23 = vld [vmem:[#allocation5 + $0xfd8] sm:$0xff] }
 0x273   :  { %v15135_v37 = vcombine.low %v715_v26, %v723_v28 }
 0x274   :  { %3611 = vmatmul.mubr.bf16.vlgmr.msra.gmra.mrb[4].mxu0 %v18368_v12  ;;  %3693 = vmatmul.mubr.bf16.vlgmr.msra.gmra.mrb[4].mxu1 %v18368_v12 }
 0x275   :  { %3620 = vmatpush1.bf16.msra.mxu0 %v15005_v33  ;;  %3702 = vmatpush1.bf16.msra.mxu1 %v15007_v15  ;;  %v738_v33 = vld [vmem:[#allocation5 + $0xcd0] sm:$0xff]  ;;  %v731_v15 = vld [vmem:[#allocation5 + $0xc98] sm:$0xff] }
 0x276   :  { %3621 = vmatprep.subr.bf16.mxu0 %v15022_v34  ;;  %3703 = vmatprep.subr.bf16.mxu1 %v15024_v38  ;;  %v15136_v34 = vcombine.high %v715_v26, %v723_v28  ;;  %v15150_v38 = vcombine.high %v730_v32, %v738_v33  ;;  %v15149_v44 = vcombine.low %v730_v32, %v738_v33  ;;  %v332_v28 = vld [vmem:[#allocation5 + $0x20] sm:$0xff]  ;;  %v341_v32 = vld [vmem:[#allocation5 + $0x68] sm:$0xff] }
 0x277   :  { %3651 = vmatprep.mubr.bf16.mxu0 %v18374_v53  ;;  %3733 = vmatprep.mubr.bf16.mxu1 %v18374_v53  ;;  %v15151_v45 = vcombine.low %v731_v15, %v739_v35 }
 0x279   :  { %3622 = vmatpush1.bf16.msra.mxu0 %v15021_v40  ;;  %3704 = vmatpush1.bf16.msra.mxu1 %v15023_v41  ;;  %v754_v40 = vld [vmem:[#allocation5 + $0xd50] sm:$0xff]  ;;  %v747_v41 = vld [vmem:[#allocation5 + $0xd18] sm:$0xff] }
 0x27a   :  { %3623 = vmatprep.subr.bf16.mxu0 %v15038_v42  ;;  %3705 = vmatprep.subr.bf16.mxu1 %v15040_v46  ;;  %v15152_v42 = vcombine.high %v731_v15, %v739_v35  ;;  %v15166_v46 = vcombine.high %v746_v39, %v754_v40  ;;  %v15165_v52 = vcombine.low %v746_v39, %v754_v40  ;;  %v348_v35 = vld [vmem:[#allocation5 + $0xa0] sm:$0xff]  ;;  %v357_v39 = vld [vmem:[#allocation5 + $0xe8] sm:$0xff] }
 0x27b   :  { %v15167_v54 = vcombine.low %v747_v41, %v755_v43 }
 0x27d   :  { %3624 = vmatpush1.bf16.msra.mxu0 %v15037_v48  ;;  %3706 = vmatpush1.bf16.msra.mxu1 %v15039_v49  ;;  %v770_v48 = vld [vmem:[#allocation5 + $0xdd0] sm:$0xff]  ;;  %v763_v49 = vld [vmem:[#allocation5 + $0xd98] sm:$0xff] }
 0x27e   :  { %3625 = vmatprep.subr.bf16.mxu0 %v15054_v50  ;;  %3707 = vmatprep.subr.bf16.mxu1 %v15056_v55  ;;  %v15168_v50 = vcombine.high %v747_v41, %v755_v43  ;;  %v15182_v55 = vcombine.high %v762_v47, %v770_v48  ;;  %v15181_v62 = vcombine.low %v762_v47, %v770_v48  ;;  %v373_v47 = vld [vmem:[#allocation5 + $0x168] sm:$0xff] }
 0x27f   :  { %v15183_v63 = vcombine.low %v763_v49, %v771_v51 }
 0x281   :  { %3626 = vmatpush1.bf16.msra.mxu0 %v15053_v58  ;;  %3708 = vmatpush1.bf16.msra.mxu1 %v15055_v59  ;;  %v786_v58 = vld [vmem:[#allocation5 + $0xe50] sm:$0xff]  ;;  %v779_v59 = vld [vmem:[#allocation5 + $0xe18] sm:$0xff] }
 0x282   :  { %3627 = vmatprep.subr.bf16.mxu0 %v15070_v60  ;;  %3709 = vmatprep.subr.bf16.mxu1 %v15072_v0  ;;  %v15184_v60 = vcombine.high %v763_v49, %v771_v51  ;;  %v15198_v0 = vcombine.high %v778_v56, %v786_v58  ;;  %v15197_v6 = vcombine.low %v778_v56, %v786_v58  ;;  %v389_v56 = vld [vmem:[#allocation5 + $0x1e8] sm:$0xff] }
 0x283   :  { %v15199_v7 = vcombine.low %v779_v59, %v787_v61 }
 0x285   :  { %3628 = vmatpush1.bf16.msra.mxu0 %v15069_v2  ;;  %3710 = vmatpush1.bf16.msra.mxu1 %v15071_v3  ;;  %v802_v2 = vld [vmem:[#allocation5 + $0xed0] sm:$0xff]  ;;  %v795_v3 = vld [vmem:[#allocation5 + $0xe98] sm:$0xff] }
 0x286   :  { %3629 = vmatprep.subr.bf16.mxu0 %v15086_v4  ;;  %3711 = vmatprep.subr.bf16.mxu1 %v15088_v8  ;;  %v15200_v4 = vcombine.high %v779_v59, %v787_v61  ;;  %v15214_v8 = vcombine.high %v794_v1, %v802_v2  ;;  %v15215_v17 = vcombine.low %v795_v3, %v803_v5 }
 0x289   :  { %3630 = vmatpush1.bf16.msra.mxu0 %v15085_v10  ;;  %3712 = vmatpush1.bf16.msra.mxu1 %v15087_v11  ;;  %v818_v10 = vld [vmem:[#allocation5 + $0xf50] sm:$0xff]  ;;  %v811_v11 = vld [vmem:[#allocation5 + $0xf18] sm:$0xff] }
 0x28a   :  { %3631 = vmatprep.subr.bf16.mxu0 %v15102_v13  ;;  %3713 = vmatprep.subr.bf16.mxu1 %v15104_v16  ;;  %v15216_v13 = vcombine.high %v795_v3, %v803_v5  ;;  %v15213_v16 = vcombine.low %v794_v1, %v802_v2  ;;  %v15230_v18 = vcombine.high %v810_v9, %v818_v10  ;;  %v405_v1 = vld [vmem:[#allocation5 + $0x268] sm:$0xff] }
 0x28b   :  { %v15229_v25 = vcombine.low %v810_v9, %v818_v10  ;;  %v15231_v26 = vcombine.low %v811_v11, %v819_v14  ;;  %v421_v9 = vld [vmem:[#allocation5 + $0x2e8] sm:$0xff] }
 0x28d   :  { %3632 = vmatpush1.bf16.msra.mxu0 %v15101_v20  ;;  %3714 = vmatpush1.bf16.msra.mxu1 %v15103_v21  ;;  %v834_v20 = vld [vmem:[#allocation5 + $0xfd0] sm:$0xff]  ;;  %v827_v21 = vld [vmem:[#allocation5 + $0xf98] sm:$0xff] }
 0x28e   :  { %3633 = vmatprep.subr.bf16.mxu0 %v15118_v22  ;;  %3715 = vmatprep.subr.bf16.mxu1 %v15120_v27  ;;  %v15232_v22 = vcombine.high %v811_v11, %v819_v14  ;;  %v15246_v27 = vcombine.high %v826_v19, %v834_v20  ;;  %v15245_v33 = vcombine.low %v826_v19, %v834_v20  ;;  %v437_v19 = vld [vmem:[#allocation5 + $0x368] sm:$0xff] }
 0x28f   :  { %v15247_v15 = vcombine.low %v827_v21, %v835_v23 }
 0x291   :  { %3634 = vmatpush1.bf16.msra.mxu0 %v15117_v29  ;;  %3716 = vmatpush1.bf16.msra.mxu1 %v15119_v30  ;;  %v340_v29 = vld [vmem:[#allocation5 + $0x60] sm:$0xff]  ;;  %v333_v30 = vld [vmem:[#allocation5 + $0x28] sm:$0xff] }
 0x292   :  { %3635 = vmatprep.subr.bf16.mxu0 %v15134_v31  ;;  %3717 = vmatprep.subr.bf16.mxu1 %v15136_v34  ;;  %v15248_v31 = vcombine.high %v827_v21, %v835_v23  ;;  %v14754_v34 = vcombine.high %v332_v28, %v340_v29  ;;  %v14753_v40 = vcombine.low %v332_v28, %v340_v29  ;;  %v453_v28 = vld [vmem:[#allocation5 + $0x3e8] sm:$0xff] }
 0x293   :  { %v14755_v41 = vcombine.low %v333_v30, %v341_v32 }
 0x295   :  { %3636 = vmatpush1.bf16.msra.mxu0 %v15133_v36  ;;  %3718 = vmatpush1.bf16.msra.mxu1 %v15135_v37  ;;  %v356_v36 = vld [vmem:[#allocation5 + $0xe0] sm:$0xff]  ;;  %v349_v37 = vld [vmem:[#allocation5 + $0xa8] sm:$0xff] }
 0x296   :  { %3637 = vmatprep.subr.bf16.mxu0 %v15150_v38  ;;  %3719 = vmatprep.subr.bf16.mxu1 %v15152_v42  ;;  %v14756_v38 = vcombine.high %v333_v30, %v341_v32  ;;  %v14770_v42 = vcombine.high %v348_v35, %v356_v36  ;;  %v14772_v43 = vcombine.high %v349_v37, %v357_v39 }
 0x297   :  { %v14769_v48 = vcombine.low %v348_v35, %v356_v36  ;;  %v14771_v49 = vcombine.low %v349_v37, %v357_v39  ;;  %v469_v35 = vld [vmem:[#allocation5 + $0x468] sm:$0xff] }
 0x299   :  { %3638 = vmatpush1.bf16.msra.mxu0 %v15149_v44  ;;  %3720 = vmatpush1.bf16.msra.mxu1 %v15151_v45  ;;  %v364_v44 = vld [vmem:[#allocation5 + $0x120] sm:$0xff] }
 0x29a   :  { %3639 = vmatprep.subr.bf16.mxu0 %v15166_v46  ;;  %3721 = vmatprep.subr.bf16.mxu1 %v15168_v50  ;;  %v372_v45 = vld [vmem:[#allocation5 + $0x160] sm:$0xff]  ;;  %v365_v46 = vld [vmem:[#allocation5 + $0x128] sm:$0xff] }
 0x29b   :  { %v14786_v50 = vcombine.high %v364_v44, %v372_v45  ;;  %v14788_v51 = vcombine.high %v365_v46, %v373_v47  ;;  %v14785_v58 = vcombine.low %v364_v44, %v372_v45  ;;  %v14787_v59 = vcombine.low %v365_v46, %v373_v47 }
 0x29d   :  { %3640 = vmatpush1.bf16.msra.mxu0 %v15165_v52  ;;  %3722 = vmatpush1.bf16.msra.mxu1 %v15167_v54  ;;  %v380_v52 = vld [vmem:[#allocation5 + $0x1a0] sm:$0xff] }
 0x29e   :  { %3641 = vmatprep.subr.bf16.mxu0 %v15182_v55  ;;  %3723 = vmatprep.subr.bf16.mxu1 %v15184_v60  ;;  %v388_v54 = vld [vmem:[#allocation5 + $0x1e0] sm:$0xff]  ;;  %v381_v55 = vld [vmem:[#allocation5 + $0x1a8] sm:$0xff] }
 0x29f   :  { %v14802_v60 = vcombine.high %v380_v52, %v388_v54  ;;  %v14804_v61 = vcombine.high %v381_v55, %v389_v56  ;;  %v14801_v2 = vcombine.low %v380_v52, %v388_v54  ;;  %v14803_v3 = vcombine.low %v381_v55, %v389_v56 }
 0x2a1   :  { %3642 = vmatpush1.bf16.msra.mxu0 %v15181_v62  ;;  %3724 = vmatpush1.bf16.msra.mxu1 %v15183_v63  ;;  %v396_v62 = vld [vmem:[#allocation5 + $0x220] sm:$0xff] }
 0x2a2   :  { %3643 = vmatprep.subr.bf16.mxu0 %v15198_v0  ;;  %3725 = vmatprep.subr.bf16.mxu1 %v15200_v4  ;;  %v404_v63 = vld [vmem:[#allocation5 + $0x260] sm:$0xff]  ;;  %v397_v0 = vld [vmem:[#allocation5 + $0x228] sm:$0xff] }
 0x2a3   :  { %v14818_v4 = vcombine.high %v396_v62, %v404_v63  ;;  %v14820_v5 = vcombine.high %v397_v0, %v405_v1  ;;  %v14817_v10 = vcombine.low %v396_v62, %v404_v63  ;;  %v14819_v11 = vcombine.low %v397_v0, %v405_v1 }
 0x2a5   :  { %3644 = vmatpush1.bf16.msra.mxu0 %v15197_v6  ;;  %3726 = vmatpush1.bf16.msra.mxu1 %v15199_v7  ;;  %v412_v6 = vld [vmem:[#allocation5 + $0x2a0] sm:$0xff] }
 0x2a6   :  { %3645 = vmatprep.subr.bf16.mxu0 %v15214_v8  ;;  %3727 = vmatprep.subr.bf16.mxu1 %v15216_v13  ;;  %v420_v7 = vld [vmem:[#allocation5 + $0x2e0] sm:$0xff]  ;;  %v413_v8 = vld [vmem:[#allocation5 + $0x2a8] sm:$0xff] }
 0x2a7   :  { %v14834_v13 = vcombine.high %v412_v6, %v420_v7  ;;  %v14836_v14 = vcombine.high %v413_v8, %v421_v9  ;;  %v14833_v20 = vcombine.low %v412_v6, %v420_v7  ;;  %v14835_v21 = vcombine.low %v413_v8, %v421_v9 }
 0x2a9   :  { %3646 = vmatpush1.bf16.msra.mxu0 %v15213_v16  ;;  %3728 = vmatpush1.bf16.msra.mxu1 %v15215_v17  ;;  %v428_v16 = vld [vmem:[#allocation5 + $0x320] sm:$0xff] }
 0x2aa   :  { %3647 = vmatprep.subr.bf16.mxu0 %v15230_v18  ;;  %3729 = vmatprep.subr.bf16.mxu1 %v15232_v22  ;;  %v436_v17 = vld [vmem:[#allocation5 + $0x360] sm:$0xff]  ;;  %v429_v18 = vld [vmem:[#allocation5 + $0x328] sm:$0xff] }
 0x2ab   :  { %v14850_v22 = vcombine.high %v428_v16, %v436_v17  ;;  %v14852_v23 = vcombine.high %v429_v18, %v437_v19  ;;  %v14849_v29 = vcombine.low %v428_v16, %v436_v17  ;;  %v14851_v30 = vcombine.low %v429_v18, %v437_v19 }
 0x2ad   :  { %3648 = vmatpush1.bf16.msra.mxu0 %v15229_v25  ;;  %3730 = vmatpush1.bf16.msra.mxu1 %v15231_v26  ;;  %v444_v25 = vld [vmem:[#allocation5 + $0x3a0] sm:$0xff] }
 0x2ae   :  { %3649 = vmatprep.subr.bf16.mxu0 %v15246_v27  ;;  %3731 = vmatprep.subr.bf16.mxu1 %v15248_v31  ;;  %v452_v26 = vld [vmem:[#allocation5 + $0x3e0] sm:$0xff]  ;;  %v445_v27 = vld [vmem:[#allocation5 + $0x3a8] sm:$0xff] }
 0x2af   :  { %v14866_v31 = vcombine.high %v444_v25, %v452_v26  ;;  %v14868_v32 = vcombine.high %v445_v27, %v453_v28  ;;  %v14865_v36 = vcombine.low %v444_v25, %v452_v26  ;;  %v14867_v37 = vcombine.low %v445_v27, %v453_v28 }
 0x2b1   :  { %3650 = vmatpush1.bf16.msra.mxu0 %v15245_v33  ;;  %3732 = vmatpush1.bf16.msra.mxu1 %v15247_v15  ;;  %v460_v33 = vld [vmem:[#allocation5 + $0x420] sm:$0xff] }
 0x2b2   :  { %3742 = vmatprep.subr.bf16.mxu0 %v14754_v34  ;;  %3824 = vmatprep.subr.bf16.mxu1 %v14756_v38  ;;  %v468_v15 = vld [vmem:[#allocation5 + $0x460] sm:$0xff]  ;;  %v461_v34 = vld [vmem:[#allocation5 + $0x428] sm:$0xff] }
 0x2b3   :  { %v14882_v38 = vcombine.high %v460_v33, %v468_v15  ;;  %v14884_v39 = vcombine.high %v461_v34, %v469_v35  ;;  %v14881_v44 = vcombine.low %v460_v33, %v468_v15  ;;  %v14883_v45 = vcombine.low %v461_v34, %v469_v35 }
 0x2b4   :  { %3652 = vmatmul.mubr.bf16.vlgmr.msra.gmra.mrb[4].mxu0 %v18382_v24  ;;  %3734 = vmatmul.mubr.bf16.vlgmr.msra.gmra.mrb[4].mxu1 %v18382_v24 }
 0x2b5   :  { %3743 = vmatpush1.bf16.msra.mxu0 %v14753_v40  ;;  %3825 = vmatpush1.bf16.msra.mxu1 %v14755_v41  ;;  %v476_v40 = vld [vmem:[#allocation5 + $0x4a0] sm:$0xff] }
 0x2b6   :  { %3744 = vmatprep.subr.bf16.mxu0 %v14770_v42  ;;  %3826 = vmatprep.subr.bf16.mxu1 %v14772_v43  ;;  %v484_v41 = vld [vmem:[#allocation5 + $0x4e0] sm:$0xff]  ;;  %v477_v42 = vld [vmem:[#allocation5 + $0x4a8] sm:$0xff] }
 0x2b7   :  { %3774 = vmatprep.mubr.bf16.mxu0 %v18362_v57  ;;  %3856 = vmatprep.mubr.bf16.mxu1 %v18362_v57  ;;  %v485_v43 = vld [vmem:[#allocation5 + $0x4e8] sm:$0xff]  ;;  %v14898_v46 = vcombine.high %v476_v40, %v484_v41  ;;  %v14897_v52 = vcombine.low %v476_v40, %v484_v41 }
 0x2b8   :  { %v14900_v47 = vcombine.high %v477_v42, %v485_v43  ;;  %v14899_v54 = vcombine.low %v477_v42, %v485_v43 }
 0x2b9   :  { %3745 = vmatpush1.bf16.msra.mxu0 %v14769_v48  ;;  %3827 = vmatpush1.bf16.msra.mxu1 %v14771_v49  ;;  %v492_v48 = vld [vmem:[#allocation5 + $0x520] sm:$0xff] }
 0x2ba   :  { %3746 = vmatprep.subr.bf16.mxu0 %v14786_v50  ;;  %3828 = vmatprep.subr.bf16.mxu1 %v14788_v51  ;;  %v500_v49 = vld [vmem:[#allocation5 + $0x560] sm:$0xff]  ;;  %v493_v50 = vld [vmem:[#allocation5 + $0x528] sm:$0xff] }
 0x2bb   :  { %v501_v51 = vld [vmem:[#allocation5 + $0x568] sm:$0xff]  ;;  %v14914_v55 = vcombine.high %v492_v48, %v500_v49  ;;  %v14913_v62 = vcombine.low %v492_v48, %v500_v49 }
 0x2bc   :  { %v14916_v56 = vcombine.high %v493_v50, %v501_v51  ;;  %v14915_v63 = vcombine.low %v493_v50, %v501_v51 }
 0x2bd   :  { %3747 = vmatpush1.bf16.msra.mxu0 %v14785_v58  ;;  %3829 = vmatpush1.bf16.msra.mxu1 %v14787_v59  ;;  %v508_v58 = vld [vmem:[#allocation5 + $0x5a0] sm:$0xff] }
 0x2be   :  { %3748 = vmatprep.subr.bf16.mxu0 %v14802_v60  ;;  %3830 = vmatprep.subr.bf16.mxu1 %v14804_v61  ;;  %v516_v59 = vld [vmem:[#allocation5 + $0x5e0] sm:$0xff]  ;;  %v509_v60 = vld [vmem:[#allocation5 + $0x5a8] sm:$0xff] }
 0x2bf   :  { %v517_v61 = vld [vmem:[#allocation5 + $0x5e8] sm:$0xff]  ;;  %v14930_v0 = vcombine.high %v508_v58, %v516_v59  ;;  %v14929_v6 = vcombine.low %v508_v58, %v516_v59 }
 0x2c0   :  { %v14932_v1 = vcombine.high %v509_v60, %v517_v61  ;;  %v14931_v7 = vcombine.low %v509_v60, %v517_v61 }
 0x2c1   :  { %3749 = vmatpush1.bf16.msra.mxu0 %v14801_v2  ;;  %3831 = vmatpush1.bf16.msra.mxu1 %v14803_v3  ;;  %v524_v2 = vld [vmem:[#allocation5 + $0x620] sm:$0xff] }
 0x2c2   :  { %3750 = vmatprep.subr.bf16.mxu0 %v14818_v4  ;;  %3832 = vmatprep.subr.bf16.mxu1 %v14820_v5  ;;  %v532_v3 = vld [vmem:[#allocation5 + $0x660] sm:$0xff]  ;;  %v525_v4 = vld [vmem:[#allocation5 + $0x628] sm:$0xff] }
 0x2c3   :  { %v533_v5 = vld [vmem:[#allocation5 + $0x668] sm:$0xff]  ;;  %v14946_v8 = vcombine.high %v524_v2, %v532_v3  ;;  %v14945_v16 = vcombine.low %v524_v2, %v532_v3 }
 0x2c4   :  { %v14948_v9 = vcombine.high %v525_v4, %v533_v5  ;;  %v14947_v17 = vcombine.low %v525_v4, %v533_v5 }
 0x2c5   :  { %3751 = vmatpush1.bf16.msra.mxu0 %v14817_v10  ;;  %3833 = vmatpush1.bf16.msra.mxu1 %v14819_v11  ;;  %v540_v10 = vld [vmem:[#allocation5 + $0x6a0] sm:$0xff] }
 0x2c6   :  { %3752 = vmatprep.subr.bf16.mxu0 %v14834_v13  ;;  %3834 = vmatprep.subr.bf16.mxu1 %v14836_v14  ;;  %v548_v11 = vld [vmem:[#allocation5 + $0x6e0] sm:$0xff]  ;;  %v541_v13 = vld [vmem:[#allocation5 + $0x6a8] sm:$0xff] }
 0x2c7   :  { %v549_v14 = vld [vmem:[#allocation5 + $0x6e8] sm:$0xff]  ;;  %v14962_v18 = vcombine.high %v540_v10, %v548_v11  ;;  %v14961_v25 = vcombine.low %v540_v10, %v548_v11 }
 0x2c8   :  { %v14964_v19 = vcombine.high %v541_v13, %v549_v14  ;;  %v14963_v26 = vcombine.low %v541_v13, %v549_v14 }
 0x2c9   :  { %3753 = vmatpush1.bf16.msra.mxu0 %v14833_v20  ;;  %3835 = vmatpush1.bf16.msra.mxu1 %v14835_v21  ;;  %v556_v20 = vld [vmem:[#allocation5 + $0x720] sm:$0xff] }
 0x2ca   :  { %3754 = vmatprep.subr.bf16.mxu0 %v14850_v22  ;;  %3836 = vmatprep.subr.bf16.mxu1 %v14852_v23  ;;  %v564_v21 = vld [vmem:[#allocation5 + $0x760] sm:$0xff]  ;;  %v557_v22 = vld [vmem:[#allocation5 + $0x728] sm:$0xff] }
 0x2cb   :  { %v565_v23 = vld [vmem:[#allocation5 + $0x768] sm:$0xff]  ;;  %v14978_v27 = vcombine.high %v556_v20, %v564_v21  ;;  %v14977_v33 = vcombine.low %v556_v20, %v564_v21 }
 0x2cc   :  { %v14980_v28 = vcombine.high %v557_v22, %v565_v23  ;;  %v14979_v15 = vcombine.low %v557_v22, %v565_v23 }
 0x2cd   :  { %3755 = vmatpush1.bf16.msra.mxu0 %v14849_v29  ;;  %3837 = vmatpush1.bf16.msra.mxu1 %v14851_v30  ;;  %v572_v29 = vld [vmem:[#allocation5 + $0x7a0] sm:$0xff] }
 0x2ce   :  { %3756 = vmatprep.subr.bf16.mxu0 %v14866_v31  ;;  %3838 = vmatprep.subr.bf16.mxu1 %v14868_v32  ;;  %v580_v30 = vld [vmem:[#allocation5 + $0x7e0] sm:$0xff]  ;;  %v573_v31 = vld [vmem:[#allocation5 + $0x7a8] sm:$0xff] }
 0x2cf   :  { %v581_v32 = vld [vmem:[#allocation5 + $0x7e8] sm:$0xff]  ;;  %v14994_v34 = vcombine.high %v572_v29, %v580_v30  ;;  %v14993_v40 = vcombine.low %v572_v29, %v580_v30 }
 0x2d0   :  { %v14996_v35 = vcombine.high %v573_v31, %v581_v32  ;;  %v14995_v41 = vcombine.low %v573_v31, %v581_v32 }
 0x2d1   :  { %3757 = vmatpush1.bf16.msra.mxu0 %v14865_v36  ;;  %3839 = vmatpush1.bf16.msra.mxu1 %v14867_v37  ;;  %v588_v36 = vld [vmem:[#allocation5 + $0x820] sm:$0xff] }
 0x2d2   :  { %3758 = vmatprep.subr.bf16.mxu0 %v14882_v38  ;;  %3840 = vmatprep.subr.bf16.mxu1 %v14884_v39  ;;  %v596_v37 = vld [vmem:[#allocation5 + $0x860] sm:$0xff]  ;;  %v589_v38 = vld [vmem:[#allocation5 + $0x828] sm:$0xff] }
 0x2d3   :  { %v597_v39 = vld [vmem:[#allocation5 + $0x868] sm:$0xff]  ;;  %v15010_v42 = vcombine.high %v588_v36, %v596_v37  ;;  %v15009_v48 = vcombine.low %v588_v36, %v596_v37 }
 0x2d4   :  { %v15012_v43 = vcombine.high %v589_v38, %v597_v39  ;;  %v15011_v49 = vcombine.low %v589_v38, %v597_v39  ;;  %v701_v37 = vld [vmem:[#allocation5 + $0xba8] sm:$0xff] }
 0x2d5   :  { %3759 = vmatpush1.bf16.msra.mxu0 %v14881_v44  ;;  %3841 = vmatpush1.bf16.msra.mxu1 %v14883_v45  ;;  %v604_v44 = vld [vmem:[#allocation5 + $0x8a0] sm:$0xff]  ;;  %v709_v38 = vld [vmem:[#allocation5 + $0xbe8] sm:$0xff] }
 0x2d6   :  { %3760 = vmatprep.subr.bf16.mxu0 %v14898_v46  ;;  %3842 = vmatprep.subr.bf16.mxu1 %v14900_v47  ;;  %v612_v45 = vld [vmem:[#allocation5 + $0x8e0] sm:$0xff]  ;;  %v605_v46 = vld [vmem:[#allocation5 + $0x8a8] sm:$0xff] }
 0x2d7   :  { %v613_v47 = vld [vmem:[#allocation5 + $0x8e8] sm:$0xff]  ;;  %v15026_v50 = vcombine.high %v604_v44, %v612_v45  ;;  %v15025_v58 = vcombine.low %v604_v44, %v612_v45 }
 0x2d8   :  { %v15028_v51 = vcombine.high %v605_v46, %v613_v47  ;;  %v15027_v59 = vcombine.low %v605_v46, %v613_v47  ;;  %v15124_v47 = vcombine.high %v701_v37, %v709_v38 }
 0x2d9   :  { %3761 = vmatpush1.bf16.msra.mxu0 %v14897_v52  ;;  %3843 = vmatpush1.bf16.msra.mxu1 %v14899_v54  ;;  %v620_v52 = vld [vmem:[#allocation5 + $0x920] sm:$0xff] }
 0x2da   :  { %3762 = vmatprep.subr.bf16.mxu0 %v14914_v55  ;;  %3844 = vmatprep.subr.bf16.mxu1 %v14916_v56  ;;  %v628_v54 = vld [vmem:[#allocation5 + $0x960] sm:$0xff]  ;;  %v621_v55 = vld [vmem:[#allocation5 + $0x928] sm:$0xff] }
 0x2db   :  { %v629_v56 = vld [vmem:[#allocation5 + $0x968] sm:$0xff]  ;;  %v15042_v60 = vcombine.high %v620_v52, %v628_v54  ;;  %v15041_v2 = vcombine.low %v620_v52, %v628_v54  ;;  %v15123_v54 = vcombine.low %v701_v37, %v709_v38 }
 0x2dc   :  { %v15044_v61 = vcombine.high %v621_v55, %v629_v56  ;;  %v15043_v3 = vcombine.low %v621_v55, %v629_v56 }
 0x2dd   :  { %3763 = vmatpush1.bf16.msra.mxu0 %v14913_v62  ;;  %3845 = vmatpush1.bf16.msra.mxu1 %v14915_v63  ;;  %v636_v62 = vld [vmem:[#allocation5 + $0x9a0] sm:$0xff] }
 0x2de   :  { %3764 = vmatprep.subr.bf16.mxu0 %v14930_v0  ;;  %3846 = vmatprep.subr.bf16.mxu1 %v14932_v1  ;;  %v644_v63 = vld [vmem:[#allocation5 + $0x9e0] sm:$0xff]  ;;  %v637_v0 = vld [vmem:[#allocation5 + $0x9a8] sm:$0xff] }
 0x2df   :  { %v645_v1 = vld [vmem:[#allocation5 + $0x9e8] sm:$0xff]  ;;  %v15058_v4 = vcombine.high %v636_v62, %v644_v63  ;;  %v15057_v10 = vcombine.low %v636_v62, %v644_v63 }
 0x2e0   :  { %v15060_v5 = vcombine.high %v637_v0, %v645_v1  ;;  %v15059_v11 = vcombine.low %v637_v0, %v645_v1 }
 0x2e1   :  { %3765 = vmatpush1.bf16.msra.mxu0 %v14929_v6  ;;  %3847 = vmatpush1.bf16.msra.mxu1 %v14931_v7  ;;  %v652_v6 = vld [vmem:[#allocation5 + $0xa20] sm:$0xff] }
 0x2e2   :  { %3766 = vmatprep.subr.bf16.mxu0 %v14946_v8  ;;  %3848 = vmatprep.subr.bf16.mxu1 %v14948_v9  ;;  %v660_v7 = vld [vmem:[#allocation5 + $0xa60] sm:$0xff]  ;;  %v653_v8 = vld [vmem:[#allocation5 + $0xa28] sm:$0xff] }
 0x2e3   :  { %v661_v9 = vld [vmem:[#allocation5 + $0xa68] sm:$0xff]  ;;  %v15074_v13 = vcombine.high %v652_v6, %v660_v7  ;;  %v15073_v20 = vcombine.low %v652_v6, %v660_v7 }
 0x2e4   :  { %v15076_v14 = vcombine.high %v653_v8, %v661_v9  ;;  %v15075_v21 = vcombine.low %v653_v8, %v661_v9 }
 0x2e5   :  { %3767 = vmatpush1.bf16.msra.mxu0 %v14945_v16  ;;  %3849 = vmatpush1.bf16.msra.mxu1 %v14947_v17  ;;  %v668_v16 = vld [vmem:[#allocation5 + $0xaa0] sm:$0xff] }
 0x2e6   :  { %3768 = vmatprep.subr.bf16.mxu0 %v14962_v18  ;;  %3850 = vmatprep.subr.bf16.mxu1 %v14964_v19  ;;  %v676_v17 = vld [vmem:[#allocation5 + $0xae0] sm:$0xff]  ;;  %v669_v18 = vld [vmem:[#allocation5 + $0xaa8] sm:$0xff] }
 0x2e7   :  { %v677_v19 = vld [vmem:[#allocation5 + $0xae8] sm:$0xff]  ;;  %v15090_v22 = vcombine.high %v668_v16, %v676_v17  ;;  %v15089_v29 = vcombine.low %v668_v16, %v676_v17 }
 0x2e8   :  { %v15092_v23 = vcombine.high %v669_v18, %v677_v19  ;;  %v15091_v30 = vcombine.low %v669_v18, %v677_v19 }
 0x2e9   :  { %3769 = vmatpush1.bf16.msra.mxu0 %v14961_v25  ;;  %3851 = vmatpush1.bf16.msra.mxu1 %v14963_v26  ;;  %v684_v25 = vld [vmem:[#allocation5 + $0xb20] sm:$0xff] }
 0x2ea   :  { %3770 = vmatprep.subr.bf16.mxu0 %v14978_v27  ;;  %3852 = vmatprep.subr.bf16.mxu1 %v14980_v28  ;;  %v692_v26 = vld [vmem:[#allocation5 + $0xb60] sm:$0xff]  ;;  %v685_v27 = vld [vmem:[#allocation5 + $0xb28] sm:$0xff] }
 0x2eb   :  { %v693_v28 = vld [vmem:[#allocation5 + $0xb68] sm:$0xff]  ;;  %v15106_v31 = vcombine.high %v684_v25, %v692_v26 }
 0x2ec   :  { %v15107_v44 = vcombine.low %v685_v27, %v693_v28 }
 0x2ed   :  { %3771 = vmatpush1.bf16.msra.mxu0 %v14977_v33  ;;  %3853 = vmatpush1.bf16.msra.mxu1 %v14979_v15  ;;  %v15108_v33 = vcombine.high %v685_v27, %v693_v28  ;;  %v700_v15 = vld [vmem:[#allocation5 + $0xba0] sm:$0xff] }
 0x2ee   :  { %3772 = vmatprep.subr.bf16.mxu0 %v14994_v34  ;;  %3854 = vmatprep.subr.bf16.mxu1 %v14996_v35  ;;  %v708_v34 = vld [vmem:[#allocation5 + $0xbe0] sm:$0xff] }
 0x2ef   :  { %v15122_v45 = vcombine.high %v700_v15, %v708_v34  ;;  %v15121_v52 = vcombine.low %v700_v15, %v708_v34 }
 0x2f1   :  { %3773 = vmatpush1.bf16.msra.mxu0 %v14993_v40  ;;  %3855 = vmatpush1.bf16.msra.mxu1 %v14995_v41  ;;  %v15105_v41 = vcombine.low %v684_v25, %v692_v26 }
 0x2f2   :  { %3783 = vmatprep.subr.bf16.mxu0 %v15010_v42  ;;  %3865 = vmatprep.subr.bf16.mxu1 %v15012_v43 }
 0x2f4   :  { %3775 = vmatmul.mubr.bf16.vlgmr.msra.gmra.mrb[8].mxu0 %v18368_v12  ;;  %3857 = vmatmul.mubr.bf16.vlgmr.msra.gmra.mrb[8].mxu1 %v18368_v12 }
 0x2f5   :  { %3784 = vmatpush1.bf16.msra.mxu0 %v15009_v48  ;;  %3866 = vmatpush1.bf16.msra.mxu1 %v15011_v49  ;;  %v716_v48 = vld [vmem:[#allocation5 + $0xc20] sm:$0xff] }
 0x2f6   :  { %3785 = vmatprep.subr.bf16.mxu0 %v15026_v50  ;;  %3867 = vmatprep.subr.bf16.mxu1 %v15028_v51  ;;  %v724_v49 = vld [vmem:[#allocation5 + $0xc60] sm:$0xff]  ;;  %v717_v50 = vld [vmem:[#allocation5 + $0xc28] sm:$0xff] }
 0x2f7   :  { %3815 = vmatprep.mubr.bf16.mxu0 %v18374_v53  ;;  %3897 = vmatprep.mubr.bf16.mxu1 %v18374_v53  ;;  %v725_v51 = vld [vmem:[#allocation5 + $0xc68] sm:$0xff]  ;;  %v15138_v55 = vcombine.high %v716_v48, %v724_v49  ;;  %v15137_v62 = vcombine.low %v716_v48, %v724_v49  ;;  %v828_v48 = vld [vmem:[#allocation5 + $0xfa0] sm:$0xff] }
 0x2f8   :  { %v15140_v56 = vcombine.high %v717_v50, %v725_v51  ;;  %v15139_v63 = vcombine.low %v717_v50, %v725_v51  ;;  %v836_v49 = vld [vmem:[#allocation5 + $0xfe0] sm:$0xff]  ;;  %v829_v50 = vld [vmem:[#allocation5 + $0xfa8] sm:$0xff] }
 0x2f9   :  { %3786 = vmatpush1.bf16.msra.mxu0 %v15025_v58  ;;  %3868 = vmatpush1.bf16.msra.mxu1 %v15027_v59  ;;  %v732_v58 = vld [vmem:[#allocation5 + $0xca0] sm:$0xff]  ;;  %v837_v51 = vld [vmem:[#allocation5 + $0xfe8] sm:$0xff] }
 0x2fa   :  { %3787 = vmatprep.subr.bf16.mxu0 %v15042_v60  ;;  %3869 = vmatprep.subr.bf16.mxu1 %v15044_v61  ;;  %v740_v59 = vld [vmem:[#allocation5 + $0xce0] sm:$0xff]  ;;  %v733_v60 = vld [vmem:[#allocation5 + $0xca8] sm:$0xff] }
 0x2fb   :  { %v741_v61 = vld [vmem:[#allocation5 + $0xce8] sm:$0xff]  ;;  %v15154_v0 = vcombine.high %v732_v58, %v740_v59  ;;  %v15153_v6 = vcombine.low %v732_v58, %v740_v59  ;;  %v334_v58 = vld [vmem:[#allocation5 + $0x30] sm:$0xff] }
 0x2fc   :  { %v15156_v1 = vcombine.high %v733_v60, %v741_v61  ;;  %v15155_v7 = vcombine.low %v733_v60, %v741_v61  ;;  %v342_v59 = vld [vmem:[#allocation5 + $0x70] sm:$0xff]  ;;  %v335_v60 = vld [vmem:[#allocation5 + $0x38] sm:$0xff] }
 0x2fd   :  { %3788 = vmatpush1.bf16.msra.mxu0 %v15041_v2  ;;  %3870 = vmatpush1.bf16.msra.mxu1 %v15043_v3  ;;  %v748_v2 = vld [vmem:[#allocation5 + $0xd20] sm:$0xff]  ;;  %v343_v61 = vld [vmem:[#allocation5 + $0x78] sm:$0xff] }
 0x2fe   :  { %3789 = vmatprep.subr.bf16.mxu0 %v15058_v4  ;;  %3871 = vmatprep.subr.bf16.mxu1 %v15060_v5  ;;  %v756_v3 = vld [vmem:[#allocation5 + $0xd60] sm:$0xff]  ;;  %v749_v4 = vld [vmem:[#allocation5 + $0xd28] sm:$0xff] }
 0x2ff   :  { %v757_v5 = vld [vmem:[#allocation5 + $0xd68] sm:$0xff]  ;;  %v15170_v8 = vcombine.high %v748_v2, %v756_v3  ;;  %v15169_v16 = vcombine.low %v748_v2, %v756_v3  ;;  %v350_v2 = vld [vmem:[#allocation5 + $0xb0] sm:$0xff] }
 0x300   :  { %v15172_v9 = vcombine.high %v749_v4, %v757_v5  ;;  %v15171_v17 = vcombine.low %v749_v4, %v757_v5  ;;  %v358_v3 = vld [vmem:[#allocation5 + $0xf0] sm:$0xff]  ;;  %v351_v4 = vld [vmem:[#allocation5 + $0xb8] sm:$0xff] }
 0x301   :  { %3790 = vmatpush1.bf16.msra.mxu0 %v15057_v10  ;;  %3872 = vmatpush1.bf16.msra.mxu1 %v15059_v11  ;;  %v764_v10 = vld [vmem:[#allocation5 + $0xda0] sm:$0xff]  ;;  %v359_v5 = vld [vmem:[#allocation5 + $0xf8] sm:$0xff] }
 0x302   :  { %3791 = vmatprep.subr.bf16.mxu0 %v15074_v13  ;;  %3873 = vmatprep.subr.bf16.mxu1 %v15076_v14  ;;  %v772_v11 = vld [vmem:[#allocation5 + $0xde0] sm:$0xff]  ;;  %v765_v13 = vld [vmem:[#allocation5 + $0xda8] sm:$0xff] }
 0x303   :  { %v773_v14 = vld [vmem:[#allocation5 + $0xde8] sm:$0xff]  ;;  %v15186_v18 = vcombine.high %v764_v10, %v772_v11  ;;  %v15185_v25 = vcombine.low %v764_v10, %v772_v11  ;;  %v366_v10 = vld [vmem:[#allocation5 + $0x130] sm:$0xff] }
 0x304   :  { %v15188_v19 = vcombine.high %v765_v13, %v773_v14  ;;  %v15187_v26 = vcombine.low %v765_v13, %v773_v14  ;;  %v374_v11 = vld [vmem:[#allocation5 + $0x170] sm:$0xff]  ;;  %v367_v13 = vld [vmem:[#allocation5 + $0x138] sm:$0xff] }
 0x305   :  { %3792 = vmatpush1.bf16.msra.mxu0 %v15073_v20  ;;  %3874 = vmatpush1.bf16.msra.mxu1 %v15075_v21  ;;  %v780_v20 = vld [vmem:[#allocation5 + $0xe20] sm:$0xff]  ;;  %v375_v14 = vld [vmem:[#allocation5 + $0x178] sm:$0xff] }
 0x306   :  { %3793 = vmatprep.subr.bf16.mxu0 %v15090_v22  ;;  %3875 = vmatprep.subr.bf16.mxu1 %v15092_v23  ;;  %v788_v21 = vld [vmem:[#allocation5 + $0xe60] sm:$0xff]  ;;  %v781_v22 = vld [vmem:[#allocation5 + $0xe28] sm:$0xff] }
 0x307   :  { %v18400_v32 = vpop.f32.mrb[0].mxu0  ;;  %v18402_v35 = vpop.f32.mrb[0].mxu1  ;;  %v789_v23 = vld [vmem:[#allocation5 + $0xe68] sm:$0xff]  ;;  %v15202_v27 = vcombine.high %v780_v20, %v788_v21  ;;  %v15201_v15 = vcombine.low %v780_v20, %v788_v21  ;;  %v382_v20 = vld [vmem:[#allocation5 + $0x1b0] sm:$0xff] }
 0x308   :  { %v18404_v36 = vpop.f32.mrb[1].mxu0  ;;  %v18406_v39 = vpop.f32.mrb[1].mxu1  ;;  %v15204_v28 = vcombine.high %v781_v22, %v789_v23  ;;  %v15203_v34 = vcombine.low %v781_v22, %v789_v23  ;;  %v390_v21 = vld [vmem:[#allocation5 + $0x1f0] sm:$0xff]  ;;  %v383_v22 = vld [vmem:[#allocation5 + $0x1b8] sm:$0xff] }
 0x309   :  { %v3493_v40 = vpop.f32.mrb[2].mxu0  ;;  %3794 = vmatpush1.bf16.msra.mxu0 %v15089_v29  ;;  %v3575_v42 = vpop.f32.mrb[2].mxu1  ;;  %3876 = vmatpush1.bf16.msra.mxu1 %v15091_v30  ;;  %v796_v29 = vld [vmem:[#allocation5 + $0xea0] sm:$0xff]  ;;  %v391_v23 = vld [vmem:[#allocation5 + $0x1f8] sm:$0xff] }
 0x30a   :  { %v3494_v43 = vpop.f32.mrb[3].mxu0  ;;  %3795 = vmatprep.subr.bf16.mxu0 %v15106_v31  ;;  %v3576_v46 = vpop.f32.mrb[3].mxu1  ;;  %3877 = vmatprep.subr.bf16.mxu1 %v15108_v33  ;;  %v804_v30 = vld [vmem:[#allocation5 + $0xee0] sm:$0xff]  ;;  %v797_v31 = vld [vmem:[#allocation5 + $0xea8] sm:$0xff] }
 0x30b   :  { %v805_v33 = vld [vmem:[#allocation5 + $0xee8] sm:$0xff]  ;;  %v15218_v37 = vcombine.high %v796_v29, %v804_v30  ;;  %v812_v40 = vld [vmem:[#allocation5 + $0xf20] sm:$0xff] }
 0x30c   :  { %v15220_v38 = vcombine.high %v797_v31, %v805_v33  ;;  %v813_v42 = vld [vmem:[#allocation5 + $0xf28] sm:$0xff] }
 0x30d   :  { %3796 = vmatpush1.bf16.msra.mxu0 %v15105_v41  ;;  %3878 = vmatpush1.bf16.msra.mxu1 %v15107_v44  ;;  %v820_v41 = vld [vmem:[#allocation5 + $0xf60] sm:$0xff]  ;;  %v821_v43 = vld [vmem:[#allocation5 + $0xf68] sm:$0xff]  ;;  %v15217_v44 = vcombine.low %v796_v29, %v804_v30  ;;  %v398_v29 = vld [vmem:[#allocation5 + $0x230] sm:$0xff] }
 0x30e   :  { %3797 = vmatprep.subr.bf16.mxu0 %v15122_v45  ;;  %3879 = vmatprep.subr.bf16.mxu1 %v15124_v47  ;;  %v15219_v45 = vcombine.low %v797_v31, %v805_v33  ;;  %v15234_v46 = vcombine.high %v812_v40, %v820_v41  ;;  %v15236_v47 = vcombine.high %v813_v42, %v821_v43  ;;  %v406_v30 = vld [vmem:[#allocation5 + $0x270] sm:$0xff]  ;;  %v399_v31 = vld [vmem:[#allocation5 + $0x238] sm:$0xff] }
 0x30f   :  { %v407_v33 = vld [vmem:[#allocation5 + $0x278] sm:$0xff] }
 0x311   :  { %3798 = vmatpush1.bf16.msra.mxu0 %v15121_v52  ;;  %3880 = vmatpush1.bf16.msra.mxu1 %v15123_v54  ;;  %v15233_v52 = vcombine.low %v812_v40, %v820_v41  ;;  %v15235_v54 = vcombine.low %v813_v42, %v821_v43  ;;  %v422_v40 = vld [vmem:[#allocation5 + $0x2f0] sm:$0xff]  ;;  %v415_v41 = vld [vmem:[#allocation5 + $0x2b8] sm:$0xff]  ;;  %v14821_v43 = vcombine.low %v398_v29, %v406_v30 }
 0x312   :  { %3799 = vmatprep.subr.bf16.mxu0 %v15138_v55  ;;  %3881 = vmatprep.subr.bf16.mxu1 %v15140_v56  ;;  %v15250_v55 = vcombine.high %v828_v48, %v836_v49  ;;  %v15252_v56 = vcombine.high %v829_v50, %v837_v51  ;;  %v423_v42 = vld [vmem:[#allocation5 + $0x2f8] sm:$0xff] }
 0x315   :  { %3800 = vmatpush1.bf16.msra.mxu0 %v15137_v62  ;;  %3882 = vmatpush1.bf16.msra.mxu1 %v15139_v63  ;;  %v15249_v62 = vcombine.low %v828_v48, %v836_v49  ;;  %v15251_v63 = vcombine.low %v829_v50, %v837_v51  ;;  %v438_v48 = vld [vmem:[#allocation5 + $0x370] sm:$0xff]  ;;  %v431_v49 = vld [vmem:[#allocation5 + $0x338] sm:$0xff] }
 0x316   :  { %3801 = vmatprep.subr.bf16.mxu0 %v15154_v0  ;;  %3883 = vmatprep.subr.bf16.mxu1 %v15156_v1  ;;  %v14758_v0 = vcombine.high %v334_v58, %v342_v59  ;;  %v14760_v1 = vcombine.high %v335_v60, %v343_v61  ;;  %v439_v50 = vld [vmem:[#allocation5 + $0x378] sm:$0xff] }
 0x319   :  { %3802 = vmatpush1.bf16.msra.mxu0 %v15153_v6  ;;  %3884 = vmatpush1.bf16.msra.mxu1 %v15155_v7  ;;  %v14757_v6 = vcombine.low %v334_v58, %v342_v59  ;;  %v14759_v7 = vcombine.low %v335_v60, %v343_v61  ;;  %v454_v58 = vld [vmem:[#allocation5 + $0x3f0] sm:$0xff]  ;;  %v447_v59 = vld [vmem:[#allocation5 + $0x3b8] sm:$0xff] }
 0x31a   :  { %3803 = vmatprep.subr.bf16.mxu0 %v15170_v8  ;;  %3885 = vmatprep.subr.bf16.mxu1 %v15172_v9  ;;  %v14774_v8 = vcombine.high %v350_v2, %v358_v3  ;;  %v14776_v9 = vcombine.high %v351_v4, %v359_v5  ;;  %v455_v60 = vld [vmem:[#allocation5 + $0x3f8] sm:$0xff] }
 0x31d   :  { %3804 = vmatpush1.bf16.msra.mxu0 %v15169_v16  ;;  %3886 = vmatpush1.bf16.msra.mxu1 %v15171_v17  ;;  %v14773_v16 = vcombine.low %v350_v2, %v358_v3  ;;  %v14775_v17 = vcombine.low %v351_v4, %v359_v5  ;;  %v470_v2 = vld [vmem:[#allocation5 + $0x470] sm:$0xff]  ;;  %v463_v3 = vld [vmem:[#allocation5 + $0x438] sm:$0xff] }
 0x31e   :  { %3805 = vmatprep.subr.bf16.mxu0 %v15186_v18  ;;  %3887 = vmatprep.subr.bf16.mxu1 %v15188_v19  ;;  %v14790_v18 = vcombine.high %v366_v10, %v374_v11  ;;  %v14792_v19 = vcombine.high %v367_v13, %v375_v14  ;;  %v471_v4 = vld [vmem:[#allocation5 + $0x478] sm:$0xff] }
 0x321   :  { %3806 = vmatpush1.bf16.msra.mxu0 %v15185_v25  ;;  %3888 = vmatpush1.bf16.msra.mxu1 %v15187_v26  ;;  %v14789_v25 = vcombine.low %v366_v10, %v374_v11  ;;  %v14791_v26 = vcombine.low %v367_v13, %v375_v14  ;;  %v486_v10 = vld [vmem:[#allocation5 + $0x4f0] sm:$0xff]  ;;  %v479_v11 = vld [vmem:[#allocation5 + $0x4b8] sm:$0xff] }
 0x322   :  { %3807 = vmatprep.subr.bf16.mxu0 %v15202_v27  ;;  %3889 = vmatprep.subr.bf16.mxu1 %v15204_v28  ;;  %v14806_v27 = vcombine.high %v382_v20, %v390_v21  ;;  %v14808_v28 = vcombine.high %v383_v22, %v391_v23  ;;  %v487_v13 = vld [vmem:[#allocation5 + $0x4f8] sm:$0xff] }
 0x325   :  { %3808 = vmatpush1.bf16.msra.mxu0 %v15201_v15  ;;  %3890 = vmatpush1.bf16.msra.mxu1 %v15203_v34  ;;  %v14805_v15 = vcombine.low %v382_v20, %v390_v21  ;;  %v14807_v34 = vcombine.low %v383_v22, %v391_v23  ;;  %v502_v20 = vld [vmem:[#allocation5 + $0x570] sm:$0xff]  ;;  %v495_v21 = vld [vmem:[#allocation5 + $0x538] sm:$0xff] }
 0x326   :  { %3809 = vmatprep.subr.bf16.mxu0 %v15218_v37  ;;  %3891 = vmatprep.subr.bf16.mxu1 %v15220_v38  ;;  %v14822_v37 = vcombine.high %v398_v29, %v406_v30  ;;  %v414_v38 = vld [vmem:[#allocation5 + $0x2b0] sm:$0xff]  ;;  %v503_v22 = vld [vmem:[#allocation5 + $0x578] sm:$0xff] }
 0x327   :  { %v14837_v51 = vcombine.low %v414_v38, %v422_v40  ;;  %v518_v29 = vld [vmem:[#allocation5 + $0x5f0] sm:$0xff]  ;;  %v511_v30 = vld [vmem:[#allocation5 + $0x5b8] sm:$0xff] }
 0x329   :  { %3810 = vmatpush1.bf16.msra.mxu0 %v15217_v44  ;;  %3892 = vmatpush1.bf16.msra.mxu1 %v15219_v45  ;;  %v14823_v44 = vcombine.low %v399_v31, %v407_v33  ;;  %v14838_v45 = vcombine.high %v414_v38, %v422_v40  ;;  %v534_v38 = vld [vmem:[#allocation5 + $0x670] sm:$0xff]  ;;  %v527_v40 = vld [vmem:[#allocation5 + $0x638] sm:$0xff] }
 0x32a   :  { %3811 = vmatprep.subr.bf16.mxu0 %v15234_v46  ;;  %3893 = vmatprep.subr.bf16.mxu1 %v15236_v47  ;;  %v14840_v46 = vcombine.high %v415_v41, %v423_v42  ;;  %v430_v47 = vld [vmem:[#allocation5 + $0x330] sm:$0xff] }
 0x32b   :  { %v14853_v61 = vcombine.low %v430_v47, %v438_v48 }
 0x32d   :  { %3812 = vmatpush1.bf16.msra.mxu0 %v15233_v52  ;;  %3894 = vmatpush1.bf16.msra.mxu1 %v15235_v54  ;;  %v14839_v52 = vcombine.low %v415_v41, %v423_v42  ;;  %v14854_v54 = vcombine.high %v430_v47, %v438_v48  ;;  %v535_v41 = vld [vmem:[#allocation5 + $0x678] sm:$0xff]  ;;  %v550_v47 = vld [vmem:[#allocation5 + $0x6f0] sm:$0xff] }
 0x32e   :  { %3813 = vmatprep.subr.bf16.mxu0 %v15250_v55  ;;  %3895 = vmatprep.subr.bf16.mxu1 %v15252_v56  ;;  %v14856_v55 = vcombine.high %v431_v49, %v439_v50  ;;  %v446_v56 = vld [vmem:[#allocation5 + $0x3b0] sm:$0xff]  ;;  %v543_v48 = vld [vmem:[#allocation5 + $0x6b8] sm:$0xff] }
 0x32f   :  { %v14869_v5 = vcombine.low %v446_v56, %v454_v58 }
 0x331   :  { %3814 = vmatpush1.bf16.msra.mxu0 %v15249_v62  ;;  %3896 = vmatpush1.bf16.msra.mxu1 %v15251_v63  ;;  %v14855_v62 = vcombine.low %v431_v49, %v439_v50  ;;  %v14870_v63 = vcombine.high %v446_v56, %v454_v58  ;;  %v551_v49 = vld [vmem:[#allocation5 + $0x6f8] sm:$0xff]  ;;  %v566_v56 = vld [vmem:[#allocation5 + $0x770] sm:$0xff] }
 0x332   :  { %3906 = vmatprep.subr.bf16.mxu0 %v14758_v0  ;;  %3988 = vmatprep.subr.bf16.mxu1 %v14760_v1  ;;  %v14872_v0 = vcombine.high %v447_v59, %v455_v60  ;;  %v462_v1 = vld [vmem:[#allocation5 + $0x430] sm:$0xff]  ;;  %v559_v58 = vld [vmem:[#allocation5 + $0x738] sm:$0xff] }
 0x333   :  { %v14885_v14 = vcombine.low %v462_v1, %v470_v2 }
 0x334   :  { %3816 = vmatmul.mubr.bf16.vlgmr.msra.gmra.mrb[8].mxu0 %v18382_v24  ;;  %3898 = vmatmul.mubr.bf16.vlgmr.msra.gmra.mrb[8].mxu1 %v18382_v24 }
 0x335   :  { %3907 = vmatpush1.bf16.msra.mxu0 %v14757_v6  ;;  %3989 = vmatpush1.bf16.msra.mxu1 %v14759_v7  ;;  %v14871_v6 = vcombine.low %v447_v59, %v455_v60  ;;  %v14886_v7 = vcombine.high %v462_v1, %v470_v2  ;;  %v567_v59 = vld [vmem:[#allocation5 + $0x778] sm:$0xff]  ;;  %v582_v1 = vld [vmem:[#allocation5 + $0x7f0] sm:$0xff] }
 0x336   :  { %3908 = vmatprep.subr.bf16.mxu0 %v14774_v8  ;;  %3990 = vmatprep.subr.bf16.mxu1 %v14776_v9  ;;  %v14888_v8 = vcombine.high %v463_v3, %v471_v4  ;;  %v478_v9 = vld [vmem:[#allocation5 + $0x4b0] sm:$0xff]  ;;  %v575_v2 = vld [vmem:[#allocation5 + $0x7b8] sm:$0xff] }
 0x337   :  { %3938 = vmatprep.mubr.bf16.mxu0 %v18362_v57  ;;  %4020 = vmatprep.mubr.bf16.mxu1 %v18362_v57  ;;  %v14824_v57 = vcombine.high %v399_v31, %v407_v33  ;;  %v14901_v23 = vcombine.low %v478_v9, %v486_v10  ;;  %v519_v31 = vld [vmem:[#allocation5 + $0x5f8] sm:$0xff] }
 0x339   :  { %3909 = vmatpush1.bf16.msra.mxu0 %v14773_v16  ;;  %3991 = vmatpush1.bf16.msra.mxu1 %v14775_v17  ;;  %v14887_v16 = vcombine.low %v463_v3, %v471_v4  ;;  %v14902_v17 = vcombine.high %v478_v9, %v486_v10  ;;  %v583_v3 = vld [vmem:[#allocation5 + $0x7f8] sm:$0xff]  ;;  %v598_v9 = vld [vmem:[#allocation5 + $0x870] sm:$0xff] }
 0x33a   :  { %3910 = vmatprep.subr.bf16.mxu0 %v14790_v18  ;;  %3992 = vmatprep.subr.bf16.mxu1 %v14792_v19  ;;  %v14904_v18 = vcombine.high %v479_v11, %v487_v13  ;;  %v494_v19 = vld [vmem:[#allocation5 + $0x530] sm:$0xff]  ;;  %v591_v10 = vld [vmem:[#allocation5 + $0x838] sm:$0xff] }
 0x33b   :  { %v14917_v33 = vcombine.low %v494_v19, %v502_v20 }
 0x33d   :  { %3911 = vmatpush1.bf16.msra.mxu0 %v14789_v25  ;;  %3993 = vmatpush1.bf16.msra.mxu1 %v14791_v26  ;;  %v14903_v25 = vcombine.low %v479_v11, %v487_v13  ;;  %v14918_v26 = vcombine.high %v494_v19, %v502_v20  ;;  %v599_v11 = vld [vmem:[#allocation5 + $0x878] sm:$0xff]  ;;  %v614_v19 = vld [vmem:[#allocation5 + $0x8f0] sm:$0xff] }
 0x33e   :  { %3912 = vmatprep.subr.bf16.mxu0 %v14806_v27  ;;  %3994 = vmatprep.subr.bf16.mxu1 %v14808_v28  ;;  %v14920_v27 = vcombine.high %v495_v21, %v503_v22  ;;  %v510_v28 = vld [vmem:[#allocation5 + $0x5b0] sm:$0xff]  ;;  %v607_v20 = vld [vmem:[#allocation5 + $0x8b8] sm:$0xff] }
 0x33f   :  { %v14933_v42 = vcombine.low %v510_v28, %v518_v29 }
 0x341   :  { %3913 = vmatpush1.bf16.msra.mxu0 %v14805_v15  ;;  %3995 = vmatpush1.bf16.msra.mxu1 %v14807_v34  ;;  %v14919_v15 = vcombine.low %v495_v21, %v503_v22  ;;  %v14934_v34 = vcombine.high %v510_v28, %v518_v29  ;;  %v615_v21 = vld [vmem:[#allocation5 + $0x8f8] sm:$0xff]  ;;  %v630_v28 = vld [vmem:[#allocation5 + $0x970] sm:$0xff] }
 0x342   :  { %3914 = vmatprep.subr.bf16.mxu0 %v14822_v37  ;;  %3996 = vmatprep.subr.bf16.mxu1 %v14824_v57  ;;  %v14936_v37 = vcombine.high %v511_v30, %v519_v31  ;;  %v526_v57 = vld [vmem:[#allocation5 + $0x630] sm:$0xff]  ;;  %v623_v29 = vld [vmem:[#allocation5 + $0x938] sm:$0xff] }
 0x343   :  { %v14949_v50 = vcombine.low %v526_v57, %v534_v38 }
 0x345   :  { %3915 = vmatpush1.bf16.msra.mxu0 %v14821_v43  ;;  %3997 = vmatpush1.bf16.msra.mxu1 %v14823_v44  ;;  %v14935_v43 = vcombine.low %v511_v30, %v519_v31  ;;  %v14950_v44 = vcombine.high %v526_v57, %v534_v38  ;;  %v631_v30 = vld [vmem:[#allocation5 + $0x978] sm:$0xff]  ;;  %v646_v57 = vld [vmem:[#allocation5 + $0x9f0] sm:$0xff] }
 0x346   :  { %3916 = vmatprep.subr.bf16.mxu0 %v14838_v45  ;;  %3998 = vmatprep.subr.bf16.mxu1 %v14840_v46  ;;  %v14952_v45 = vcombine.high %v527_v40, %v535_v41  ;;  %v542_v46 = vld [vmem:[#allocation5 + $0x6b0] sm:$0xff]  ;;  %v639_v38 = vld [vmem:[#allocation5 + $0x9b8] sm:$0xff] }
 0x347   :  { %v14965_v60 = vcombine.low %v542_v46, %v550_v47 }
 0x349   :  { %3917 = vmatpush1.bf16.msra.mxu0 %v14837_v51  ;;  %3999 = vmatpush1.bf16.msra.mxu1 %v14839_v52  ;;  %v14951_v51 = vcombine.low %v527_v40, %v535_v41  ;;  %v14966_v52 = vcombine.high %v542_v46, %v550_v47  ;;  %v647_v40 = vld [vmem:[#allocation5 + $0x9f8] sm:$0xff] }
 0x34a   :  { %3918 = vmatprep.subr.bf16.mxu0 %v14854_v54  ;;  %4000 = vmatprep.subr.bf16.mxu1 %v14856_v55  ;;  %v14968_v54 = vcombine.high %v543_v48, %v551_v49  ;;  %v558_v55 = vld [vmem:[#allocation5 + $0x730] sm:$0xff]  ;;  %v655_v46 = vld [vmem:[#allocation5 + $0xa38] sm:$0xff] }
 0x34b   :  { %v14981_v4 = vcombine.low %v558_v55, %v566_v56  ;;  %v663_v47 = vld [vmem:[#allocation5 + $0xa78] sm:$0xff] }
 0x34d   :  { %3919 = vmatpush1.bf16.msra.mxu0 %v14853_v61  ;;  %4001 = vmatpush1.bf16.msra.mxu1 %v14855_v62  ;;  %v14967_v61 = vcombine.low %v543_v48, %v551_v49  ;;  %v14982_v62 = vcombine.high %v558_v55, %v566_v56  ;;  %v15063_v49 = vcombine.low %v639_v38, %v647_v40  ;;  %v679_v55 = vld [vmem:[#allocation5 + $0xaf8] sm:$0xff] }
 0x34e   :  { %3920 = vmatprep.subr.bf16.mxu0 %v14870_v63  ;;  %4002 = vmatprep.subr.bf16.mxu1 %v14872_v0  ;;  %v14984_v63 = vcombine.high %v559_v58, %v567_v59  ;;  %v574_v0 = vld [vmem:[#allocation5 + $0x7b0] sm:$0xff] }
 0x34f   :  { %v14997_v13 = vcombine.low %v574_v0, %v582_v1 }
 0x351   :  { %3921 = vmatpush1.bf16.msra.mxu0 %v14869_v5  ;;  %4003 = vmatpush1.bf16.msra.mxu1 %v14871_v6  ;;  %v14983_v5 = vcombine.low %v559_v58, %v567_v59  ;;  %v14998_v6 = vcombine.high %v574_v0, %v582_v1  ;;  %v15079_v58 = vcombine.low %v655_v46, %v663_v47  ;;  %v695_v0 = vld [vmem:[#allocation5 + $0xb78] sm:$0xff] }
 0x352   :  { %3922 = vmatprep.subr.bf16.mxu0 %v14886_v7  ;;  %4004 = vmatprep.subr.bf16.mxu1 %v14888_v8  ;;  %v15000_v7 = vcombine.high %v575_v2, %v583_v3  ;;  %v590_v8 = vld [vmem:[#allocation5 + $0x830] sm:$0xff] }
 0x353   :  { %v15013_v22 = vcombine.low %v590_v8, %v598_v9 }
 0x355   :  { %3923 = vmatpush1.bf16.msra.mxu0 %v14885_v14  ;;  %4005 = vmatpush1.bf16.msra.mxu1 %v14887_v16  ;;  %v14999_v14 = vcombine.low %v575_v2, %v583_v3  ;;  %v15014_v16 = vcombine.high %v590_v8, %v598_v9 }
 0x356   :  { %3924 = vmatprep.subr.bf16.mxu0 %v14902_v17  ;;  %4006 = vmatprep.subr.bf16.mxu1 %v14904_v18  ;;  %v15016_v17 = vcombine.high %v591_v10, %v599_v11  ;;  %v606_v18 = vld [vmem:[#allocation5 + $0x8b0] sm:$0xff] }
 0x357   :  { %v15029_v31 = vcombine.low %v606_v18, %v614_v19 }
 0x359   :  { %3925 = vmatpush1.bf16.msra.mxu0 %v14901_v23  ;;  %4007 = vmatpush1.bf16.msra.mxu1 %v14903_v25  ;;  %v15015_v23 = vcombine.low %v591_v10, %v599_v11  ;;  %v15030_v25 = vcombine.high %v606_v18, %v614_v19  ;;  %v703_v10 = vld [vmem:[#allocation5 + $0xbb8] sm:$0xff] }
 0x35a   :  { %3926 = vmatprep.subr.bf16.mxu0 %v14918_v26  ;;  %4008 = vmatprep.subr.bf16.mxu1 %v14920_v27  ;;  %v15032_v26 = vcombine.high %v607_v20, %v615_v21  ;;  %v622_v27 = vld [vmem:[#allocation5 + $0x930] sm:$0xff]  ;;  %v711_v11 = vld [vmem:[#allocation5 + $0xbf8] sm:$0xff] }
 0x35b   :  { %v15045_v41 = vcombine.low %v622_v27, %v630_v28 }
 0x35d   :  { %3927 = vmatpush1.bf16.msra.mxu0 %v14917_v33  ;;  %4009 = vmatpush1.bf16.msra.mxu1 %v14919_v15  ;;  %v15031_v33 = vcombine.low %v607_v20, %v615_v21  ;;  %v15046_v15 = vcombine.high %v622_v27, %v630_v28  ;;  %v727_v27 = vld [vmem:[#allocation5 + $0xc78] sm:$0xff] }
 0x35e   :  { %3928 = vmatprep.subr.bf16.mxu0 %v14934_v34  ;;  %4010 = vmatprep.subr.bf16.mxu1 %v14936_v37  ;;  %v15048_v34 = vcombine.high %v623_v29, %v631_v30  ;;  %v638_v37 = vld [vmem:[#allocation5 + $0x9b0] sm:$0xff] }
 0x35f   :  { %v15061_v48 = vcombine.low %v638_v37, %v646_v57 }
 0x361   :  { %3929 = vmatpush1.bf16.msra.mxu0 %v14933_v42  ;;  %4011 = vmatpush1.bf16.msra.mxu1 %v14935_v43  ;;  %v15062_v42 = vcombine.high %v638_v37, %v646_v57  ;;  %v15064_v43 = vcombine.high %v639_v38, %v647_v40  ;;  %v743_v37 = vld [vmem:[#allocation5 + $0xcf8] sm:$0xff] }
 0x362   :  { %3930 = vmatprep.subr.bf16.mxu0 %v14950_v44  ;;  %4012 = vmatprep.subr.bf16.mxu1 %v14952_v45  ;;  %v654_v44 = vld [vmem:[#allocation5 + $0xa30] sm:$0xff] }
 0x363   :  { %v662_v45 = vld [vmem:[#allocation5 + $0xa70] sm:$0xff] }
 0x364   :  { %v15077_v56 = vcombine.low %v654_v44, %v662_v45 }
 0x365   :  { %3931 = vmatpush1.bf16.msra.mxu0 %v14949_v50  ;;  %4013 = vmatpush1.bf16.msra.mxu1 %v14951_v51  ;;  %v15078_v50 = vcombine.high %v654_v44, %v662_v45  ;;  %v670_v51 = vld [vmem:[#allocation5 + $0xab0] sm:$0xff]  ;;  %v759_v44 = vld [vmem:[#allocation5 + $0xd78] sm:$0xff] }
 0x366   :  { %3932 = vmatprep.subr.bf16.mxu0 %v14966_v52  ;;  %4014 = vmatprep.subr.bf16.mxu1 %v14968_v54  ;;  %v678_v52 = vld [vmem:[#allocation5 + $0xaf0] sm:$0xff]  ;;  %v671_v54 = vld [vmem:[#allocation5 + $0xab8] sm:$0xff] }
 0x367   :  { %v15094_v59 = vcombine.high %v670_v51, %v678_v52  ;;  %v15093_v1 = vcombine.low %v670_v51, %v678_v52  ;;  %v15095_v2 = vcombine.low %v671_v54, %v679_v55  ;;  %v767_v51 = vld [vmem:[#allocation5 + $0xdb8] sm:$0xff] }
 0x368   :  { %v775_v52 = vld [vmem:[#allocation5 + $0xdf8] sm:$0xff] }
 0x369   :  { %3933 = vmatpush1.bf16.msra.mxu0 %v14965_v60  ;;  %4015 = vmatpush1.bf16.msra.mxu1 %v14967_v61  ;;  %v15096_v60 = vcombine.high %v671_v54, %v679_v55  ;;  %v686_v61 = vld [vmem:[#allocation5 + $0xb30] sm:$0xff] }
 0x36a   :  { %3934 = vmatprep.subr.bf16.mxu0 %v14982_v62  ;;  %4016 = vmatprep.subr.bf16.mxu1 %v14984_v63  ;;  %v694_v62 = vld [vmem:[#allocation5 + $0xb70] sm:$0xff]  ;;  %v687_v63 = vld [vmem:[#allocation5 + $0xb38] sm:$0xff] }
 0x36b   :  { %v15110_v3 = vcombine.high %v686_v61, %v694_v62  ;;  %v15111_v19 = vcombine.low %v687_v63, %v695_v0 }
 0x36d   :  { %3935 = vmatpush1.bf16.msra.mxu0 %v14981_v4  ;;  %4017 = vmatpush1.bf16.msra.mxu1 %v14983_v5  ;;  %v15112_v5 = vcombine.high %v687_v63, %v695_v0  ;;  %v791_v63 = vld [vmem:[#allocation5 + $0xe78] sm:$0xff] }
 0x36e   :  { %3936 = vmatprep.subr.bf16.mxu0 %v14998_v6  ;;  %4018 = vmatprep.subr.bf16.mxu1 %v15000_v7  ;;  %v702_v6 = vld [vmem:[#allocation5 + $0xbb0] sm:$0xff] }
 0x36f   :  { %v710_v7 = vld [vmem:[#allocation5 + $0xbf0] sm:$0xff] }
 0x370   :  { %v15126_v20 = vcombine.high %v702_v6, %v710_v7  ;;  %v15125_v28 = vcombine.low %v702_v6, %v710_v7  ;;  %v806_v6 = vld [vmem:[#allocation5 + $0xef0] sm:$0xff] }
 0x371   :  { %3937 = vmatpush1.bf16.msra.mxu0 %v14997_v13  ;;  %4019 = vmatpush1.bf16.msra.mxu1 %v14999_v14 }
 0x372   :  { %3947 = vmatprep.subr.bf16.mxu0 %v15014_v16  ;;  %4029 = vmatprep.subr.bf16.mxu1 %v15016_v17  ;;  %v15109_v16 = vcombine.low %v686_v61, %v694_v62  ;;  %v783_v62 = vld [vmem:[#allocation5 + $0xe38] sm:$0xff] }
 0x374   :  { %3939 = vmatmul.mubr.bf16.vlgmr.msra.gmra.mrb[12].mxu0 %v18368_v12  ;;  %4021 = vmatmul.mubr.bf16.vlgmr.msra.gmra.mrb[12].mxu1 %v18368_v12  ;;  %v15047_v12 = vcombine.low %v623_v29, %v631_v30  ;;  %v15127_v29 = vcombine.low %v703_v10, %v711_v11 }
 0x375   :  { %3948 = vmatpush1.bf16.msra.mxu0 %v15013_v22  ;;  %4030 = vmatpush1.bf16.msra.mxu1 %v15015_v23  ;;  %v15128_v22 = vcombine.high %v703_v10, %v711_v11  ;;  %v718_v23 = vld [vmem:[#allocation5 + $0xc30] sm:$0xff]  ;;  %v799_v10 = vld [vmem:[#allocation5 + $0xeb8] sm:$0xff] }
 0x376   :  { %3949 = vmatprep.subr.bf16.mxu0 %v15030_v25  ;;  %4031 = vmatprep.subr.bf16.mxu1 %v15032_v26  ;;  %v726_v25 = vld [vmem:[#allocation5 + $0xc70] sm:$0xff]  ;;  %v719_v26 = vld [vmem:[#allocation5 + $0xc38] sm:$0xff] }
 0x377   :  { %3979 = vmatprep.mubr.bf16.mxu0 %v18374_v53  ;;  %4061 = vmatprep.mubr.bf16.mxu1 %v18374_v53  ;;  %v15080_v53 = vcombine.high %v655_v46, %v663_v47  ;;  %v15142_v30 = vcombine.high %v718_v23, %v726_v25  ;;  %v15141_v57 = vcombine.low %v718_v23, %v726_v25  ;;  %v807_v11 = vld [vmem:[#allocation5 + $0xef8] sm:$0xff] }
 0x378   :  { %v15143_v38 = vcombine.low %v719_v26, %v727_v27  ;;  %v815_v23 = vld [vmem:[#allocation5 + $0xf38] sm:$0xff] }
 0x379   :  { %3950 = vmatpush1.bf16.msra.mxu0 %v15029_v31  ;;  %4032 = vmatpush1.bf16.msra.mxu1 %v15031_v33  ;;  %v15144_v31 = vcombine.high %v719_v26, %v727_v27  ;;  %v734_v33 = vld [vmem:[#allocation5 + $0xcb0] sm:$0xff]  ;;  %v823_v25 = vld [vmem:[#allocation5 + $0xf78] sm:$0xff] }
 0x37a   :  { %3951 = vmatprep.subr.bf16.mxu0 %v15046_v15  ;;  %4033 = vmatprep.subr.bf16.mxu1 %v15048_v34  ;;  %v742_v15 = vld [vmem:[#allocation5 + $0xcf0] sm:$0xff]  ;;  %v735_v34 = vld [vmem:[#allocation5 + $0xcb8] sm:$0xff] }
 0x37b   :  { %v15158_v40 = vcombine.high %v734_v33, %v742_v15  ;;  %v15157_v45 = vcombine.low %v734_v33, %v742_v15  ;;  %v15159_v46 = vcombine.low %v735_v34, %v743_v37  ;;  %v18433_v26 = vld [vmem:[#allocation8] sm:$0xff] }
 0x37c   :  { %v838_v33 = vld [vmem:[#allocation5 + $0xff0] sm:$0xff] }
 0x37d   :  { %3952 = vmatpush1.bf16.msra.mxu0 %v15045_v41  ;;  %4034 = vmatpush1.bf16.msra.mxu1 %v15047_v12  ;;  %v15160_v41 = vcombine.high %v735_v34, %v743_v37  ;;  %v750_v12 = vld [vmem:[#allocation5 + $0xd30] sm:$0xff]  ;;  %v831_v37 = vld [vmem:[#allocation5 + $0xfb8] sm:$0xff] }
 0x37e   :  { %3953 = vmatprep.subr.bf16.mxu0 %v15062_v42  ;;  %4035 = vmatprep.subr.bf16.mxu1 %v15064_v43  ;;  %v758_v42 = vld [vmem:[#allocation5 + $0xd70] sm:$0xff]  ;;  %v751_v43 = vld [vmem:[#allocation5 + $0xd38] sm:$0xff] }
 0x37f   :  { %v15174_v47 = vcombine.high %v750_v12, %v758_v42  ;;  %v15173_v54 = vcombine.low %v750_v12, %v758_v42  ;;  %v15175_v55 = vcombine.low %v751_v43, %v759_v44  ;;  %v4302_v42 = vld [vmem:[#allocation10] sm:$0xff] }
 0x381   :  { %3954 = vmatpush1.bf16.msra.mxu0 %v15061_v48  ;;  %4036 = vmatpush1.bf16.msra.mxu1 %v15063_v49  ;;  %v15176_v48 = vcombine.high %v751_v43, %v759_v44  ;;  %v766_v49 = vld [vmem:[#allocation5 + $0xdb0] sm:$0xff]  ;;  %v4306_v43 = vld [vmem:[#allocation10 + $0x20] sm:$0xff] }
 0x382   :  { %3955 = vmatprep.subr.bf16.mxu0 %v15078_v50  ;;  %4037 = vmatprep.subr.bf16.mxu1 %v15080_v53  ;;  %v774_v50 = vld [vmem:[#allocation5 + $0xdf0] sm:$0xff]  ;;  %v4074_v53 = vlaneseq }
 0x383   :  { %v15189_v0 = vcombine.low %v766_v49, %v774_v50 }
 0x384   :  { %v18424_v61 = vshrl.u32 %v4074_v53, 7  ;;  %v4310_v53 = vld [vmem:[#allocation10 + $0x40] sm:$0xff] }
 0x385   :  { %3956 = vmatpush1.bf16.msra.mxu0 %v15077_v56  ;;  %4038 = vmatpush1.bf16.msra.mxu1 %v15079_v58  ;;  %v15190_v56 = vcombine.high %v766_v49, %v774_v50  ;;  %v15192_v58 = vcombine.high %v767_v51, %v775_v52 }
 0x386   :  { %3957 = vmatprep.subr.bf16.mxu0 %v15094_v59  ;;  %4039 = vmatprep.subr.bf16.mxu1 %v15096_v60  ;;  %v782_v59 = vld [vmem:[#allocation5 + $0xe30] sm:$0xff]  ;;  %v18427_v7 = vsub.s32 1, %v18424_v61 }
 0x387   :  { %v18416_v4 = vpop.f32.mrb[4].mxu0  ;;  %v18418_v8 = vpop.f32.mrb[4].mxu1  ;;  %v790_v60 = vld [vmem:[#allocation5 + $0xe70] sm:$0xff] }
 0x388   :  { %v18420_v9 = vpop.f32.mrb[5].mxu0  ;;  %v18422_v13 = vpop.f32.mrb[5].mxu1  ;;  %v4181_v34 = vrot.slane %v18433_v26, %v18427_v7 }
 0x389   :  { %v3657_v14 = vpop.f32.mrb[6].mxu0  ;;  %3958 = vmatpush1.bf16.msra.mxu0 %v15093_v1  ;;  %v3739_v17 = vpop.f32.mrb[6].mxu1  ;;  %4040 = vmatpush1.bf16.msra.mxu1 %v15095_v2  ;;  %v15191_v1 = vcombine.low %v767_v51, %v775_v52  ;;  %v15206_v2 = vcombine.high %v782_v59, %v790_v60  ;;  %v4314_v51 = vld [vmem:[#allocation10 + $0x60] sm:$0xff]  ;;  %v15257_v52 = vcombine.low %v4302_v42, %v4306_v43 }
 0x38a   :  { %v3658_v18 = vpop.f32.mrb[7].mxu0  ;;  %3959 = vmatprep.subr.bf16.mxu0 %v15110_v3  ;;  %v3740_v21 = vpop.f32.mrb[7].mxu1  ;;  %4041 = vmatprep.subr.bf16.mxu1 %v15112_v5  ;;  %v15208_v3 = vcombine.high %v783_v62, %v791_v63  ;;  %v798_v5 = vld [vmem:[#allocation5 + $0xeb0] sm:$0xff]  ;;  %v18429_v14 = vld [vmem:[#allocation7] sm:$0xff]  ;;  %v15207_v17 = vcombine.low %v783_v62, %v791_v63 }
 0x38b   :  { %v15222_v18 = vcombine.high %v798_v5, %v806_v6  ;;  %v822_v21 = vld [vmem:[#allocation5 + $0xf70] sm:$0xff]  ;;  %v15221_v27 = vcombine.low %v798_v5, %v806_v6 }
 0x38d   :  { %3960 = vmatpush1.bf16.msra.mxu0 %v15109_v16  ;;  %4042 = vmatpush1.bf16.msra.mxu1 %v15111_v19  ;;  %v15205_v16 = vcombine.low %v782_v59, %v790_v60  ;;  %v15224_v19 = vcombine.high %v799_v10, %v807_v11  ;;  %v4318_v59 = vld [vmem:[#allocation10 + $0x80] sm:$0xff] }
 0x38e   :  { %3961 = vmatprep.subr.bf16.mxu0 %v15126_v20  ;;  %4043 = vmatprep.subr.bf16.mxu1 %v15128_v22  ;;  %v814_v20 = vld [vmem:[#allocation5 + $0xf30] sm:$0xff]  ;;  %v4081_v22 = vrot.slane %v18429_v14, %v18427_v7  ;;  %v4322_v60 = vld [vmem:[#allocation10 + $0xa0] sm:$0xff] }
 0x38f   :  { %v15274_v5 = vcombine.high %v4318_v59, %v4322_v60 }
 0x390   :  { %v4155_v15 = vmul.f32 %v4081_v22, %v18404_v36  ;;  %v4338_v22 = vld [vmem:[#allocation10 + $0x120] sm:$0xff] }
 0x391   :  { %3962 = vmatpush1.bf16.msra.mxu0 %v15125_v28  ;;  %4044 = vmatpush1.bf16.msra.mxu1 %v15127_v29  ;;  %v15223_v28 = vcombine.low %v799_v10, %v807_v11  ;;  %v15238_v29 = vcombine.high %v814_v20, %v822_v21  ;;  %v4326_v10 = vld [vmem:[#allocation10 + $0xc0] sm:$0xff] }
 0x392   :  { %3963 = vmatprep.subr.bf16.mxu0 %v15142_v30  ;;  %4045 = vmatprep.subr.bf16.mxu1 %v15144_v31  ;;  %v15240_v30 = vcombine.high %v815_v23, %v823_v25  ;;  %v830_v31 = vld [vmem:[#allocation5 + $0xfb0] sm:$0xff]  ;;  %v4255_v44 = vadd.f32 %v4181_v34, %v4155_v15  ;;  %v4330_v11 = vld [vmem:[#allocation10 + $0xe0] sm:$0xff]  ;;  %v4343_v15 = vld [vmem:[#allocation10 + $0x148] sm:$0xff] }
 0x393   :  { %v15253_v36 = vcombine.low %v830_v31, %v838_v33  ;;  %v4347_v34 = vld [vmem:[#allocation10 + $0x168] sm:$0xff] }
 0x394   :  { %v4271_v50 = vmax.f32 %v4255_v44, 0.0 }
 0x395   :  { %3964 = vmatpush1.bf16.msra.mxu0 %v15141_v57  ;;  %4046 = vmatpush1.bf16.msra.mxu1 %v15143_v38  ;;  %v839_v57 = vld [vmem:[#allocation5 + $0xff8] sm:$0xff]  ;;  %v15237_v38 = vcombine.low %v814_v20, %v822_v21  ;;  %v4334_v21 = vld [vmem:[#allocation10 + $0x100] sm:$0xff] }
 0x396   :  { %3965 = vmatprep.subr.bf16.mxu0 %v15158_v40  ;;  %4047 = vmatprep.subr.bf16.mxu1 %v15160_v41  ;;  %v15239_v40 = vcombine.low %v815_v23, %v823_v25  ;;  %v15254_v41 = vcombine.high %v830_v31, %v838_v33  ;;  %v15256_v12 = vcombine.high %v831_v37, %v839_v57  ;;  %v4335_v23 = vld [vmem:[#allocation10 + $0x108] sm:$0xff]  ;;  %v4342_v31 = vld [vmem:[#allocation10 + $0x140] sm:$0xff] }
 0x397   :  { %v18438_v62 = vpack.c.bf16 %v4271_v50, %v4271_v50  ;;  %v4339_v25 = vld [vmem:[#allocation10 + $0x128] sm:$0xff]  ;;  %v4346_v33 = vld [vmem:[#allocation10 + $0x160] sm:$0xff] }
 0x398   :  { %v15297_v44 = vcombine.low %v4342_v31, %v4346_v33  ;;  %v4363_v50 = vld [vmem:[#allocation10 + $0x1e8] sm:$0xff] }
 0x399   :  { %3966 = vmatpush1.bf16.msra.mxu0 %v15157_v45  ;;  %4048 = vmatpush1.bf16.msra.mxu1 %v15159_v46  ;;  %v4303_v45 = vld [vmem:[#allocation10 + $0x8] sm:$0xff] }
 0x39a   :  { %3967 = vmatprep.subr.bf16.mxu0 %v15174_v47  ;;  %4049 = vmatprep.subr.bf16.mxu1 %v15176_v48  ;;  %v4307_v46 = vld [vmem:[#allocation10 + $0x28] sm:$0xff]  ;;  %v15255_v47 = vcombine.low %v831_v37, %v839_v57  ;;  %v15258_v48 = vcombine.high %v4302_v42, %v4306_v43  ;;  %v15289_v37 = vcombine.low %v4334_v21, %v4338_v22 }
 0x39b   :  { %v15260_v49 = vcombine.high %v4303_v45, %v4307_v46  ;;  %v15291_v57 = vcombine.low %v4335_v23, %v4339_v25  ;;  %v4351_v42 = vld [vmem:[#allocation10 + $0x188] sm:$0xff] }
 0x39c   :  { %v4355_v43 = vld [vmem:[#allocation10 + $0x1a8] sm:$0xff] }
 0x39d   :  { %3968 = vmatpush1.bf16.msra.mxu0 %v15173_v54  ;;  %4050 = vmatpush1.bf16.msra.mxu1 %v15175_v55  ;;  %v4311_v54 = vld [vmem:[#allocation10 + $0x48] sm:$0xff] }
 0x39e   :  { %3969 = vmatprep.subr.bf16.mxu0 %v15190_v56  ;;  %4051 = vmatprep.subr.bf16.mxu1 %v15192_v58  ;;  %v4315_v55 = vld [vmem:[#allocation10 + $0x68] sm:$0xff]  ;;  %v15259_v56 = vcombine.low %v4303_v45, %v4307_v46  ;;  %v15266_v58 = vcombine.high %v4310_v53, %v4314_v51  ;;  %v15299_v45 = vcombine.low %v4343_v15, %v4347_v34 }
 0x39f   :  { %v15268_v63 = vcombine.high %v4311_v54, %v4315_v55 }
 0x3a1   :  { %3970 = vmatpush1.bf16.msra.mxu0 %v15189_v0  ;;  %4052 = vmatpush1.bf16.msra.mxu1 %v15191_v1  ;;  %v4319_v0 = vld [vmem:[#allocation10 + $0x88] sm:$0xff] }
 0x3a2   :  { %3971 = vmatprep.subr.bf16.mxu0 %v15206_v2  ;;  %4053 = vmatprep.subr.bf16.mxu1 %v15208_v3  ;;  %v4323_v1 = vld [vmem:[#allocation10 + $0xa8] sm:$0xff]  ;;  %v15265_v2 = vcombine.low %v4310_v53, %v4314_v51  ;;  %v15267_v3 = vcombine.low %v4311_v54, %v4315_v55  ;;  %v15307_v51 = vcombine.low %v4351_v42, %v4355_v43  ;;  %v4366_v55 = vld [vmem:[#allocation10 + $0x200] sm:$0xff] }
 0x3a3   :  { %v15276_v6 = vcombine.high %v4319_v0, %v4323_v1 }
 0x3a5   :  { %3972 = vmatpush1.bf16.msra.mxu0 %v15205_v16  ;;  %4054 = vmatpush1.bf16.msra.mxu1 %v15207_v17  ;;  %v4327_v16 = vld [vmem:[#allocation10 + $0xc8] sm:$0xff] }
 0x3a6   :  { %3973 = vmatprep.subr.bf16.mxu0 %v15222_v18  ;;  %4055 = vmatprep.subr.bf16.mxu1 %v15224_v19  ;;  %v4331_v17 = vld [vmem:[#allocation10 + $0xe8] sm:$0xff]  ;;  %v15273_v18 = vcombine.low %v4318_v59, %v4322_v60  ;;  %v15282_v19 = vcombine.high %v4326_v10, %v4330_v11 }
 0x3a7   :  { %v15284_v20 = vcombine.high %v4327_v16, %v4331_v17  ;;  %v4371_v59 = vld [vmem:[#allocation10 + $0x228] sm:$0xff] }
 0x3a9   :  { %3974 = vmatpush1.bf16.msra.mxu0 %v15221_v27  ;;  %4056 = vmatpush1.bf16.msra.mxu1 %v15223_v28  ;;  %v15281_v27 = vcombine.low %v4326_v10, %v4330_v11  ;;  %v15283_v28 = vcombine.low %v4327_v16, %v4331_v17 }
 0x3aa   :  { %3975 = vmatprep.subr.bf16.mxu0 %v15238_v29  ;;  %4057 = vmatprep.subr.bf16.mxu1 %v15240_v30  ;;  %v15290_v29 = vcombine.high %v4334_v21, %v4338_v22  ;;  %v15292_v30 = vcombine.high %v4335_v23, %v4339_v25 }
 0x3ad   :  { %3976 = vmatpush1.bf16.msra.mxu0 %v15237_v38  ;;  %4058 = vmatpush1.bf16.msra.mxu1 %v15239_v40  ;;  %v15298_v38 = vcombine.high %v4342_v31, %v4346_v33  ;;  %v15300_v40 = vcombine.high %v4343_v15, %v4347_v34 }
 0x3ae   :  { %3977 = vmatprep.subr.bf16.mxu0 %v15254_v41  ;;  %4059 = vmatprep.subr.bf16.mxu1 %v15256_v12  ;;  %v4350_v41 = vld [vmem:[#allocation10 + $0x180] sm:$0xff] }
 0x3af   :  { %v4354_v12 = vld [vmem:[#allocation10 + $0x1a0] sm:$0xff] }
 0x3b0   :  { %v15306_v46 = vcombine.high %v4350_v41, %v4354_v12  ;;  %v15305_v53 = vcombine.low %v4350_v41, %v4354_v12  ;;  %v18445_v12 = vsub.s32 0, %v18424_v61 }
 0x3b1   :  { %3978 = vmatpush1.bf16.msra.mxu0 %v15253_v36  ;;  %4060 = vmatpush1.bf16.msra.mxu1 %v15255_v47  ;;  %v15308_v36 = vcombine.high %v4351_v42, %v4355_v43  ;;  %v4358_v47 = vld [vmem:[#allocation10 + $0x1c0] sm:$0xff] }
 0x3b2   :  { %10446 = vmatprep.subr.bf16.mxu0 %v15258_v48  ;;  %10774 = vmatprep.subr.bf16.mxu1 %v15260_v49  ;;  %v4362_v48 = vld [vmem:[#allocation10 + $0x1e0] sm:$0xff]  ;;  %v4359_v49 = vld [vmem:[#allocation10 + $0x1c8] sm:$0xff] }
 0x3b3   :  { %v15316_v54 = vcombine.high %v4359_v49, %v4363_v50  ;;  %v15313_v60 = vcombine.low %v4358_v47, %v4362_v48 }
 0x3b4   :  { %3980 = vmatmul.mubr.bf16.vlgmr.msra.gmra.mrb[12].mxu0 %v18382_v24  ;;  %4062 = vmatmul.mubr.bf16.vlgmr.msra.gmra.mrb[12].mxu1 %v18382_v24  ;;  %v15275_v24 = vcombine.low %v4319_v0, %v4323_v1 }
 0x3b5   :  { %10447 = vmatpush1.bf16.msra.mxu0 %v15257_v52  ;;  %10478 = vmatprep.mubr.bf16.mxu0 %v18438_v62  ;;  %v15314_v52 = vcombine.high %v4358_v47, %v4362_v48  ;;  %v4407_v47 = vld [vmem:[#allocation10 + $0x348] sm:$0xff] }
 0x3b6   :  { %10775 = vmatpush1.bf16.msra.mxu1 %v15259_v56  ;;  %10806 = vmatprep.mubr.bf16.mxu1 %v18438_v62  ;;  %v4370_v56 = vld [vmem:[#allocation10 + $0x220] sm:$0xff]  ;;  %v4411_v48 = vld [vmem:[#allocation10 + $0x368] sm:$0xff] }
 0x3b7   :  { %10448 = vmatprep.subr.bf16.mxu0 %v15266_v58  ;;  %10776 = vmatprep.subr.bf16.mxu1 %v15268_v63  ;;  %v4367_v58 = vld [vmem:[#allocation10 + $0x208] sm:$0xff]  ;;  %v15315_v63 = vcombine.low %v4359_v49, %v4363_v50  ;;  %v15322_v0 = vcombine.high %v4366_v55, %v4370_v56  ;;  %v15321_v10 = vcombine.low %v4366_v55, %v4370_v56  ;;  %v4418_v55 = vld [vmem:[#allocation10 + $0x3a0] sm:$0xff] }
 0x3b8   :  { %v15324_v1 = vcombine.high %v4367_v58, %v4371_v59  ;;  %v15323_v11 = vcombine.low %v4367_v58, %v4371_v59  ;;  %v4077_v50 = vrot.slane %v18429_v14, %v18445_v12  ;;  %v4415_v58 = vld [vmem:[#allocation10 + $0x388] sm:$0xff] }
 0x3b9   :  { %10449 = vmatpush1.bf16.msra.mxu0 %v15265_v2  ;;  %v4374_v2 = vld [vmem:[#allocation10 + $0x240] sm:$0xff]  ;;  %v4419_v59 = vld [vmem:[#allocation10 + $0x3a8] sm:$0xff] }
 0x3ba   :  { %10777 = vmatpush1.bf16.msra.mxu1 %v15267_v3  ;;  %10450 = vmatprep.subr.bf16.mxu0 %v15274_v5  ;;  %v4378_v3 = vld [vmem:[#allocation10 + $0x260] sm:$0xff]  ;;  %v4375_v5 = vld [vmem:[#allocation10 + $0x248] sm:$0xff] }
 0x3bb   :  { %10778 = vmatprep.subr.bf16.mxu1 %v15276_v6  ;;  %v4379_v6 = vld [vmem:[#allocation10 + $0x268] sm:$0xff]  ;;  %v15330_v16 = vcombine.high %v4374_v2, %v4378_v3  ;;  %v15329_v21 = vcombine.low %v4374_v2, %v4378_v3  ;;  %v15372_v3 = vcombine.high %v4415_v58, %v4419_v59 }
 0x3bc   :  { %v15332_v17 = vcombine.high %v4375_v5, %v4379_v6  ;;  %v15331_v22 = vcombine.low %v4375_v5, %v4379_v6  ;;  %v4422_v5 = vld [vmem:[#allocation10 + $0x3c0] sm:$0xff] }
 0x3bd   :  { %10451 = vmatpush1.bf16.msra.mxu0 %v15273_v18  ;;  %v4382_v18 = vld [vmem:[#allocation10 + $0x280] sm:$0xff] }
 0x3be   :  { %10779 = vmatpush1.bf16.msra.mxu1 %v15275_v24  ;;  %10452 = vmatprep.subr.bf16.mxu0 %v15282_v19  ;;  %v4386_v24 = vld [vmem:[#allocation10 + $0x2a0] sm:$0xff]  ;;  %v4383_v19 = vld [vmem:[#allocation10 + $0x288] sm:$0xff] }
 0x3bf   :  { %10780 = vmatprep.subr.bf16.mxu1 %v15284_v20  ;;  %v4387_v20 = vld [vmem:[#allocation10 + $0x2a8] sm:$0xff]  ;;  %v15338_v23 = vcombine.high %v4382_v18, %v4386_v24  ;;  %v15337_v31 = vcombine.low %v4382_v18, %v4386_v24  ;;  %v4426_v6 = vld [vmem:[#allocation10 + $0x3e0] sm:$0xff] }
 0x3c0   :  { %v15340_v25 = vcombine.high %v4383_v19, %v4387_v20  ;;  %v15339_v33 = vcombine.low %v4383_v19, %v4387_v20  ;;  %v15378_v19 = vcombine.high %v4422_v5, %v4426_v6 }
 0x3c1   :  { %10453 = vmatpush1.bf16.msra.mxu0 %v15281_v27  ;;  %v4390_v27 = vld [vmem:[#allocation10 + $0x2c0] sm:$0xff] }
 0x3c2   :  { %10781 = vmatpush1.bf16.msra.mxu1 %v15283_v28  ;;  %10454 = vmatprep.subr.bf16.mxu0 %v15290_v29  ;;  %v4394_v28 = vld [vmem:[#allocation10 + $0x2e0] sm:$0xff]  ;;  %v4391_v29 = vld [vmem:[#allocation10 + $0x2c8] sm:$0xff] }
 0x3c3   :  { %10782 = vmatprep.subr.bf16.mxu1 %v15292_v30  ;;  %v4395_v30 = vld [vmem:[#allocation10 + $0x2e8] sm:$0xff]  ;;  %v15346_v15 = vcombine.high %v4390_v27, %v4394_v28  ;;  %v15345_v41 = vcombine.low %v4390_v27, %v4394_v28 }
 0x3c4   :  { %v15348_v34 = vcombine.high %v4391_v29, %v4395_v30  ;;  %v15347_v42 = vcombine.low %v4391_v29, %v4395_v30  ;;  %v4435_v27 = vld [vmem:[#allocation10 + $0x428] sm:$0xff] }
 0x3c5   :  { %10455 = vmatpush1.bf16.msra.mxu0 %v15289_v37  ;;  %v4398_v37 = vld [vmem:[#allocation10 + $0x300] sm:$0xff] }
 0x3c6   :  { %10783 = vmatpush1.bf16.msra.mxu1 %v15291_v57  ;;  %10456 = vmatprep.subr.bf16.mxu0 %v15298_v38  ;;  %v4402_v57 = vld [vmem:[#allocation10 + $0x320] sm:$0xff]  ;;  %v4399_v38 = vld [vmem:[#allocation10 + $0x308] sm:$0xff] }
 0x3c7   :  { %10784 = vmatprep.subr.bf16.mxu1 %v15300_v40  ;;  %v4403_v40 = vld [vmem:[#allocation10 + $0x328] sm:$0xff]  ;;  %v15354_v43 = vcombine.high %v4398_v37, %v4402_v57  ;;  %v15353_v49 = vcombine.low %v4398_v37, %v4402_v57 }
 0x3c8   :  { %v4439_v57 = vld [vmem:[#allocation10 + $0x448] sm:$0xff] }
 0x3c9   :  { %10457 = vmatpush1.bf16.msra.mxu0 %v15297_v44  ;;  %v15356_v44 = vcombine.high %v4399_v38, %v4403_v40 }
 0x3ca   :  { %10785 = vmatpush1.bf16.msra.mxu1 %v15299_v45  ;;  %10458 = vmatprep.subr.bf16.mxu0 %v15306_v46  ;;  %v4406_v45 = vld [vmem:[#allocation10 + $0x340] sm:$0xff] }
 0x3cb   :  { %10786 = vmatprep.subr.bf16.mxu1 %v15308_v36  ;;  %v4410_v46 = vld [vmem:[#allocation10 + $0x360] sm:$0xff]  ;;  %v18448_v36 = vsub.s32 3, %v18424_v61 }
 0x3cd   :  { %10459 = vmatpush1.bf16.msra.mxu0 %v15305_v53  ;;  %v15355_v53 = vcombine.low %v4399_v38, %v4403_v40  ;;  %v4089_v56 = vrot.slane %v18429_v14, %v18448_v36  ;;  %v4443_v38 = vld [vmem:[#allocation10 + $0x468] sm:$0xff] }
 0x3ce   :  { %10787 = vmatpush1.bf16.msra.mxu1 %v15307_v51  ;;  %10460 = vmatprep.subr.bf16.mxu0 %v15314_v52  ;;  %v15362_v51 = vcombine.high %v4406_v45, %v4410_v46  ;;  %v15364_v52 = vcombine.high %v4407_v47, %v4411_v48 }
 0x3cf   :  { %10788 = vmatprep.subr.bf16.mxu1 %v15316_v54  ;;  %v4414_v54 = vld [vmem:[#allocation10 + $0x380] sm:$0xff] }
 0x3d0   :  { %v15370_v2 = vcombine.high %v4414_v54, %v4418_v55  ;;  %v15369_v18 = vcombine.low %v4414_v54, %v4418_v55  ;;  %v4458_v54 = vld [vmem:[#allocation10 + $0x4e0] sm:$0xff]  ;;  %v4455_v55 = vld [vmem:[#allocation10 + $0x4c8] sm:$0xff] }
 0x3d1   :  { %10461 = vmatpush1.bf16.msra.mxu0 %v15313_v60  ;;  %v4177_v60 = vrot.slane %v18433_v26, %v18445_v12 }
 0x3d2   :  { %10789 = vmatpush1.bf16.msra.mxu1 %v15315_v63  ;;  %10462 = vmatprep.subr.bf16.mxu0 %v15322_v0  ;;  %v15361_v63 = vcombine.low %v4406_v45, %v4410_v46  ;;  %v4154_v0 = vmul.f32 %v4077_v50, %v18400_v32  ;;  %v15371_v32 = vcombine.low %v4415_v58, %v4419_v59 }
 0x3d3   :  { %10790 = vmatprep.subr.bf16.mxu1 %v15324_v1  ;;  %v15363_v1 = vcombine.low %v4407_v47, %v4411_v48  ;;  %v15396_v46 = vcombine.high %v4439_v57, %v4443_v38  ;;  %v4447_v47 = vld [vmem:[#allocation10 + $0x488] sm:$0xff]  ;;  %v15395_v50 = vcombine.low %v4439_v57, %v4443_v38 }
 0x3d4   :  { %v4254_v24 = vadd.f32 %v4177_v60, %v4154_v0  ;;  %v4451_v48 = vld [vmem:[#allocation10 + $0x4a8] sm:$0xff]  ;;  %v4462_v0 = vld [vmem:[#allocation10 + $0x500] sm:$0xff] }
 0x3d5   :  { %10463 = vmatpush1.bf16.msra.mxu0 %v15321_v10  ;;  %v4157_v10 = vmul.f32 %v4089_v56, %v18406_v39  ;;  %v15377_v39 = vcombine.low %v4422_v5, %v4426_v6  ;;  %v4459_v56 = vld [vmem:[#allocation10 + $0x4e8] sm:$0xff]  ;;  %v15403_v59 = vcombine.low %v4447_v47, %v4451_v48 }
 0x3d6   :  { %10791 = vmatpush1.bf16.msra.mxu1 %v15323_v11  ;;  %10464 = vmatprep.subr.bf16.mxu0 %v15330_v16  ;;  %v4189_v11 = vrot.slane %v18433_v26, %v18448_v36  ;;  %v4423_v16 = vld [vmem:[#allocation10 + $0x3c8] sm:$0xff]  ;;  %v4270_v28 = vmax.f32 %v4254_v24, 0.0  ;;  %v15411_v6 = vcombine.low %v4455_v55, %v4459_v56 }
 0x3d7   :  { %10792 = vmatprep.subr.bf16.mxu1 %v15332_v17  ;;  %v4427_v17 = vld [vmem:[#allocation10 + $0x3e8] sm:$0xff] }
 0x3d8   :  { %v15380_v20 = vcombine.high %v4423_v16, %v4427_v17  ;;  %v15379_v29 = vcombine.low %v4423_v16, %v4427_v17  ;;  %v18460_v40 = vpack.c.bf16 %v4270_v28, %v4270_v28  ;;  %v4470_v16 = vld [vmem:[#allocation10 + $0x540] sm:$0xff]  ;;  %v4475_v24 = vld [vmem:[#allocation10 + $0x568] sm:$0xff] }
 0x3d9   :  { %10465 = vmatpush1.bf16.msra.mxu0 %v15329_v21  ;;  %v4430_v21 = vld [vmem:[#allocation10 + $0x400] sm:$0xff]  ;;  %v4487_v57 = vld [vmem:[#allocation10 + $0x5c8] sm:$0xff] }
 0x3da   :  { %10793 = vmatpush1.bf16.msra.mxu1 %v15331_v22  ;;  %10466 = vmatprep.subr.bf16.mxu0 %v15338_v23  ;;  %v4434_v22 = vld [vmem:[#allocation10 + $0x420] sm:$0xff]  ;;  %v4257_v23 = vadd.f32 %v4189_v11, %v4157_v10  ;;  %v4491_v38 = vld [vmem:[#allocation10 + $0x5e8] sm:$0xff] }
 0x3db   :  { %10794 = vmatprep.subr.bf16.mxu1 %v15340_v25  ;;  %v4431_v25 = vld [vmem:[#allocation10 + $0x408] sm:$0xff]  ;;  %v15386_v30 = vcombine.high %v4430_v21, %v4434_v22  ;;  %v15385_v37 = vcombine.low %v4430_v21, %v4434_v22  ;;  %v4474_v17 = vld [vmem:[#allocation10 + $0x560] sm:$0xff] }
 0x3dc   :  { %v4478_v22 = vld [vmem:[#allocation10 + $0x580] sm:$0xff] }
 0x3dd   :  { %10467 = vmatpush1.bf16.msra.mxu0 %v15337_v31  ;;  %v15388_v31 = vcombine.high %v4431_v25, %v4435_v27 }
 0x3de   :  { %10795 = vmatpush1.bf16.msra.mxu1 %v15339_v33  ;;  %10468 = vmatprep.subr.bf16.mxu0 %v15346_v15  ;;  %v4273_v33 = vmax.f32 %v4257_v23, 0.0  ;;  %v4438_v15 = vld [vmem:[#allocation10 + $0x440] sm:$0xff] }
 0x3df   :  { %10796 = vmatprep.subr.bf16.mxu1 %v15348_v34  ;;  %v4442_v34 = vld [vmem:[#allocation10 + $0x460] sm:$0xff] }
 0x3e0   :  { %v18462_v45 = vpack.c.bf16 %v4273_v33, %v4273_v33  ;;  %v4482_v23 = vld [vmem:[#allocation10 + $0x5a0] sm:$0xff] }
 0x3e1   :  { %10469 = vmatpush1.bf16.msra.mxu0 %v15345_v41  ;;  %v15387_v41 = vcombine.low %v4431_v25, %v4435_v27  ;;  %v4479_v25 = vld [vmem:[#allocation10 + $0x588] sm:$0xff]  ;;  %v4486_v33 = vld [vmem:[#allocation10 + $0x5c0] sm:$0xff] }
 0x3e2   :  { %10797 = vmatpush1.bf16.msra.mxu1 %v15347_v42  ;;  %10470 = vmatprep.subr.bf16.mxu0 %v15354_v43  ;;  %v15394_v42 = vcombine.high %v4438_v15, %v4442_v34  ;;  %v4446_v43 = vld [vmem:[#allocation10 + $0x480] sm:$0xff]  ;;  %v4483_v27 = vld [vmem:[#allocation10 + $0x5a8] sm:$0xff] }
 0x3e3   :  { %10798 = vmatprep.subr.bf16.mxu1 %v15356_v44  ;;  %v4450_v44 = vld [vmem:[#allocation10 + $0x4a0] sm:$0xff] }
 0x3e4   :  { %v15401_v58 = vcombine.low %v4446_v43, %v4450_v44 }
 0x3e5   :  { %10471 = vmatpush1.bf16.msra.mxu0 %v15353_v49  ;;  %v15393_v49 = vcombine.low %v4438_v15, %v4442_v34  ;;  %v4490_v15 = vld [vmem:[#allocation10 + $0x5e0] sm:$0xff] }
 0x3e6   :  { %10799 = vmatpush1.bf16.msra.mxu1 %v15355_v53  ;;  %10472 = vmatprep.subr.bf16.mxu0 %v15362_v51  ;;  %v15402_v53 = vcombine.high %v4446_v43, %v4450_v44  ;;  %v15404_v51 = vcombine.high %v4447_v47, %v4451_v48  ;;  %v15433_v43 = vcombine.low %v4478_v22, %v4482_v23 }
 0x3e7   :  { %10800 = vmatprep.subr.bf16.mxu1 %v15364_v52  ;;  %v4454_v52 = vld [vmem:[#allocation10 + $0x4c0] sm:$0xff]  ;;  %v15435_v47 = vcombine.low %v4479_v25, %v4483_v27  ;;  %v15442_v48 = vcombine.high %v4486_v33, %v4490_v15 }
 0x3e8   :  { %v15410_v60 = vcombine.high %v4454_v52, %v4458_v54  ;;  %v15409_v5 = vcombine.low %v4454_v52, %v4458_v54  ;;  %v4495_v52 = vld [vmem:[#allocation10 + $0x608] sm:$0xff] }
 0x3e9   :  { %10473 = vmatpush1.bf16.msra.mxu0 %v15361_v63  ;;  %v15412_v63 = vcombine.high %v4455_v55, %v4459_v56  ;;  %v4499_v54 = vld [vmem:[#allocation10 + $0x628] sm:$0xff]  ;;  %v15441_v55 = vcombine.low %v4486_v33, %v4490_v15  ;;  %v15443_v56 = vcombine.low %v4487_v57, %v4491_v38 }
 0x3ea   :  { %10801 = vmatpush1.bf16.msra.mxu1 %v15363_v1  ;;  %10474 = vmatprep.subr.bf16.mxu0 %v15370_v2  ;;  %v4466_v1 = vld [vmem:[#allocation10 + $0x520] sm:$0xff]  ;;  %v4463_v2 = vld [vmem:[#allocation10 + $0x508] sm:$0xff] }
 0x3eb   :  { %10802 = vmatprep.subr.bf16.mxu1 %v15372_v3  ;;  %v4467_v3 = vld [vmem:[#allocation10 + $0x528] sm:$0xff]  ;;  %v15418_v10 = vcombine.high %v4462_v0, %v4466_v1 }
 0x3ec   :  { %v15420_v11 = vcombine.high %v4463_v2, %v4467_v3  ;;  %v4527_v33 = vld [vmem:[#allocation10 + $0x708] sm:$0xff] }
 0x3ed   :  { %10475 = vmatpush1.bf16.msra.mxu0 %v15369_v18  ;;  %v4471_v18 = vld [vmem:[#allocation10 + $0x548] sm:$0xff] }
 0x3ee   :  { %10803 = vmatpush1.bf16.msra.mxu1 %v15371_v32  ;;  %10476 = vmatprep.subr.bf16.mxu0 %v15378_v19  ;;  %v15417_v32 = vcombine.low %v4462_v0, %v4466_v1  ;;  %v15419_v19 = vcombine.low %v4463_v2, %v4467_v3  ;;  %v15428_v21 = vcombine.high %v4471_v18, %v4475_v24  ;;  %v4503_v0 = vld [vmem:[#allocation10 + $0x648] sm:$0xff] }
 0x3ef   :  { %10804 = vmatprep.subr.bf16.mxu1 %v15380_v20  ;;  %v15426_v20 = vcombine.high %v4470_v16, %v4474_v17  ;;  %v15427_v28 = vcombine.low %v4471_v18, %v4475_v24  ;;  %v4507_v1 = vld [vmem:[#allocation10 + $0x668] sm:$0xff]  ;;  %v15451_v3 = vcombine.low %v4495_v52, %v4499_v54 }
 0x3f0   :  { %v15459_v24 = vcombine.low %v4503_v0, %v4507_v1  ;;  %v4531_v15 = vld [vmem:[#allocation10 + $0x728] sm:$0xff] }
 0x3f1   :  { %10477 = vmatpush1.bf16.msra.mxu0 %v15377_v39  ;;  %v15425_v39 = vcombine.low %v4470_v16, %v4474_v17  ;;  %v4511_v16 = vld [vmem:[#allocation10 + $0x688] sm:$0xff] }
 0x3f2   :  { %10805 = vmatpush1.bf16.msra.mxu1 %v15379_v29  ;;  %10487 = vmatprep.subr.bf16.mxu0 %v15386_v30  ;;  %v15434_v29 = vcombine.high %v4478_v22, %v4482_v23  ;;  %v4515_v17 = vld [vmem:[#allocation10 + $0x6a8] sm:$0xff] }
 0x3f3   :  { %10815 = vmatprep.subr.bf16.mxu1 %v15388_v31  ;;  %v15436_v31 = vcombine.high %v4479_v25, %v4483_v27  ;;  %v4519_v22 = vld [vmem:[#allocation10 + $0x6c8] sm:$0xff]  ;;  %v15467_v27 = vcombine.low %v4511_v16, %v4515_v17 }
 0x3f4   :  { %10479 = vmatmul.mubr.bf16.vlgmr.msra.gmra.mrb[16].mxu0 %v18460_v40  ;;  %v4523_v23 = vld [vmem:[#allocation10 + $0x6e8] sm:$0xff] }
 0x3f5   :  { %10807 = vmatmul.mubr.bf16.vlgmr.msra.gmra.mrb[16].mxu1 %v18460_v40  ;;  %10488 = vmatpush1.bf16.msra.mxu0 %v15385_v37 }
 0x3f6   :  { %10519 = vmatprep.mubr.bf16.mxu0 %v18462_v45  ;;  %10816 = vmatpush1.bf16.msra.mxu1 %v15387_v41 }
 0x3f7   :  { %10847 = vmatprep.mubr.bf16.mxu1 %v18462_v45  ;;  %10489 = vmatprep.subr.bf16.mxu0 %v15394_v42 }
 0x3f8   :  { %10817 = vmatprep.subr.bf16.mxu1 %v15396_v46 }
 0x3f9   :  { %10490 = vmatpush1.bf16.msra.mxu0 %v15393_v49 }
 0x3fa   :  { %10818 = vmatpush1.bf16.msra.mxu1 %v15395_v50  ;;  %10491 = vmatprep.subr.bf16.mxu0 %v15402_v53  ;;  %v15444_v50 = vcombine.high %v4487_v57, %v4491_v38  ;;  %v4494_v53 = vld [vmem:[#allocation10 + $0x600] sm:$0xff]  ;;  %v18477_v38 = vsub.s32 2, %v18424_v61 }
 0x3fb   :  { %10819 = vmatprep.subr.bf16.mxu1 %v15404_v51  ;;  %v4498_v51 = vld [vmem:[#allocation10 + $0x620] sm:$0xff] }
 0x3fc   :  { %v15449_v2 = vcombine.low %v4494_v53, %v4498_v51 }
 0x3fd   :  { %10492 = vmatpush1.bf16.msra.mxu0 %v15401_v58  ;;  %v15450_v58 = vcombine.high %v4494_v53, %v4498_v51  ;;  %v4085_v51 = vrot.slane %v18429_v14, %v18477_v38 }
 0x3fe   :  { %10820 = vmatpush1.bf16.msra.mxu1 %v15403_v59  ;;  %10493 = vmatprep.subr.bf16.mxu0 %v15410_v60  ;;  %v15452_v59 = vcombine.high %v4495_v52, %v4499_v54  ;;  %v4502_v60 = vld [vmem:[#allocation10 + $0x640] sm:$0xff]  ;;  %v15483_v52 = vcombine.low %v4527_v33, %v4531_v15 }
 0x3ff   :  { %10821 = vmatprep.subr.bf16.mxu1 %v15412_v63  ;;  %v4506_v63 = vld [vmem:[#allocation10 + $0x660] sm:$0xff] }
 0x400   :  { %v15457_v18 = vcombine.low %v4502_v60, %v4506_v63 }
 0x401   :  { %10494 = vmatpush1.bf16.msra.mxu0 %v15409_v5  ;;  %v15458_v5 = vcombine.high %v4502_v60, %v4506_v63  ;;  %v4543_v60 = vld [vmem:[#allocation10 + $0x788] sm:$0xff] }
 0x402   :  { %10822 = vmatpush1.bf16.msra.mxu1 %v15411_v6  ;;  %10495 = vmatprep.subr.bf16.mxu0 %v15418_v10  ;;  %v15460_v6 = vcombine.high %v4503_v0, %v4507_v1  ;;  %v4510_v10 = vld [vmem:[#allocation10 + $0x680] sm:$0xff]  ;;  %v4547_v63 = vld [vmem:[#allocation10 + $0x7a8] sm:$0xff]  ;;  %v4185_v0 = vrot.slane %v18433_v26, %v18477_v38 }
 0x403   :  { %10823 = vmatprep.subr.bf16.mxu1 %v15420_v11  ;;  %v4514_v11 = vld [vmem:[#allocation10 + $0x6a0] sm:$0xff] }
 0x404   :  { %v15465_v25 = vcombine.low %v4510_v10, %v4514_v11 }
 0x405   :  { %10496 = vmatpush1.bf16.msra.mxu0 %v15417_v32  ;;  %v15466_v32 = vcombine.high %v4510_v10, %v4514_v11  ;;  %v4550_v10 = vld [vmem:[#allocation10 + $0x7c0] sm:$0xff] }
 0x406   :  { %10824 = vmatpush1.bf16.msra.mxu1 %v15419_v19  ;;  %10497 = vmatprep.subr.bf16.mxu0 %v15426_v20  ;;  %v15468_v19 = vcombine.high %v4511_v16, %v4515_v17  ;;  %v4518_v20 = vld [vmem:[#allocation10 + $0x6c0] sm:$0xff]  ;;  %v4551_v17 = vld [vmem:[#allocation10 + $0x7c8] sm:$0xff] }
 0x407   :  { %v18468_v30 = vpop.f32.mrb[8].mxu0  ;;  %10825 = vmatprep.subr.bf16.mxu1 %v15428_v21  ;;  %v18470_v34 = vpop.f32.mrb[8].mxu1  ;;  %v4522_v21 = vld [vmem:[#allocation10 + $0x6e0] sm:$0xff] }
 0x408   :  { %v18472_v37 = vpop.f32.mrb[9].mxu0  ;;  %v18474_v41 = vpop.f32.mrb[9].mxu1  ;;  %v15473_v57 = vcombine.low %v4518_v20, %v4522_v21  ;;  %v4554_v11 = vld [vmem:[#allocation10 + $0x7e0] sm:$0xff] }
 0x409   :  { %v3821_v42 = vpop.f32.mrb[10].mxu0  ;;  %10498 = vmatpush1.bf16.msra.mxu0 %v15425_v39  ;;  %v3903_v44 = vpop.f32.mrb[10].mxu1  ;;  %v15474_v39 = vcombine.high %v4518_v20, %v4522_v21  ;;  %v4558_v21 = vld [vmem:[#allocation10 + $0x800] sm:$0xff] }
 0x40a   :  { %10826 = vmatpush1.bf16.msra.mxu1 %v15427_v28  ;;  %v3822_v46 = vpop.f32.mrb[11].mxu0  ;;  %10499 = vmatprep.subr.bf16.mxu0 %v15434_v29  ;;  %v3904_v49 = vpop.f32.mrb[11].mxu1  ;;  %v15476_v28 = vcombine.high %v4519_v22, %v4523_v23  ;;  %v4526_v29 = vld [vmem:[#allocation10 + $0x700] sm:$0xff]  ;;  %v15475_v42 = vcombine.low %v4519_v22, %v4523_v23  ;;  %v15484_v44 = vcombine.high %v4527_v33, %v4531_v15 }
 0x40b   :  { %10827 = vmatprep.subr.bf16.mxu1 %v15436_v31  ;;  %v4530_v31 = vld [vmem:[#allocation10 + $0x720] sm:$0xff]  ;;  %v4535_v49 = vld [vmem:[#allocation10 + $0x748] sm:$0xff] }
 0x40c   :  { %v4534_v46 = vld [vmem:[#allocation10 + $0x740] sm:$0xff]  ;;  %v15481_v53 = vcombine.low %v4526_v29, %v4530_v31 }
 0x40d   :  { %10500 = vmatpush1.bf16.msra.mxu0 %v15433_v43  ;;  %v15482_v43 = vcombine.high %v4526_v29, %v4530_v31  ;;  %v4562_v22 = vld [vmem:[#allocation10 + $0x820] sm:$0xff] }
 0x40e   :  { %10828 = vmatpush1.bf16.msra.mxu1 %v15435_v47  ;;  %10501 = vmatprep.subr.bf16.mxu0 %v15442_v48  ;;  %v4538_v47 = vld [vmem:[#allocation10 + $0x760] sm:$0xff]  ;;  %v18480_v48 = vsub.s32 5, %v18424_v61 }
 0x40f   :  { %10829 = vmatprep.subr.bf16.mxu1 %v15444_v50  ;;  %v4539_v50 = vld [vmem:[#allocation10 + $0x768] sm:$0xff]  ;;  %v15490_v54 = vcombine.high %v4534_v46, %v4538_v47  ;;  %v15489_v1 = vcombine.low %v4534_v46, %v4538_v47  ;;  %v4566_v33 = vld [vmem:[#allocation10 + $0x840] sm:$0xff] }
 0x410   :  { %v4570_v15 = vld [vmem:[#allocation10 + $0x860] sm:$0xff] }
 0x411   :  { %10502 = vmatpush1.bf16.msra.mxu0 %v15441_v55  ;;  %v15492_v55 = vcombine.high %v4535_v49, %v4539_v50  ;;  %v15522_v47 = vcombine.high %v4566_v33, %v4570_v15 }
 0x412   :  { %10830 = vmatpush1.bf16.msra.mxu1 %v15443_v56  ;;  %10503 = vmatprep.subr.bf16.mxu0 %v15450_v58  ;;  %v4542_v56 = vld [vmem:[#allocation10 + $0x780] sm:$0xff] }
 0x413   :  { %10831 = vmatprep.subr.bf16.mxu1 %v15452_v59  ;;  %v4546_v58 = vld [vmem:[#allocation10 + $0x7a0] sm:$0xff]  ;;  %v4097_v59 = vrot.slane %v18429_v14, %v18480_v48  ;;  %v4197_v14 = vrot.slane %v18433_v26, %v18480_v48 }
 0x415   :  { %10504 = vmatpush1.bf16.msra.mxu0 %v15449_v2  ;;  %v4156_v2 = vmul.f32 %v4085_v51, %v18402_v35  ;;  %v4159_v16 = vmul.f32 %v4097_v59, %v18420_v9  ;;  %v15499_v35 = vcombine.low %v4543_v60, %v4547_v63  ;;  %v15505_v9 = vcombine.low %v4550_v10, %v4554_v11 }
 0x416   :  { %10832 = vmatpush1.bf16.msra.mxu1 %v15451_v3  ;;  %10505 = vmatprep.subr.bf16.mxu0 %v15458_v5  ;;  %v15491_v3 = vcombine.low %v4535_v49, %v4539_v50  ;;  %v15498_v5 = vcombine.high %v4542_v56, %v4546_v58  ;;  %v4574_v49 = vld [vmem:[#allocation10 + $0x880] sm:$0xff] }
 0x417   :  { %10833 = vmatprep.subr.bf16.mxu1 %v15460_v6  ;;  %v15500_v6 = vcombine.high %v4543_v60, %v4547_v63  ;;  %v4259_v23 = vadd.f32 %v4197_v14, %v4159_v16  ;;  %v4578_v50 = vld [vmem:[#allocation10 + $0x8a0] sm:$0xff]  ;;  %v4591_v16 = vld [vmem:[#allocation10 + $0x908] sm:$0xff] }
 0x418   :  { %v4582_v60 = vld [vmem:[#allocation10 + $0x8c0] sm:$0xff]  ;;  %v4595_v14 = vld [vmem:[#allocation10 + $0x928] sm:$0xff] }
 0x419   :  { %10506 = vmatpush1.bf16.msra.mxu0 %v15457_v18  ;;  %v4555_v18 = vld [vmem:[#allocation10 + $0x7e8] sm:$0xff]  ;;  %v4275_v31 = vmax.f32 %v4259_v23, 0.0  ;;  %v4586_v63 = vld [vmem:[#allocation10 + $0x8e0] sm:$0xff]  ;;  %v15547_v23 = vcombine.low %v4591_v16, %v4595_v14 }
 0x41a   :  { %10834 = vmatpush1.bf16.msra.mxu1 %v15459_v24  ;;  %10507 = vmatprep.subr.bf16.mxu0 %v15466_v32  ;;  %v15497_v24 = vcombine.low %v4542_v56, %v4546_v58  ;;  %v4256_v32 = vadd.f32 %v4185_v0, %v4156_v2  ;;  %v15508_v20 = vcombine.high %v4551_v17, %v4555_v18  ;;  %v4583_v0 = vld [vmem:[#allocation10 + $0x8c8] sm:$0xff] }
 0x41b   :  { %10835 = vmatprep.subr.bf16.mxu1 %v15468_v19  ;;  %v15506_v19 = vcombine.high %v4550_v10, %v4554_v11  ;;  %v15507_v26 = vcombine.low %v4551_v17, %v4555_v18  ;;  %v15530_v58 = vcombine.high %v4574_v49, %v4578_v50  ;;  %v15529_v2 = vcombine.low %v4574_v49, %v4578_v50  ;;  %v4590_v10 = vld [vmem:[#allocation10 + $0x900] sm:$0xff] }
 0x41c   :  { %v4594_v11 = vld [vmem:[#allocation10 + $0x920] sm:$0xff]  ;;  %v15537_v17 = vcombine.low %v4582_v60, %v4586_v63 }
 0x41d   :  { %10508 = vmatpush1.bf16.msra.mxu0 %v15465_v25  ;;  %v4559_v25 = vld [vmem:[#allocation10 + $0x808] sm:$0xff] }
 0x41e   :  { %10836 = vmatpush1.bf16.msra.mxu1 %v15467_v27  ;;  %10509 = vmatprep.subr.bf16.mxu0 %v15474_v39  ;;  %v4563_v27 = vld [vmem:[#allocation10 + $0x828] sm:$0xff]  ;;  %v4272_v39 = vmax.f32 %v4256_v32, 0.0  ;;  %v15548_v32 = vcombine.high %v4591_v16, %v4595_v14  ;;  %v4638_v16 = vld [vmem:[#allocation10 + $0xa80] sm:$0xff] }
 0x41f   :  { %10837 = vmatprep.subr.bf16.mxu1 %v15476_v28  ;;  %v15514_v28 = vcombine.high %v4558_v21, %v4562_v22  ;;  %v15516_v29 = vcombine.high %v4559_v25, %v4563_v27  ;;  %v15515_v46 = vcombine.low %v4559_v25, %v4563_v27  ;;  %v4642_v14 = vld [vmem:[#allocation10 + $0xaa0] sm:$0xff] }
 0x421   :  { %10510 = vmatpush1.bf16.msra.mxu0 %v15473_v57  ;;  %v15513_v57 = vcombine.low %v4558_v21, %v4562_v22  ;;  %v4603_v21 = vld [vmem:[#allocation10 + $0x968] sm:$0xff]  ;;  %v15545_v22 = vcombine.low %v4590_v10, %v4594_v11 }
 0x422   :  { %10838 = vmatpush1.bf16.msra.mxu1 %v15475_v42  ;;  %10511 = vmatprep.subr.bf16.mxu0 %v15482_v43  ;;  %v4567_v42 = vld [vmem:[#allocation10 + $0x848] sm:$0xff] }
 0x423   :  { %10839 = vmatprep.subr.bf16.mxu1 %v15484_v44  ;;  %v4571_v43 = vld [vmem:[#allocation10 + $0x868] sm:$0xff]  ;;  %v18492_v44 = vpack.c.bf16 %v4272_v39, %v4272_v39  ;;  %v4610_v39 = vld [vmem:[#allocation10 + $0x9a0] sm:$0xff] }
 0x424   :  { %v15524_v51 = vcombine.high %v4567_v42, %v4571_v43  ;;  %v15523_v56 = vcombine.low %v4567_v42, %v4571_v43  ;;  %v4618_v42 = vld [vmem:[#allocation10 + $0x9e0] sm:$0xff]  ;;  %v4615_v43 = vld [vmem:[#allocation10 + $0x9c8] sm:$0xff] }
 0x425   :  { %10512 = vmatpush1.bf16.msra.mxu0 %v15481_v53  ;;  %v18494_v53 = vpack.c.bf16 %v4275_v31, %v4275_v31 }
 0x426   :  { %10840 = vmatpush1.bf16.msra.mxu1 %v15483_v52  ;;  %10513 = vmatprep.subr.bf16.mxu0 %v15490_v54  ;;  %v4575_v52 = vld [vmem:[#allocation10 + $0x888] sm:$0xff] }
 0x427   :  { %10841 = vmatprep.subr.bf16.mxu1 %v15492_v55  ;;  %v4579_v54 = vld [vmem:[#allocation10 + $0x8a8] sm:$0xff]  ;;  %v15521_v55 = vcombine.low %v4566_v33, %v4570_v15 }
 0x428   :  { %v15532_v59 = vcombine.high %v4575_v52, %v4579_v54 }
 0x429   :  { %10514 = vmatpush1.bf16.msra.mxu0 %v15489_v1  ;;  %v4587_v1 = vld [vmem:[#allocation10 + $0x8e8] sm:$0xff] }
 0x42a   :  { %10842 = vmatpush1.bf16.msra.mxu1 %v15491_v3  ;;  %10515 = vmatprep.subr.bf16.mxu0 %v15498_v5  ;;  %v15531_v3 = vcombine.low %v4575_v52, %v4579_v54  ;;  %v15538_v5 = vcombine.high %v4582_v60, %v4586_v63  ;;  %v15539_v18 = vcombine.low %v4583_v0, %v4587_v1  ;;  %v4622_v52 = vld [vmem:[#allocation10 + $0xa00] sm:$0xff] }
 0x42b   :  { %10843 = vmatprep.subr.bf16.mxu1 %v15500_v6  ;;  %v15540_v6 = vcombine.high %v4583_v0, %v4587_v1  ;;  %v4626_v54 = vld [vmem:[#allocation10 + $0xa20] sm:$0xff] }
 0x42c   :  { %v15578_v60 = vcombine.high %v4622_v52, %v4626_v54  ;;  %v4630_v0 = vld [vmem:[#allocation10 + $0xa40] sm:$0xff] }
 0x42d   :  { %10516 = vmatpush1.bf16.msra.mxu0 %v15497_v24  ;;  %v15546_v24 = vcombine.high %v4590_v10, %v4594_v11  ;;  %v4634_v1 = vld [vmem:[#allocation10 + $0xa60] sm:$0xff] }
 0x42e   :  { %10844 = vmatpush1.bf16.msra.mxu1 %v15499_v35  ;;  %10517 = vmatprep.subr.bf16.mxu0 %v15506_v19  ;;  %v4598_v35 = vld [vmem:[#allocation10 + $0x940] sm:$0xff]  ;;  %v15586_v10 = vcombine.high %v4630_v0, %v4634_v1 }
 0x42f   :  { %10845 = vmatprep.subr.bf16.mxu1 %v15508_v20  ;;  %v4602_v19 = vld [vmem:[#allocation10 + $0x960] sm:$0xff]  ;;  %v4599_v20 = vld [vmem:[#allocation10 + $0x948] sm:$0xff] }
 0x430   :  { %v15554_v25 = vcombine.high %v4598_v35, %v4602_v19  ;;  %v15556_v27 = vcombine.high %v4599_v20, %v4603_v21  ;;  %v15555_v31 = vcombine.low %v4599_v20, %v4603_v21  ;;  %v4646_v20 = vld [vmem:[#allocation10 + $0xac0] sm:$0xff] }
 0x431   :  { %10518 = vmatpush1.bf16.msra.mxu0 %v15505_v9  ;;  %v4606_v9 = vld [vmem:[#allocation10 + $0x980] sm:$0xff] }
 0x432   :  { %10846 = vmatpush1.bf16.msra.mxu1 %v15507_v26  ;;  %10528 = vmatprep.subr.bf16.mxu0 %v15514_v28  ;;  %v4607_v26 = vld [vmem:[#allocation10 + $0x988] sm:$0xff]  ;;  %v15562_v33 = vcombine.high %v4606_v9, %v4610_v39  ;;  %v4650_v21 = vld [vmem:[#allocation10 + $0xae0] sm:$0xff] }
 0x433   :  { %10856 = vmatprep.subr.bf16.mxu1 %v15516_v29  ;;  %v4611_v28 = vld [vmem:[#allocation10 + $0x9a8] sm:$0xff]  ;;  %v15553_v29 = vcombine.low %v4598_v35, %v4602_v19  ;;  %v15594_v35 = vcombine.high %v4638_v16, %v4642_v14 }
 0x434   :  { %10520 = vmatmul.mubr.bf16.vlgmr.msra.gmra.mrb[16].mxu0 %v18492_v44  ;;  %v15564_v15 = vcombine.high %v4607_v26, %v4611_v28  ;;  %v15563_v49 = vcombine.low %v4607_v26, %v4611_v28  ;;  %v4654_v26 = vld [vmem:[#allocation10 + $0xb00] sm:$0xff] }
 0x435   :  { %10848 = vmatmul.mubr.bf16.vlgmr.msra.gmra.mrb[16].mxu1 %v18492_v44  ;;  %10529 = vmatpush1.bf16.msra.mxu0 %v15513_v57  ;;  %v4614_v57 = vld [vmem:[#allocation10 + $0x9c0] sm:$0xff] }
 0x436   :  { %10560 = vmatprep.mubr.bf16.mxu0 %v18494_v53  ;;  %10857 = vmatpush1.bf16.msra.mxu1 %v15515_v46  ;;  %v4619_v46 = vld [vmem:[#allocation10 + $0x9e8] sm:$0xff]  ;;  %v15570_v50 = vcombine.high %v4614_v57, %v4618_v42  ;;  %v4658_v28 = vld [vmem:[#allocation10 + $0xb20] sm:$0xff] }
 0x437   :  { %10888 = vmatprep.mubr.bf16.mxu1 %v18494_v53  ;;  %10530 = vmatprep.subr.bf16.mxu0 %v15522_v47  ;;  %v15561_v47 = vcombine.low %v4606_v9, %v4610_v39  ;;  %v15602_v9 = vcombine.high %v4646_v20, %v4650_v21 }
 0x438   :  { %10858 = vmatprep.subr.bf16.mxu1 %v15524_v51  ;;  %v15572_v51 = vcombine.high %v4615_v43, %v4619_v46 }
 0x439   :  { %10531 = vmatpush1.bf16.msra.mxu0 %v15521_v55  ;;  %v4623_v55 = vld [vmem:[#allocation10 + $0xa08] sm:$0xff] }
 0x43a   :  { %10859 = vmatpush1.bf16.msra.mxu1 %v15523_v56  ;;  %10532 = vmatprep.subr.bf16.mxu0 %v15530_v58  ;;  %v4627_v56 = vld [vmem:[#allocation10 + $0xa28] sm:$0xff]  ;;  %v15569_v58 = vcombine.low %v4614_v57, %v4618_v42  ;;  %v15610_v42 = vcombine.high %v4654_v26, %v4658_v28 }
 0x43b   :  { %10860 = vmatprep.subr.bf16.mxu1 %v15532_v59  ;;  %v15571_v59 = vcombine.low %v4615_v43, %v4619_v46  ;;  %v15580_v63 = vcombine.high %v4623_v55, %v4627_v56  ;;  %v4662_v46 = vld [vmem:[#allocation10 + $0xb40] sm:$0xff] }
 0x43d   :  { %10533 = vmatpush1.bf16.msra.mxu0 %v15529_v2  ;;  %v4631_v2 = vld [vmem:[#allocation10 + $0xa48] sm:$0xff] }
 0x43e   :  { %10861 = vmatpush1.bf16.msra.mxu1 %v15531_v3  ;;  %10534 = vmatprep.subr.bf16.mxu0 %v15538_v5  ;;  %v4635_v3 = vld [vmem:[#allocation10 + $0xa68] sm:$0xff]  ;;  %v15577_v5 = vcombine.low %v4622_v52, %v4626_v54  ;;  %v15609_v52 = vcombine.low %v4654_v26, %v4658_v28  ;;  %v18506_v54 = vld [vmem:[#allocation7] sm:$0xff] }
 0x43f   :  { %10862 = vmatprep.subr.bf16.mxu1 %v15540_v6  ;;  %v15579_v6 = vcombine.low %v4623_v55, %v4627_v56  ;;  %v15588_v11 = vcombine.high %v4631_v2, %v4635_v3  ;;  %v4691_v26 = vld [vmem:[#allocation10 + $0xc28] sm:$0xff] }
 0x441   :  { %10535 = vmatpush1.bf16.msra.mxu0 %v15537_v17  ;;  %v4639_v17 = vld [vmem:[#allocation10 + $0xa88] sm:$0xff] }
 0x442   :  { %10863 = vmatpush1.bf16.msra.mxu1 %v15539_v18  ;;  %10536 = vmatprep.subr.bf16.mxu0 %v15546_v24  ;;  %v4643_v18 = vld [vmem:[#allocation10 + $0xaa8] sm:$0xff]  ;;  %v15585_v24 = vcombine.low %v4630_v0, %v4634_v1 }
 0x443   :  { %10864 = vmatprep.subr.bf16.mxu1 %v15548_v32  ;;  %v15587_v32 = vcombine.low %v4631_v2, %v4635_v3  ;;  %v15596_v19 = vcombine.high %v4639_v17, %v4643_v18  ;;  %v4671_v1 = vld [vmem:[#allocation10 + $0xb88] sm:$0xff]  ;;  %v18512_v3 = vld [vmem:[#allocation8] sm:$0xff] }
 0x444   :  { %v4675_v2 = vld [vmem:[#allocation10 + $0xba8] sm:$0xff] }
 0x445   :  { %10537 = vmatpush1.bf16.msra.mxu0 %v15545_v22  ;;  %v4647_v22 = vld [vmem:[#allocation10 + $0xac8] sm:$0xff] }
 0x446   :  { %10865 = vmatpush1.bf16.msra.mxu1 %v15547_v23  ;;  %10538 = vmatprep.subr.bf16.mxu0 %v15554_v25  ;;  %v4651_v23 = vld [vmem:[#allocation10 + $0xae8] sm:$0xff]  ;;  %v15593_v25 = vcombine.low %v4638_v16, %v4642_v14  ;;  %v15628_v14 = vcombine.high %v4671_v1, %v4675_v2 }
 0x447   :  { %10866 = vmatprep.subr.bf16.mxu1 %v15556_v27  ;;  %v15595_v27 = vcombine.low %v4639_v17, %v4643_v18  ;;  %v15604_v39 = vcombine.high %v4647_v22, %v4651_v23  ;;  %v15603_v57 = vcombine.low %v4647_v22, %v4651_v23  ;;  %v4678_v17 = vld [vmem:[#allocation10 + $0xbc0] sm:$0xff] }
 0x448   :  { %v4682_v18 = vld [vmem:[#allocation10 + $0xbe0] sm:$0xff] }
 0x449   :  { %10539 = vmatpush1.bf16.msra.mxu0 %v15553_v29  ;;  %v4655_v29 = vld [vmem:[#allocation10 + $0xb08] sm:$0xff]  ;;  %v15634_v22 = vcombine.high %v4678_v17, %v4682_v18 }
 0x44a   :  { %10867 = vmatpush1.bf16.msra.mxu1 %v15555_v31  ;;  %10540 = vmatprep.subr.bf16.mxu0 %v15562_v33  ;;  %v4659_v31 = vld [vmem:[#allocation10 + $0xb28] sm:$0xff]  ;;  %v15601_v33 = vcombine.low %v4646_v20, %v4650_v21 }
 0x44b   :  { %10868 = vmatprep.subr.bf16.mxu1 %v15564_v15  ;;  %v18501_v15 = vsub.s32 4, %v18424_v61  ;;  %v15612_v43 = vcombine.high %v4655_v29, %v4659_v31  ;;  %v15611_v56 = vcombine.low %v4655_v29, %v4659_v31 }
 0x44d   :  { %10541 = vmatpush1.bf16.msra.mxu0 %v15561_v47  ;;  %v4666_v47 = vld [vmem:[#allocation10 + $0xb60] sm:$0xff]  ;;  %v4093_v55 = vrot.slane %v18506_v54, %v18501_v15 }
 0x44e   :  { %10869 = vmatpush1.bf16.msra.mxu1 %v15563_v49  ;;  %10542 = vmatprep.subr.bf16.mxu0 %v15570_v50  ;;  %v18504_v49 = vsub.s32 7, %v18424_v61  ;;  %v4663_v50 = vld [vmem:[#allocation10 + $0xb48] sm:$0xff] }
 0x44f   :  { %10870 = vmatprep.subr.bf16.mxu1 %v15572_v51  ;;  %v4667_v51 = vld [vmem:[#allocation10 + $0xb68] sm:$0xff] }
 0x450   :  { %v4105_v0 = vrot.slane %v18506_v54, %v18504_v49 }
 0x451   :  { %10543 = vmatpush1.bf16.msra.mxu0 %v15569_v58  ;;  %v15618_v58 = vcombine.high %v4662_v46, %v4666_v47 }
 0x452   :  { %10871 = vmatpush1.bf16.msra.mxu1 %v15571_v59  ;;  %10544 = vmatprep.subr.bf16.mxu0 %v15578_v60  ;;  %v15620_v59 = vcombine.high %v4663_v50, %v4667_v51  ;;  %v4670_v60 = vld [vmem:[#allocation10 + $0xb80] sm:$0xff] }
 0x453   :  { %10872 = vmatprep.subr.bf16.mxu1 %v15580_v63  ;;  %v4674_v63 = vld [vmem:[#allocation10 + $0xba0] sm:$0xff] }
 0x454   :  { %v15626_v16 = vcombine.high %v4670_v60, %v4674_v63  ;;  %v15625_v20 = vcombine.low %v4670_v60, %v4674_v63  ;;  %v4703_v63 = vld [vmem:[#allocation10 + $0xc88] sm:$0xff] }
 0x455   :  { %10545 = vmatpush1.bf16.msra.mxu0 %v15577_v5  ;;  %v4193_v5 = vrot.slane %v18512_v3, %v18501_v15 }
 0x456   :  { %10873 = vmatpush1.bf16.msra.mxu1 %v15579_v6  ;;  %10546 = vmatprep.subr.bf16.mxu0 %v15586_v10  ;;  %v15617_v6 = vcombine.low %v4662_v46, %v4666_v47  ;;  %v4158_v10 = vmul.f32 %v4093_v55, %v18416_v4  ;;  %v15627_v4 = vcombine.low %v4671_v1, %v4675_v2  ;;  %v4695_v47 = vld [vmem:[#allocation10 + $0xc48] sm:$0xff] }
 0x457   :  { %10874 = vmatprep.subr.bf16.mxu1 %v15588_v11  ;;  %v15619_v11 = vcombine.low %v4663_v50, %v4667_v51  ;;  %v4699_v50 = vld [vmem:[#allocation10 + $0xc68] sm:$0xff] }
 0x458   :  { %v4258_v21 = vadd.f32 %v4193_v5, %v4158_v10  ;;  %v15652_v60 = vcombine.high %v4695_v47, %v4699_v50  ;;  %v15651_v2 = vcombine.low %v4695_v47, %v4699_v50  ;;  %v4710_v10 = vld [vmem:[#allocation10 + $0xcc0] sm:$0xff] }
 0x459   :  { %10547 = vmatpush1.bf16.msra.mxu0 %v15585_v24  ;;  %v4161_v24 = vmul.f32 %v4105_v0, %v18422_v13  ;;  %v15633_v13 = vcombine.low %v4678_v17, %v4682_v18  ;;  %v4707_v0 = vld [vmem:[#allocation10 + $0xca8] sm:$0xff] }
 0x45a   :  { %10875 = vmatpush1.bf16.msra.mxu1 %v15587_v32  ;;  %10548 = vmatprep.subr.bf16.mxu0 %v15594_v35  ;;  %v4205_v32 = vrot.slane %v18512_v3, %v18504_v49  ;;  %v4679_v35 = vld [vmem:[#allocation10 + $0xbc8] sm:$0xff]  ;;  %v4274_v28 = vmax.f32 %v4258_v21, 0.0  ;;  %v15659_v18 = vcombine.low %v4703_v63, %v4707_v0 }
 0x45b   :  { %10876 = vmatprep.subr.bf16.mxu1 %v15596_v19  ;;  %v4683_v19 = vld [vmem:[#allocation10 + $0xbe8] sm:$0xff] }
 0x45c   :  { %v15636_v23 = vcombine.high %v4679_v35, %v4683_v19  ;;  %v15635_v29 = vcombine.low %v4679_v35, %v4683_v19  ;;  %v18520_v51 = vpack.c.bf16 %v4274_v28, %v4274_v28  ;;  %v4718_v35 = vld [vmem:[#allocation10 + $0xd00] sm:$0xff]  ;;  %v4723_v21 = vld [vmem:[#allocation10 + $0xd28] sm:$0xff] }
 0x45d   :  { %10549 = vmatpush1.bf16.msra.mxu0 %v15593_v25  ;;  %v4686_v25 = vld [vmem:[#allocation10 + $0xc00] sm:$0xff] }
 0x45e   :  { %10877 = vmatpush1.bf16.msra.mxu1 %v15595_v27  ;;  %10550 = vmatprep.subr.bf16.mxu0 %v15602_v9  ;;  %v4690_v27 = vld [vmem:[#allocation10 + $0xc20] sm:$0xff]  ;;  %v4261_v9 = vadd.f32 %v4205_v32, %v4161_v24 }
 0x45f   :  { %10878 = vmatprep.subr.bf16.mxu1 %v15604_v39  ;;  %v4687_v39 = vld [vmem:[#allocation10 + $0xc08] sm:$0xff]  ;;  %v15642_v31 = vcombine.high %v4686_v25, %v4690_v27  ;;  %v15641_v46 = vcombine.low %v4686_v25, %v4690_v27  ;;  %v4722_v19 = vld [vmem:[#allocation10 + $0xd20] sm:$0xff] }
 0x460   :  { %v4726_v27 = vld [vmem:[#allocation10 + $0xd40] sm:$0xff] }
 0x461   :  { %10551 = vmatpush1.bf16.msra.mxu0 %v15601_v33  ;;  %v15644_v33 = vcombine.high %v4687_v39, %v4691_v26 }
 0x462   :  { %10879 = vmatpush1.bf16.msra.mxu1 %v15603_v57  ;;  %10552 = vmatprep.subr.bf16.mxu0 %v15610_v42  ;;  %v4277_v57 = vmax.f32 %v4261_v9, 0.0  ;;  %v4694_v42 = vld [vmem:[#allocation10 + $0xc40] sm:$0xff] }
 0x463   :  { %10880 = vmatprep.subr.bf16.mxu1 %v15612_v43  ;;  %v4698_v43 = vld [vmem:[#allocation10 + $0xc60] sm:$0xff] }
 0x464   :  { %v15650_v55 = vcombine.high %v4694_v42, %v4698_v43  ;;  %v15649_v1 = vcombine.low %v4694_v42, %v4698_v43  ;;  %v4730_v9 = vld [vmem:[#allocation10 + $0xd60] sm:$0xff]  ;;  %v4735_v42 = vld [vmem:[#allocation10 + $0xd88] sm:$0xff] }
 0x465   :  { %10553 = vmatpush1.bf16.msra.mxu0 %v15609_v52  ;;  %v15643_v52 = vcombine.low %v4687_v39, %v4691_v26  ;;  %v4727_v39 = vld [vmem:[#allocation10 + $0xd48] sm:$0xff] }
 0x466   :  { %10881 = vmatpush1.bf16.msra.mxu1 %v15611_v56  ;;  %10554 = vmatprep.subr.bf16.mxu0 %v15618_v58  ;;  %v4702_v56 = vld [vmem:[#allocation10 + $0xc80] sm:$0xff]  ;;  %v4731_v26 = vld [vmem:[#allocation10 + $0xd68] sm:$0xff] }
 0x467   :  { %10882 = vmatprep.subr.bf16.mxu1 %v15620_v59  ;;  %v4706_v58 = vld [vmem:[#allocation10 + $0xca0] sm:$0xff]  ;;  %v18522_v59 = vpack.c.bf16 %v4277_v57, %v4277_v57  ;;  %v4739_v43 = vld [vmem:[#allocation10 + $0xda8] sm:$0xff]  ;;  %v15683_v47 = vcombine.low %v4727_v39, %v4731_v26 }
 0x468   :  { %v15658_v5 = vcombine.high %v4702_v56, %v4706_v58  ;;  %v15657_v17 = vcombine.low %v4702_v56, %v4706_v58  ;;  %v4738_v57 = vld [vmem:[#allocation10 + $0xda0] sm:$0xff] }
 0x469   :  { %10555 = vmatpush1.bf16.msra.mxu0 %v15617_v6  ;;  %v15660_v6 = vcombine.high %v4703_v63, %v4707_v0  ;;  %v4742_v56 = vld [vmem:[#allocation10 + $0xdc0] sm:$0xff]  ;;  %v4743_v0 = vld [vmem:[#allocation10 + $0xdc8] sm:$0xff] }
 0x46a   :  { %10883 = vmatpush1.bf16.msra.mxu1 %v15619_v11  ;;  %10556 = vmatprep.subr.bf16.mxu0 %v15626_v16  ;;  %v4714_v11 = vld [vmem:[#allocation10 + $0xce0] sm:$0xff]  ;;  %v4711_v16 = vld [vmem:[#allocation10 + $0xcc8] sm:$0xff] }
 0x46b   :  { %10884 = vmatprep.subr.bf16.mxu1 %v15628_v14  ;;  %v4715_v14 = vld [vmem:[#allocation10 + $0xce8] sm:$0xff]  ;;  %v15666_v24 = vcombine.high %v4710_v10, %v4714_v11  ;;  %v4746_v58 = vld [vmem:[#allocation10 + $0xde0] sm:$0xff] }
 0x46c   :  { %v15668_v32 = vcombine.high %v4711_v16, %v4715_v14 }
 0x46d   :  { %10557 = vmatpush1.bf16.msra.mxu0 %v15625_v20  ;;  %v4719_v20 = vld [vmem:[#allocation10 + $0xd08] sm:$0xff] }
 0x46e   :  { %10885 = vmatpush1.bf16.msra.mxu1 %v15627_v4  ;;  %10558 = vmatprep.subr.bf16.mxu0 %v15634_v22  ;;  %v15665_v4 = vcombine.low %v4710_v10, %v4714_v11  ;;  %v15667_v22 = vcombine.low %v4711_v16, %v4715_v14  ;;  %v15676_v25 = vcombine.high %v4719_v20, %v4723_v21 }
 0x46f   :  { %10886 = vmatprep.subr.bf16.mxu1 %v15636_v23  ;;  %v15674_v23 = vcombine.high %v4718_v35, %v4722_v19  ;;  %v15675_v28 = vcombine.low %v4719_v20, %v4723_v21  ;;  %v15691_v16 = vcombine.low %v4735_v42, %v4739_v43  ;;  %v15698_v14 = vcombine.high %v4742_v56, %v4746_v58 }
 0x470   :  { %v15697_v20 = vcombine.low %v4742_v56, %v4746_v58  ;;  %v4775_v56 = vld [vmem:[#allocation10 + $0xec8] sm:$0xff] }
 0x471   :  { %10559 = vmatpush1.bf16.msra.mxu0 %v15633_v13  ;;  %v15673_v13 = vcombine.low %v4718_v35, %v4722_v19  ;;  %v4751_v35 = vld [vmem:[#allocation10 + $0xe08] sm:$0xff] }
 0x472   :  { %10887 = vmatpush1.bf16.msra.mxu1 %v15635_v29  ;;  %10569 = vmatprep.subr.bf16.mxu0 %v15642_v31  ;;  %v15682_v29 = vcombine.high %v4726_v27, %v4730_v9  ;;  %v15684_v31 = vcombine.high %v4727_v39, %v4731_v26  ;;  %v4755_v19 = vld [vmem:[#allocation10 + $0xe28] sm:$0xff] }
 0x473   :  { %10897 = vmatprep.subr.bf16.mxu1 %v15644_v33  ;;  %v4734_v33 = vld [vmem:[#allocation10 + $0xd80] sm:$0xff]  ;;  %v15707_v26 = vcombine.low %v4751_v35, %v4755_v19  ;;  %v4779_v58 = vld [vmem:[#allocation10 + $0xee8] sm:$0xff] }
 0x474   :  { %10561 = vmatmul.mubr.bf16.vlgmr.msra.gmra.mrb[16].mxu0 %v18520_v51  ;;  %v15690_v50 = vcombine.high %v4734_v33, %v4738_v57 }
 0x475   :  { %10889 = vmatmul.mubr.bf16.vlgmr.msra.gmra.mrb[16].mxu1 %v18520_v51  ;;  %10570 = vmatpush1.bf16.msra.mxu0 %v15641_v46  ;;  %v15681_v46 = vcombine.low %v4726_v27, %v4730_v9  ;;  %v4759_v27 = vld [vmem:[#allocation10 + $0xe48] sm:$0xff] }
 0x476   :  { %10601 = vmatprep.mubr.bf16.mxu0 %v18522_v59  ;;  %10898 = vmatpush1.bf16.msra.mxu1 %v15643_v52  ;;  %v4763_v9 = vld [vmem:[#allocation10 + $0xe68] sm:$0xff] }
 0x477   :  { %10929 = vmatprep.mubr.bf16.mxu1 %v18522_v59  ;;  %10571 = vmatprep.subr.bf16.mxu0 %v15650_v55  ;;  %v15692_v55 = vcombine.high %v4735_v42, %v4739_v43  ;;  %v15715_v43 = vcombine.low %v4759_v27, %v4763_v9 }
 0x478   :  { %10899 = vmatprep.subr.bf16.mxu1 %v15652_v60 }
 0x479   :  { %10572 = vmatpush1.bf16.msra.mxu0 %v15649_v1  ;;  %v4747_v1 = vld [vmem:[#allocation10 + $0xde8] sm:$0xff] }
 0x47a   :  { %10900 = vmatpush1.bf16.msra.mxu1 %v15651_v2  ;;  %10573 = vmatprep.subr.bf16.mxu0 %v15658_v5  ;;  %v15699_v21 = vcombine.low %v4743_v0, %v4747_v1 }
 0x47b   :  { %10901 = vmatprep.subr.bf16.mxu1 %v15660_v6  ;;  %v15689_v6 = vcombine.low %v4734_v33, %v4738_v57  ;;  %v4767_v33 = vld [vmem:[#allocation10 + $0xe88] sm:$0xff] }
 0x47c   :  { %v4771_v57 = vld [vmem:[#allocation10 + $0xea8] sm:$0xff] }
 0x47d   :  { %10574 = vmatpush1.bf16.msra.mxu0 %v15657_v17 }
 0x47e   :  { %10902 = vmatpush1.bf16.msra.mxu1 %v15659_v18  ;;  %10575 = vmatprep.subr.bf16.mxu0 %v15666_v24  ;;  %v15700_v18 = vcombine.high %v4743_v0, %v4747_v1  ;;  %v4750_v24 = vld [vmem:[#allocation10 + $0xe00] sm:$0xff]  ;;  %v15723_v1 = vcombine.low %v4767_v33, %v4771_v57 }
 0x47f   :  { %10903 = vmatprep.subr.bf16.mxu1 %v15668_v32  ;;  %v4754_v32 = vld [vmem:[#allocation10 + $0xe20] sm:$0xff] }
 0x480   :  { %v15705_v39 = vcombine.low %v4750_v24, %v4754_v32 }
 0x481   :  { %10576 = vmatpush1.bf16.msra.mxu0 %v15665_v4  ;;  %v15706_v4 = vcombine.high %v4750_v24, %v4754_v32  ;;  %v15731_v24 = vcombine.low %v4775_v56, %v4779_v58 }
 0x482   :  { %10904 = vmatpush1.bf16.msra.mxu1 %v15667_v22  ;;  %10577 = vmatprep.subr.bf16.mxu0 %v15674_v23  ;;  %v15708_v22 = vcombine.high %v4751_v35, %v4755_v19  ;;  %v4758_v23 = vld [vmem:[#allocation10 + $0xe40] sm:$0xff] }
 0x483   :  { %10905 = vmatprep.subr.bf16.mxu1 %v15676_v25  ;;  %v4762_v25 = vld [vmem:[#allocation10 + $0xe60] sm:$0xff] }
 0x484   :  { %v15713_v42 = vcombine.low %v4758_v23, %v4762_v25  ;;  %v4790_v19 = vld [vmem:[#allocation10 + $0xf40] sm:$0xff] }
 0x485   :  { %10578 = vmatpush1.bf16.msra.mxu0 %v15673_v13  ;;  %v15714_v13 = vcombine.high %v4758_v23, %v4762_v25 }
 0x486   :  { %10906 = vmatpush1.bf16.msra.mxu1 %v15675_v28  ;;  %10579 = vmatprep.subr.bf16.mxu0 %v15682_v29  ;;  %v15716_v28 = vcombine.high %v4759_v27, %v4763_v9  ;;  %v4766_v29 = vld [vmem:[#allocation10 + $0xe80] sm:$0xff] }
 0x487   :  { %v18528_v52 = vpop.f32.mrb[12].mxu0  ;;  %10907 = vmatprep.subr.bf16.mxu1 %v15684_v31  ;;  %v18530_v60 = vpop.f32.mrb[12].mxu1  ;;  %v4770_v31 = vld [vmem:[#allocation10 + $0xea0] sm:$0xff] }
 0x488   :  { %v18532_v63 = vpop.f32.mrb[13].mxu0  ;;  %v18534_v2 = vpop.f32.mrb[13].mxu1  ;;  %v15721_v0 = vcombine.low %v4766_v29, %v4770_v31 }
 0x489   :  { %v3985_v5 = vpop.f32.mrb[14].mxu0  ;;  %10580 = vmatpush1.bf16.msra.mxu0 %v15681_v46  ;;  %v4067_v10 = vpop.f32.mrb[14].mxu1  ;;  %v15722_v46 = vcombine.high %v4766_v29, %v4770_v31  ;;  %v4803_v29 = vld [vmem:[#allocation10 + $0xfa8] sm:$0xff] }
 0x48a   :  { %10908 = vmatpush1.bf16.msra.mxu1 %v15683_v47  ;;  %v3986_v11 = vpop.f32.mrb[15].mxu0  ;;  %10581 = vmatprep.subr.bf16.mxu0 %v15690_v50  ;;  %v4068_v17 = vpop.f32.mrb[15].mxu1  ;;  %v15724_v47 = vcombine.high %v4767_v33, %v4771_v57  ;;  %v4774_v50 = vld [vmem:[#allocation10 + $0xec0] sm:$0xff]  ;;  %v18547_v33 = vld [vmem:[#allocation8 + $0x8] sm:$0xff] }
 0x48b   :  { %10909 = vmatprep.subr.bf16.mxu1 %v15692_v55  ;;  %v4778_v55 = vld [vmem:[#allocation10 + $0xee0] sm:$0xff] }
 0x48c   :  { %v15730_v5 = vcombine.high %v4774_v50, %v4778_v55  ;;  %v4782_v10 = vld [vmem:[#allocation10 + $0xf00] sm:$0xff]  ;;  %v15729_v17 = vcombine.low %v4774_v50, %v4778_v55 }
 0x48d   :  { %10582 = vmatpush1.bf16.msra.mxu0 %v15689_v6  ;;  %v15732_v6 = vcombine.high %v4775_v56, %v4779_v58  ;;  %v4786_v11 = vld [vmem:[#allocation10 + $0xf20] sm:$0xff]  ;;  %v4213_v56 = vrot.slane %v18547_v33, %v18427_v7  ;;  %v4811_v58 = vld [vmem:[#allocation10 + $0xfe8] sm:$0xff] }
 0x48e   :  { %10910 = vmatpush1.bf16.msra.mxu1 %v15691_v16  ;;  %10583 = vmatprep.subr.bf16.mxu0 %v15698_v14  ;;  %v4783_v16 = vld [vmem:[#allocation10 + $0xf08] sm:$0xff]  ;;  %v15738_v32 = vcombine.high %v4782_v10, %v4786_v11  ;;  %v15737_v23 = vcombine.low %v4782_v10, %v4786_v11  ;;  %v4810_v50 = vld [vmem:[#allocation10 + $0xfe0] sm:$0xff] }
 0x48f   :  { %10911 = vmatprep.subr.bf16.mxu1 %v15700_v18  ;;  %v4787_v14 = vld [vmem:[#allocation10 + $0xf28] sm:$0xff]  ;;  %v18537_v18 = vsub.s32 6, %v18424_v61  ;;  %v4814_v10 = vld [vmem:[#allocation10 + $0x1000] sm:$0xff] }
 0x490   :  { %v15740_v35 = vcombine.high %v4783_v16, %v4787_v14  ;;  %v15739_v61 = vcombine.low %v4783_v16, %v4787_v14  ;;  %v4818_v11 = vld [vmem:[#allocation10 + $0x1020] sm:$0xff]  ;;  %v4815_v14 = vld [vmem:[#allocation10 + $0x1008] sm:$0xff] }
 0x491   :  { %10584 = vmatpush1.bf16.msra.mxu0 %v15697_v20  ;;  %v4794_v20 = vld [vmem:[#allocation10 + $0xf60] sm:$0xff]  ;;  %v4101_v25 = vrot.slane %v18506_v54, %v18537_v18  ;;  %v4201_v31 = vrot.slane %v18512_v3, %v18537_v18  ;;  %v4807_v3 = vld [vmem:[#allocation10 + $0xfc8] sm:$0xff] }
 0x492   :  { %10912 = vmatpush1.bf16.msra.mxu1 %v15699_v21  ;;  %10585 = vmatprep.subr.bf16.mxu0 %v15706_v4  ;;  %v4791_v21 = vld [vmem:[#allocation10 + $0xf48] sm:$0xff]  ;;  %v15746_v27 = vcombine.high %v4790_v19, %v4794_v20  ;;  %v15745_v54 = vcombine.low %v4790_v19, %v4794_v20 }
 0x493   :  { %10913 = vmatprep.subr.bf16.mxu1 %v15708_v22  ;;  %v4795_v4 = vld [vmem:[#allocation10 + $0xf68] sm:$0xff]  ;;  %v4160_v57 = vmul.f32 %v4101_v25, %v18418_v8 }
 0x494   :  { %v18539_v22 = vld [vmem:[#allocation7 + $0x8] sm:$0xff]  ;;  %v15748_v9 = vcombine.high %v4791_v21, %v4795_v4 }
 0x495   :  { %10586 = vmatpush1.bf16.msra.mxu0 %v15705_v39  ;;  %v4798_v39 = vld [vmem:[#allocation10 + $0xf80] sm:$0xff]  ;;  %v4823_v25 = vld [vmem:[#allocation10 + $0x1048] sm:$0xff] }
 0x496   :  { %10914 = vmatpush1.bf16.msra.mxu1 %v15707_v26  ;;  %10587 = vmatprep.subr.bf16.mxu0 %v15714_v13  ;;  %v4802_v26 = vld [vmem:[#allocation10 + $0xfa0] sm:$0xff]  ;;  %v4113_v13 = vrot.slane %v18539_v22, %v18427_v7 }
 0x497   :  { %10915 = vmatprep.subr.bf16.mxu1 %v15716_v28  ;;  %v4799_v28 = vld [vmem:[#allocation10 + $0xf88] sm:$0xff] }
 0x498   :  { %v4163_v55 = vmul.f32 %v4113_v13, %v18472_v37  ;;  %v15755_v8 = vcombine.low %v4799_v28, %v4803_v29  ;;  %v4834_v13 = vld [vmem:[#allocation10 + $0x10a0] sm:$0xff] }
 0x499   :  { %10588 = vmatpush1.bf16.msra.mxu0 %v15713_v42  ;;  %v15747_v42 = vcombine.low %v4791_v21, %v4795_v4  ;;  %v4822_v21 = vld [vmem:[#allocation10 + $0x1040] sm:$0xff] }
 0x49a   :  { %10916 = vmatpush1.bf16.msra.mxu1 %v15715_v43  ;;  %10589 = vmatprep.subr.bf16.mxu0 %v15722_v46  ;;  %v15754_v43 = vcombine.high %v4798_v39, %v4802_v26  ;;  %v15756_v46 = vcombine.high %v4799_v28, %v4803_v29  ;;  %v4263_v16 = vadd.f32 %v4213_v56, %v4163_v55  ;;  %v4826_v4 = vld [vmem:[#allocation10 + $0x1060] sm:$0xff]  ;;  %v4839_v55 = vld [vmem:[#allocation10 + $0x10c8] sm:$0xff] }
 0x49b   :  { %10917 = vmatprep.subr.bf16.mxu1 %v15724_v47  ;;  %v4806_v47 = vld [vmem:[#allocation10 + $0xfc0] sm:$0xff]  ;;  %v4843_v56 = vld [vmem:[#allocation10 + $0x10e8] sm:$0xff] }
 0x49c   :  { %v15761_v37 = vcombine.low %v4806_v47, %v4810_v50  ;;  %v4279_v20 = vmax.f32 %v4263_v16, 0.0  ;;  %v15795_v16 = vcombine.low %v4839_v55, %v4843_v56 }
 0x49d   :  { %10590 = vmatpush1.bf16.msra.mxu0 %v15721_v0  ;;  %v15753_v0 = vcombine.low %v4798_v39, %v4802_v26  ;;  %v15778_v39 = vcombine.high %v4822_v21, %v4826_v4  ;;  %v4830_v26 = vld [vmem:[#allocation10 + $0x1080] sm:$0xff] }
 0x49e   :  { %10918 = vmatpush1.bf16.msra.mxu1 %v15723_v1  ;;  %10591 = vmatprep.subr.bf16.mxu0 %v15730_v5  ;;  %v4260_v1 = vadd.f32 %v4201_v31, %v4160_v57  ;;  %v15762_v5 = vcombine.high %v4806_v47, %v4810_v50  ;;  %v18555_v28 = vpack.c.bf16 %v4279_v20, %v4279_v20  ;;  %v4831_v31 = vld [vmem:[#allocation10 + $0x1088] sm:$0xff]  ;;  %v4838_v47 = vld [vmem:[#allocation10 + $0x10c0] sm:$0xff] }
 0x49f   :  { %10919 = vmatprep.subr.bf16.mxu1 %v15732_v6  ;;  %v15764_v6 = vcombine.high %v4807_v3, %v4811_v58  ;;  %v15777_v57 = vcombine.low %v4822_v21, %v4826_v4  ;;  %v4842_v50 = vld [vmem:[#allocation10 + $0x10e0] sm:$0xff] }
 0x4a1   :  { %10592 = vmatpush1.bf16.msra.mxu0 %v15729_v17  ;;  %v4819_v17 = vld [vmem:[#allocation10 + $0x1028] sm:$0xff] }
 0x4a2   :  { %10920 = vmatpush1.bf16.msra.mxu1 %v15731_v24  ;;  %10593 = vmatprep.subr.bf16.mxu0 %v15738_v32  ;;  %v4276_v24 = vmax.f32 %v4260_v1, 0.0  ;;  %v15763_v32 = vcombine.low %v4807_v3, %v4811_v58  ;;  %v15772_v19 = vcombine.high %v4815_v14, %v4819_v17  ;;  %v15785_v3 = vcombine.low %v4830_v26, %v4834_v13 }
 0x4a3   :  { %10921 = vmatprep.subr.bf16.mxu1 %v15740_v35  ;;  %v15770_v35 = vcombine.high %v4814_v10, %v4818_v11  ;;  %v15796_v1 = vcombine.high %v4839_v55, %v4843_v56  ;;  %v4878_v55 = vld [vmem:[#allocation10 + $0x1200] sm:$0xff] }
 0x4a4   :  { %v4882_v56 = vld [vmem:[#allocation10 + $0x1220] sm:$0xff] }
 0x4a5   :  { %10594 = vmatpush1.bf16.msra.mxu0 %v15737_v23  ;;  %v15769_v23 = vcombine.low %v4814_v10, %v4818_v11  ;;  %v4851_v10 = vld [vmem:[#allocation10 + $0x1128] sm:$0xff]  ;;  %v15793_v11 = vcombine.low %v4838_v47, %v4842_v50 }
 0x4a6   :  { %10922 = vmatpush1.bf16.msra.mxu1 %v15739_v61  ;;  %10595 = vmatprep.subr.bf16.mxu0 %v15746_v27  ;;  %v4827_v61 = vld [vmem:[#allocation10 + $0x1068] sm:$0xff]  ;;  %v18553_v27 = vpack.c.bf16 %v4276_v24, %v4276_v24  ;;  %v4858_v24 = vld [vmem:[#allocation10 + $0x1160] sm:$0xff] }
 0x4a7   :  { %10923 = vmatprep.subr.bf16.mxu1 %v15748_v9  ;;  %v15771_v9 = vcombine.low %v4815_v14, %v4819_v17  ;;  %v15780_v29 = vcombine.high %v4823_v25, %v4827_v61 }
 0x4a9   :  { %10596 = vmatpush1.bf16.msra.mxu0 %v15745_v54  ;;  %v4835_v54 = vld [vmem:[#allocation10 + $0x10a8] sm:$0xff] }
 0x4aa   :  { %10924 = vmatpush1.bf16.msra.mxu1 %v15747_v42  ;;  %10597 = vmatprep.subr.bf16.mxu0 %v15754_v43  ;;  %v15779_v42 = vcombine.low %v4823_v25, %v4827_v61  ;;  %v15786_v43 = vcombine.high %v4830_v26, %v4834_v13  ;;  %v15787_v58 = vcombine.low %v4831_v31, %v4835_v54  ;;  %v4866_v25 = vld [vmem:[#allocation10 + $0x11a0] sm:$0xff]  ;;  %v4863_v61 = vld [vmem:[#allocation10 + $0x1188] sm:$0xff] }
 0x4ab   :  { %10925 = vmatprep.subr.bf16.mxu1 %v15756_v46  ;;  %v15788_v46 = vcombine.high %v4831_v31, %v4835_v54  ;;  %v4870_v31 = vld [vmem:[#allocation10 + $0x11c0] sm:$0xff] }
 0x4ac   :  { %v4874_v54 = vld [vmem:[#allocation10 + $0x11e0] sm:$0xff] }
 0x4ad   :  { %10598 = vmatpush1.bf16.msra.mxu0 %v15753_v0  ;;  %v15794_v0 = vcombine.high %v4838_v47, %v4842_v50  ;;  %v15826_v47 = vcombine.high %v4870_v31, %v4874_v54 }
 0x4ae   :  { %10926 = vmatpush1.bf16.msra.mxu1 %v15755_v8  ;;  %10599 = vmatprep.subr.bf16.mxu0 %v15762_v5  ;;  %v4846_v8 = vld [vmem:[#allocation10 + $0x1100] sm:$0xff] }
 0x4af   :  { %10927 = vmatprep.subr.bf16.mxu1 %v15764_v6  ;;  %v4850_v5 = vld [vmem:[#allocation10 + $0x1120] sm:$0xff]  ;;  %v4847_v6 = vld [vmem:[#allocation10 + $0x1108] sm:$0xff] }
 0x4b0   :  { %v15802_v14 = vcombine.high %v4846_v8, %v4850_v5  ;;  %v15804_v17 = vcombine.high %v4847_v6, %v4851_v10  ;;  %v15803_v20 = vcombine.low %v4847_v6, %v4851_v10  ;;  %v4886_v6 = vld [vmem:[#allocation10 + $0x1240] sm:$0xff] }
 0x4b1   :  { %10600 = vmatpush1.bf16.msra.mxu0 %v15761_v37  ;;  %v4854_v37 = vld [vmem:[#allocation10 + $0x1140] sm:$0xff] }
 0x4b2   :  { %10928 = vmatpush1.bf16.msra.mxu1 %v15763_v32  ;;  %10610 = vmatprep.subr.bf16.mxu0 %v15770_v35  ;;  %v4855_v32 = vld [vmem:[#allocation10 + $0x1148] sm:$0xff]  ;;  %v15810_v21 = vcombine.high %v4854_v37, %v4858_v24  ;;  %v4890_v10 = vld [vmem:[#allocation10 + $0x1260] sm:$0xff] }
 0x4b3   :  { %10938 = vmatprep.subr.bf16.mxu1 %v15772_v19  ;;  %v4859_v35 = vld [vmem:[#allocation10 + $0x1168] sm:$0xff]  ;;  %v15801_v19 = vcombine.low %v4846_v8, %v4850_v5  ;;  %v15834_v8 = vcombine.high %v4878_v55, %v4882_v56 }
 0x4b4   :  { %10602 = vmatmul.mubr.bf16.vlgmr.msra.gmra.mrb[16].mxu0 %v18553_v27  ;;  %v15812_v4 = vcombine.high %v4855_v32, %v4859_v35  ;;  %v15811_v26 = vcombine.low %v4855_v32, %v4859_v35  ;;  %v4894_v32 = vld [vmem:[#allocation10 + $0x1280] sm:$0xff] }
 0x4b5   :  { %10930 = vmatmul.mubr.bf16.vlgmr.msra.gmra.mrb[16].mxu1 %v18553_v27  ;;  %10611 = vmatpush1.bf16.msra.mxu0 %v15769_v23  ;;  %v4862_v23 = vld [vmem:[#allocation10 + $0x1180] sm:$0xff] }
 0x4b6   :  { %10642 = vmatprep.mubr.bf16.mxu0 %v18555_v28  ;;  %10939 = vmatpush1.bf16.msra.mxu1 %v15771_v9  ;;  %v4867_v9 = vld [vmem:[#allocation10 + $0x11a8] sm:$0xff]  ;;  %v15818_v13 = vcombine.high %v4862_v23, %v4866_v25  ;;  %v4898_v35 = vld [vmem:[#allocation10 + $0x12a0] sm:$0xff] }
 0x4b7   :  { %10970 = vmatprep.mubr.bf16.mxu1 %v18555_v28  ;;  %10612 = vmatprep.subr.bf16.mxu0 %v15778_v39  ;;  %v15809_v39 = vcombine.low %v4854_v37, %v4858_v24  ;;  %v15842_v37 = vcombine.high %v4886_v6, %v4890_v10 }
 0x4b8   :  { %10940 = vmatprep.subr.bf16.mxu1 %v15780_v29  ;;  %v15820_v29 = vcombine.high %v4863_v61, %v4867_v9 }
 0x4b9   :  { %10613 = vmatpush1.bf16.msra.mxu0 %v15777_v57  ;;  %v4871_v57 = vld [vmem:[#allocation10 + $0x11c8] sm:$0xff] }
 0x4ba   :  { %10941 = vmatpush1.bf16.msra.mxu1 %v15779_v42  ;;  %10614 = vmatprep.subr.bf16.mxu0 %v15786_v43  ;;  %v4875_v42 = vld [vmem:[#allocation10 + $0x11e8] sm:$0xff]  ;;  %v15817_v43 = vcombine.low %v4862_v23, %v4866_v25  ;;  %v15850_v23 = vcombine.high %v4894_v32, %v4898_v35 }
 0x4bb   :  { %10942 = vmatprep.subr.bf16.mxu1 %v15788_v46  ;;  %v15819_v46 = vcombine.low %v4863_v61, %v4867_v9  ;;  %v15828_v50 = vcombine.high %v4871_v57, %v4875_v42  ;;  %v4902_v61 = vld [vmem:[#allocation10 + $0x12c0] sm:$0xff] }
 0x4bc   :  { %v4906_v9 = vld [vmem:[#allocation10 + $0x12e0] sm:$0xff] }
 0x4bd   :  { %10615 = vmatpush1.bf16.msra.mxu0 %v15785_v3  ;;  %v4879_v3 = vld [vmem:[#allocation10 + $0x1208] sm:$0xff] }
 0x4be   :  { %10943 = vmatpush1.bf16.msra.mxu1 %v15787_v58  ;;  %10616 = vmatprep.subr.bf16.mxu0 %v15794_v0  ;;  %v4883_v58 = vld [vmem:[#allocation10 + $0x1228] sm:$0xff]  ;;  %v15825_v0 = vcombine.low %v4870_v31, %v4874_v54  ;;  %v15858_v31 = vcombine.high %v4902_v61, %v4906_v9 }
 0x4bf   :  { %10944 = vmatprep.subr.bf16.mxu1 %v15796_v1  ;;  %v15827_v1 = vcombine.low %v4871_v57, %v4875_v42  ;;  %v15836_v5 = vcombine.high %v4879_v3, %v4883_v58  ;;  %v4910_v57 = vld [vmem:[#allocation10 + $0x1300] sm:$0xff] }
 0x4c0   :  { %v4914_v42 = vld [vmem:[#allocation10 + $0x1320] sm:$0xff] }
 0x4c1   :  { %10617 = vmatpush1.bf16.msra.mxu0 %v15793_v11  ;;  %v4887_v11 = vld [vmem:[#allocation10 + $0x1248] sm:$0xff] }
 0x4c2   :  { %10945 = vmatpush1.bf16.msra.mxu1 %v15795_v16  ;;  %10618 = vmatprep.subr.bf16.mxu0 %v15802_v14  ;;  %v4891_v16 = vld [vmem:[#allocation10 + $0x1268] sm:$0xff]  ;;  %v15833_v14 = vcombine.low %v4878_v55, %v4882_v56  ;;  %v15866_v55 = vcombine.high %v4910_v57, %v4914_v42 }
 0x4c3   :  { %10946 = vmatprep.subr.bf16.mxu1 %v15804_v17  ;;  %v15835_v17 = vcombine.low %v4879_v3, %v4883_v58  ;;  %v15844_v24 = vcombine.high %v4887_v11, %v4891_v16  ;;  %v4918_v3 = vld [vmem:[#allocation10 + $0x1340] sm:$0xff] }
 0x4c4   :  { %v4922_v58 = vld [vmem:[#allocation10 + $0x1360] sm:$0xff] }
 0x4c5   :  { %10619 = vmatpush1.bf16.msra.mxu0 %v15801_v19  ;;  %v4895_v19 = vld [vmem:[#allocation10 + $0x1288] sm:$0xff] }
 0x4c6   :  { %10947 = vmatpush1.bf16.msra.mxu1 %v15803_v20  ;;  %10620 = vmatprep.subr.bf16.mxu0 %v15810_v21  ;;  %v4899_v20 = vld [vmem:[#allocation10 + $0x12a8] sm:$0xff]  ;;  %v15841_v21 = vcombine.low %v4886_v6, %v4890_v10  ;;  %v15874_v10 = vcombine.high %v4918_v3, %v4922_v58 }
 0x4c7   :  { %10948 = vmatprep.subr.bf16.mxu1 %v15812_v4  ;;  %v15843_v4 = vcombine.low %v4887_v11, %v4891_v16  ;;  %v15852_v25 = vcombine.high %v4895_v19, %v4899_v20  ;;  %v4926_v16 = vld [vmem:[#allocation10 + $0x1380] sm:$0xff] }
 0x4c9   :  { %10621 = vmatpush1.bf16.msra.mxu0 %v15809_v39  ;;  %v4903_v39 = vld [vmem:[#allocation10 + $0x12c8] sm:$0xff] }
 0x4ca   :  { %10949 = vmatpush1.bf16.msra.mxu1 %v15811_v26  ;;  %10622 = vmatprep.subr.bf16.mxu0 %v15818_v13  ;;  %v4907_v26 = vld [vmem:[#allocation10 + $0x12e8] sm:$0xff]  ;;  %v15849_v13 = vcombine.low %v4894_v32, %v4898_v35  ;;  %v4209_v32 = vrot.slane %v18547_v33, %v18445_v12  ;;  %v15873_v35 = vcombine.low %v4918_v3, %v4922_v58 }
 0x4cb   :  { %10950 = vmatprep.subr.bf16.mxu1 %v15820_v29  ;;  %v15851_v29 = vcombine.low %v4895_v19, %v4899_v20  ;;  %v15860_v54 = vcombine.high %v4903_v39, %v4907_v26 }
 0x4cd   :  { %10623 = vmatpush1.bf16.msra.mxu0 %v15817_v43  ;;  %v4911_v43 = vld [vmem:[#allocation10 + $0x1308] sm:$0xff] }
 0x4ce   :  { %10951 = vmatpush1.bf16.msra.mxu1 %v15819_v46  ;;  %10624 = vmatprep.subr.bf16.mxu0 %v15826_v47  ;;  %v4915_v46 = vld [vmem:[#allocation10 + $0x1328] sm:$0xff]  ;;  %v15857_v47 = vcombine.low %v4902_v61, %v4906_v9  ;;  %v4221_v9 = vrot.slane %v18547_v33, %v18448_v36 }
 0x4cf   :  { %10952 = vmatprep.subr.bf16.mxu1 %v15828_v50  ;;  %v15859_v50 = vcombine.low %v4903_v39, %v4907_v26  ;;  %v15868_v56 = vcombine.high %v4911_v43, %v4915_v46  ;;  %v15867_v6 = vcombine.low %v4911_v43, %v4915_v46  ;;  %v4935_v39 = vld [vmem:[#allocation10 + $0x13c8] sm:$0xff] }
 0x4d0   :  { %v4939_v26 = vld [vmem:[#allocation10 + $0x13e8] sm:$0xff] }
 0x4d1   :  { %10625 = vmatpush1.bf16.msra.mxu0 %v15825_v0  ;;  %v4919_v0 = vld [vmem:[#allocation10 + $0x1348] sm:$0xff] }
 0x4d2   :  { %10953 = vmatpush1.bf16.msra.mxu1 %v15827_v1  ;;  %10626 = vmatprep.subr.bf16.mxu0 %v15834_v8  ;;  %v4923_v1 = vld [vmem:[#allocation10 + $0x1368] sm:$0xff]  ;;  %v15865_v8 = vcombine.low %v4910_v57, %v4914_v42  ;;  %v4942_v57 = vld [vmem:[#allocation10 + $0x1400] sm:$0xff] }
 0x4d3   :  { %10954 = vmatprep.subr.bf16.mxu1 %v15836_v5  ;;  %v4109_v5 = vrot.slane %v18539_v22, %v18445_v12  ;;  %v15876_v11 = vcombine.high %v4919_v0, %v4923_v1  ;;  %v15875_v20 = vcombine.low %v4919_v0, %v4923_v1  ;;  %v4946_v42 = vld [vmem:[#allocation10 + $0x1420] sm:$0xff]  ;;  %v4943_v46 = vld [vmem:[#allocation10 + $0x1408] sm:$0xff] }
 0x4d4   :  { %v4950_v0 = vld [vmem:[#allocation10 + $0x1440] sm:$0xff] }
 0x4d5   :  { %10627 = vmatpush1.bf16.msra.mxu0 %v15833_v14  ;;  %v4930_v14 = vld [vmem:[#allocation10 + $0x13a0] sm:$0xff]  ;;  %v4162_v19 = vmul.f32 %v4109_v5, %v18468_v30  ;;  %v4951_v5 = vld [vmem:[#allocation10 + $0x1448] sm:$0xff] }
 0x4d6   :  { %10955 = vmatpush1.bf16.msra.mxu1 %v15835_v17  ;;  %10628 = vmatprep.subr.bf16.mxu0 %v15842_v37  ;;  %v4121_v17 = vrot.slane %v18539_v22, %v18448_v36  ;;  %v4927_v37 = vld [vmem:[#allocation10 + $0x1388] sm:$0xff]  ;;  %v4954_v1 = vld [vmem:[#allocation10 + $0x1460] sm:$0xff] }
 0x4d7   :  { %10956 = vmatprep.subr.bf16.mxu1 %v15844_v24  ;;  %v4931_v24 = vld [vmem:[#allocation10 + $0x13a8] sm:$0xff] }
 0x4d8   :  { %v4165_v61 = vmul.f32 %v4121_v17, %v18474_v41  ;;  %v15883_v30 = vcombine.low %v4927_v37, %v4931_v24  ;;  %v4962_v17 = vld [vmem:[#allocation10 + $0x14a0] sm:$0xff] }
 0x4d9   :  { %10629 = vmatpush1.bf16.msra.mxu0 %v15841_v21  ;;  %v15882_v21 = vcombine.high %v4926_v16, %v4930_v14 }
 0x4da   :  { %10957 = vmatpush1.bf16.msra.mxu1 %v15843_v4  ;;  %10630 = vmatprep.subr.bf16.mxu0 %v15850_v23  ;;  %v15884_v4 = vcombine.high %v4927_v37, %v4931_v24  ;;  %v4934_v23 = vld [vmem:[#allocation10 + $0x13c0] sm:$0xff]  ;;  %v4265_v43 = vadd.f32 %v4221_v9, %v4165_v61  ;;  %v4967_v61 = vld [vmem:[#allocation10 + $0x14c8] sm:$0xff] }
 0x4db   :  { %10958 = vmatprep.subr.bf16.mxu1 %v15852_v25  ;;  %v4938_v25 = vld [vmem:[#allocation10 + $0x13e0] sm:$0xff]  ;;  %v4971_v9 = vld [vmem:[#allocation10 + $0x14e8] sm:$0xff] }
 0x4dc   :  { %v15889_v41 = vcombine.low %v4934_v23, %v4938_v25  ;;  %v4281_v58 = vmax.f32 %v4265_v43, 0.0  ;;  %v15923_v43 = vcombine.low %v4967_v61, %v4971_v9 }
 0x4dd   :  { %10631 = vmatpush1.bf16.msra.mxu0 %v15849_v13  ;;  %v15881_v13 = vcombine.low %v4926_v16, %v4930_v14  ;;  %v15906_v16 = vcombine.high %v4950_v0, %v4954_v1  ;;  %v4958_v14 = vld [vmem:[#allocation10 + $0x1480] sm:$0xff] }
 0x4de   :  { %10959 = vmatpush1.bf16.msra.mxu1 %v15851_v29  ;;  %10632 = vmatprep.subr.bf16.mxu0 %v15858_v31  ;;  %v4262_v29 = vadd.f32 %v4209_v32, %v4162_v19  ;;  %v15890_v31 = vcombine.high %v4934_v23, %v4938_v25  ;;  %v18573_v37 = vpack.c.bf16 %v4281_v58, %v4281_v58  ;;  %v4959_v32 = vld [vmem:[#allocation10 + $0x1488] sm:$0xff]  ;;  %v4966_v23 = vld [vmem:[#allocation10 + $0x14c0] sm:$0xff] }
 0x4df   :  { %10960 = vmatprep.subr.bf16.mxu1 %v15860_v54  ;;  %v15892_v54 = vcombine.high %v4935_v39, %v4939_v26  ;;  %v15905_v19 = vcombine.low %v4950_v0, %v4954_v1  ;;  %v4970_v25 = vld [vmem:[#allocation10 + $0x14e0] sm:$0xff] }
 0x4e1   :  { %10633 = vmatpush1.bf16.msra.mxu0 %v15857_v47  ;;  %v4947_v47 = vld [vmem:[#allocation10 + $0x1428] sm:$0xff] }
 0x4e2   :  { %10961 = vmatpush1.bf16.msra.mxu1 %v15859_v50  ;;  %10634 = vmatprep.subr.bf16.mxu0 %v15866_v55  ;;  %v4278_v50 = vmax.f32 %v4262_v29, 0.0  ;;  %v15891_v55 = vcombine.low %v4935_v39, %v4939_v26  ;;  %v15900_v3 = vcombine.high %v4943_v46, %v4947_v47  ;;  %v15913_v39 = vcombine.low %v4958_v14, %v4962_v17 }
 0x4e3   :  { %10962 = vmatprep.subr.bf16.mxu1 %v15868_v56  ;;  %v15898_v56 = vcombine.high %v4942_v57, %v4946_v42  ;;  %v15924_v29 = vcombine.high %v4967_v61, %v4971_v9  ;;  %v5006_v61 = vld [vmem:[#allocation10 + $0x1600] sm:$0xff] }
 0x4e4   :  { %v5010_v9 = vld [vmem:[#allocation10 + $0x1620] sm:$0xff] }
 0x4e5   :  { %10635 = vmatpush1.bf16.msra.mxu0 %v15865_v8  ;;  %v15897_v8 = vcombine.low %v4942_v57, %v4946_v42  ;;  %v4979_v57 = vld [vmem:[#allocation10 + $0x1528] sm:$0xff]  ;;  %v15921_v42 = vcombine.low %v4966_v23, %v4970_v25 }
 0x4e6   :  { %10963 = vmatpush1.bf16.msra.mxu1 %v15867_v6  ;;  %10636 = vmatprep.subr.bf16.mxu0 %v15874_v10  ;;  %v4955_v6 = vld [vmem:[#allocation10 + $0x1468] sm:$0xff]  ;;  %v18571_v10 = vpack.c.bf16 %v4278_v50, %v4278_v50  ;;  %v4986_v50 = vld [vmem:[#allocation10 + $0x1560] sm:$0xff] }
 0x4e7   :  { %10964 = vmatprep.subr.bf16.mxu1 %v15876_v11  ;;  %v15899_v11 = vcombine.low %v4943_v46, %v4947_v47  ;;  %v15908_v24 = vcombine.high %v4951_v5, %v4955_v6 }
 0x4e9   :  { %10637 = vmatpush1.bf16.msra.mxu0 %v15873_v35  ;;  %v4963_v35 = vld [vmem:[#allocation10 + $0x14a8] sm:$0xff] }
 0x4ea   :  { %10965 = vmatpush1.bf16.msra.mxu1 %v15875_v20  ;;  %10638 = vmatprep.subr.bf16.mxu0 %v15882_v21  ;;  %v15907_v20 = vcombine.low %v4951_v5, %v4955_v6  ;;  %v15914_v21 = vcombine.high %v4958_v14, %v4962_v17  ;;  %v15915_v26 = vcombine.low %v4959_v32, %v4963_v35  ;;  %v4994_v5 = vld [vmem:[#allocation10 + $0x15a0] sm:$0xff]  ;;  %v4991_v6 = vld [vmem:[#allocation10 + $0x1588] sm:$0xff] }
 0x4eb   :  { %10966 = vmatprep.subr.bf16.mxu1 %v15884_v4  ;;  %v15916_v4 = vcombine.high %v4959_v32, %v4963_v35  ;;  %v4998_v32 = vld [vmem:[#allocation10 + $0x15c0] sm:$0xff] }
 0x4ec   :  { %v5002_v35 = vld [vmem:[#allocation10 + $0x15e0] sm:$0xff] }
 0x4ed   :  { %10639 = vmatpush1.bf16.msra.mxu0 %v15881_v13  ;;  %v15922_v13 = vcombine.high %v4966_v23, %v4970_v25  ;;  %v15954_v23 = vcombine.high %v4998_v32, %v5002_v35 }
 0x4ee   :  { %10967 = vmatpush1.bf16.msra.mxu1 %v15883_v30  ;;  %10640 = vmatprep.subr.bf16.mxu0 %v15890_v31  ;;  %v4974_v30 = vld [vmem:[#allocation10 + $0x1500] sm:$0xff] }
 0x4ef   :  { %10968 = vmatprep.subr.bf16.mxu1 %v15892_v54  ;;  %v4978_v31 = vld [vmem:[#allocation10 + $0x1520] sm:$0xff]  ;;  %v4975_v54 = vld [vmem:[#allocation10 + $0x1508] sm:$0xff] }
 0x4f0   :  { %v15930_v46 = vcombine.high %v4974_v30, %v4978_v31  ;;  %v15932_v47 = vcombine.high %v4975_v54, %v4979_v57  ;;  %v15931_v58 = vcombine.low %v4975_v54, %v4979_v57  ;;  %v5014_v54 = vld [vmem:[#allocation10 + $0x1640] sm:$0xff] }
 0x4f1   :  { %10641 = vmatpush1.bf16.msra.mxu0 %v15889_v41  ;;  %v4982_v41 = vld [vmem:[#allocation10 + $0x1540] sm:$0xff] }
 0x4f2   :  { %10969 = vmatpush1.bf16.msra.mxu1 %v15891_v55  ;;  %10651 = vmatprep.subr.bf16.mxu0 %v15898_v56  ;;  %v4983_v55 = vld [vmem:[#allocation10 + $0x1548] sm:$0xff]  ;;  %v15938_v0 = vcombine.high %v4982_v41, %v4986_v50  ;;  %v5018_v57 = vld [vmem:[#allocation10 + $0x1660] sm:$0xff] }
 0x4f3   :  { %10979 = vmatprep.subr.bf16.mxu1 %v15900_v3  ;;  %v4987_v56 = vld [vmem:[#allocation10 + $0x1568] sm:$0xff]  ;;  %v15929_v3 = vcombine.low %v4974_v30, %v4978_v31  ;;  %v15962_v30 = vcombine.high %v5006_v61, %v5010_v9 }
 0x4f4   :  { %10643 = vmatmul.mubr.bf16.vlgmr.msra.gmra.mrb[16].mxu0 %v18571_v10  ;;  %v15940_v1 = vcombine.high %v4983_v55, %v4987_v56  ;;  %v15939_v14 = vcombine.low %v4983_v55, %v4987_v56  ;;  %v5022_v55 = vld [vmem:[#allocation10 + $0x1680] sm:$0xff] }
 0x4f5   :  { %10971 = vmatmul.mubr.bf16.vlgmr.msra.gmra.mrb[16].mxu1 %v18571_v10  ;;  %10652 = vmatpush1.bf16.msra.mxu0 %v15897_v8  ;;  %v4990_v8 = vld [vmem:[#allocation10 + $0x1580] sm:$0xff] }
 0x4f6   :  { %10683 = vmatprep.mubr.bf16.mxu0 %v18573_v37  ;;  %10980 = vmatpush1.bf16.msra.mxu1 %v15899_v11  ;;  %v4995_v11 = vld [vmem:[#allocation10 + $0x15a8] sm:$0xff]  ;;  %v15946_v17 = vcombine.high %v4990_v8, %v4994_v5  ;;  %v5026_v56 = vld [vmem:[#allocation10 + $0x16a0] sm:$0xff] }
 0x4f7   :  { %11011 = vmatprep.mubr.bf16.mxu1 %v18573_v37  ;;  %10653 = vmatprep.subr.bf16.mxu0 %v15906_v16  ;;  %v15937_v16 = vcombine.low %v4982_v41, %v4986_v50  ;;  %v15970_v41 = vcombine.high %v5014_v54, %v5018_v57 }
 0x4f8   :  { %10981 = vmatprep.subr.bf16.mxu1 %v15908_v24  ;;  %v15948_v24 = vcombine.high %v4991_v6, %v4995_v11 }
 0x4f9   :  { %10654 = vmatpush1.bf16.msra.mxu0 %v15905_v19  ;;  %v4999_v19 = vld [vmem:[#allocation10 + $0x15c8] sm:$0xff] }
 0x4fa   :  { %10982 = vmatpush1.bf16.msra.mxu1 %v15907_v20  ;;  %10655 = vmatprep.subr.bf16.mxu0 %v15914_v21  ;;  %v5003_v20 = vld [vmem:[#allocation10 + $0x15e8] sm:$0xff]  ;;  %v15945_v21 = vcombine.low %v4990_v8, %v4994_v5  ;;  %v15978_v8 = vcombine.high %v5022_v55, %v5026_v56 }
 0x4fb   :  { %10983 = vmatprep.subr.bf16.mxu1 %v15916_v4  ;;  %v15947_v4 = vcombine.low %v4991_v6, %v4995_v11  ;;  %v15956_v25 = vcombine.high %v4999_v19, %v5003_v20  ;;  %v5030_v6 = vld [vmem:[#allocation10 + $0x16c0] sm:$0xff] }
 0x4fc   :  { %v5034_v11 = vld [vmem:[#allocation10 + $0x16e0] sm:$0xff] }
 0x4fd   :  { %10656 = vmatpush1.bf16.msra.mxu0 %v15913_v39  ;;  %v5007_v39 = vld [vmem:[#allocation10 + $0x1608] sm:$0xff] }
 0x4fe   :  { %10984 = vmatpush1.bf16.msra.mxu1 %v15915_v26  ;;  %10657 = vmatprep.subr.bf16.mxu0 %v15922_v13  ;;  %v5011_v26 = vld [vmem:[#allocation10 + $0x1628] sm:$0xff]  ;;  %v15953_v13 = vcombine.low %v4998_v32, %v5002_v35  ;;  %v15986_v32 = vcombine.high %v5030_v6, %v5034_v11 }
 0x4ff   :  { %10985 = vmatprep.subr.bf16.mxu1 %v15924_v29  ;;  %v15955_v29 = vcombine.low %v4999_v19, %v5003_v20  ;;  %v15964_v31 = vcombine.high %v5007_v39, %v5011_v26  ;;  %v5038_v19 = vld [vmem:[#allocation10 + $0x1700] sm:$0xff] }
 0x500   :  { %v5042_v20 = vld [vmem:[#allocation10 + $0x1720] sm:$0xff] }
 0x501   :  { %10658 = vmatpush1.bf16.msra.mxu0 %v15921_v42  ;;  %v5015_v42 = vld [vmem:[#allocation10 + $0x1648] sm:$0xff] }
 0x502   :  { %10986 = vmatpush1.bf16.msra.mxu1 %v15923_v43  ;;  %10659 = vmatprep.subr.bf16.mxu0 %v15930_v46  ;;  %v5019_v43 = vld [vmem:[#allocation10 + $0x1668] sm:$0xff]  ;;  %v15961_v46 = vcombine.low %v5006_v61, %v5010_v9  ;;  %v15994_v61 = vcombine.high %v5038_v19, %v5042_v20 }
 0x503   :  { %10987 = vmatprep.subr.bf16.mxu1 %v15932_v47  ;;  %v15963_v47 = vcombine.low %v5007_v39, %v5011_v26  ;;  %v15972_v50 = vcombine.high %v5015_v42, %v5019_v43  ;;  %v5046_v39 = vld [vmem:[#allocation10 + $0x1740] sm:$0xff] }
 0x504   :  { %v5050_v26 = vld [vmem:[#allocation10 + $0x1760] sm:$0xff] }
 0x505   :  { %10660 = vmatpush1.bf16.msra.mxu0 %v15929_v3  ;;  %v5023_v3 = vld [vmem:[#allocation10 + $0x1688] sm:$0xff] }
 0x506   :  { %10988 = vmatpush1.bf16.msra.mxu1 %v15931_v58  ;;  %10661 = vmatprep.subr.bf16.mxu0 %v15938_v0  ;;  %v5027_v58 = vld [vmem:[#allocation10 + $0x16a8] sm:$0xff]  ;;  %v15969_v0 = vcombine.low %v5014_v54, %v5018_v57  ;;  %v16002_v57 = vcombine.high %v5046_v39, %v5050_v26 }
 0x507   :  { %10989 = vmatprep.subr.bf16.mxu1 %v15940_v1  ;;  %v15971_v1 = vcombine.low %v5015_v42, %v5019_v43  ;;  %v15980_v5 = vcombine.high %v5023_v3, %v5027_v58  ;;  %v5054_v43 = vld [vmem:[#allocation10 + $0x1780] sm:$0xff] }
 0x509   :  { %10662 = vmatpush1.bf16.msra.mxu0 %v15937_v16  ;;  %v5031_v16 = vld [vmem:[#allocation10 + $0x16c8] sm:$0xff] }
 0x50a   :  { %10990 = vmatpush1.bf16.msra.mxu1 %v15939_v14  ;;  %10663 = vmatprep.subr.bf16.mxu0 %v15946_v17  ;;  %v5035_v14 = vld [vmem:[#allocation10 + $0x16e8] sm:$0xff]  ;;  %v15977_v17 = vcombine.low %v5022_v55, %v5026_v56  ;;  %v4217_v55 = vrot.slane %v18547_v33, %v18477_v38  ;;  %v16001_v56 = vcombine.low %v5046_v39, %v5050_v26  ;;  %v5078_v39 = vld [vmem:[#allocation10 + $0x1840] sm:$0xff] }
 0x50b   :  { %10991 = vmatprep.subr.bf16.mxu1 %v15948_v24  ;;  %v15979_v24 = vcombine.low %v5023_v3, %v5027_v58  ;;  %v15988_v35 = vcombine.high %v5031_v16, %v5035_v14  ;;  %v5082_v26 = vld [vmem:[#allocation10 + $0x1860] sm:$0xff] }
 0x50d   :  { %10664 = vmatpush1.bf16.msra.mxu0 %v15945_v21  ;;  %v5039_v21 = vld [vmem:[#allocation10 + $0x1708] sm:$0xff] }
 0x50e   :  { %10992 = vmatpush1.bf16.msra.mxu1 %v15947_v4  ;;  %10665 = vmatprep.subr.bf16.mxu0 %v15954_v23  ;;  %v5043_v4 = vld [vmem:[#allocation10 + $0x1728] sm:$0xff]  ;;  %v15985_v23 = vcombine.low %v5030_v6, %v5034_v11 }
 0x50f   :  { %10993 = vmatprep.subr.bf16.mxu1 %v15956_v25  ;;  %v15987_v25 = vcombine.low %v5031_v16, %v5035_v14  ;;  %v15996_v9 = vcombine.high %v5039_v21, %v5043_v4  ;;  %v15995_v54 = vcombine.low %v5039_v21, %v5043_v4  ;;  %v5063_v11 = vld [vmem:[#allocation10 + $0x17c8] sm:$0xff] }
 0x510   :  { %v5067_v16 = vld [vmem:[#allocation10 + $0x17e8] sm:$0xff] }
 0x511   :  { %10666 = vmatpush1.bf16.msra.mxu0 %v15953_v13  ;;  %v5047_v13 = vld [vmem:[#allocation10 + $0x1748] sm:$0xff] }
 0x512   :  { %10994 = vmatpush1.bf16.msra.mxu1 %v15955_v29  ;;  %10667 = vmatprep.subr.bf16.mxu0 %v15962_v30  ;;  %v5051_v29 = vld [vmem:[#allocation10 + $0x1768] sm:$0xff]  ;;  %v15993_v30 = vcombine.low %v5038_v19, %v5042_v20  ;;  %v5074_v19 = vld [vmem:[#allocation10 + $0x1820] sm:$0xff] }
 0x513   :  { %10995 = vmatprep.subr.bf16.mxu1 %v15964_v31  ;;  %v4117_v31 = vrot.slane %v18539_v22, %v18477_v38  ;;  %v16004_v42 = vcombine.high %v5047_v13, %v5051_v29  ;;  %v16003_v58 = vcombine.low %v5047_v13, %v5051_v29  ;;  %v5071_v21 = vld [vmem:[#allocation10 + $0x1808] sm:$0xff] }
 0x514   :  { %v5075_v4 = vld [vmem:[#allocation10 + $0x1828] sm:$0xff] }
 0x515   :  { %10668 = vmatpush1.bf16.msra.mxu0 %v15961_v46  ;;  %v5058_v46 = vld [vmem:[#allocation10 + $0x17a0] sm:$0xff]  ;;  %v4164_v3 = vmul.f32 %v4117_v31, %v18470_v34  ;;  %v5079_v29 = vld [vmem:[#allocation10 + $0x1848] sm:$0xff] }
 0x516   :  { %10996 = vmatpush1.bf16.msra.mxu1 %v15963_v47  ;;  %10669 = vmatprep.subr.bf16.mxu0 %v15970_v41  ;;  %v4129_v47 = vrot.slane %v18539_v22, %v18480_v48  ;;  %v5055_v41 = vld [vmem:[#allocation10 + $0x1788] sm:$0xff]  ;;  %v4229_v22 = vrot.slane %v18547_v33, %v18480_v48  ;;  %v16009_v14 = vcombine.low %v5054_v43, %v5058_v46 }
 0x517   :  { %10997 = vmatprep.subr.bf16.mxu1 %v15972_v50  ;;  %v5059_v50 = vld [vmem:[#allocation10 + $0x17a8] sm:$0xff]  ;;  %v16019_v33 = vcombine.low %v5063_v11, %v5067_v16 }
 0x518   :  { %v4167_v6 = vmul.f32 %v4129_v47, %v18532_v63  ;;  %v16011_v34 = vcombine.low %v5055_v41, %v5059_v50 }
 0x519   :  { %10670 = vmatpush1.bf16.msra.mxu0 %v15969_v0  ;;  %v16010_v0 = vcombine.high %v5054_v43, %v5058_v46  ;;  %v5090_v43 = vld [vmem:[#allocation10 + $0x18a0] sm:$0xff] }
 0x51a   :  { %10998 = vmatpush1.bf16.msra.mxu1 %v15971_v1  ;;  %10671 = vmatprep.subr.bf16.mxu0 %v15978_v8  ;;  %v16012_v1 = vcombine.high %v5055_v41, %v5059_v50  ;;  %v5062_v8 = vld [vmem:[#allocation10 + $0x17c0] sm:$0xff]  ;;  %v4267_v20 = vadd.f32 %v4229_v22, %v4167_v6  ;;  %v5087_v41 = vld [vmem:[#allocation10 + $0x1888] sm:$0xff] }
 0x51b   :  { %10999 = vmatprep.subr.bf16.mxu1 %v15980_v5  ;;  %v5066_v5 = vld [vmem:[#allocation10 + $0x17e0] sm:$0xff]  ;;  %v5091_v50 = vld [vmem:[#allocation10 + $0x18a8] sm:$0xff] }
 0x51c   :  { %v16017_v63 = vcombine.low %v5062_v8, %v5066_v5  ;;  %v16043_v22 = vcombine.low %v5087_v41, %v5091_v50 }
 0x51d   :  { %10672 = vmatpush1.bf16.msra.mxu0 %v15977_v17  ;;  %v4264_v17 = vadd.f32 %v4217_v55, %v4164_v3  ;;  %v16033_v55 = vcombine.low %v5078_v39, %v5082_v26 }
 0x51e   :  { %11000 = vmatpush1.bf16.msra.mxu1 %v15979_v24  ;;  %10673 = vmatprep.subr.bf16.mxu0 %v15986_v32  ;;  %v16018_v24 = vcombine.high %v5062_v8, %v5066_v5  ;;  %v16020_v32 = vcombine.high %v5063_v11, %v5067_v16  ;;  %v5095_v8 = vld [vmem:[#allocation10 + $0x18c8] sm:$0xff] }
 0x51f   :  { %11001 = vmatprep.subr.bf16.mxu1 %v15988_v35  ;;  %v5070_v35 = vld [vmem:[#allocation10 + $0x1800] sm:$0xff]  ;;  %v5099_v5 = vld [vmem:[#allocation10 + $0x18e8] sm:$0xff] }
 0x520   :  { %v16025_v13 = vcombine.low %v5070_v35, %v5074_v19  ;;  %v16052_v16 = vcombine.high %v5095_v8, %v5099_v5 }
 0x521   :  { %10674 = vmatpush1.bf16.msra.mxu0 %v15985_v23  ;;  %v4280_v23 = vmax.f32 %v4264_v17, 0.0  ;;  %v5106_v17 = vld [vmem:[#allocation10 + $0x1920] sm:$0xff] }
 0x522   :  { %11002 = vmatpush1.bf16.msra.mxu1 %v15987_v25  ;;  %10675 = vmatprep.subr.bf16.mxu0 %v15994_v61  ;;  %v16026_v25 = vcombine.high %v5070_v35, %v5074_v19  ;;  %v16028_v61 = vcombine.high %v5071_v21, %v5075_v4  ;;  %v16051_v35 = vcombine.low %v5095_v8, %v5099_v5  ;;  %v5135_v8 = vld [vmem:[#allocation10 + $0x1a08] sm:$0xff] }
 0x523   :  { %11003 = vmatprep.subr.bf16.mxu1 %v15996_v9  ;;  %v4283_v9 = vmax.f32 %v4267_v20, 0.0  ;;  %v18589_v31 = vpack.c.bf16 %v4280_v23, %v4280_v23  ;;  %v5115_v23 = vld [vmem:[#allocation10 + $0x1968] sm:$0xff] }
 0x524   :  { %v5139_v5 = vld [vmem:[#allocation10 + $0x1a28] sm:$0xff] }
 0x525   :  { %10676 = vmatpush1.bf16.msra.mxu0 %v15993_v30  ;;  %v5083_v30 = vld [vmem:[#allocation10 + $0x1868] sm:$0xff]  ;;  %v18591_v46 = vpack.c.bf16 %v4283_v9, %v4283_v9 }
 0x526   :  { %11004 = vmatpush1.bf16.msra.mxu1 %v15995_v54  ;;  %10677 = vmatprep.subr.bf16.mxu0 %v16002_v57  ;;  %v16027_v54 = vcombine.low %v5071_v21, %v5075_v4  ;;  %v16034_v57 = vcombine.high %v5078_v39, %v5082_v26  ;;  %v16036_v47 = vcombine.high %v5079_v29, %v5083_v30  ;;  %v5110_v21 = vld [vmem:[#allocation10 + $0x1940] sm:$0xff] }
 0x527   :  { %11005 = vmatprep.subr.bf16.mxu1 %v16004_v42  ;;  %v5086_v42 = vld [vmem:[#allocation10 + $0x1880] sm:$0xff] }
 0x528   :  { %v16042_v3 = vcombine.high %v5086_v42, %v5090_v43  ;;  %v16041_v6 = vcombine.low %v5086_v42, %v5090_v43  ;;  %v5114_v4 = vld [vmem:[#allocation10 + $0x1960] sm:$0xff] }
 0x529   :  { %10678 = vmatpush1.bf16.msra.mxu0 %v16001_v56  ;;  %v16035_v56 = vcombine.low %v5079_v29, %v5083_v30  ;;  %v5118_v39 = vld [vmem:[#allocation10 + $0x1980] sm:$0xff]  ;;  %v5123_v29 = vld [vmem:[#allocation10 + $0x19a8] sm:$0xff]  ;;  %v16065_v30 = vcombine.low %v5110_v21, %v5114_v4 }
 0x52a   :  { %11006 = vmatpush1.bf16.msra.mxu1 %v16003_v58  ;;  %10679 = vmatprep.subr.bf16.mxu0 %v16010_v0  ;;  %v16044_v58 = vcombine.high %v5087_v41, %v5091_v50  ;;  %v5094_v0 = vld [vmem:[#allocation10 + $0x18c0] sm:$0xff]  ;;  %v5127_v41 = vld [vmem:[#allocation10 + $0x19c8] sm:$0xff] }
 0x52b   :  { %11007 = vmatprep.subr.bf16.mxu1 %v16012_v1  ;;  %v5098_v1 = vld [vmem:[#allocation10 + $0x18e0] sm:$0xff]  ;;  %v5131_v50 = vld [vmem:[#allocation10 + $0x19e8] sm:$0xff] }
 0x52c   :  { %v16050_v11 = vcombine.high %v5094_v0, %v5098_v1  ;;  %v5122_v26 = vld [vmem:[#allocation10 + $0x19a0] sm:$0xff] }
 0x52d   :  { %10680 = vmatpush1.bf16.msra.mxu0 %v16009_v14  ;;  %v5102_v14 = vld [vmem:[#allocation10 + $0x1900] sm:$0xff] }
 0x52e   :  { %11008 = vmatpush1.bf16.msra.mxu1 %v16011_v34  ;;  %10681 = vmatprep.subr.bf16.mxu0 %v16018_v24  ;;  %v5103_v34 = vld [vmem:[#allocation10 + $0x1908] sm:$0xff]  ;;  %v16058_v19 = vcombine.high %v5102_v14, %v5106_v17  ;;  %v5126_v43 = vld [vmem:[#allocation10 + $0x19c0] sm:$0xff] }
 0x52f   :  { %11009 = vmatprep.subr.bf16.mxu1 %v16020_v32  ;;  %v5107_v24 = vld [vmem:[#allocation10 + $0x1928] sm:$0xff]  ;;  %v16049_v32 = vcombine.low %v5094_v0, %v5098_v1  ;;  %v5134_v0 = vld [vmem:[#allocation10 + $0x1a00] sm:$0xff] }
 0x530   :  { %v16060_v20 = vcombine.high %v5103_v34, %v5107_v24  ;;  %v5138_v1 = vld [vmem:[#allocation10 + $0x1a20] sm:$0xff] }
 0x531   :  { %10682 = vmatpush1.bf16.msra.mxu0 %v16017_v63  ;;  %v5111_v63 = vld [vmem:[#allocation10 + $0x1948] sm:$0xff] }
 0x532   :  { %11010 = vmatpush1.bf16.msra.mxu1 %v16019_v33  ;;  %10692 = vmatprep.subr.bf16.mxu0 %v16026_v25  ;;  %v16057_v33 = vcombine.low %v5102_v14, %v5106_v17  ;;  %v16059_v25 = vcombine.low %v5103_v34, %v5107_v24  ;;  %v16068_v9 = vcombine.high %v5111_v63, %v5115_v23  ;;  %v5142_v14 = vld [vmem:[#allocation10 + $0x1a40] sm:$0xff]  ;;  %v5143_v34 = vld [vmem:[#allocation10 + $0x1a48] sm:$0xff] }
 0x533   :  { %11020 = vmatprep.subr.bf16.mxu1 %v16028_v61  ;;  %v16066_v61 = vcombine.high %v5110_v21, %v5114_v4  ;;  %v5146_v17 = vld [vmem:[#allocation10 + $0x1a60] sm:$0xff]  ;;  %v5147_v24 = vld [vmem:[#allocation10 + $0x1a68] sm:$0xff] }
 0x534   :  { %10684 = vmatmul.mubr.bf16.vlgmr.msra.gmra.mrb[16].mxu0 %v18589_v31  ;;  %v5150_v21 = vld [vmem:[#allocation10 + $0x1a80] sm:$0xff] }
 0x535   :  { %11012 = vmatmul.mubr.bf16.vlgmr.msra.gmra.mrb[16].mxu1 %v18589_v31  ;;  %10693 = vmatpush1.bf16.msra.mxu0 %v16025_v13  ;;  %v5119_v13 = vld [vmem:[#allocation10 + $0x1988] sm:$0xff]  ;;  %v5154_v4 = vld [vmem:[#allocation10 + $0x1aa0] sm:$0xff] }
 0x536   :  { %10724 = vmatprep.mubr.bf16.mxu0 %v18591_v46  ;;  %11021 = vmatpush1.bf16.msra.mxu1 %v16027_v54  ;;  %v16067_v54 = vcombine.low %v5111_v63, %v5115_v23  ;;  %v16076_v42 = vcombine.high %v5119_v13, %v5123_v29  ;;  %v5151_v63 = vld [vmem:[#allocation10 + $0x1a88] sm:$0xff] }
 0x537   :  { %11052 = vmatprep.mubr.bf16.mxu1 %v18591_v46  ;;  %10694 = vmatprep.subr.bf16.mxu0 %v16034_v57  ;;  %v16074_v57 = vcombine.high %v5118_v39, %v5122_v26  ;;  %v5155_v23 = vld [vmem:[#allocation10 + $0x1aa8] sm:$0xff] }
 0x538   :  { %11022 = vmatprep.subr.bf16.mxu1 %v16036_v47  ;;  %v5130_v47 = vld [vmem:[#allocation10 + $0x19e0] sm:$0xff] }
 0x539   :  { %10695 = vmatpush1.bf16.msra.mxu0 %v16033_v55  ;;  %v16073_v55 = vcombine.low %v5118_v39, %v5122_v26  ;;  %v5158_v39 = vld [vmem:[#allocation10 + $0x1ac0] sm:$0xff] }
 0x53a   :  { %11023 = vmatpush1.bf16.msra.mxu1 %v16035_v56  ;;  %10696 = vmatprep.subr.bf16.mxu0 %v16042_v3  ;;  %v16075_v56 = vcombine.low %v5119_v13, %v5123_v29  ;;  %v16082_v3 = vcombine.high %v5126_v43, %v5130_v47  ;;  %v5162_v26 = vld [vmem:[#allocation10 + $0x1ae0] sm:$0xff]  ;;  %v5159_v13 = vld [vmem:[#allocation10 + $0x1ac8] sm:$0xff] }
 0x53b   :  { %11024 = vmatprep.subr.bf16.mxu1 %v16044_v58  ;;  %v16084_v58 = vcombine.high %v5127_v41, %v5131_v50  ;;  %v5163_v29 = vld [vmem:[#allocation10 + $0x1ae8] sm:$0xff] }
 0x53d   :  { %10697 = vmatpush1.bf16.msra.mxu0 %v16041_v6  ;;  %v16081_v6 = vcombine.low %v5126_v43, %v5130_v47  ;;  %v5166_v43 = vld [vmem:[#allocation10 + $0x1b00] sm:$0xff] }
 0x53e   :  { %11025 = vmatpush1.bf16.msra.mxu1 %v16043_v22  ;;  %10698 = vmatprep.subr.bf16.mxu0 %v16050_v11  ;;  %v16083_v22 = vcombine.low %v5127_v41, %v5131_v50  ;;  %v16090_v11 = vcombine.high %v5134_v0, %v5138_v1  ;;  %v5170_v47 = vld [vmem:[#allocation10 + $0x1b20] sm:$0xff]  ;;  %v5167_v41 = vld [vmem:[#allocation10 + $0x1b08] sm:$0xff] }
 0x53f   :  { %11026 = vmatprep.subr.bf16.mxu1 %v16052_v16  ;;  %v16092_v16 = vcombine.high %v5135_v8, %v5139_v5  ;;  %v5171_v50 = vld [vmem:[#allocation10 + $0x1b28] sm:$0xff] }
 0x541   :  { %10699 = vmatpush1.bf16.msra.mxu0 %v16049_v32  ;;  %v16089_v32 = vcombine.low %v5134_v0, %v5138_v1  ;;  %v5174_v0 = vld [vmem:[#allocation10 + $0x1b40] sm:$0xff] }
 0x542   :  { %11027 = vmatpush1.bf16.msra.mxu1 %v16051_v35  ;;  %10700 = vmatprep.subr.bf16.mxu0 %v16058_v19  ;;  %v16091_v35 = vcombine.low %v5135_v8, %v5139_v5  ;;  %v16098_v19 = vcombine.high %v5142_v14, %v5146_v17  ;;  %v5178_v1 = vld [vmem:[#allocation10 + $0x1b60] sm:$0xff]  ;;  %v5175_v8 = vld [vmem:[#allocation10 + $0x1b48] sm:$0xff] }
 0x543   :  { %11028 = vmatprep.subr.bf16.mxu1 %v16060_v20  ;;  %v16100_v20 = vcombine.high %v5143_v34, %v5147_v24  ;;  %v5179_v5 = vld [vmem:[#allocation10 + $0x1b68] sm:$0xff] }
 0x545   :  { %10701 = vmatpush1.bf16.msra.mxu0 %v16057_v33  ;;  %v16097_v33 = vcombine.low %v5142_v14, %v5146_v17  ;;  %v16130_v14 = vcombine.high %v5174_v0, %v5178_v1  ;;  %v16132_v17 = vcombine.high %v5175_v8, %v5179_v5 }
 0x546   :  { %11029 = vmatpush1.bf16.msra.mxu1 %v16059_v25  ;;  %10702 = vmatprep.subr.bf16.mxu0 %v16066_v61  ;;  %v16099_v25 = vcombine.low %v5143_v34, %v5147_v24  ;;  %v16106_v61 = vcombine.high %v5150_v21, %v5154_v4  ;;  %v5182_v34 = vld [vmem:[#allocation10 + $0x1b80] sm:$0xff] }
 0x547   :  { %11030 = vmatprep.subr.bf16.mxu1 %v16068_v9  ;;  %v16108_v9 = vcombine.high %v5151_v63, %v5155_v23  ;;  %v5186_v24 = vld [vmem:[#allocation10 + $0x1ba0] sm:$0xff] }
 0x549   :  { %10703 = vmatpush1.bf16.msra.mxu0 %v16065_v30  ;;  %v16105_v30 = vcombine.low %v5150_v21, %v5154_v4  ;;  %v16129_v4 = vcombine.low %v5174_v0, %v5178_v1 }
 0x54a   :  { %11031 = vmatpush1.bf16.msra.mxu1 %v16067_v54  ;;  %10704 = vmatprep.subr.bf16.mxu0 %v16074_v57  ;;  %v16107_v54 = vcombine.low %v5151_v63, %v5155_v23  ;;  %v16114_v57 = vcombine.high %v5158_v39, %v5162_v26  ;;  %v16131_v23 = vcombine.low %v5175_v8, %v5179_v5  ;;  %v5206_v8 = vld [vmem:[#allocation10 + $0x1c40] sm:$0xff] }
 0x54b   :  { %11032 = vmatprep.subr.bf16.mxu1 %v16076_v42  ;;  %v16116_v42 = vcombine.high %v5159_v13, %v5163_v29  ;;  %v5210_v5 = vld [vmem:[#allocation10 + $0x1c60] sm:$0xff] }
 0x54d   :  { %10705 = vmatpush1.bf16.msra.mxu0 %v16073_v55  ;;  %v16113_v55 = vcombine.low %v5158_v39, %v5162_v26 }
 0x54e   :  { %11033 = vmatpush1.bf16.msra.mxu1 %v16075_v56  ;;  %10706 = vmatprep.subr.bf16.mxu0 %v16082_v3  ;;  %v16115_v56 = vcombine.low %v5159_v13, %v5163_v29  ;;  %v16122_v3 = vcombine.high %v5166_v43, %v5170_v47  ;;  %v5191_v13 = vld [vmem:[#allocation10 + $0x1bc8] sm:$0xff] }
 0x54f   :  { %11034 = vmatprep.subr.bf16.mxu1 %v16084_v58  ;;  %v16124_v58 = vcombine.high %v5167_v41, %v5171_v50  ;;  %v5195_v29 = vld [vmem:[#allocation10 + $0x1be8] sm:$0xff] }
 0x551   :  { %10707 = vmatpush1.bf16.msra.mxu0 %v16081_v6  ;;  %v16121_v6 = vcombine.low %v5166_v43, %v5170_v47  ;;  %v5198_v43 = vld [vmem:[#allocation10 + $0x1c00] sm:$0xff] }
 0x552   :  { %11035 = vmatpush1.bf16.msra.mxu1 %v16083_v22  ;;  %10708 = vmatprep.subr.bf16.mxu0 %v16090_v11  ;;  %v18597_v22 = vld [vmem:[#allocation7 + $0x8] sm:$0xff]  ;;  %v5202_v47 = vld [vmem:[#allocation10 + $0x1c20] sm:$0xff] }
 0x553   :  { %11036 = vmatprep.subr.bf16.mxu1 %v16092_v16  ;;  %v4125_v11 = vrot.slane %v18597_v22, %v18501_v15  ;;  %v16123_v16 = vcombine.low %v5167_v41, %v5171_v50  ;;  %v5199_v50 = vld [vmem:[#allocation10 + $0x1c08] sm:$0xff] }
 0x555   :  { %10709 = vmatpush1.bf16.msra.mxu0 %v16089_v32  ;;  %v4137_v32 = vrot.slane %v18597_v22, %v18504_v49  ;;  %v4166_v63 = vmul.f32 %v4125_v11, %v18528_v52  ;;  %v5207_v11 = vld [vmem:[#allocation10 + $0x1c48] sm:$0xff] }
 0x556   :  { %11037 = vmatpush1.bf16.msra.mxu1 %v16091_v35  ;;  %10710 = vmatprep.subr.bf16.mxu0 %v16098_v19  ;;  %v5183_v35 = vld [vmem:[#allocation10 + $0x1b88] sm:$0xff] }
 0x557   :  { %11038 = vmatprep.subr.bf16.mxu1 %v16100_v20  ;;  %v5187_v19 = vld [vmem:[#allocation10 + $0x1ba8] sm:$0xff]  ;;  %v18603_v20 = vld [vmem:[#allocation8 + $0x8] sm:$0xff]  ;;  %v4169_v39 = vmul.f32 %v4137_v32, %v18534_v2  ;;  %v5218_v32 = vld [vmem:[#allocation10 + $0x1ca0] sm:$0xff] }
 0x558   :  { %v4225_v21 = vrot.slane %v18603_v20, %v18501_v15  ;;  %v4237_v26 = vrot.slane %v18603_v20, %v18504_v49  ;;  %v16139_v52 = vcombine.low %v5183_v35, %v5187_v19 }
 0x559   :  { %10711 = vmatpush1.bf16.msra.mxu0 %v16097_v33  ;;  %v16138_v33 = vcombine.high %v5182_v34, %v5186_v24 }
 0x55a   :  { %11039 = vmatpush1.bf16.msra.mxu1 %v16099_v25  ;;  %10712 = vmatprep.subr.bf16.mxu0 %v16106_v61  ;;  %v16140_v25 = vcombine.high %v5183_v35, %v5187_v19  ;;  %v5190_v61 = vld [vmem:[#allocation10 + $0x1bc0] sm:$0xff]  ;;  %v4269_v41 = vadd.f32 %v4237_v26, %v4169_v39  ;;  %v5223_v39 = vld [vmem:[#allocation10 + $0x1cc8] sm:$0xff] }
 0x55b   :  { %11040 = vmatprep.subr.bf16.mxu1 %v16108_v9  ;;  %v5194_v9 = vld [vmem:[#allocation10 + $0x1be0] sm:$0xff]  ;;  %v5227_v26 = vld [vmem:[#allocation10 + $0x1ce8] sm:$0xff] }
 0x55c   :  { %v16145_v2 = vcombine.low %v5190_v61, %v5194_v9  ;;  %v4285_v1 = vmax.f32 %v4269_v41, 0.0  ;;  %v16179_v41 = vcombine.low %v5223_v39, %v5227_v26 }
 0x55d   :  { %10713 = vmatpush1.bf16.msra.mxu0 %v16105_v30  ;;  %v16137_v30 = vcombine.low %v5182_v34, %v5186_v24  ;;  %v16162_v34 = vcombine.high %v5206_v8, %v5210_v5  ;;  %v5214_v24 = vld [vmem:[#allocation10 + $0x1c80] sm:$0xff] }
 0x55e   :  { %11041 = vmatpush1.bf16.msra.mxu1 %v16107_v54  ;;  %10714 = vmatprep.subr.bf16.mxu0 %v16114_v57  ;;  %v4266_v54 = vadd.f32 %v4225_v21, %v4166_v63  ;;  %v16146_v57 = vcombine.high %v5190_v61, %v5194_v9  ;;  %v18613_v35 = vpack.c.bf16 %v4285_v1, %v4285_v1  ;;  %v5215_v21 = vld [vmem:[#allocation10 + $0x1c88] sm:$0xff]  ;;  %v5222_v61 = vld [vmem:[#allocation10 + $0x1cc0] sm:$0xff] }
 0x55f   :  { %11042 = vmatprep.subr.bf16.mxu1 %v16116_v42  ;;  %v16148_v42 = vcombine.high %v5191_v13, %v5195_v29  ;;  %v16161_v63 = vcombine.low %v5206_v8, %v5210_v5  ;;  %v5226_v9 = vld [vmem:[#allocation10 + $0x1ce0] sm:$0xff] }
 0x561   :  { %10715 = vmatpush1.bf16.msra.mxu0 %v16113_v55  ;;  %v5203_v55 = vld [vmem:[#allocation10 + $0x1c28] sm:$0xff] }
 0x562   :  { %11043 = vmatpush1.bf16.msra.mxu1 %v16115_v56  ;;  %10716 = vmatprep.subr.bf16.mxu0 %v16122_v3  ;;  %v4282_v56 = vmax.f32 %v4266_v54, 0.0  ;;  %v16147_v3 = vcombine.low %v5191_v13, %v5195_v29  ;;  %v16156_v0 = vcombine.high %v5199_v50, %v5203_v55  ;;  %v16169_v13 = vcombine.low %v5214_v24, %v5218_v32 }
 0x563   :  { %11044 = vmatprep.subr.bf16.mxu1 %v16124_v58  ;;  %v16154_v58 = vcombine.high %v5198_v43, %v5202_v47  ;;  %v16180_v54 = vcombine.high %v5223_v39, %v5227_v26  ;;  %v5262_v39 = vld [vmem:[#allocation10 + $0x1e00] sm:$0xff] }
 0x564   :  { %v5266_v26 = vld [vmem:[#allocation10 + $0x1e20] sm:$0xff] }
 0x565   :  { %10717 = vmatpush1.bf16.msra.mxu0 %v16121_v6  ;;  %v16153_v6 = vcombine.low %v5198_v43, %v5202_v47  ;;  %v5235_v43 = vld [vmem:[#allocation10 + $0x1d28] sm:$0xff]  ;;  %v16177_v47 = vcombine.low %v5222_v61, %v5226_v9 }
 0x566   :  { %11045 = vmatpush1.bf16.msra.mxu1 %v16123_v16  ;;  %10718 = vmatprep.subr.bf16.mxu0 %v16130_v14  ;;  %v5211_v16 = vld [vmem:[#allocation10 + $0x1c68] sm:$0xff]  ;;  %v18611_v14 = vpack.c.bf16 %v4282_v56, %v4282_v56  ;;  %v5242_v56 = vld [vmem:[#allocation10 + $0x1d60] sm:$0xff] }
 0x567   :  { %11046 = vmatprep.subr.bf16.mxu1 %v16132_v17  ;;  %v16155_v17 = vcombine.low %v5199_v50, %v5203_v55  ;;  %v16164_v19 = vcombine.high %v5207_v11, %v5211_v16 }
 0x569   :  { %10719 = vmatpush1.bf16.msra.mxu0 %v16129_v4  ;;  %v5219_v4 = vld [vmem:[#allocation10 + $0x1ca8] sm:$0xff] }
 0x56a   :  { %11047 = vmatpush1.bf16.msra.mxu1 %v16131_v23  ;;  %10720 = vmatprep.subr.bf16.mxu0 %v16138_v33  ;;  %v16163_v23 = vcombine.low %v5207_v11, %v5211_v16  ;;  %v16170_v33 = vcombine.high %v5214_v24, %v5218_v32  ;;  %v16171_v29 = vcombine.low %v5215_v21, %v5219_v4  ;;  %v5250_v11 = vld [vmem:[#allocation10 + $0x1da0] sm:$0xff]  ;;  %v5247_v16 = vld [vmem:[#allocation10 + $0x1d88] sm:$0xff] }
 0x56b   :  { %11048 = vmatprep.subr.bf16.mxu1 %v16140_v25  ;;  %v16172_v25 = vcombine.high %v5215_v21, %v5219_v4  ;;  %v5254_v21 = vld [vmem:[#allocation10 + $0x1dc0] sm:$0xff] }
 0x56c   :  { %v5258_v4 = vld [vmem:[#allocation10 + $0x1de0] sm:$0xff] }
 0x56d   :  { %10721 = vmatpush1.bf16.msra.mxu0 %v16137_v30  ;;  %v16178_v30 = vcombine.high %v5222_v61, %v5226_v9  ;;  %v16210_v61 = vcombine.high %v5254_v21, %v5258_v4 }
 0x56e   :  { %11049 = vmatpush1.bf16.msra.mxu1 %v16139_v52  ;;  %10722 = vmatprep.subr.bf16.mxu0 %v16146_v57  ;;  %v5230_v52 = vld [vmem:[#allocation10 + $0x1d00] sm:$0xff] }
 0x56f   :  { %11050 = vmatprep.subr.bf16.mxu1 %v16148_v42  ;;  %v5234_v57 = vld [vmem:[#allocation10 + $0x1d20] sm:$0xff]  ;;  %v5231_v42 = vld [vmem:[#allocation10 + $0x1d08] sm:$0xff] }
 0x570   :  { %v16186_v50 = vcombine.high %v5230_v52, %v5234_v57  ;;  %v16188_v55 = vcombine.high %v5231_v42, %v5235_v43  ;;  %v16187_v1 = vcombine.low %v5231_v42, %v5235_v43  ;;  %v5270_v42 = vld [vmem:[#allocation10 + $0x1e40] sm:$0xff] }
 0x571   :  { %10723 = vmatpush1.bf16.msra.mxu0 %v16145_v2  ;;  %v5238_v2 = vld [vmem:[#allocation10 + $0x1d40] sm:$0xff] }
 0x572   :  { %11051 = vmatpush1.bf16.msra.mxu1 %v16147_v3  ;;  %10733 = vmatprep.subr.bf16.mxu0 %v16154_v58  ;;  %v5239_v3 = vld [vmem:[#allocation10 + $0x1d48] sm:$0xff]  ;;  %v16194_v8 = vcombine.high %v5238_v2, %v5242_v56  ;;  %v5274_v43 = vld [vmem:[#allocation10 + $0x1e60] sm:$0xff] }
 0x573   :  { %11061 = vmatprep.subr.bf16.mxu1 %v16156_v0  ;;  %v5243_v58 = vld [vmem:[#allocation10 + $0x1d68] sm:$0xff]  ;;  %v16185_v0 = vcombine.low %v5230_v52, %v5234_v57  ;;  %v16218_v52 = vcombine.high %v5262_v39, %v5266_v26 }
 0x574   :  { %10725 = vmatmul.mubr.bf16.vlgmr.msra.gmra.mrb[16].mxu0 %v18611_v14  ;;  %v16196_v5 = vcombine.high %v5239_v3, %v5243_v58  ;;  %v16195_v24 = vcombine.low %v5239_v3, %v5243_v58  ;;  %v5278_v3 = vld [vmem:[#allocation10 + $0x1e80] sm:$0xff] }
 0x575   :  { %11053 = vmatmul.mubr.bf16.vlgmr.msra.gmra.mrb[16].mxu1 %v18611_v14  ;;  %10734 = vmatpush1.bf16.msra.mxu0 %v16153_v6  ;;  %v5246_v6 = vld [vmem:[#allocation10 + $0x1d80] sm:$0xff] }
 0x576   :  { %10765 = vmatprep.mubr.bf16.mxu0 %v18613_v35  ;;  %11062 = vmatpush1.bf16.msra.mxu1 %v16155_v17  ;;  %v5251_v17 = vld [vmem:[#allocation10 + $0x1da8] sm:$0xff]  ;;  %v16202_v32 = vcombine.high %v5246_v6, %v5250_v11  ;;  %v5282_v58 = vld [vmem:[#allocation10 + $0x1ea0] sm:$0xff] }
 0x577   :  { %11093 = vmatprep.mubr.bf16.mxu1 %v18613_v35  ;;  %10735 = vmatprep.subr.bf16.mxu0 %v16162_v34  ;;  %v16193_v34 = vcombine.low %v5238_v2, %v5242_v56  ;;  %v16226_v2 = vcombine.high %v5270_v42, %v5274_v43 }
 0x578   :  { %11063 = vmatprep.subr.bf16.mxu1 %v16164_v19  ;;  %v16204_v19 = vcombine.high %v5247_v16, %v5251_v17 }
 0x579   :  { %10736 = vmatpush1.bf16.msra.mxu0 %v16161_v63  ;;  %v5255_v63 = vld [vmem:[#allocation10 + $0x1dc8] sm:$0xff] }
 0x57a   :  { %11064 = vmatpush1.bf16.msra.mxu1 %v16163_v23  ;;  %10737 = vmatprep.subr.bf16.mxu0 %v16170_v33  ;;  %v5259_v23 = vld [vmem:[#allocation10 + $0x1de8] sm:$0xff]  ;;  %v16201_v33 = vcombine.low %v5246_v6, %v5250_v11  ;;  %v16234_v6 = vcombine.high %v5278_v3, %v5282_v58 }
 0x57b   :  { %11065 = vmatprep.subr.bf16.mxu1 %v16172_v25  ;;  %v16203_v25 = vcombine.low %v5247_v16, %v5251_v17  ;;  %v16212_v9 = vcombine.high %v5255_v63, %v5259_v23  ;;  %v5286_v16 = vld [vmem:[#allocation10 + $0x1ec0] sm:$0xff] }
 0x57c   :  { %v5290_v17 = vld [vmem:[#allocation10 + $0x1ee0] sm:$0xff] }
 0x57d   :  { %10738 = vmatpush1.bf16.msra.mxu0 %v16169_v13  ;;  %v5263_v13 = vld [vmem:[#allocation10 + $0x1e08] sm:$0xff] }
 0x57e   :  { %11066 = vmatpush1.bf16.msra.mxu1 %v16171_v29  ;;  %10739 = vmatprep.subr.bf16.mxu0 %v16178_v30  ;;  %v5267_v29 = vld [vmem:[#allocation10 + $0x1e28] sm:$0xff]  ;;  %v16209_v30 = vcombine.low %v5254_v21, %v5258_v4  ;;  %v16242_v21 = vcombine.high %v5286_v16, %v5290_v17 }
 0x57f   :  { %11067 = vmatprep.subr.bf16.mxu1 %v16180_v54  ;;  %v16211_v54 = vcombine.low %v5255_v63, %v5259_v23  ;;  %v16220_v57 = vcombine.high %v5263_v13, %v5267_v29  ;;  %v5294_v63 = vld [vmem:[#allocation10 + $0x1f00] sm:$0xff] }
 0x580   :  { %v5298_v23 = vld [vmem:[#allocation10 + $0x1f20] sm:$0xff] }
 0x581   :  { %10740 = vmatpush1.bf16.msra.mxu0 %v16177_v47  ;;  %v5271_v47 = vld [vmem:[#allocation10 + $0x1e48] sm:$0xff] }
 0x582   :  { %11068 = vmatpush1.bf16.msra.mxu1 %v16179_v41  ;;  %10741 = vmatprep.subr.bf16.mxu0 %v16186_v50  ;;  %v5275_v41 = vld [vmem:[#allocation10 + $0x1e68] sm:$0xff]  ;;  %v16217_v50 = vcombine.low %v5262_v39, %v5266_v26  ;;  %v16250_v39 = vcombine.high %v5294_v63, %v5298_v23 }
 0x583   :  { %11069 = vmatprep.subr.bf16.mxu1 %v16188_v55  ;;  %v16219_v55 = vcombine.low %v5263_v13, %v5267_v29  ;;  %v16228_v56 = vcombine.high %v5271_v47, %v5275_v41  ;;  %v5302_v13 = vld [vmem:[#allocation10 + $0x1f40] sm:$0xff] }
 0x584   :  { %v5306_v29 = vld [vmem:[#allocation10 + $0x1f60] sm:$0xff] }
 0x585   :  { %10742 = vmatpush1.bf16.msra.mxu0 %v16185_v0  ;;  %v5279_v0 = vld [vmem:[#allocation10 + $0x1e88] sm:$0xff] }
 0x586   :  { %11070 = vmatpush1.bf16.msra.mxu1 %v16187_v1  ;;  %10743 = vmatprep.subr.bf16.mxu0 %v16194_v8  ;;  %v5283_v1 = vld [vmem:[#allocation10 + $0x1ea8] sm:$0xff]  ;;  %v16225_v8 = vcombine.low %v5270_v42, %v5274_v43  ;;  %v16258_v43 = vcombine.high %v5302_v13, %v5306_v29 }
 0x587   :  { %11071 = vmatprep.subr.bf16.mxu1 %v16196_v5  ;;  %v16227_v5 = vcombine.low %v5271_v47, %v5275_v41  ;;  %v16236_v11 = vcombine.high %v5279_v0, %v5283_v1  ;;  %v5310_v41 = vld [vmem:[#allocation10 + $0x1f80] sm:$0xff] }
 0x589   :  { %10744 = vmatpush1.bf16.msra.mxu0 %v16193_v34  ;;  %v5287_v34 = vld [vmem:[#allocation10 + $0x1ec8] sm:$0xff] }
 0x58a   :  { %11072 = vmatpush1.bf16.msra.mxu1 %v16195_v24  ;;  %10745 = vmatprep.subr.bf16.mxu0 %v16202_v32  ;;  %v5291_v24 = vld [vmem:[#allocation10 + $0x1ee8] sm:$0xff]  ;;  %v16233_v32 = vcombine.low %v5278_v3, %v5282_v58  ;;  %v16257_v3 = vcombine.low %v5302_v13, %v5306_v29  ;;  %v4317_v13 = vld [vmem:[#allocation10 + $0x78] sm:$0xff] }
 0x58b   :  { %11073 = vmatprep.subr.bf16.mxu1 %v16204_v19  ;;  %v16235_v19 = vcombine.low %v5279_v0, %v5283_v1  ;;  %v16244_v4 = vcombine.high %v5287_v34, %v5291_v24 }
 0x58d   :  { %10746 = vmatpush1.bf16.msra.mxu0 %v16201_v33  ;;  %v5295_v33 = vld [vmem:[#allocation10 + $0x1f08] sm:$0xff] }
 0x58e   :  { %11074 = vmatpush1.bf16.msra.mxu1 %v16203_v25  ;;  %10747 = vmatprep.subr.bf16.mxu0 %v16210_v61  ;;  %v5299_v25 = vld [vmem:[#allocation10 + $0x1f28] sm:$0xff]  ;;  %v16241_v61 = vcombine.low %v5286_v16, %v5290_v17 }
 0x58f   :  { %11075 = vmatprep.subr.bf16.mxu1 %v16212_v9  ;;  %v16243_v9 = vcombine.low %v5287_v34, %v5291_v24  ;;  %v16252_v26 = vcombine.high %v5295_v33, %v5299_v25  ;;  %v16251_v42 = vcombine.low %v5295_v33, %v5299_v25 }
 0x591   :  { %10748 = vmatpush1.bf16.msra.mxu0 %v16209_v30  ;;  %v5303_v30 = vld [vmem:[#allocation10 + $0x1f48] sm:$0xff] }
 0x592   :  { %11076 = vmatpush1.bf16.msra.mxu1 %v16211_v54  ;;  %10749 = vmatprep.subr.bf16.mxu0 %v16218_v52  ;;  %v5307_v54 = vld [vmem:[#allocation10 + $0x1f68] sm:$0xff]  ;;  %v16249_v52 = vcombine.low %v5294_v63, %v5298_v23 }
 0x593   :  { %11077 = vmatprep.subr.bf16.mxu1 %v16220_v57  ;;  %v4133_v57 = vrot.slane %v18597_v22, %v18537_v18  ;;  %v16260_v47 = vcombine.high %v5303_v30, %v5307_v54  ;;  %v16259_v22 = vcombine.low %v5303_v30, %v5307_v54 }
 0x595   :  { %10750 = vmatpush1.bf16.msra.mxu0 %v16217_v50  ;;  %v5314_v50 = vld [vmem:[#allocation10 + $0x1fa0] sm:$0xff]  ;;  %v4168_v58 = vmul.f32 %v4133_v57, %v18530_v60  ;;  %v4304_v60 = vld [vmem:[#allocation10 + $0x10] sm:$0xff] }
 0x596   :  { %11078 = vmatpush1.bf16.msra.mxu1 %v16219_v55  ;;  %10751 = vmatprep.subr.bf16.mxu0 %v16226_v2  ;;  %v5311_v55 = vld [vmem:[#allocation10 + $0x1f88] sm:$0xff]  ;;  %v16266_v0 = vcombine.high %v5310_v41, %v5314_v50  ;;  %v16265_v16 = vcombine.low %v5310_v41, %v5314_v50  ;;  %v4324_v57 = vld [vmem:[#allocation10 + $0xb0] sm:$0xff] }
 0x597   :  { %11079 = vmatprep.subr.bf16.mxu1 %v16228_v56  ;;  %v5315_v2 = vld [vmem:[#allocation10 + $0x1fa8] sm:$0xff]  ;;  %v4233_v56 = vrot.slane %v18603_v20, %v18537_v18 }
 0x598   :  { %v16268_v1 = vcombine.high %v5311_v55, %v5315_v2  ;;  %v16267_v20 = vcombine.low %v5311_v55, %v5315_v2 }
 0x599   :  { %10752 = vmatpush1.bf16.msra.mxu0 %v16225_v8  ;;  %v5318_v8 = vld [vmem:[#allocation10 + $0x1fc0] sm:$0xff]  ;;  %v4268_v17 = vadd.f32 %v4233_v56, %v4168_v58  ;;  %v4328_v56 = vld [vmem:[#allocation10 + $0xd0] sm:$0xff]  ;;  %v4329_v58 = vld [vmem:[#allocation10 + $0xd8] sm:$0xff] }
 0x59a   :  { %11080 = vmatpush1.bf16.msra.mxu1 %v16227_v5  ;;  %10753 = vmatprep.subr.bf16.mxu0 %v16234_v6  ;;  %v5322_v5 = vld [vmem:[#allocation10 + $0x1fe0] sm:$0xff]  ;;  %v5319_v6 = vld [vmem:[#allocation10 + $0x1fc8] sm:$0xff] }
 0x59b   :  { %11081 = vmatprep.subr.bf16.mxu1 %v16236_v11  ;;  %v5323_v11 = vld [vmem:[#allocation10 + $0x1fe8] sm:$0xff]  ;;  %v16274_v34 = vcombine.high %v5318_v8, %v5322_v5  ;;  %v4284_v63 = vmax.f32 %v4268_v17, 0.0  ;;  %v4341_v17 = vld [vmem:[#allocation10 + $0x138] sm:$0xff] }
 0x59c   :  { %v16276_v24 = vcombine.high %v5319_v6, %v5323_v11  ;;  %v16275_v23 = vcombine.low %v5319_v6, %v5323_v11  ;;  %v4336_v6 = vld [vmem:[#allocation10 + $0x110] sm:$0xff] }
 0x59d   :  { %10754 = vmatpush1.bf16.msra.mxu0 %v16233_v32  ;;  %v4308_v32 = vld [vmem:[#allocation10 + $0x30] sm:$0xff]  ;;  %v18624_v29 = vpack.c.bf16 %v4284_v63, %v4284_v63 }
 0x59e   :  { %11082 = vmatpush1.bf16.msra.mxu1 %v16235_v19  ;;  %10755 = vmatprep.subr.bf16.mxu0 %v16242_v21  ;;  %v4305_v19 = vld [vmem:[#allocation10 + $0x18] sm:$0xff]  ;;  %v15262_v33 = vcombine.high %v4304_v60, %v4308_v32  ;;  %v4340_v11 = vld [vmem:[#allocation10 + $0x130] sm:$0xff] }
 0x59f   :  { %11083 = vmatprep.subr.bf16.mxu1 %v16244_v4  ;;  %v4309_v21 = vld [vmem:[#allocation10 + $0x38] sm:$0xff]  ;;  %v16273_v4 = vcombine.low %v5318_v8, %v5322_v5 }
 0x5a0   :  { %v15264_v25 = vcombine.high %v4305_v19, %v4309_v21  ;;  %v15263_v30 = vcombine.low %v4305_v19, %v4309_v21  ;;  %v4345_v19 = vld [vmem:[#allocation10 + $0x158] sm:$0xff] }
 0x5a1   :  { %10756 = vmatpush1.bf16.msra.mxu0 %v16241_v61  ;;  %v4312_v61 = vld [vmem:[#allocation10 + $0x50] sm:$0xff]  ;;  %v4349_v21 = vld [vmem:[#allocation10 + $0x178] sm:$0xff] }
 0x5a2   :  { %11084 = vmatpush1.bf16.msra.mxu1 %v16243_v9  ;;  %10757 = vmatprep.subr.bf16.mxu0 %v16250_v39  ;;  %v4316_v9 = vld [vmem:[#allocation10 + $0x70] sm:$0xff]  ;;  %v15261_v39 = vcombine.low %v4304_v60, %v4308_v32 }
 0x5a3   :  { %11085 = vmatprep.subr.bf16.mxu1 %v16252_v26  ;;  %v4313_v26 = vld [vmem:[#allocation10 + $0x58] sm:$0xff]  ;;  %v15270_v54 = vcombine.high %v4312_v61, %v4316_v9  ;;  %v15269_v41 = vcombine.low %v4312_v61, %v4316_v9  ;;  %v4344_v60 = vld [vmem:[#allocation10 + $0x150] sm:$0xff] }
 0x5a4   :  { %v15271_v50 = vcombine.low %v4313_v26, %v4317_v13  ;;  %v4348_v32 = vld [vmem:[#allocation10 + $0x170] sm:$0xff]  ;;  %v4353_v9 = vld [vmem:[#allocation10 + $0x198] sm:$0xff] }
 0x5a5   :  { %10758 = vmatpush1.bf16.msra.mxu0 %v16249_v52  ;;  %v4320_v52 = vld [vmem:[#allocation10 + $0x90] sm:$0xff] }
 0x5a6   :  { %11086 = vmatpush1.bf16.msra.mxu1 %v16251_v42  ;;  %10759 = vmatprep.subr.bf16.mxu0 %v16258_v43  ;;  %v15272_v42 = vcombine.high %v4313_v26, %v4317_v13  ;;  %v4321_v43 = vld [vmem:[#allocation10 + $0x98] sm:$0xff]  ;;  %v15278_v55 = vcombine.high %v4320_v52, %v4324_v57  ;;  %v4356_v61 = vld [vmem:[#allocation10 + $0x1b0] sm:$0xff]  ;;  %v15301_v26 = vcombine.low %v4344_v60, %v4348_v32 }
 0x5a7   :  { %11087 = vmatprep.subr.bf16.mxu1 %v16260_v47  ;;  %v4325_v47 = vld [vmem:[#allocation10 + $0xb8] sm:$0xff]  ;;  %v15303_v13 = vcombine.low %v4345_v19, %v4349_v21 }
 0x5a8   :  { %v15280_v2 = vcombine.high %v4321_v43, %v4325_v47 }
 0x5a9   :  { %10760 = vmatpush1.bf16.msra.mxu0 %v16257_v3  ;;  %v4332_v3 = vld [vmem:[#allocation10 + $0xf0] sm:$0xff] }
 0x5aa   :  { %11088 = vmatpush1.bf16.msra.mxu1 %v16259_v22  ;;  %10761 = vmatprep.subr.bf16.mxu0 %v16266_v0  ;;  %v4333_v22 = vld [vmem:[#allocation10 + $0xf8] sm:$0xff]  ;;  %v15277_v0 = vcombine.low %v4320_v52, %v4324_v57  ;;  %v15286_v8 = vcombine.high %v4328_v56, %v4332_v3  ;;  %v4360_v52 = vld [vmem:[#allocation10 + $0x1d0] sm:$0xff] }
 0x5ab   :  { %11089 = vmatprep.subr.bf16.mxu1 %v16268_v1  ;;  %v15279_v1 = vcombine.low %v4321_v43, %v4325_v47  ;;  %v15288_v5 = vcombine.high %v4329_v58, %v4333_v22  ;;  %v4364_v57 = vld [vmem:[#allocation10 + $0x1f0] sm:$0xff]  ;;  %v4365_v43 = vld [vmem:[#allocation10 + $0x1f8] sm:$0xff] }
 0x5ad   :  { %10762 = vmatpush1.bf16.msra.mxu0 %v16265_v16  ;;  %v4337_v16 = vld [vmem:[#allocation10 + $0x118] sm:$0xff] }
 0x5ae   :  { %11090 = vmatpush1.bf16.msra.mxu1 %v16267_v20  ;;  %10763 = vmatprep.subr.bf16.mxu0 %v16274_v34  ;;  %v15287_v20 = vcombine.low %v4329_v58, %v4333_v22  ;;  %v15294_v34 = vcombine.high %v4336_v6, %v4340_v11  ;;  %v15295_v63 = vcombine.low %v4337_v16, %v4341_v17  ;;  %v4373_v58 = vld [vmem:[#allocation10 + $0x238] sm:$0xff] }
 0x5af   :  { %11091 = vmatprep.subr.bf16.mxu1 %v16276_v24  ;;  %v15296_v24 = vcombine.high %v4337_v16, %v4341_v17  ;;  %v15317_v22 = vcombine.low %v4360_v52, %v4364_v57  ;;  %v4381_v16 = vld [vmem:[#allocation10 + $0x278] sm:$0xff] }
 0x5b1   :  { %10764 = vmatpush1.bf16.msra.mxu0 %v16273_v4  ;;  %v15293_v4 = vcombine.low %v4336_v6, %v4340_v11  ;;  %v4380_v6 = vld [vmem:[#allocation10 + $0x270] sm:$0xff]  ;;  %v4377_v11 = vld [vmem:[#allocation10 + $0x258] sm:$0xff] }
 0x5b2   :  { %11092 = vmatpush1.bf16.msra.mxu1 %v16275_v23  ;;  %11102 = vmatprep.subr.bf16.mxu0 %v15262_v33  ;;  %v15302_v23 = vcombine.high %v4344_v60, %v4348_v32  ;;  %v15304_v33 = vcombine.high %v4345_v19, %v4349_v21  ;;  %v4388_v60 = vld [vmem:[#allocation10 + $0x2b0] sm:$0xff]  ;;  %v4385_v32 = vld [vmem:[#allocation10 + $0x298] sm:$0xff] }
 0x5b3   :  { %11430 = vmatprep.subr.bf16.mxu1 %v15264_v25  ;;  %v4352_v25 = vld [vmem:[#allocation10 + $0x190] sm:$0xff]  ;;  %v4389_v19 = vld [vmem:[#allocation10 + $0x2b8] sm:$0xff] }
 0x5b4   :  { %10766 = vmatmul.mubr.bf16.vlgmr.msra.gmra.mrb[16].mxu0 %v18624_v29  ;;  %v15309_v47 = vcombine.low %v4352_v25, %v4356_v61 }
 0x5b5   :  { %11094 = vmatmul.mubr.bf16.vlgmr.msra.gmra.mrb[16].mxu1 %v18624_v29  ;;  %11103 = vmatpush1.bf16.msra.mxu0 %v15261_v39  ;;  %v4357_v39 = vld [vmem:[#allocation10 + $0x1b8] sm:$0xff] }
 0x5b6   :  { %11134 = vmatprep.mubr.bf16.mxu0 %v18438_v62  ;;  %11431 = vmatpush1.bf16.msra.mxu1 %v15263_v30  ;;  %v15310_v30 = vcombine.high %v4352_v25, %v4356_v61  ;;  %v4396_v25 = vld [vmem:[#allocation10 + $0x2f0] sm:$0xff]  ;;  %v4393_v61 = vld [vmem:[#allocation10 + $0x2d8] sm:$0xff] }
 0x5b7   :  { %11462 = vmatprep.mubr.bf16.mxu1 %v18438_v62  ;;  %11104 = vmatprep.subr.bf16.mxu0 %v15270_v54  ;;  %v15285_v62 = vcombine.low %v4328_v56, %v4332_v3  ;;  %v15312_v54 = vcombine.high %v4353_v9, %v4357_v39  ;;  %v4372_v56 = vld [vmem:[#allocation10 + $0x230] sm:$0xff]  ;;  %v4369_v3 = vld [vmem:[#allocation10 + $0x218] sm:$0xff] }
 0x5b8   :  { %11432 = vmatprep.subr.bf16.mxu1 %v15272_v42  ;;  %v4361_v42 = vld [vmem:[#allocation10 + $0x1d8] sm:$0xff] }
 0x5b9   :  { %11105 = vmatpush1.bf16.msra.mxu0 %v15269_v41  ;;  %v15311_v41 = vcombine.low %v4353_v9, %v4357_v39  ;;  %v4397_v9 = vld [vmem:[#allocation10 + $0x2f8] sm:$0xff] }
 0x5ba   :  { %11433 = vmatpush1.bf16.msra.mxu1 %v15271_v50  ;;  %11106 = vmatprep.subr.bf16.mxu0 %v15278_v55  ;;  %v15318_v50 = vcombine.high %v4360_v52, %v4364_v57  ;;  %v15320_v55 = vcombine.high %v4361_v42, %v4365_v43  ;;  %v4404_v52 = vld [vmem:[#allocation10 + $0x330] sm:$0xff]  ;;  %v4401_v57 = vld [vmem:[#allocation10 + $0x318] sm:$0xff] }
 0x5bb   :  { %11434 = vmatprep.subr.bf16.mxu1 %v15280_v2  ;;  %v4368_v2 = vld [vmem:[#allocation10 + $0x210] sm:$0xff] }
 0x5bc   :  { %v15325_v17 = vcombine.low %v4368_v2, %v4372_v56 }
 0x5bd   :  { %11107 = vmatpush1.bf16.msra.mxu0 %v15277_v0  ;;  %v15319_v0 = vcombine.low %v4361_v42, %v4365_v43  ;;  %v4405_v42 = vld [vmem:[#allocation10 + $0x338] sm:$0xff] }
 0x5be   :  { %11435 = vmatpush1.bf16.msra.mxu1 %v15279_v1  ;;  %11108 = vmatprep.subr.bf16.mxu0 %v15286_v8  ;;  %v15326_v1 = vcombine.high %v4368_v2, %v4372_v56  ;;  %v15328_v8 = vcombine.high %v4369_v3, %v4373_v58  ;;  %v4412_v2 = vld [vmem:[#allocation10 + $0x370] sm:$0xff]  ;;  %v4409_v56 = vld [vmem:[#allocation10 + $0x358] sm:$0xff] }
 0x5bf   :  { %11436 = vmatprep.subr.bf16.mxu1 %v15288_v5  ;;  %v4376_v5 = vld [vmem:[#allocation10 + $0x250] sm:$0xff] }
 0x5c0   :  { %v15333_v21 = vcombine.low %v4376_v5, %v4380_v6 }
 0x5c1   :  { %11109 = vmatpush1.bf16.msra.mxu0 %v15285_v62  ;;  %v15327_v62 = vcombine.low %v4369_v3, %v4373_v58  ;;  %v4413_v3 = vld [vmem:[#allocation10 + $0x378] sm:$0xff] }
 0x5c2   :  { %11437 = vmatpush1.bf16.msra.mxu1 %v15287_v20  ;;  %11110 = vmatprep.subr.bf16.mxu0 %v15294_v34  ;;  %v15334_v20 = vcombine.high %v4376_v5, %v4380_v6  ;;  %v15336_v34 = vcombine.high %v4377_v11, %v4381_v16  ;;  %v4420_v5 = vld [vmem:[#allocation10 + $0x3b0] sm:$0xff]  ;;  %v4417_v6 = vld [vmem:[#allocation10 + $0x398] sm:$0xff] }
 0x5c3   :  { %11438 = vmatprep.subr.bf16.mxu1 %v15296_v24  ;;  %v4384_v24 = vld [vmem:[#allocation10 + $0x290] sm:$0xff] }
 0x5c4   :  { %v15341_v39 = vcombine.low %v4384_v24, %v4388_v60 }
 0x5c5   :  { %11111 = vmatpush1.bf16.msra.mxu0 %v15293_v4  ;;  %v15335_v4 = vcombine.low %v4377_v11, %v4381_v16  ;;  %v4421_v11 = vld [vmem:[#allocation10 + $0x3b8] sm:$0xff] }
 0x5c6   :  { %11439 = vmatpush1.bf16.msra.mxu1 %v15295_v63  ;;  %11112 = vmatprep.subr.bf16.mxu0 %v15302_v23  ;;  %v15342_v63 = vcombine.high %v4384_v24, %v4388_v60  ;;  %v15344_v23 = vcombine.high %v4385_v32, %v4389_v19  ;;  %v4428_v24 = vld [vmem:[#allocation10 + $0x3f0] sm:$0xff]  ;;  %v4425_v60 = vld [vmem:[#allocation10 + $0x3d8] sm:$0xff] }
 0x5c7   :  { %11440 = vmatprep.subr.bf16.mxu1 %v15304_v33  ;;  %v4392_v33 = vld [vmem:[#allocation10 + $0x2d0] sm:$0xff] }
 0x5c8   :  { %v15349_v43 = vcombine.low %v4392_v33, %v4396_v25 }
 0x5c9   :  { %11113 = vmatpush1.bf16.msra.mxu0 %v15301_v26  ;;  %v15343_v26 = vcombine.low %v4385_v32, %v4389_v19  ;;  %v4429_v32 = vld [vmem:[#allocation10 + $0x3f8] sm:$0xff] }
 0x5ca   :  { %11441 = vmatpush1.bf16.msra.mxu1 %v15303_v13  ;;  %11114 = vmatprep.subr.bf16.mxu0 %v15310_v30  ;;  %v15350_v13 = vcombine.high %v4392_v33, %v4396_v25  ;;  %v15352_v30 = vcombine.high %v4393_v61, %v4397_v9  ;;  %v4436_v33 = vld [vmem:[#allocation10 + $0x430] sm:$0xff]  ;;  %v4433_v25 = vld [vmem:[#allocation10 + $0x418] sm:$0xff] }
 0x5cb   :  { %11442 = vmatprep.subr.bf16.mxu1 %v15312_v54  ;;  %v4400_v54 = vld [vmem:[#allocation10 + $0x310] sm:$0xff] }
 0x5cc   :  { %v15357_v58 = vcombine.low %v4400_v54, %v4404_v52 }
 0x5cd   :  { %11115 = vmatpush1.bf16.msra.mxu0 %v15309_v47  ;;  %v15351_v47 = vcombine.low %v4393_v61, %v4397_v9  ;;  %v4437_v61 = vld [vmem:[#allocation10 + $0x438] sm:$0xff] }
 0x5ce   :  { %11443 = vmatpush1.bf16.msra.mxu1 %v15311_v41  ;;  %11116 = vmatprep.subr.bf16.mxu0 %v15318_v50  ;;  %v15358_v41 = vcombine.high %v4400_v54, %v4404_v52  ;;  %v15360_v50 = vcombine.high %v4401_v57, %v4405_v42  ;;  %v4444_v54 = vld [vmem:[#allocation10 + $0x470] sm:$0xff] }
 0x5cf   :  { %11444 = vmatprep.subr.bf16.mxu1 %v15320_v55  ;;  %v4408_v55 = vld [vmem:[#allocation10 + $0x350] sm:$0xff] }
 0x5d0   :  { %v15365_v16 = vcombine.low %v4408_v55, %v4412_v2 }
 0x5d1   :  { %11117 = vmatpush1.bf16.msra.mxu0 %v15317_v22  ;;  %v15359_v22 = vcombine.low %v4401_v57, %v4405_v42  ;;  %v4441_v57 = vld [vmem:[#allocation10 + $0x458] sm:$0xff] }
 0x5d2   :  { %11445 = vmatpush1.bf16.msra.mxu1 %v15319_v0  ;;  %11118 = vmatprep.subr.bf16.mxu0 %v15326_v1  ;;  %v15366_v0 = vcombine.high %v4408_v55, %v4412_v2  ;;  %v15368_v1 = vcombine.high %v4409_v56, %v4413_v3  ;;  %v4445_v42 = vld [vmem:[#allocation10 + $0x478] sm:$0xff] }
 0x5d3   :  { %11446 = vmatprep.subr.bf16.mxu1 %v15328_v8  ;;  %v4416_v8 = vld [vmem:[#allocation10 + $0x390] sm:$0xff]  ;;  %v15400_v55 = vcombine.high %v4441_v57, %v4445_v42  ;;  %v4449_v2 = vld [vmem:[#allocation10 + $0x498] sm:$0xff] }
 0x5d4   :  { %v15373_v19 = vcombine.low %v4416_v8, %v4420_v5 }
 0x5d5   :  { %11119 = vmatpush1.bf16.msra.mxu0 %v15325_v17  ;;  %v15367_v17 = vcombine.low %v4409_v56, %v4413_v3  ;;  %v4453_v56 = vld [vmem:[#allocation10 + $0x4b8] sm:$0xff] }
 0x5d6   :  { %11447 = vmatpush1.bf16.msra.mxu1 %v15327_v62  ;;  %11120 = vmatprep.subr.bf16.mxu0 %v15334_v20  ;;  %v15374_v62 = vcombine.high %v4416_v8, %v4420_v5  ;;  %v15376_v20 = vcombine.high %v4417_v6, %v4421_v11  ;;  %v4460_v8 = vld [vmem:[#allocation10 + $0x4f0] sm:$0xff]  ;;  %v4457_v5 = vld [vmem:[#allocation10 + $0x4d8] sm:$0xff] }
 0x5d7   :  { %11448 = vmatprep.subr.bf16.mxu1 %v15336_v34  ;;  %v4424_v34 = vld [vmem:[#allocation10 + $0x3d0] sm:$0xff] }
 0x5d8   :  { %v15381_v9 = vcombine.low %v4424_v34, %v4428_v24 }
 0x5d9   :  { %11121 = vmatpush1.bf16.msra.mxu0 %v15333_v21  ;;  %v15375_v21 = vcombine.low %v4417_v6, %v4421_v11  ;;  %v4461_v6 = vld [vmem:[#allocation10 + $0x4f8] sm:$0xff] }
 0x5da   :  { %11449 = vmatpush1.bf16.msra.mxu1 %v15335_v4  ;;  %11122 = vmatprep.subr.bf16.mxu0 %v15342_v63  ;;  %v15382_v4 = vcombine.high %v4424_v34, %v4428_v24  ;;  %v15384_v63 = vcombine.high %v4425_v60, %v4429_v32  ;;  %v4465_v34 = vld [vmem:[#allocation10 + $0x518] sm:$0xff] }
 0x5db   :  { %11450 = vmatprep.subr.bf16.mxu1 %v15344_v23  ;;  %v4432_v23 = vld [vmem:[#allocation10 + $0x410] sm:$0xff]  ;;  %v4469_v24 = vld [vmem:[#allocation10 + $0x538] sm:$0xff] }
 0x5dc   :  { %v15389_v52 = vcombine.low %v4432_v23, %v4436_v33 }
 0x5dd   :  { %11123 = vmatpush1.bf16.msra.mxu0 %v15341_v39  ;;  %v15383_v39 = vcombine.low %v4425_v60, %v4429_v32  ;;  %v15415_v60 = vcombine.low %v4457_v5, %v4461_v6 }
 0x5de   :  { %11451 = vmatpush1.bf16.msra.mxu1 %v15343_v26  ;;  %11124 = vmatprep.subr.bf16.mxu0 %v15350_v13  ;;  %v15390_v26 = vcombine.high %v4432_v23, %v4436_v33  ;;  %v15392_v13 = vcombine.high %v4433_v25, %v4437_v61  ;;  %v4477_v23 = vld [vmem:[#allocation10 + $0x578] sm:$0xff] }
 0x5df   :  { %11452 = vmatprep.subr.bf16.mxu1 %v15352_v30  ;;  %v4440_v30 = vld [vmem:[#allocation10 + $0x450] sm:$0xff] }
 0x5e0   :  { %v15397_v3 = vcombine.low %v4440_v30, %v4444_v54 }
 0x5e1   :  { %11125 = vmatpush1.bf16.msra.mxu0 %v15349_v43  ;;  %v15391_v43 = vcombine.low %v4433_v25, %v4437_v61  ;;  %v15423_v25 = vcombine.low %v4465_v34, %v4469_v24 }
 0x5e2   :  { %11453 = vmatpush1.bf16.msra.mxu1 %v15351_v47  ;;  %11126 = vmatprep.subr.bf16.mxu0 %v15358_v41  ;;  %v15398_v47 = vcombine.high %v4440_v30, %v4444_v54  ;;  %v4448_v41 = vld [vmem:[#allocation10 + $0x490] sm:$0xff]  ;;  %v4485_v30 = vld [vmem:[#allocation10 + $0x5b8] sm:$0xff] }
 0x5e3   :  { %11454 = vmatprep.subr.bf16.mxu1 %v15360_v50  ;;  %v4452_v50 = vld [vmem:[#allocation10 + $0x4b0] sm:$0xff] }
 0x5e4   :  { %v15405_v11 = vcombine.low %v4448_v41, %v4452_v50 }
 0x5e5   :  { %11127 = vmatpush1.bf16.msra.mxu0 %v15357_v58  ;;  %v15399_v58 = vcombine.low %v4441_v57, %v4445_v42 }
 0x5e6   :  { %11455 = vmatpush1.bf16.msra.mxu1 %v15359_v22  ;;  %11128 = vmatprep.subr.bf16.mxu0 %v15366_v0  ;;  %v15406_v22 = vcombine.high %v4448_v41, %v4452_v50  ;;  %v15408_v0 = vcombine.high %v4449_v2, %v4453_v56  ;;  %v4489_v41 = vld [vmem:[#allocation10 + $0x5d8] sm:$0xff] }
 0x5e7   :  { %11456 = vmatprep.subr.bf16.mxu1 %v15368_v1  ;;  %v4456_v1 = vld [vmem:[#allocation10 + $0x4d0] sm:$0xff]  ;;  %v4493_v50 = vld [vmem:[#allocation10 + $0x5f8] sm:$0xff] }
 0x5e9   :  { %11129 = vmatpush1.bf16.msra.mxu0 %v15365_v16  ;;  %v15414_v16 = vcombine.high %v4456_v1, %v4460_v8 }
 0x5ea   :  { %11457 = vmatpush1.bf16.msra.mxu1 %v15367_v17  ;;  %11130 = vmatprep.subr.bf16.mxu0 %v15374_v62  ;;  %v15416_v17 = vcombine.high %v4457_v5, %v4461_v6  ;;  %v4464_v62 = vld [vmem:[#allocation10 + $0x510] sm:$0xff]  ;;  %v15447_v5 = vcombine.low %v4489_v41, %v4493_v50 }
 0x5eb   :  { %11458 = vmatprep.subr.bf16.mxu1 %v15376_v20  ;;  %v4468_v20 = vld [vmem:[#allocation10 + $0x530] sm:$0xff] }
 0x5ec   :  { %v15422_v32 = vcombine.high %v4464_v62, %v4468_v20  ;;  %v15421_v33 = vcombine.low %v4464_v62, %v4468_v20  ;;  %v4509_v62 = vld [vmem:[#allocation10 + $0x678] sm:$0xff] }
 0x5ed   :  { %11131 = vmatpush1.bf16.msra.mxu0 %v15373_v19  ;;  %v15424_v19 = vcombine.high %v4465_v34, %v4469_v24 }
 0x5ee   :  { %11459 = vmatpush1.bf16.msra.mxu1 %v15375_v21  ;;  %11132 = vmatprep.subr.bf16.mxu0 %v15382_v4  ;;  %v4472_v21 = vld [vmem:[#allocation10 + $0x550] sm:$0xff] }
 0x5ef   :  { %11460 = vmatprep.subr.bf16.mxu1 %v15384_v63  ;;  %v4476_v4 = vld [vmem:[#allocation10 + $0x570] sm:$0xff]  ;;  %v4473_v63 = vld [vmem:[#allocation10 + $0x558] sm:$0xff] }
 0x5f0   :  { %v15430_v61 = vcombine.high %v4472_v21, %v4476_v4  ;;  %v15429_v54 = vcombine.low %v4472_v21, %v4476_v4  ;;  %v4517_v21 = vld [vmem:[#allocation10 + $0x6b8] sm:$0xff] }
 0x5f1   :  { %11133 = vmatpush1.bf16.msra.mxu0 %v15381_v9  ;;  %v15432_v9 = vcombine.high %v4473_v63, %v4477_v23 }
 0x5f2   :  { %11461 = vmatpush1.bf16.msra.mxu1 %v15383_v39  ;;  %11143 = vmatprep.subr.bf16.mxu0 %v15390_v26  ;;  %v4480_v39 = vld [vmem:[#allocation10 + $0x590] sm:$0xff] }
 0x5f3   :  { %11471 = vmatprep.subr.bf16.mxu1 %v15392_v13  ;;  %v4484_v26 = vld [vmem:[#allocation10 + $0x5b0] sm:$0xff]  ;;  %v4481_v13 = vld [vmem:[#allocation10 + $0x598] sm:$0xff] }
 0x5f4   :  { %11135 = vmatmul.mubr.bf16.vlgmr.msra.gmra.mrb[20].mxu0 %v18460_v40  ;;  %v15438_v57 = vcombine.high %v4480_v39, %v4484_v26  ;;  %v15440_v42 = vcombine.high %v4481_v13, %v4485_v30 }
 0x5f5   :  { %11463 = vmatmul.mubr.bf16.vlgmr.msra.gmra.mrb[20].mxu1 %v18460_v40  ;;  %11144 = vmatpush1.bf16.msra.mxu0 %v15389_v52  ;;  %v15407_v40 = vcombine.low %v4449_v2, %v4453_v56  ;;  %v15431_v52 = vcombine.low %v4473_v63, %v4477_v23  ;;  %v15439_v2 = vcombine.low %v4481_v13, %v4485_v30 }
 0x5f6   :  { %11175 = vmatprep.mubr.bf16.mxu0 %v18462_v45  ;;  %11472 = vmatpush1.bf16.msra.mxu1 %v15391_v43  ;;  %v4488_v43 = vld [vmem:[#allocation10 + $0x5d0] sm:$0xff] }
 0x5f7   :  { %11503 = vmatprep.mubr.bf16.mxu1 %v18462_v45  ;;  %11145 = vmatprep.subr.bf16.mxu0 %v15398_v47  ;;  %v15413_v45 = vcombine.low %v4456_v1, %v4460_v8  ;;  %v4492_v47 = vld [vmem:[#allocation10 + $0x5f0] sm:$0xff]  ;;  %v4501_v1 = vld [vmem:[#allocation10 + $0x638] sm:$0xff] }
 0x5f8   :  { %11473 = vmatprep.subr.bf16.mxu1 %v15400_v55  ;;  %v15437_v55 = vcombine.low %v4480_v39, %v4484_v26  ;;  %v15446_v56 = vcombine.high %v4488_v43, %v4492_v47  ;;  %v15445_v8 = vcombine.low %v4488_v43, %v4492_v47  ;;  %v4525_v39 = vld [vmem:[#allocation10 + $0x6f8] sm:$0xff] }
 0x5f9   :  { %11146 = vmatpush1.bf16.msra.mxu0 %v15397_v3  ;;  %v15448_v3 = vcombine.high %v4489_v41, %v4493_v50  ;;  %v4533_v43 = vld [vmem:[#allocation10 + $0x738] sm:$0xff] }
 0x5fa   :  { %11474 = vmatpush1.bf16.msra.mxu1 %v15399_v58  ;;  %11147 = vmatprep.subr.bf16.mxu0 %v15406_v22  ;;  %v4496_v58 = vld [vmem:[#allocation10 + $0x610] sm:$0xff] }
 0x5fb   :  { %11475 = vmatprep.subr.bf16.mxu1 %v15408_v0  ;;  %v4500_v22 = vld [vmem:[#allocation10 + $0x630] sm:$0xff]  ;;  %v4497_v0 = vld [vmem:[#allocation10 + $0x618] sm:$0xff] }
 0x5fc   :  { %v15454_v6 = vcombine.high %v4496_v58, %v4500_v22  ;;  %v15453_v20 = vcombine.low %v4496_v58, %v4500_v22  ;;  %v15455_v34 = vcombine.low %v4497_v0, %v4501_v1  ;;  %v4541_v58 = vld [vmem:[#allocation10 + $0x778] sm:$0xff] }
 0x5fd   :  { %11148 = vmatpush1.bf16.msra.mxu0 %v15405_v11  ;;  %v15456_v11 = vcombine.high %v4497_v0, %v4501_v1 }
 0x5fe   :  { %11476 = vmatpush1.bf16.msra.mxu1 %v15407_v40  ;;  %11149 = vmatprep.subr.bf16.mxu0 %v15414_v16  ;;  %v4504_v40 = vld [vmem:[#allocation10 + $0x650] sm:$0xff] }
 0x5ff   :  { %11477 = vmatprep.subr.bf16.mxu1 %v15416_v17  ;;  %v4508_v16 = vld [vmem:[#allocation10 + $0x670] sm:$0xff]  ;;  %v4505_v17 = vld [vmem:[#allocation10 + $0x658] sm:$0xff] }
 0x600   :  { %v15462_v24 = vcombine.high %v4504_v40, %v4508_v16  ;;  %v15461_v4 = vcombine.low %v4504_v40, %v4508_v16  ;;  %v15463_v63 = vcombine.low %v4505_v17, %v4509_v62  ;;  %v4549_v40 = vld [vmem:[#allocation10 + $0x7b8] sm:$0xff] }
 0x601   :  { %11150 = vmatpush1.bf16.msra.mxu0 %v15413_v45  ;;  %v15464_v45 = vcombine.high %v4505_v17, %v4509_v62 }
 0x602   :  { %11478 = vmatpush1.bf16.msra.mxu1 %v15415_v60  ;;  %11151 = vmatprep.subr.bf16.mxu0 %v15422_v32  ;;  %v4512_v60 = vld [vmem:[#allocation10 + $0x690] sm:$0xff] }
 0x603   :  { %11479 = vmatprep.subr.bf16.mxu1 %v15424_v19  ;;  %v4516_v32 = vld [vmem:[#allocation10 + $0x6b0] sm:$0xff]  ;;  %v4513_v19 = vld [vmem:[#allocation10 + $0x698] sm:$0xff] }
 0x604   :  { %v15470_v23 = vcombine.high %v4512_v60, %v4516_v32  ;;  %v15469_v26 = vcombine.low %v4512_v60, %v4516_v32  ;;  %v15471_v13 = vcombine.low %v4513_v19, %v4517_v21  ;;  %v4557_v60 = vld [vmem:[#allocation10 + $0x7f8] sm:$0xff] }
 0x605   :  { %11152 = vmatpush1.bf16.msra.mxu0 %v15421_v33  ;;  %v15472_v33 = vcombine.high %v4513_v19, %v4517_v21 }
 0x606   :  { %11480 = vmatpush1.bf16.msra.mxu1 %v15423_v25  ;;  %11153 = vmatprep.subr.bf16.mxu0 %v15430_v61  ;;  %v4520_v25 = vld [vmem:[#allocation10 + $0x6d0] sm:$0xff] }
 0x607   :  { %11481 = vmatprep.subr.bf16.mxu1 %v15432_v9  ;;  %v4524_v61 = vld [vmem:[#allocation10 + $0x6f0] sm:$0xff]  ;;  %v4521_v9 = vld [vmem:[#allocation10 + $0x6d8] sm:$0xff] }
 0x608   :  { %v15478_v30 = vcombine.high %v4520_v25, %v4524_v61  ;;  %v15477_v47 = vcombine.low %v4520_v25, %v4524_v61  ;;  %v15479_v41 = vcombine.low %v4521_v9, %v4525_v39  ;;  %v4565_v25 = vld [vmem:[#allocation10 + $0x838] sm:$0xff] }
 0x609   :  { %11154 = vmatpush1.bf16.msra.mxu0 %v15429_v54  ;;  %v15480_v54 = vcombine.high %v4521_v9, %v4525_v39 }
 0x60a   :  { %11482 = vmatpush1.bf16.msra.mxu1 %v15431_v52  ;;  %11155 = vmatprep.subr.bf16.mxu0 %v15438_v57  ;;  %v4528_v52 = vld [vmem:[#allocation10 + $0x710] sm:$0xff] }
 0x60b   :  { %11483 = vmatprep.subr.bf16.mxu1 %v15440_v42  ;;  %v4532_v57 = vld [vmem:[#allocation10 + $0x730] sm:$0xff]  ;;  %v4529_v42 = vld [vmem:[#allocation10 + $0x718] sm:$0xff] }
 0x60c   :  { %v15486_v50 = vcombine.high %v4528_v52, %v4532_v57  ;;  %v15485_v22 = vcombine.low %v4528_v52, %v4532_v57  ;;  %v15487_v0 = vcombine.low %v4529_v42, %v4533_v43  ;;  %v4569_v52 = vld [vmem:[#allocation10 + $0x858] sm:$0xff] }
 0x60d   :  { %11156 = vmatpush1.bf16.msra.mxu0 %v15437_v55  ;;  %v15488_v55 = vcombine.high %v4529_v42, %v4533_v43  ;;  %v4573_v57 = vld [vmem:[#allocation10 + $0x878] sm:$0xff] }
 0x60e   :  { %11484 = vmatpush1.bf16.msra.mxu1 %v15439_v2  ;;  %11157 = vmatprep.subr.bf16.mxu0 %v15446_v56  ;;  %v4536_v2 = vld [vmem:[#allocation10 + $0x750] sm:$0xff] }
 0x60f   :  { %11485 = vmatprep.subr.bf16.mxu1 %v15448_v3  ;;  %v4540_v56 = vld [vmem:[#allocation10 + $0x770] sm:$0xff]  ;;  %v4537_v3 = vld [vmem:[#allocation10 + $0x758] sm:$0xff] }
 0x610   :  { %v15494_v1 = vcombine.high %v4536_v2, %v4540_v56  ;;  %v15493_v16 = vcombine.low %v4536_v2, %v4540_v56  ;;  %v15495_v17 = vcombine.low %v4537_v3, %v4541_v58  ;;  %v4581_v2 = vld [vmem:[#allocation10 + $0x8b8] sm:$0xff] }
 0x611   :  { %11158 = vmatpush1.bf16.msra.mxu0 %v15445_v8  ;;  %v15496_v8 = vcombine.high %v4537_v3, %v4541_v58  ;;  %v15527_v3 = vcombine.low %v4569_v52, %v4573_v57 }
 0x612   :  { %11486 = vmatpush1.bf16.msra.mxu1 %v15447_v5  ;;  %11159 = vmatprep.subr.bf16.mxu0 %v15454_v6  ;;  %v4544_v5 = vld [vmem:[#allocation10 + $0x790] sm:$0xff] }
 0x613   :  { %11487 = vmatprep.subr.bf16.mxu1 %v15456_v11  ;;  %v4548_v6 = vld [vmem:[#allocation10 + $0x7b0] sm:$0xff]  ;;  %v4545_v11 = vld [vmem:[#allocation10 + $0x798] sm:$0xff] }
 0x614   :  { %v15502_v62 = vcombine.high %v4544_v5, %v4548_v6  ;;  %v15501_v32 = vcombine.low %v4544_v5, %v4548_v6  ;;  %v15503_v19 = vcombine.low %v4545_v11, %v4549_v40  ;;  %v4589_v5 = vld [vmem:[#allocation10 + $0x8f8] sm:$0xff] }
 0x615   :  { %11160 = vmatpush1.bf16.msra.mxu0 %v15453_v20  ;;  %v15504_v20 = vcombine.high %v4545_v11, %v4549_v40 }
 0x616   :  { %11488 = vmatpush1.bf16.msra.mxu1 %v15455_v34  ;;  %11161 = vmatprep.subr.bf16.mxu0 %v15462_v24  ;;  %v4552_v34 = vld [vmem:[#allocation10 + $0x7d0] sm:$0xff] }
 0x617   :  { %11489 = vmatprep.subr.bf16.mxu1 %v15464_v45  ;;  %v4556_v24 = vld [vmem:[#allocation10 + $0x7f0] sm:$0xff]  ;;  %v4553_v45 = vld [vmem:[#allocation10 + $0x7d8] sm:$0xff] }
 0x618   :  { %v15510_v21 = vcombine.high %v4552_v34, %v4556_v24  ;;  %v15509_v61 = vcombine.low %v4552_v34, %v4556_v24  ;;  %v15511_v9 = vcombine.low %v4553_v45, %v4557_v60 }
 0x619   :  { %11162 = vmatpush1.bf16.msra.mxu0 %v15461_v4  ;;  %v15512_v4 = vcombine.high %v4553_v45, %v4557_v60  ;;  %v4600_v60 = vld [vmem:[#allocation10 + $0x950] sm:$0xff] }
 0x61a   :  { %11490 = vmatpush1.bf16.msra.mxu1 %v15463_v63  ;;  %11163 = vmatprep.subr.bf16.mxu0 %v15470_v23  ;;  %v4560_v63 = vld [vmem:[#allocation10 + $0x810] sm:$0xff] }
 0x61b   :  { %11491 = vmatprep.subr.bf16.mxu1 %v15472_v33  ;;  %v4564_v23 = vld [vmem:[#allocation10 + $0x830] sm:$0xff]  ;;  %v4561_v33 = vld [vmem:[#allocation10 + $0x818] sm:$0xff] }
 0x61c   :  { %v15518_v39 = vcombine.high %v4560_v63, %v4564_v23  ;;  %v15519_v42 = vcombine.low %v4561_v33, %v4565_v25 }
 0x61d   :  { %11164 = vmatpush1.bf16.msra.mxu0 %v15469_v26  ;;  %v15520_v26 = vcombine.high %v4561_v33, %v4565_v25  ;;  %v4608_v25 = vld [vmem:[#allocation10 + $0x990] sm:$0xff] }
 0x61e   :  { %11492 = vmatpush1.bf16.msra.mxu1 %v15471_v13  ;;  %11165 = vmatprep.subr.bf16.mxu0 %v15478_v30  ;;  %v4568_v13 = vld [vmem:[#allocation10 + $0x850] sm:$0xff] }
 0x61f   :  { %11493 = vmatprep.subr.bf16.mxu1 %v15480_v54  ;;  %v4572_v30 = vld [vmem:[#allocation10 + $0x870] sm:$0xff]  ;;  %v15517_v54 = vcombine.low %v4560_v63, %v4564_v23 }
 0x620   :  { %v15526_v43 = vcombine.high %v4568_v13, %v4572_v30  ;;  %v15525_v56 = vcombine.low %v4568_v13, %v4572_v30 }
 0x621   :  { %11166 = vmatpush1.bf16.msra.mxu0 %v15477_v47  ;;  %v4576_v47 = vld [vmem:[#allocation10 + $0x890] sm:$0xff] }
 0x622   :  { %11494 = vmatpush1.bf16.msra.mxu1 %v15479_v41  ;;  %11167 = vmatprep.subr.bf16.mxu0 %v15486_v50  ;;  %v4580_v41 = vld [vmem:[#allocation10 + $0x8b0] sm:$0xff]  ;;  %v15528_v50 = vcombine.high %v4569_v52, %v4573_v57 }
 0x623   :  { %11495 = vmatprep.subr.bf16.mxu1 %v15488_v55  ;;  %v4577_v55 = vld [vmem:[#allocation10 + $0x898] sm:$0xff]  ;;  %v15534_v58 = vcombine.high %v4576_v47, %v4580_v41  ;;  %v15533_v6 = vcombine.low %v4576_v47, %v4580_v41  ;;  %v4616_v52 = vld [vmem:[#allocation10 + $0x9d0] sm:$0xff] }
 0x624   :  { %v4620_v57 = vld [vmem:[#allocation10 + $0x9f0] sm:$0xff] }
 0x625   :  { %11168 = vmatpush1.bf16.msra.mxu0 %v15485_v22  ;;  %v15536_v22 = vcombine.high %v4577_v55, %v4581_v2 }
 0x626   :  { %11496 = vmatpush1.bf16.msra.mxu1 %v15487_v0  ;;  %11169 = vmatprep.subr.bf16.mxu0 %v15494_v1  ;;  %v4584_v0 = vld [vmem:[#allocation10 + $0x8d0] sm:$0xff] }
 0x627   :  { %11497 = vmatprep.subr.bf16.mxu1 %v15496_v8  ;;  %v4588_v1 = vld [vmem:[#allocation10 + $0x8f0] sm:$0xff]  ;;  %v4585_v8 = vld [vmem:[#allocation10 + $0x8d8] sm:$0xff] }
 0x628   :  { %v15542_v11 = vcombine.high %v4584_v0, %v4588_v1  ;;  %v15544_v40 = vcombine.high %v4585_v8, %v4589_v5  ;;  %v15543_v34 = vcombine.low %v4585_v8, %v4589_v5  ;;  %v4632_v5 = vld [vmem:[#allocation10 + $0xa50] sm:$0xff] }
 0x629   :  { %11170 = vmatpush1.bf16.msra.mxu0 %v15493_v16  ;;  %v4592_v16 = vld [vmem:[#allocation10 + $0x910] sm:$0xff] }
 0x62a   :  { %11498 = vmatpush1.bf16.msra.mxu1 %v15495_v17  ;;  %11171 = vmatprep.subr.bf16.mxu0 %v15502_v62  ;;  %v4596_v17 = vld [vmem:[#allocation10 + $0x930] sm:$0xff]  ;;  %v4593_v62 = vld [vmem:[#allocation10 + $0x918] sm:$0xff] }
 0x62b   :  { %11499 = vmatprep.subr.bf16.mxu1 %v15504_v20  ;;  %v4597_v20 = vld [vmem:[#allocation10 + $0x938] sm:$0xff]  ;;  %v15550_v24 = vcombine.high %v4592_v16, %v4596_v17 }
 0x62c   :  { %v15552_v45 = vcombine.high %v4593_v62, %v4597_v20  ;;  %v15551_v63 = vcombine.low %v4593_v62, %v4597_v20  ;;  %v4640_v20 = vld [vmem:[#allocation10 + $0xa90] sm:$0xff] }
 0x62d   :  { %11172 = vmatpush1.bf16.msra.mxu0 %v15501_v32  ;;  %v4604_v32 = vld [vmem:[#allocation10 + $0x970] sm:$0xff] }
 0x62e   :  { %11500 = vmatpush1.bf16.msra.mxu1 %v15503_v19  ;;  %11173 = vmatprep.subr.bf16.mxu0 %v15510_v21  ;;  %v4601_v19 = vld [vmem:[#allocation10 + $0x958] sm:$0xff]  ;;  %v15558_v23 = vcombine.high %v4600_v60, %v4604_v32 }
 0x62f   :  { %11501 = vmatprep.subr.bf16.mxu1 %v15512_v4  ;;  %v4605_v21 = vld [vmem:[#allocation10 + $0x978] sm:$0xff]  ;;  %v15549_v4 = vcombine.low %v4592_v16, %v4596_v17 }
 0x630   :  { %v15560_v33 = vcombine.high %v4601_v19, %v4605_v21  ;;  %v15559_v13 = vcombine.low %v4601_v19, %v4605_v21  ;;  %v4648_v21 = vld [vmem:[#allocation10 + $0xad0] sm:$0xff] }
 0x631   :  { %11174 = vmatpush1.bf16.msra.mxu0 %v15509_v61  ;;  %v4612_v61 = vld [vmem:[#allocation10 + $0x9b0] sm:$0xff] }
 0x632   :  { %11502 = vmatpush1.bf16.msra.mxu1 %v15511_v9  ;;  %11184 = vmatprep.subr.bf16.mxu0 %v15518_v39  ;;  %v4609_v9 = vld [vmem:[#allocation10 + $0x998] sm:$0xff]  ;;  %v15566_v30 = vcombine.high %v4608_v25, %v4612_v61  ;;  %v15565_v47 = vcombine.low %v4608_v25, %v4612_v61 }
 0x633   :  { %11512 = vmatprep.subr.bf16.mxu1 %v15520_v26  ;;  %v4613_v39 = vld [vmem:[#allocation10 + $0x9b8] sm:$0xff]  ;;  %v15557_v26 = vcombine.low %v4600_v60, %v4604_v32 }
 0x634   :  { %11176 = vmatmul.mubr.bf16.vlgmr.msra.gmra.mrb[20].mxu0 %v18492_v44  ;;  %v15567_v41 = vcombine.low %v4609_v9, %v4613_v39 }
 0x635   :  { %11504 = vmatmul.mubr.bf16.vlgmr.msra.gmra.mrb[20].mxu1 %v18492_v44  ;;  %11185 = vmatpush1.bf16.msra.mxu0 %v15517_v54  ;;  %v15535_v44 = vcombine.low %v4577_v55, %v4581_v2  ;;  %v15568_v54 = vcombine.high %v4609_v9, %v4613_v39  ;;  %v4624_v2 = vld [vmem:[#allocation10 + $0xa10] sm:$0xff] }
 0x636   :  { %11216 = vmatprep.mubr.bf16.mxu0 %v18494_v53  ;;  %11513 = vmatpush1.bf16.msra.mxu1 %v15519_v42  ;;  %v4617_v42 = vld [vmem:[#allocation10 + $0x9d8] sm:$0xff]  ;;  %v4656_v39 = vld [vmem:[#allocation10 + $0xb10] sm:$0xff] }
 0x637   :  { %11544 = vmatprep.mubr.bf16.mxu1 %v18494_v53  ;;  %11186 = vmatprep.subr.bf16.mxu0 %v15526_v43  ;;  %v15541_v53 = vcombine.low %v4584_v0, %v4588_v1  ;;  %v4621_v43 = vld [vmem:[#allocation10 + $0x9f8] sm:$0xff] }
 0x638   :  { %11514 = vmatprep.subr.bf16.mxu1 %v15528_v50  ;;  %v15574_v50 = vcombine.high %v4616_v52, %v4620_v57  ;;  %v15576_v55 = vcombine.high %v4617_v42, %v4621_v43  ;;  %v15575_v0 = vcombine.low %v4617_v42, %v4621_v43  ;;  %v4664_v43 = vld [vmem:[#allocation10 + $0xb50] sm:$0xff] }
 0x639   :  { %11187 = vmatpush1.bf16.msra.mxu0 %v15525_v56  ;;  %v4628_v56 = vld [vmem:[#allocation10 + $0xa30] sm:$0xff] }
 0x63a   :  { %11515 = vmatpush1.bf16.msra.mxu1 %v15527_v3  ;;  %11188 = vmatprep.subr.bf16.mxu0 %v15534_v58  ;;  %v4625_v3 = vld [vmem:[#allocation10 + $0xa18] sm:$0xff]  ;;  %v15582_v1 = vcombine.high %v4624_v2, %v4628_v56 }
 0x63b   :  { %11516 = vmatprep.subr.bf16.mxu1 %v15536_v22  ;;  %v4629_v58 = vld [vmem:[#allocation10 + $0xa38] sm:$0xff]  ;;  %v15573_v22 = vcombine.low %v4616_v52, %v4620_v57 }
 0x63c   :  { %v15584_v8 = vcombine.high %v4625_v3, %v4629_v58  ;;  %v15583_v16 = vcombine.low %v4625_v3, %v4629_v58  ;;  %v4672_v58 = vld [vmem:[#allocation10 + $0xb90] sm:$0xff] }
 0x63d   :  { %11189 = vmatpush1.bf16.msra.mxu0 %v15533_v6  ;;  %v4636_v6 = vld [vmem:[#allocation10 + $0xa70] sm:$0xff] }
 0x63e   :  { %11517 = vmatpush1.bf16.msra.mxu1 %v15535_v44  ;;  %11190 = vmatprep.subr.bf16.mxu0 %v15542_v11  ;;  %v4633_v44 = vld [vmem:[#allocation10 + $0xa58] sm:$0xff]  ;;  %v15590_v17 = vcombine.high %v4632_v5, %v4636_v6 }
 0x63f   :  { %11518 = vmatprep.subr.bf16.mxu1 %v15544_v40  ;;  %v4637_v11 = vld [vmem:[#allocation10 + $0xa78] sm:$0xff]  ;;  %v15581_v40 = vcombine.low %v4624_v2, %v4628_v56 }
 0x640   :  { %v15592_v62 = vcombine.high %v4633_v44, %v4637_v11  ;;  %v15591_v60 = vcombine.low %v4633_v44, %v4637_v11  ;;  %v4680_v11 = vld [vmem:[#allocation10 + $0xbd0] sm:$0xff] }
 0x641   :  { %11191 = vmatpush1.bf16.msra.mxu0 %v15541_v53  ;;  %v4644_v53 = vld [vmem:[#allocation10 + $0xab0] sm:$0xff] }
 0x642   :  { %11519 = vmatpush1.bf16.msra.mxu1 %v15543_v34  ;;  %11192 = vmatprep.subr.bf16.mxu0 %v15550_v24  ;;  %v4641_v34 = vld [vmem:[#allocation10 + $0xa98] sm:$0xff]  ;;  %v15598_v32 = vcombine.high %v4640_v20, %v4644_v53 }
 0x643   :  { %11520 = vmatprep.subr.bf16.mxu1 %v15552_v45  ;;  %v4645_v24 = vld [vmem:[#allocation10 + $0xab8] sm:$0xff]  ;;  %v15589_v45 = vcombine.low %v4632_v5, %v4636_v6 }
 0x644   :  { %v15600_v19 = vcombine.high %v4641_v34, %v4645_v24  ;;  %v15599_v25 = vcombine.low %v4641_v34, %v4645_v24  ;;  %v4688_v24 = vld [vmem:[#allocation10 + $0xc10] sm:$0xff] }
 0x645   :  { %11193 = vmatpush1.bf16.msra.mxu0 %v15549_v4  ;;  %v4652_v4 = vld [vmem:[#allocation10 + $0xaf0] sm:$0xff] }
 0x646   :  { %11521 = vmatpush1.bf16.msra.mxu1 %v15551_v63  ;;  %11194 = vmatprep.subr.bf16.mxu0 %v15558_v23  ;;  %v4649_v63 = vld [vmem:[#allocation10 + $0xad8] sm:$0xff]  ;;  %v15606_v61 = vcombine.high %v4648_v21, %v4652_v4 }
 0x647   :  { %11522 = vmatprep.subr.bf16.mxu1 %v15560_v33  ;;  %v4653_v23 = vld [vmem:[#allocation10 + $0xaf8] sm:$0xff]  ;;  %v15597_v33 = vcombine.low %v4640_v20, %v4644_v53 }
 0x648   :  { %v15608_v9 = vcombine.high %v4649_v63, %v4653_v23  ;;  %v15607_v52 = vcombine.low %v4649_v63, %v4653_v23  ;;  %v4696_v23 = vld [vmem:[#allocation10 + $0xc50] sm:$0xff] }
 0x649   :  { %11195 = vmatpush1.bf16.msra.mxu0 %v15557_v26  ;;  %v4660_v26 = vld [vmem:[#allocation10 + $0xb30] sm:$0xff] }
 0x64a   :  { %11523 = vmatpush1.bf16.msra.mxu1 %v15559_v13  ;;  %11196 = vmatprep.subr.bf16.mxu0 %v15566_v30  ;;  %v4657_v13 = vld [vmem:[#allocation10 + $0xb18] sm:$0xff]  ;;  %v15614_v57 = vcombine.high %v4656_v39, %v4660_v26 }
 0x64b   :  { %11524 = vmatprep.subr.bf16.mxu1 %v15568_v54  ;;  %v4661_v30 = vld [vmem:[#allocation10 + $0xb38] sm:$0xff]  ;;  %v15605_v54 = vcombine.low %v4648_v21, %v4652_v4 }
 0x64c   :  { %v15616_v42 = vcombine.high %v4657_v13, %v4661_v30  ;;  %v15615_v2 = vcombine.low %v4657_v13, %v4661_v30  ;;  %v4704_v13 = vld [vmem:[#allocation10 + $0xc90] sm:$0xff] }
 0x64d   :  { %11197 = vmatpush1.bf16.msra.mxu0 %v15565_v47  ;;  %v4668_v47 = vld [vmem:[#allocation10 + $0xb70] sm:$0xff] }
 0x64e   :  { %11525 = vmatpush1.bf16.msra.mxu1 %v15567_v41  ;;  %11198 = vmatprep.subr.bf16.mxu0 %v15574_v50  ;;  %v4665_v41 = vld [vmem:[#allocation10 + $0xb58] sm:$0xff]  ;;  %v15622_v56 = vcombine.high %v4664_v43, %v4668_v47  ;;  %v4708_v30 = vld [vmem:[#allocation10 + $0xcb0] sm:$0xff] }
 0x64f   :  { %11526 = vmatprep.subr.bf16.mxu1 %v15576_v55  ;;  %v4669_v50 = vld [vmem:[#allocation10 + $0xb78] sm:$0xff]  ;;  %v15613_v55 = vcombine.low %v4656_v39, %v4660_v26 }
 0x650   :  { %v15624_v3 = vcombine.high %v4665_v41, %v4669_v50  ;;  %v15623_v5 = vcombine.low %v4665_v41, %v4669_v50  ;;  %v4712_v50 = vld [vmem:[#allocation10 + $0xcd0] sm:$0xff] }
 0x651   :  { %11199 = vmatpush1.bf16.msra.mxu0 %v15573_v22  ;;  %v4676_v22 = vld [vmem:[#allocation10 + $0xbb0] sm:$0xff] }
 0x652   :  { %11527 = vmatpush1.bf16.msra.mxu1 %v15575_v0  ;;  %11200 = vmatprep.subr.bf16.mxu0 %v15582_v1  ;;  %v4673_v0 = vld [vmem:[#allocation10 + $0xb98] sm:$0xff]  ;;  %v15630_v6 = vcombine.high %v4672_v58, %v4676_v22 }
 0x653   :  { %11528 = vmatprep.subr.bf16.mxu1 %v15584_v8  ;;  %v4677_v1 = vld [vmem:[#allocation10 + $0xbb8] sm:$0xff]  ;;  %v15621_v8 = vcombine.low %v4664_v43, %v4668_v47  ;;  %v15662_v47 = vcombine.high %v4704_v13, %v4708_v30 }
 0x654   :  { %v15632_v44 = vcombine.high %v4673_v0, %v4677_v1  ;;  %v15631_v20 = vcombine.low %v4673_v0, %v4677_v1  ;;  %v4720_v0 = vld [vmem:[#allocation10 + $0xd10] sm:$0xff] }
 0x655   :  { %11201 = vmatpush1.bf16.msra.mxu0 %v15581_v40  ;;  %v4684_v40 = vld [vmem:[#allocation10 + $0xbf0] sm:$0xff] }
 0x656   :  { %11529 = vmatpush1.bf16.msra.mxu1 %v15583_v16  ;;  %11202 = vmatprep.subr.bf16.mxu0 %v15590_v17  ;;  %v4681_v16 = vld [vmem:[#allocation10 + $0xbd8] sm:$0xff]  ;;  %v15638_v53 = vcombine.high %v4680_v11, %v4684_v40  ;;  %v4724_v1 = vld [vmem:[#allocation10 + $0xd30] sm:$0xff] }
 0x657   :  { %11530 = vmatprep.subr.bf16.mxu1 %v15592_v62  ;;  %v4685_v17 = vld [vmem:[#allocation10 + $0xbf8] sm:$0xff]  ;;  %v15629_v62 = vcombine.low %v4672_v58, %v4676_v22 }
 0x658   :  { %v15640_v34 = vcombine.high %v4681_v16, %v4685_v17  ;;  %v15639_v21 = vcombine.low %v4681_v16, %v4685_v17  ;;  %v4732_v16 = vld [vmem:[#allocation10 + $0xd70] sm:$0xff]  ;;  %v4729_v17 = vld [vmem:[#allocation10 + $0xd58] sm:$0xff] }
 0x659   :  { %11203 = vmatpush1.bf16.msra.mxu0 %v15589_v45  ;;  %v4692_v45 = vld [vmem:[#allocation10 + $0xc30] sm:$0xff] }
 0x65a   :  { %11531 = vmatpush1.bf16.msra.mxu1 %v15591_v60  ;;  %11204 = vmatprep.subr.bf16.mxu0 %v15598_v32  ;;  %v4689_v60 = vld [vmem:[#allocation10 + $0xc18] sm:$0xff]  ;;  %v15646_v4 = vcombine.high %v4688_v24, %v4692_v45 }
 0x65b   :  { %11532 = vmatprep.subr.bf16.mxu1 %v15600_v19  ;;  %v4693_v32 = vld [vmem:[#allocation10 + $0xc38] sm:$0xff]  ;;  %v15637_v19 = vcombine.low %v4680_v11, %v4684_v40  ;;  %v4728_v40 = vld [vmem:[#allocation10 + $0xd50] sm:$0xff] }
 0x65c   :  { %v15648_v63 = vcombine.high %v4689_v60, %v4693_v32  ;;  %v15647_v39 = vcombine.low %v4689_v60, %v4693_v32  ;;  %v4740_v60 = vld [vmem:[#allocation10 + $0xdb0] sm:$0xff]  ;;  %v4737_v32 = vld [vmem:[#allocation10 + $0xd98] sm:$0xff] }
 0x65d   :  { %11205 = vmatpush1.bf16.msra.mxu0 %v15597_v33  ;;  %v4700_v33 = vld [vmem:[#allocation10 + $0xc70] sm:$0xff] }
 0x65e   :  { %11533 = vmatpush1.bf16.msra.mxu1 %v15599_v25  ;;  %11206 = vmatprep.subr.bf16.mxu0 %v15606_v61  ;;  %v15645_v25 = vcombine.low %v4688_v24, %v4692_v45  ;;  %v4697_v61 = vld [vmem:[#allocation10 + $0xc58] sm:$0xff]  ;;  %v15654_v26 = vcombine.high %v4696_v23, %v4700_v33  ;;  %v4736_v45 = vld [vmem:[#allocation10 + $0xd90] sm:$0xff] }
 0x65f   :  { %11534 = vmatprep.subr.bf16.mxu1 %v15608_v9  ;;  %v4701_v9 = vld [vmem:[#allocation10 + $0xc78] sm:$0xff] }
 0x660   :  { %v15655_v43 = vcombine.low %v4697_v61, %v4701_v9 }
 0x661   :  { %11207 = vmatpush1.bf16.msra.mxu0 %v15605_v54  ;;  %v15656_v54 = vcombine.high %v4697_v61, %v4701_v9  ;;  %v4748_v61 = vld [vmem:[#allocation10 + $0xdf0] sm:$0xff] }
 0x662   :  { %11535 = vmatpush1.bf16.msra.mxu1 %v15607_v52  ;;  %11208 = vmatprep.subr.bf16.mxu0 %v15614_v57  ;;  %v4705_v52 = vld [vmem:[#allocation10 + $0xc98] sm:$0xff] }
 0x663   :  { %11536 = vmatprep.subr.bf16.mxu1 %v15616_v42  ;;  %v4709_v57 = vld [vmem:[#allocation10 + $0xcb8] sm:$0xff]  ;;  %v15653_v42 = vcombine.low %v4696_v23, %v4700_v33 }
 0x664   :  { %v15664_v41 = vcombine.high %v4705_v52, %v4709_v57 }
 0x665   :  { %11209 = vmatpush1.bf16.msra.mxu0 %v15613_v55  ;;  %v4716_v55 = vld [vmem:[#allocation10 + $0xcf0] sm:$0xff] }
 0x666   :  { %11537 = vmatpush1.bf16.msra.mxu1 %v15615_v2  ;;  %11210 = vmatprep.subr.bf16.mxu0 %v15622_v56  ;;  %v4713_v2 = vld [vmem:[#allocation10 + $0xcd8] sm:$0xff]  ;;  %v15670_v58 = vcombine.high %v4712_v50, %v4716_v55 }
 0x667   :  { %11538 = vmatprep.subr.bf16.mxu1 %v15624_v3  ;;  %v4717_v56 = vld [vmem:[#allocation10 + $0xcf8] sm:$0xff]  ;;  %v15661_v3 = vcombine.low %v4704_v13, %v4708_v30 }
 0x668   :  { %v15672_v22 = vcombine.high %v4713_v2, %v4717_v56  ;;  %v4749_v13 = vld [vmem:[#allocation10 + $0xdf8] sm:$0xff] }
 0x669   :  { %11211 = vmatpush1.bf16.msra.mxu0 %v15621_v8  ;;  %v4721_v8 = vld [vmem:[#allocation10 + $0xd18] sm:$0xff] }
 0x66a   :  { %11539 = vmatpush1.bf16.msra.mxu1 %v15623_v5  ;;  %11212 = vmatprep.subr.bf16.mxu0 %v15630_v6  ;;  %v4725_v5 = vld [vmem:[#allocation10 + $0xd38] sm:$0xff]  ;;  %v15671_v6 = vcombine.low %v4713_v2, %v4717_v56  ;;  %v4756_v2 = vld [vmem:[#allocation10 + $0xe30] sm:$0xff] }
 0x66b   :  { %11540 = vmatprep.subr.bf16.mxu1 %v15632_v44  ;;  %v15678_v44 = vcombine.high %v4720_v0, %v4724_v1  ;;  %v15680_v11 = vcombine.high %v4721_v8, %v4725_v5  ;;  %v4753_v56 = vld [vmem:[#allocation10 + $0xe18] sm:$0xff] }
 0x66d   :  { %11213 = vmatpush1.bf16.msra.mxu0 %v15629_v62  ;;  %v4733_v62 = vld [vmem:[#allocation10 + $0xd78] sm:$0xff] }
 0x66e   :  { %11541 = vmatpush1.bf16.msra.mxu1 %v15631_v20  ;;  %11214 = vmatprep.subr.bf16.mxu0 %v15638_v53  ;;  %v15677_v20 = vcombine.low %v4720_v0, %v4724_v1  ;;  %v15679_v53 = vcombine.low %v4721_v8, %v4725_v5  ;;  %v15688_v24 = vcombine.high %v4729_v17, %v4733_v62  ;;  %v4760_v1 = vld [vmem:[#allocation10 + $0xe50] sm:$0xff]  ;;  %v4761_v5 = vld [vmem:[#allocation10 + $0xe58] sm:$0xff] }
 0x66f   :  { %11542 = vmatprep.subr.bf16.mxu1 %v15640_v34  ;;  %v15686_v34 = vcombine.high %v4728_v40, %v4732_v16  ;;  %v4764_v8 = vld [vmem:[#allocation10 + $0xe70] sm:$0xff] }
 0x671   :  { %11215 = vmatpush1.bf16.msra.mxu0 %v15637_v19  ;;  %v4741_v19 = vld [vmem:[#allocation10 + $0xdb8] sm:$0xff] }
 0x672   :  { %11543 = vmatpush1.bf16.msra.mxu1 %v15639_v21  ;;  %11225 = vmatprep.subr.bf16.mxu0 %v15646_v4  ;;  %v15685_v21 = vcombine.low %v4728_v40, %v4732_v16  ;;  %v15687_v4 = vcombine.low %v4729_v17, %v4733_v62  ;;  %v15696_v33 = vcombine.high %v4737_v32, %v4741_v19  ;;  %v4768_v16 = vld [vmem:[#allocation10 + $0xe90] sm:$0xff]  ;;  %v4769_v62 = vld [vmem:[#allocation10 + $0xe98] sm:$0xff] }
 0x673   :  { %11553 = vmatprep.subr.bf16.mxu1 %v15648_v63  ;;  %v15694_v63 = vcombine.high %v4736_v45, %v4740_v60  ;;  %v4772_v17 = vld [vmem:[#allocation10 + $0xeb0] sm:$0xff] }
 0x674   :  { %11217 = vmatmul.mubr.bf16.vlgmr.msra.gmra.mrb[20].mxu0 %v18520_v51 }
 0x675   :  { %11545 = vmatmul.mubr.bf16.vlgmr.msra.gmra.mrb[20].mxu1 %v18520_v51  ;;  %11226 = vmatpush1.bf16.msra.mxu0 %v15645_v25  ;;  %v15663_v51 = vcombine.low %v4705_v52, %v4709_v57  ;;  %v4744_v25 = vld [vmem:[#allocation10 + $0xdd0] sm:$0xff]  ;;  %v15693_v52 = vcombine.low %v4736_v45, %v4740_v60 }
 0x676   :  { %11257 = vmatprep.mubr.bf16.mxu0 %v18522_v59  ;;  %11554 = vmatpush1.bf16.msra.mxu1 %v15647_v39  ;;  %v4776_v60 = vld [vmem:[#allocation10 + $0xed0] sm:$0xff] }
 0x677   :  { %11585 = vmatprep.mubr.bf16.mxu1 %v18522_v59  ;;  %11227 = vmatprep.subr.bf16.mxu0 %v15654_v26  ;;  %v15669_v59 = vcombine.low %v4712_v50, %v4716_v55  ;;  %v4745_v26 = vld [vmem:[#allocation10 + $0xdd8] sm:$0xff]  ;;  %v4752_v55 = vld [vmem:[#allocation10 + $0xe10] sm:$0xff] }
 0x678   :  { %11555 = vmatprep.subr.bf16.mxu1 %v15656_v54  ;;  %v15704_v50 = vcombine.high %v4745_v26, %v4749_v13 }
 0x679   :  { %11228 = vmatpush1.bf16.msra.mxu0 %v15653_v42 }
 0x67a   :  { %11556 = vmatpush1.bf16.msra.mxu1 %v15655_v43  ;;  %11229 = vmatprep.subr.bf16.mxu0 %v15662_v47  ;;  %v15695_v43 = vcombine.low %v4737_v32, %v4741_v19  ;;  %v15702_v47 = vcombine.high %v4744_v25, %v4748_v61  ;;  %v4780_v32 = vld [vmem:[#allocation10 + $0xef0] sm:$0xff]  ;;  %v4777_v19 = vld [vmem:[#allocation10 + $0xed8] sm:$0xff] }
 0x67b   :  { %11557 = vmatprep.subr.bf16.mxu1 %v15664_v41 }
 0x67d   :  { %11230 = vmatpush1.bf16.msra.mxu0 %v15661_v3  ;;  %v4757_v3 = vld [vmem:[#allocation10 + $0xe38] sm:$0xff] }
 0x67e   :  { %11558 = vmatpush1.bf16.msra.mxu1 %v15663_v51  ;;  %11231 = vmatprep.subr.bf16.mxu0 %v15670_v58  ;;  %v15701_v51 = vcombine.low %v4744_v25, %v4748_v61  ;;  %v15703_v58 = vcombine.low %v4745_v26, %v4749_v13  ;;  %v15712_v0 = vcombine.high %v4753_v56, %v4757_v3  ;;  %v4784_v61 = vld [vmem:[#allocation10 + $0xf10] sm:$0xff]  ;;  %v4785_v13 = vld [vmem:[#allocation10 + $0xf18] sm:$0xff] }
 0x67f   :  { %11559 = vmatprep.subr.bf16.mxu1 %v15672_v22  ;;  %v15710_v22 = vcombine.high %v4752_v55, %v4756_v2  ;;  %v4788_v26 = vld [vmem:[#allocation10 + $0xf30] sm:$0xff] }
 0x681   :  { %11232 = vmatpush1.bf16.msra.mxu0 %v15669_v59  ;;  %v4765_v59 = vld [vmem:[#allocation10 + $0xe78] sm:$0xff] }
 0x682   :  { %11560 = vmatpush1.bf16.msra.mxu1 %v15671_v6  ;;  %11233 = vmatprep.subr.bf16.mxu0 %v15678_v44  ;;  %v15709_v6 = vcombine.low %v4752_v55, %v4756_v2  ;;  %v15711_v44 = vcombine.low %v4753_v56, %v4757_v3  ;;  %v15720_v40 = vcombine.high %v4761_v5, %v4765_v59  ;;  %v4797_v55 = vld [vmem:[#allocation10 + $0xf78] sm:$0xff] }
 0x683   :  { %11561 = vmatprep.subr.bf16.mxu1 %v15680_v11  ;;  %v15718_v11 = vcombine.high %v4760_v1, %v4764_v8  ;;  %v15741_v2 = vcombine.low %v4784_v61, %v4788_v26 }
 0x685   :  { %11234 = vmatpush1.bf16.msra.mxu0 %v15677_v20  ;;  %v4773_v20 = vld [vmem:[#allocation10 + $0xeb8] sm:$0xff] }
 0x686   :  { %11562 = vmatpush1.bf16.msra.mxu1 %v15679_v53  ;;  %11235 = vmatprep.subr.bf16.mxu0 %v15686_v34  ;;  %v15717_v53 = vcombine.low %v4760_v1, %v4764_v8  ;;  %v15719_v34 = vcombine.low %v4761_v5, %v4765_v59  ;;  %v15728_v45 = vcombine.high %v4769_v62, %v4773_v20  ;;  %v4805_v1 = vld [vmem:[#allocation10 + $0xfb8] sm:$0xff] }
 0x687   :  { %v18642_v23 = vpop.f32.mrb[16].mxu0  ;;  %11563 = vmatprep.subr.bf16.mxu1 %v15688_v24  ;;  %v15726_v24 = vcombine.high %v4768_v16, %v4772_v17 }
 0x688   :  { %v18644_v9 = vpop.f32.mrb[16].mxu1  ;;  %v18646_v39 = vpop.f32.mrb[17].mxu0 }
 0x689   :  { %v18648_v30 = vpop.f32.mrb[17].mxu1  ;;  %v10771_v54 = vpop.f32.mrb[18].mxu0  ;;  %11236 = vmatpush1.bf16.msra.mxu0 %v15685_v21  ;;  %v4781_v21 = vld [vmem:[#allocation10 + $0xef8] sm:$0xff] }
 0x68a   :  { %v11099_v57 = vpop.f32.mrb[18].mxu1  ;;  %11564 = vmatpush1.bf16.msra.mxu1 %v15687_v4  ;;  %v10772_v42 = vpop.f32.mrb[19].mxu0  ;;  %11237 = vmatprep.subr.bf16.mxu0 %v15694_v63  ;;  %v15725_v4 = vcombine.low %v4768_v16, %v4772_v17  ;;  %v15727_v63 = vcombine.low %v4769_v62, %v4773_v20  ;;  %v15736_v25 = vcombine.high %v4777_v19, %v4781_v21  ;;  %v4789_v54 = vld [vmem:[#allocation10 + $0xf38] sm:$0xff] }
 0x68b   :  { %v11100_v41 = vpop.f32.mrb[19].mxu1  ;;  %11565 = vmatprep.subr.bf16.mxu1 %v15696_v33  ;;  %v15734_v33 = vcombine.high %v4776_v60, %v4780_v32  ;;  %v15735_v57 = vcombine.low %v4777_v19, %v4781_v21  ;;  %v15742_v42 = vcombine.high %v4784_v61, %v4788_v26  ;;  %v15743_v56 = vcombine.low %v4785_v13, %v4789_v54  ;;  %v4813_v16 = vld [vmem:[#allocation10 + $0xff8] sm:$0xff] }
 0x68c   :  { %v4796_v41 = vld [vmem:[#allocation10 + $0xf70] sm:$0xff]  ;;  %v4825_v61 = vld [vmem:[#allocation10 + $0x1058] sm:$0xff] }
 0x68d   :  { %11238 = vmatpush1.bf16.msra.mxu0 %v15693_v52  ;;  %v15733_v52 = vcombine.low %v4776_v60, %v4780_v32  ;;  %v4821_v60 = vld [vmem:[#allocation10 + $0x1038] sm:$0xff] }
 0x68e   :  { %11566 = vmatpush1.bf16.msra.mxu1 %v15695_v43  ;;  %11239 = vmatprep.subr.bf16.mxu0 %v15702_v47  ;;  %v15744_v43 = vcombine.high %v4785_v13, %v4789_v54  ;;  %v4792_v47 = vld [vmem:[#allocation10 + $0xf50] sm:$0xff]  ;;  %v4829_v26 = vld [vmem:[#allocation10 + $0x1078] sm:$0xff] }
 0x68f   :  { %11567 = vmatprep.subr.bf16.mxu1 %v15704_v50  ;;  %v4793_v50 = vld [vmem:[#allocation10 + $0xf58] sm:$0xff]  ;;  %v15750_v3 = vcombine.high %v4792_v47, %v4796_v41  ;;  %v15749_v8 = vcombine.low %v4792_v47, %v4796_v41 }
 0x690   :  { %v15751_v5 = vcombine.low %v4793_v50, %v4797_v55  ;;  %v4837_v47 = vld [vmem:[#allocation10 + $0x10b8] sm:$0xff] }
 0x691   :  { %11240 = vmatpush1.bf16.msra.mxu0 %v15701_v51  ;;  %v15752_v51 = vcombine.high %v4793_v50, %v4797_v55  ;;  %v15783_v50 = vcombine.low %v4825_v61, %v4829_v26 }
 0x692   :  { %11568 = vmatpush1.bf16.msra.mxu1 %v15703_v58  ;;  %11241 = vmatprep.subr.bf16.mxu0 %v15710_v22  ;;  %v4800_v58 = vld [vmem:[#allocation10 + $0xf90] sm:$0xff] }
 0x693   :  { %11569 = vmatprep.subr.bf16.mxu1 %v15712_v0  ;;  %v4804_v22 = vld [vmem:[#allocation10 + $0xfb0] sm:$0xff]  ;;  %v4801_v0 = vld [vmem:[#allocation10 + $0xf98] sm:$0xff] }
 0x694   :  { %v15758_v59 = vcombine.high %v4800_v58, %v4804_v22  ;;  %v15757_v17 = vcombine.low %v4800_v58, %v4804_v22  ;;  %v15759_v62 = vcombine.low %v4801_v0, %v4805_v1  ;;  %v4845_v58 = vld [vmem:[#allocation10 + $0x10f8] sm:$0xff] }
 0x695   :  { %11242 = vmatpush1.bf16.msra.mxu0 %v15709_v6  ;;  %v15760_v6 = vcombine.high %v4801_v0, %v4805_v1 }
 0x696   :  { %11570 = vmatpush1.bf16.msra.mxu1 %v15711_v44  ;;  %11243 = vmatprep.subr.bf16.mxu0 %v15718_v11  ;;  %v4808_v44 = vld [vmem:[#allocation10 + $0xfd0] sm:$0xff] }
 0x697   :  { %11571 = vmatprep.subr.bf16.mxu1 %v15720_v40  ;;  %v4812_v11 = vld [vmem:[#allocation10 + $0xff0] sm:$0xff]  ;;  %v4809_v40 = vld [vmem:[#allocation10 + $0xfd8] sm:$0xff] }
 0x698   :  { %v15766_v20 = vcombine.high %v4808_v44, %v4812_v11  ;;  %v15765_v32 = vcombine.low %v4808_v44, %v4812_v11  ;;  %v15767_v19 = vcombine.low %v4809_v40, %v4813_v16 }
 0x699   :  { %11244 = vmatpush1.bf16.msra.mxu0 %v15717_v53  ;;  %v15768_v53 = vcombine.high %v4809_v40, %v4813_v16  ;;  %v4856_v16 = vld [vmem:[#allocation10 + $0x1150] sm:$0xff] }
 0x69a   :  { %11572 = vmatpush1.bf16.msra.mxu1 %v15719_v34  ;;  %11245 = vmatprep.subr.bf16.mxu0 %v15726_v24  ;;  %v4816_v34 = vld [vmem:[#allocation10 + $0x1010] sm:$0xff] }
 0x69b   :  { %11573 = vmatprep.subr.bf16.mxu1 %v15728_v45  ;;  %v4820_v24 = vld [vmem:[#allocation10 + $0x1030] sm:$0xff]  ;;  %v4817_v45 = vld [vmem:[#allocation10 + $0x1018] sm:$0xff] }
 0x69c   :  { %v15774_v21 = vcombine.high %v4816_v34, %v4820_v24  ;;  %v15775_v13 = vcombine.low %v4817_v45, %v4821_v60 }
 0x69d   :  { %11246 = vmatpush1.bf16.msra.mxu0 %v15725_v4  ;;  %v15776_v4 = vcombine.high %v4817_v45, %v4821_v60  ;;  %v4864_v60 = vld [vmem:[#allocation10 + $0x1190] sm:$0xff] }
 0x69e   :  { %11574 = vmatpush1.bf16.msra.mxu1 %v15727_v63  ;;  %11247 = vmatprep.subr.bf16.mxu0 %v15734_v33  ;;  %v4824_v63 = vld [vmem:[#allocation10 + $0x1050] sm:$0xff] }
 0x69f   :  { %11575 = vmatprep.subr.bf16.mxu1 %v15736_v25  ;;  %v4828_v33 = vld [vmem:[#allocation10 + $0x1070] sm:$0xff]  ;;  %v15773_v25 = vcombine.low %v4816_v34, %v4820_v24 }
 0x6a0   :  { %v15782_v54 = vcombine.high %v4824_v63, %v4828_v33  ;;  %v15781_v41 = vcombine.low %v4824_v63, %v4828_v33 }
 0x6a1   :  { %11248 = vmatpush1.bf16.msra.mxu0 %v15733_v52  ;;  %v4832_v52 = vld [vmem:[#allocation10 + $0x1090] sm:$0xff] }
 0x6a2   :  { %11576 = vmatpush1.bf16.msra.mxu1 %v15735_v57  ;;  %11249 = vmatprep.subr.bf16.mxu0 %v15742_v42  ;;  %v4836_v57 = vld [vmem:[#allocation10 + $0x10b0] sm:$0xff]  ;;  %v15784_v42 = vcombine.high %v4825_v61, %v4829_v26 }
 0x6a3   :  { %11577 = vmatprep.subr.bf16.mxu1 %v15744_v43  ;;  %v4833_v43 = vld [vmem:[#allocation10 + $0x1098] sm:$0xff]  ;;  %v15790_v55 = vcombine.high %v4832_v52, %v4836_v57  ;;  %v15789_v22 = vcombine.low %v4832_v52, %v4836_v57  ;;  %v4872_v61 = vld [vmem:[#allocation10 + $0x11d0] sm:$0xff] }
 0x6a4   :  { %v4876_v26 = vld [vmem:[#allocation10 + $0x11f0] sm:$0xff] }
 0x6a5   :  { %11250 = vmatpush1.bf16.msra.mxu0 %v15741_v2  ;;  %v15792_v2 = vcombine.high %v4833_v43, %v4837_v47 }
 0x6a6   :  { %11578 = vmatpush1.bf16.msra.mxu1 %v15743_v56  ;;  %11251 = vmatprep.subr.bf16.mxu0 %v15750_v3  ;;  %v4840_v56 = vld [vmem:[#allocation10 + $0x10d0] sm:$0xff] }
 0x6a7   :  { %11579 = vmatprep.subr.bf16.mxu1 %v15752_v51  ;;  %v4844_v3 = vld [vmem:[#allocation10 + $0x10f0] sm:$0xff]  ;;  %v4841_v51 = vld [vmem:[#allocation10 + $0x10d8] sm:$0xff] }
 0x6a8   :  { %v15798_v0 = vcombine.high %v4840_v56, %v4844_v3  ;;  %v15800_v1 = vcombine.high %v4841_v51, %v4845_v58  ;;  %v15799_v44 = vcombine.low %v4841_v51, %v4845_v58  ;;  %v4888_v58 = vld [vmem:[#allocation10 + $0x1250] sm:$0xff] }
 0x6a9   :  { %11252 = vmatpush1.bf16.msra.mxu0 %v15749_v8  ;;  %v4848_v8 = vld [vmem:[#allocation10 + $0x1110] sm:$0xff] }
 0x6aa   :  { %11580 = vmatpush1.bf16.msra.mxu1 %v15751_v5  ;;  %11253 = vmatprep.subr.bf16.mxu0 %v15758_v59  ;;  %v4852_v5 = vld [vmem:[#allocation10 + $0x1130] sm:$0xff]  ;;  %v4849_v59 = vld [vmem:[#allocation10 + $0x1118] sm:$0xff] }
 0x6ab   :  { %11581 = vmatprep.subr.bf16.mxu1 %v15760_v6  ;;  %v4853_v6 = vld [vmem:[#allocation10 + $0x1138] sm:$0xff]  ;;  %v15806_v11 = vcombine.high %v4848_v8, %v4852_v5 }
 0x6ac   :  { %v15808_v40 = vcombine.high %v4849_v59, %v4853_v6  ;;  %v15807_v34 = vcombine.low %v4849_v59, %v4853_v6  ;;  %v4896_v6 = vld [vmem:[#allocation10 + $0x1290] sm:$0xff] }
 0x6ad   :  { %11254 = vmatpush1.bf16.msra.mxu0 %v15757_v17  ;;  %v4860_v17 = vld [vmem:[#allocation10 + $0x1170] sm:$0xff] }
 0x6ae   :  { %11582 = vmatpush1.bf16.msra.mxu1 %v15759_v62  ;;  %11255 = vmatprep.subr.bf16.mxu0 %v15766_v20  ;;  %v4857_v62 = vld [vmem:[#allocation10 + $0x1158] sm:$0xff]  ;;  %v15814_v24 = vcombine.high %v4856_v16, %v4860_v17 }
 0x6af   :  { %11583 = vmatprep.subr.bf16.mxu1 %v15768_v53  ;;  %v4861_v20 = vld [vmem:[#allocation10 + $0x1178] sm:$0xff]  ;;  %v15805_v53 = vcombine.low %v4848_v8, %v4852_v5 }
 0x6b0   :  { %v15816_v45 = vcombine.high %v4857_v62, %v4861_v20  ;;  %v15815_v63 = vcombine.low %v4857_v62, %v4861_v20  ;;  %v4904_v20 = vld [vmem:[#allocation10 + $0x12d0] sm:$0xff] }
 0x6b1   :  { %11256 = vmatpush1.bf16.msra.mxu0 %v15765_v32  ;;  %v4868_v32 = vld [vmem:[#allocation10 + $0x11b0] sm:$0xff] }
 0x6b2   :  { %11584 = vmatpush1.bf16.msra.mxu1 %v15767_v19  ;;  %11266 = vmatprep.subr.bf16.mxu0 %v15774_v21  ;;  %v4865_v19 = vld [vmem:[#allocation10 + $0x1198] sm:$0xff]  ;;  %v15822_v33 = vcombine.high %v4864_v60, %v4868_v32  ;;  %v15821_v52 = vcombine.low %v4864_v60, %v4868_v32 }
 0x6b3   :  { %11594 = vmatprep.subr.bf16.mxu1 %v15776_v4  ;;  %v4869_v21 = vld [vmem:[#allocation10 + $0x11b8] sm:$0xff]  ;;  %v15813_v4 = vcombine.low %v4856_v16, %v4860_v17 }
 0x6b4   :  { %11258 = vmatmul.mubr.bf16.vlgmr.msra.gmra.mrb[20].mxu0 %v18553_v27  ;;  %v15823_v57 = vcombine.low %v4865_v19, %v4869_v21 }
 0x6b5   :  { %11586 = vmatmul.mubr.bf16.vlgmr.msra.gmra.mrb[20].mxu1 %v18553_v27  ;;  %11267 = vmatpush1.bf16.msra.mxu0 %v15773_v25  ;;  %v15791_v27 = vcombine.low %v4833_v43, %v4837_v47  ;;  %v15824_v25 = vcombine.high %v4865_v19, %v4869_v21  ;;  %v4880_v47 = vld [vmem:[#allocation10 + $0x1210] sm:$0xff] }
 0x6b6   :  { %11298 = vmatprep.mubr.bf16.mxu0 %v18555_v28  ;;  %11595 = vmatpush1.bf16.msra.mxu1 %v15775_v13  ;;  %v4873_v13 = vld [vmem:[#allocation10 + $0x11d8] sm:$0xff]  ;;  %v4912_v21 = vld [vmem:[#allocation10 + $0x1310] sm:$0xff] }
 0x6b7   :  { %11626 = vmatprep.mubr.bf16.mxu1 %v18555_v28  ;;  %11268 = vmatprep.subr.bf16.mxu0 %v15782_v54  ;;  %v15797_v28 = vcombine.low %v4840_v56, %v4844_v3  ;;  %v4877_v54 = vld [vmem:[#allocation10 + $0x11f8] sm:$0xff] }
 0x6b8   :  { %11596 = vmatprep.subr.bf16.mxu1 %v15784_v42  ;;  %v15830_v42 = vcombine.high %v4872_v61, %v4876_v26  ;;  %v15832_v43 = vcombine.high %v4873_v13, %v4877_v54  ;;  %v15831_v56 = vcombine.low %v4873_v13, %v4877_v54  ;;  %v4920_v54 = vld [vmem:[#allocation10 + $0x1350] sm:$0xff] }
 0x6b9   :  { %11269 = vmatpush1.bf16.msra.mxu0 %v15781_v41  ;;  %v4884_v41 = vld [vmem:[#allocation10 + $0x1230] sm:$0xff] }
 0x6ba   :  { %11597 = vmatpush1.bf16.msra.mxu1 %v15783_v50  ;;  %11270 = vmatprep.subr.bf16.mxu0 %v15790_v55  ;;  %v4881_v50 = vld [vmem:[#allocation10 + $0x1218] sm:$0xff]  ;;  %v15838_v3 = vcombine.high %v4880_v47, %v4884_v41 }
 0x6bb   :  { %11598 = vmatprep.subr.bf16.mxu1 %v15792_v2  ;;  %v4885_v55 = vld [vmem:[#allocation10 + $0x1238] sm:$0xff]  ;;  %v15829_v2 = vcombine.low %v4872_v61, %v4876_v26 }
 0x6bc   :  { %v15840_v51 = vcombine.high %v4881_v50, %v4885_v55  ;;  %v15839_v8 = vcombine.low %v4881_v50, %v4885_v55  ;;  %v4928_v55 = vld [vmem:[#allocation10 + $0x1390] sm:$0xff] }
 0x6bd   :  { %11271 = vmatpush1.bf16.msra.mxu0 %v15789_v22  ;;  %v4892_v22 = vld [vmem:[#allocation10 + $0x1270] sm:$0xff] }
 0x6be   :  { %11599 = vmatpush1.bf16.msra.mxu1 %v15791_v27  ;;  %11272 = vmatprep.subr.bf16.mxu0 %v15798_v0  ;;  %v4889_v27 = vld [vmem:[#allocation10 + $0x1258] sm:$0xff]  ;;  %v15846_v5 = vcombine.high %v4888_v58, %v4892_v22 }
 0x6bf   :  { %11600 = vmatprep.subr.bf16.mxu1 %v15800_v1  ;;  %v4893_v0 = vld [vmem:[#allocation10 + $0x1278] sm:$0xff]  ;;  %v15837_v1 = vcombine.low %v4880_v47, %v4884_v41 }
 0x6c0   :  { %v15848_v59 = vcombine.high %v4889_v27, %v4893_v0  ;;  %v15847_v16 = vcombine.low %v4889_v27, %v4893_v0  ;;  %v4936_v0 = vld [vmem:[#allocation10 + $0x13d0] sm:$0xff] }
 0x6c1   :  { %11273 = vmatpush1.bf16.msra.mxu0 %v15797_v28  ;;  %v4900_v28 = vld [vmem:[#allocation10 + $0x12b0] sm:$0xff] }
 0x6c2   :  { %11601 = vmatpush1.bf16.msra.mxu1 %v15799_v44  ;;  %11274 = vmatprep.subr.bf16.mxu0 %v15806_v11  ;;  %v4897_v44 = vld [vmem:[#allocation10 + $0x1298] sm:$0xff]  ;;  %v15854_v17 = vcombine.high %v4896_v6, %v4900_v28 }
 0x6c3   :  { %11602 = vmatprep.subr.bf16.mxu1 %v15808_v40  ;;  %v4901_v11 = vld [vmem:[#allocation10 + $0x12b8] sm:$0xff]  ;;  %v15845_v40 = vcombine.low %v4888_v58, %v4892_v22 }
 0x6c4   :  { %v15856_v62 = vcombine.high %v4897_v44, %v4901_v11  ;;  %v15855_v60 = vcombine.low %v4897_v44, %v4901_v11  ;;  %v4944_v11 = vld [vmem:[#allocation10 + $0x1410] sm:$0xff] }
 0x6c5   :  { %11275 = vmatpush1.bf16.msra.mxu0 %v15805_v53  ;;  %v4908_v53 = vld [vmem:[#allocation10 + $0x12f0] sm:$0xff] }
 0x6c6   :  { %11603 = vmatpush1.bf16.msra.mxu1 %v15807_v34  ;;  %11276 = vmatprep.subr.bf16.mxu0 %v15814_v24  ;;  %v4905_v34 = vld [vmem:[#allocation10 + $0x12d8] sm:$0xff]  ;;  %v15862_v32 = vcombine.high %v4904_v20, %v4908_v53 }
 0x6c7   :  { %11604 = vmatprep.subr.bf16.mxu1 %v15816_v45  ;;  %v4909_v24 = vld [vmem:[#allocation10 + $0x12f8] sm:$0xff]  ;;  %v15853_v45 = vcombine.low %v4896_v6, %v4900_v28 }
 0x6c8   :  { %v15864_v19 = vcombine.high %v4905_v34, %v4909_v24  ;;  %v15863_v61 = vcombine.low %v4905_v34, %v4909_v24  ;;  %v4952_v24 = vld [vmem:[#allocation10 + $0x1450] sm:$0xff] }
 0x6c9   :  { %11277 = vmatpush1.bf16.msra.mxu0 %v15813_v4  ;;  %v4916_v4 = vld [vmem:[#allocation10 + $0x1330] sm:$0xff] }
 0x6ca   :  { %11605 = vmatpush1.bf16.msra.mxu1 %v15815_v63  ;;  %11278 = vmatprep.subr.bf16.mxu0 %v15822_v33  ;;  %v4913_v63 = vld [vmem:[#allocation10 + $0x1318] sm:$0xff]  ;;  %v15870_v26 = vcombine.high %v4912_v21, %v4916_v4 }
 0x6cb   :  { %11606 = vmatprep.subr.bf16.mxu1 %v15824_v25  ;;  %v4917_v33 = vld [vmem:[#allocation10 + $0x1338] sm:$0xff]  ;;  %v15861_v25 = vcombine.low %v4904_v20, %v4908_v53 }
 0x6cc   :  { %v15872_v13 = vcombine.high %v4913_v63, %v4917_v33  ;;  %v15871_v47 = vcombine.low %v4913_v63, %v4917_v33  ;;  %v4960_v63 = vld [vmem:[#allocation10 + $0x1490] sm:$0xff] }
 0x6cd   :  { %11279 = vmatpush1.bf16.msra.mxu0 %v15821_v52  ;;  %v4924_v52 = vld [vmem:[#allocation10 + $0x1370] sm:$0xff] }
 0x6ce   :  { %11607 = vmatpush1.bf16.msra.mxu1 %v15823_v57  ;;  %11280 = vmatprep.subr.bf16.mxu0 %v15830_v42  ;;  %v4921_v57 = vld [vmem:[#allocation10 + $0x1358] sm:$0xff]  ;;  %v15878_v41 = vcombine.high %v4920_v54, %v4924_v52  ;;  %v4964_v33 = vld [vmem:[#allocation10 + $0x14b0] sm:$0xff] }
 0x6cf   :  { %11608 = vmatprep.subr.bf16.mxu1 %v15832_v43  ;;  %v4925_v42 = vld [vmem:[#allocation10 + $0x1378] sm:$0xff]  ;;  %v15869_v43 = vcombine.low %v4912_v21, %v4916_v4 }
 0x6d0   :  { %v15880_v50 = vcombine.high %v4921_v57, %v4925_v42  ;;  %v15879_v58 = vcombine.low %v4921_v57, %v4925_v42  ;;  %v4968_v42 = vld [vmem:[#allocation10 + $0x14d0] sm:$0xff] }
 0x6d1   :  { %11281 = vmatpush1.bf16.msra.mxu0 %v15829_v2  ;;  %v4932_v2 = vld [vmem:[#allocation10 + $0x13b0] sm:$0xff] }
 0x6d2   :  { %11609 = vmatpush1.bf16.msra.mxu1 %v15831_v56  ;;  %11282 = vmatprep.subr.bf16.mxu0 %v15838_v3  ;;  %v4929_v56 = vld [vmem:[#allocation10 + $0x1398] sm:$0xff]  ;;  %v15886_v22 = vcombine.high %v4928_v55, %v4932_v2 }
 0x6d3   :  { %11610 = vmatprep.subr.bf16.mxu1 %v15840_v51  ;;  %v4933_v3 = vld [vmem:[#allocation10 + $0x13b8] sm:$0xff]  ;;  %v15877_v51 = vcombine.low %v4920_v54, %v4924_v52  ;;  %v15918_v52 = vcombine.high %v4960_v63, %v4964_v33 }
 0x6d4   :  { %v15888_v27 = vcombine.high %v4929_v56, %v4933_v3  ;;  %v15887_v6 = vcombine.low %v4929_v56, %v4933_v3  ;;  %v4976_v56 = vld [vmem:[#allocation10 + $0x1510] sm:$0xff] }
 0x6d5   :  { %11283 = vmatpush1.bf16.msra.mxu0 %v15837_v1  ;;  %v4940_v1 = vld [vmem:[#allocation10 + $0x13f0] sm:$0xff] }
 0x6d6   :  { %11611 = vmatpush1.bf16.msra.mxu1 %v15839_v8  ;;  %11284 = vmatprep.subr.bf16.mxu0 %v15846_v5  ;;  %v4937_v8 = vld [vmem:[#allocation10 + $0x13d8] sm:$0xff]  ;;  %v15894_v28 = vcombine.high %v4936_v0, %v4940_v1  ;;  %v4980_v3 = vld [vmem:[#allocation10 + $0x1530] sm:$0xff] }
 0x6d7   :  { %11612 = vmatprep.subr.bf16.mxu1 %v15848_v59  ;;  %v4941_v5 = vld [vmem:[#allocation10 + $0x13f8] sm:$0xff]  ;;  %v15885_v59 = vcombine.low %v4928_v55, %v4932_v2 }
 0x6d8   :  { %v15896_v44 = vcombine.high %v4937_v8, %v4941_v5  ;;  %v15895_v20 = vcombine.low %v4937_v8, %v4941_v5  ;;  %v4988_v8 = vld [vmem:[#allocation10 + $0x1570] sm:$0xff]  ;;  %v4985_v5 = vld [vmem:[#allocation10 + $0x1558] sm:$0xff] }
 0x6d9   :  { %11285 = vmatpush1.bf16.msra.mxu0 %v15845_v40  ;;  %v4948_v40 = vld [vmem:[#allocation10 + $0x1430] sm:$0xff] }
 0x6da   :  { %11613 = vmatpush1.bf16.msra.mxu1 %v15847_v16  ;;  %11286 = vmatprep.subr.bf16.mxu0 %v15854_v17  ;;  %v4945_v16 = vld [vmem:[#allocation10 + $0x1418] sm:$0xff]  ;;  %v15902_v53 = vcombine.high %v4944_v11, %v4948_v40 }
 0x6db   :  { %11614 = vmatprep.subr.bf16.mxu1 %v15856_v62  ;;  %v4949_v17 = vld [vmem:[#allocation10 + $0x1438] sm:$0xff]  ;;  %v15893_v62 = vcombine.low %v4936_v0, %v4940_v1  ;;  %v4984_v1 = vld [vmem:[#allocation10 + $0x1550] sm:$0xff] }
 0x6dc   :  { %v15904_v34 = vcombine.high %v4945_v16, %v4949_v17  ;;  %v15903_v21 = vcombine.low %v4945_v16, %v4949_v17  ;;  %v4996_v16 = vld [vmem:[#allocation10 + $0x15b0] sm:$0xff]  ;;  %v4993_v17 = vld [vmem:[#allocation10 + $0x1598] sm:$0xff] }
 0x6dd   :  { %11287 = vmatpush1.bf16.msra.mxu0 %v15853_v45  ;;  %v4956_v45 = vld [vmem:[#allocation10 + $0x1470] sm:$0xff] }
 0x6de   :  { %11615 = vmatpush1.bf16.msra.mxu1 %v15855_v60  ;;  %11288 = vmatprep.subr.bf16.mxu0 %v15862_v32  ;;  %v15901_v60 = vcombine.low %v4944_v11, %v4948_v40  ;;  %v4953_v32 = vld [vmem:[#allocation10 + $0x1458] sm:$0xff]  ;;  %v15910_v4 = vcombine.high %v4952_v24, %v4956_v45  ;;  %v4992_v40 = vld [vmem:[#allocation10 + $0x1590] sm:$0xff] }
 0x6df   :  { %11616 = vmatprep.subr.bf16.mxu1 %v15864_v19  ;;  %v4957_v19 = vld [vmem:[#allocation10 + $0x1478] sm:$0xff] }
 0x6e0   :  { %v15911_v54 = vcombine.low %v4953_v32, %v4957_v19 }
 0x6e1   :  { %11289 = vmatpush1.bf16.msra.mxu0 %v15861_v25  ;;  %v15912_v25 = vcombine.high %v4953_v32, %v4957_v19  ;;  %v5001_v32 = vld [vmem:[#allocation10 + $0x15d8] sm:$0xff] }
 0x6e2   :  { %11617 = vmatpush1.bf16.msra.mxu1 %v15863_v61  ;;  %11290 = vmatprep.subr.bf16.mxu0 %v15870_v26  ;;  %v4961_v61 = vld [vmem:[#allocation10 + $0x1498] sm:$0xff] }
 0x6e3   :  { %11618 = vmatprep.subr.bf16.mxu1 %v15872_v13  ;;  %v4965_v26 = vld [vmem:[#allocation10 + $0x14b8] sm:$0xff]  ;;  %v15909_v13 = vcombine.low %v4952_v24, %v4956_v45  ;;  %v5000_v45 = vld [vmem:[#allocation10 + $0x15d0] sm:$0xff] }
 0x6e4   :  { %v15920_v57 = vcombine.high %v4961_v61, %v4965_v26  ;;  %v5005_v19 = vld [vmem:[#allocation10 + $0x15f8] sm:$0xff] }
 0x6e5   :  { %11291 = vmatpush1.bf16.msra.mxu0 %v15869_v43  ;;  %v4972_v43 = vld [vmem:[#allocation10 + $0x14f0] sm:$0xff] }
 0x6e6   :  { %11619 = vmatpush1.bf16.msra.mxu1 %v15871_v47  ;;  %11292 = vmatprep.subr.bf16.mxu0 %v15878_v41  ;;  %v4969_v47 = vld [vmem:[#allocation10 + $0x14d8] sm:$0xff]  ;;  %v15926_v55 = vcombine.high %v4968_v42, %v4972_v43 }
 0x6e7   :  { %11620 = vmatprep.subr.bf16.mxu1 %v15880_v50  ;;  %v4973_v41 = vld [vmem:[#allocation10 + $0x14f8] sm:$0xff]  ;;  %v15917_v50 = vcombine.low %v4960_v63, %v4964_v33  ;;  %v15960_v33 = vcombine.high %v5001_v32, %v5005_v19 }
 0x6e8   :  { %v15928_v2 = vcombine.high %v4969_v47, %v4973_v41 }
 0x6e9   :  { %11293 = vmatpush1.bf16.msra.mxu0 %v15877_v51  ;;  %v4977_v51 = vld [vmem:[#allocation10 + $0x1518] sm:$0xff] }
 0x6ea   :  { %11621 = vmatpush1.bf16.msra.mxu1 %v15879_v58  ;;  %11294 = vmatprep.subr.bf16.mxu0 %v15886_v22  ;;  %v4981_v58 = vld [vmem:[#allocation10 + $0x1538] sm:$0xff]  ;;  %v15927_v22 = vcombine.low %v4969_v47, %v4973_v41  ;;  %v5020_v47 = vld [vmem:[#allocation10 + $0x1670] sm:$0xff] }
 0x6eb   :  { %11622 = vmatprep.subr.bf16.mxu1 %v15888_v27  ;;  %v15934_v27 = vcombine.high %v4976_v56, %v4980_v3  ;;  %v15936_v0 = vcombine.high %v4977_v51, %v4981_v58  ;;  %v5017_v41 = vld [vmem:[#allocation10 + $0x1658] sm:$0xff] }
 0x6ed   :  { %11295 = vmatpush1.bf16.msra.mxu0 %v15885_v59  ;;  %v4989_v59 = vld [vmem:[#allocation10 + $0x1578] sm:$0xff] }
 0x6ee   :  { %11623 = vmatpush1.bf16.msra.mxu1 %v15887_v6  ;;  %11296 = vmatprep.subr.bf16.mxu0 %v15894_v28  ;;  %v15933_v6 = vcombine.low %v4976_v56, %v4980_v3  ;;  %v15935_v28 = vcombine.low %v4977_v51, %v4981_v58  ;;  %v15944_v11 = vcombine.high %v4985_v5, %v4989_v59  ;;  %v5024_v3 = vld [vmem:[#allocation10 + $0x1690] sm:$0xff]  ;;  %v5025_v58 = vld [vmem:[#allocation10 + $0x1698] sm:$0xff] }
 0x6ef   :  { %11624 = vmatprep.subr.bf16.mxu1 %v15896_v44  ;;  %v15942_v44 = vcombine.high %v4984_v1, %v4988_v8  ;;  %v5028_v51 = vld [vmem:[#allocation10 + $0x16b0] sm:$0xff] }
 0x6f1   :  { %11297 = vmatpush1.bf16.msra.mxu0 %v15893_v62  ;;  %v4997_v62 = vld [vmem:[#allocation10 + $0x15b8] sm:$0xff] }
 0x6f2   :  { %11625 = vmatpush1.bf16.msra.mxu1 %v15895_v20  ;;  %11307 = vmatprep.subr.bf16.mxu0 %v15902_v53  ;;  %v15941_v20 = vcombine.low %v4984_v1, %v4988_v8  ;;  %v15943_v53 = vcombine.low %v4985_v5, %v4989_v59  ;;  %v15952_v24 = vcombine.high %v4993_v17, %v4997_v62  ;;  %v5032_v8 = vld [vmem:[#allocation10 + $0x16d0] sm:$0xff]  ;;  %v5033_v59 = vld [vmem:[#allocation10 + $0x16d8] sm:$0xff] }
 0x6f3   :  { %11635 = vmatprep.subr.bf16.mxu1 %v15904_v34  ;;  %v15950_v34 = vcombine.high %v4992_v40, %v4996_v16  ;;  %v5036_v5 = vld [vmem:[#allocation10 + $0x16f0] sm:$0xff] }
 0x6f4   :  { %11299 = vmatmul.mubr.bf16.vlgmr.msra.gmra.mrb[20].mxu0 %v18571_v10 }
 0x6f5   :  { %11627 = vmatmul.mubr.bf16.vlgmr.msra.gmra.mrb[20].mxu1 %v18571_v10  ;;  %11308 = vmatpush1.bf16.msra.mxu0 %v15901_v60  ;;  %v15919_v10 = vcombine.low %v4961_v61, %v4965_v26  ;;  %v5004_v60 = vld [vmem:[#allocation10 + $0x15f0] sm:$0xff]  ;;  %v5009_v26 = vld [vmem:[#allocation10 + $0x1618] sm:$0xff] }
 0x6f6   :  { %11339 = vmatprep.mubr.bf16.mxu0 %v18573_v37  ;;  %11636 = vmatpush1.bf16.msra.mxu1 %v15903_v21  ;;  %v15949_v21 = vcombine.low %v4992_v40, %v4996_v16  ;;  %v15958_v63 = vcombine.high %v5000_v45, %v5004_v60  ;;  %v5012_v61 = vld [vmem:[#allocation10 + $0x1630] sm:$0xff] }
 0x6f7   :  { %11667 = vmatprep.mubr.bf16.mxu1 %v18573_v37  ;;  %11309 = vmatprep.subr.bf16.mxu0 %v15910_v4  ;;  %v15925_v37 = vcombine.low %v4968_v42, %v4972_v43  ;;  %v15951_v4 = vcombine.low %v4993_v17, %v4997_v62  ;;  %v5016_v43 = vld [vmem:[#allocation10 + $0x1650] sm:$0xff]  ;;  %v5041_v62 = vld [vmem:[#allocation10 + $0x1718] sm:$0xff] }
 0x6f8   :  { %11637 = vmatprep.subr.bf16.mxu1 %v15912_v25  ;;  %v5008_v25 = vld [vmem:[#allocation10 + $0x1610] sm:$0xff] }
 0x6f9   :  { %11310 = vmatpush1.bf16.msra.mxu0 %v15909_v13  ;;  %v5013_v13 = vld [vmem:[#allocation10 + $0x1638] sm:$0xff]  ;;  %v5040_v16 = vld [vmem:[#allocation10 + $0x1710] sm:$0xff] }
 0x6fa   :  { %11638 = vmatpush1.bf16.msra.mxu1 %v15911_v54  ;;  %11311 = vmatprep.subr.bf16.mxu0 %v15918_v52  ;;  %v15957_v54 = vcombine.low %v5000_v45, %v5004_v60  ;;  %v15959_v52 = vcombine.low %v5001_v32, %v5005_v19  ;;  %v15968_v42 = vcombine.high %v5009_v26, %v5013_v13  ;;  %v5044_v17 = vld [vmem:[#allocation10 + $0x1730] sm:$0xff]  ;;  %v5049_v19 = vld [vmem:[#allocation10 + $0x1758] sm:$0xff] }
 0x6fb   :  { %11639 = vmatprep.subr.bf16.mxu1 %v15920_v57  ;;  %v15966_v57 = vcombine.high %v5008_v25, %v5012_v61  ;;  %v5048_v60 = vld [vmem:[#allocation10 + $0x1750] sm:$0xff] }
 0x6fc   :  { %v5052_v32 = vld [vmem:[#allocation10 + $0x1770] sm:$0xff] }
 0x6fd   :  { %11312 = vmatpush1.bf16.msra.mxu0 %v15917_v50  ;;  %v5021_v50 = vld [vmem:[#allocation10 + $0x1678] sm:$0xff] }
 0x6fe   :  { %11640 = vmatpush1.bf16.msra.mxu1 %v15919_v10  ;;  %11313 = vmatprep.subr.bf16.mxu0 %v15926_v55  ;;  %v15965_v10 = vcombine.low %v5008_v25, %v5012_v61  ;;  %v15967_v55 = vcombine.low %v5009_v26, %v5013_v13  ;;  %v15976_v56 = vcombine.high %v5017_v41, %v5021_v50  ;;  %v5056_v61 = vld [vmem:[#allocation10 + $0x1790] sm:$0xff]  ;;  %v5057_v13 = vld [vmem:[#allocation10 + $0x1798] sm:$0xff] }
 0x6ff   :  { %11641 = vmatprep.subr.bf16.mxu1 %v15928_v2  ;;  %v15974_v2 = vcombine.high %v5016_v43, %v5020_v47  ;;  %v5060_v26 = vld [vmem:[#allocation10 + $0x17b0] sm:$0xff] }
 0x701   :  { %11314 = vmatpush1.bf16.msra.mxu0 %v15925_v37  ;;  %v5029_v37 = vld [vmem:[#allocation10 + $0x16b8] sm:$0xff] }
 0x702   :  { %11642 = vmatpush1.bf16.msra.mxu1 %v15927_v22  ;;  %11315 = vmatprep.subr.bf16.mxu0 %v15934_v27  ;;  %v15973_v22 = vcombine.low %v5016_v43, %v5020_v47  ;;  %v15975_v27 = vcombine.low %v5017_v41, %v5021_v50  ;;  %v15984_v1 = vcombine.high %v5025_v58, %v5029_v37  ;;  %v5064_v47 = vld [vmem:[#allocation10 + $0x17d0] sm:$0xff]  ;;  %v5065_v50 = vld [vmem:[#allocation10 + $0x17d8] sm:$0xff] }
 0x703   :  { %11643 = vmatprep.subr.bf16.mxu1 %v15936_v0  ;;  %v15982_v0 = vcombine.high %v5024_v3, %v5028_v51  ;;  %v5068_v41 = vld [vmem:[#allocation10 + $0x17f0] sm:$0xff] }
 0x705   :  { %11316 = vmatpush1.bf16.msra.mxu0 %v15933_v6  ;;  %v5037_v6 = vld [vmem:[#allocation10 + $0x16f8] sm:$0xff] }
 0x706   :  { %11644 = vmatpush1.bf16.msra.mxu1 %v15935_v28  ;;  %11317 = vmatprep.subr.bf16.mxu0 %v15942_v44  ;;  %v15981_v28 = vcombine.low %v5024_v3, %v5028_v51  ;;  %v15983_v44 = vcombine.low %v5025_v58, %v5029_v37  ;;  %v15992_v40 = vcombine.high %v5033_v59, %v5037_v6  ;;  %v5072_v51 = vld [vmem:[#allocation10 + $0x1810] sm:$0xff]  ;;  %v5073_v37 = vld [vmem:[#allocation10 + $0x1818] sm:$0xff] }
 0x707   :  { %11645 = vmatprep.subr.bf16.mxu1 %v15944_v11  ;;  %v15990_v11 = vcombine.high %v5032_v8, %v5036_v5  ;;  %v5076_v58 = vld [vmem:[#allocation10 + $0x1830] sm:$0xff] }
 0x709   :  { %11318 = vmatpush1.bf16.msra.mxu0 %v15941_v20  ;;  %v5045_v20 = vld [vmem:[#allocation10 + $0x1738] sm:$0xff] }
 0x70a   :  { %11646 = vmatpush1.bf16.msra.mxu1 %v15943_v53  ;;  %11319 = vmatprep.subr.bf16.mxu0 %v15950_v34  ;;  %v15989_v53 = vcombine.low %v5032_v8, %v5036_v5  ;;  %v15991_v34 = vcombine.low %v5033_v59, %v5037_v6  ;;  %v16000_v45 = vcombine.high %v5041_v62, %v5045_v20  ;;  %v5080_v5 = vld [vmem:[#allocation10 + $0x1850] sm:$0xff] }
 0x70b   :  { %11647 = vmatprep.subr.bf16.mxu1 %v15952_v24  ;;  %v15998_v24 = vcombine.high %v5040_v16, %v5044_v17  ;;  %v5084_v59 = vld [vmem:[#allocation10 + $0x1870] sm:$0xff]  ;;  %v16029_v6 = vcombine.low %v5072_v51, %v5076_v58 }
 0x70d   :  { %11320 = vmatpush1.bf16.msra.mxu0 %v15949_v21  ;;  %v5053_v21 = vld [vmem:[#allocation10 + $0x1778] sm:$0xff] }
 0x70e   :  { %11648 = vmatpush1.bf16.msra.mxu1 %v15951_v4  ;;  %11321 = vmatprep.subr.bf16.mxu0 %v15958_v63  ;;  %v15997_v4 = vcombine.low %v5040_v16, %v5044_v17  ;;  %v15999_v63 = vcombine.low %v5041_v62, %v5045_v20  ;;  %v16008_v25 = vcombine.high %v5049_v19, %v5053_v21  ;;  %v5088_v16 = vld [vmem:[#allocation10 + $0x1890] sm:$0xff]  ;;  %v5089_v20 = vld [vmem:[#allocation10 + $0x1898] sm:$0xff] }
 0x70f   :  { %11649 = vmatprep.subr.bf16.mxu1 %v15960_v33  ;;  %v16006_v33 = vcombine.high %v5048_v60, %v5052_v32  ;;  %v5092_v17 = vld [vmem:[#allocation10 + $0x18b0] sm:$0xff] }
 0x711   :  { %11322 = vmatpush1.bf16.msra.mxu0 %v15957_v54  ;;  %v5061_v54 = vld [vmem:[#allocation10 + $0x17b8] sm:$0xff] }
 0x712   :  { %11650 = vmatpush1.bf16.msra.mxu1 %v15959_v52  ;;  %11323 = vmatprep.subr.bf16.mxu0 %v15966_v57  ;;  %v16005_v52 = vcombine.low %v5048_v60, %v5052_v32  ;;  %v16007_v57 = vcombine.low %v5049_v19, %v5053_v21  ;;  %v16016_v43 = vcombine.high %v5057_v13, %v5061_v54  ;;  %v5096_v32 = vld [vmem:[#allocation10 + $0x18d0] sm:$0xff]  ;;  %v5097_v21 = vld [vmem:[#allocation10 + $0x18d8] sm:$0xff] }
 0x713   :  { %11651 = vmatprep.subr.bf16.mxu1 %v15968_v42  ;;  %v16014_v42 = vcombine.high %v5056_v61, %v5060_v26  ;;  %v5100_v19 = vld [vmem:[#allocation10 + $0x18f0] sm:$0xff] }
 0x715   :  { %11324 = vmatpush1.bf16.msra.mxu0 %v15965_v10  ;;  %v5069_v10 = vld [vmem:[#allocation10 + $0x17f8] sm:$0xff] }
 0x716   :  { %11652 = vmatpush1.bf16.msra.mxu1 %v15967_v55  ;;  %11325 = vmatprep.subr.bf16.mxu0 %v15974_v2  ;;  %v16013_v55 = vcombine.low %v5056_v61, %v5060_v26  ;;  %v16015_v2 = vcombine.low %v5057_v13, %v5061_v54  ;;  %v16024_v3 = vcombine.high %v5065_v50, %v5069_v10  ;;  %v5104_v61 = vld [vmem:[#allocation10 + $0x1910] sm:$0xff]  ;;  %v5105_v13 = vld [vmem:[#allocation10 + $0x1918] sm:$0xff] }
 0x717   :  { %11653 = vmatprep.subr.bf16.mxu1 %v15976_v56  ;;  %v16022_v56 = vcombine.high %v5064_v47, %v5068_v41  ;;  %v5108_v26 = vld [vmem:[#allocation10 + $0x1930] sm:$0xff]  ;;  %v5109_v54 = vld [vmem:[#allocation10 + $0x1938] sm:$0xff] }
 0x719   :  { %11326 = vmatpush1.bf16.msra.mxu0 %v15973_v22  ;;  %v5077_v22 = vld [vmem:[#allocation10 + $0x1838] sm:$0xff] }
 0x71a   :  { %11654 = vmatpush1.bf16.msra.mxu1 %v15975_v27  ;;  %11327 = vmatprep.subr.bf16.mxu0 %v15982_v0  ;;  %v16021_v27 = vcombine.low %v5064_v47, %v5068_v41  ;;  %v16023_v0 = vcombine.low %v5065_v50, %v5069_v10  ;;  %v16032_v8 = vcombine.high %v5073_v37, %v5077_v22  ;;  %v5116_v47 = vld [vmem:[#allocation10 + $0x1970] sm:$0xff]  ;;  %v5113_v41 = vld [vmem:[#allocation10 + $0x1958] sm:$0xff] }
 0x71b   :  { %11655 = vmatprep.subr.bf16.mxu1 %v15984_v1  ;;  %v16030_v1 = vcombine.high %v5072_v51, %v5076_v58  ;;  %v5117_v50 = vld [vmem:[#allocation10 + $0x1978] sm:$0xff]  ;;  %v16061_v10 = vcombine.low %v5104_v61, %v5108_v26  ;;  %v5124_v51 = vld [vmem:[#allocation10 + $0x19b0] sm:$0xff] }
 0x71c   :  { %v5121_v58 = vld [vmem:[#allocation10 + $0x1998] sm:$0xff] }
 0x71d   :  { %11328 = vmatpush1.bf16.msra.mxu0 %v15981_v28  ;;  %v5081_v28 = vld [vmem:[#allocation10 + $0x1858] sm:$0xff] }
 0x71e   :  { %11656 = vmatpush1.bf16.msra.mxu1 %v15983_v44  ;;  %11329 = vmatprep.subr.bf16.mxu0 %v15990_v11  ;;  %v5085_v44 = vld [vmem:[#allocation10 + $0x1878] sm:$0xff]  ;;  %v16031_v11 = vcombine.low %v5073_v37, %v5077_v22 }
 0x71f   :  { %11657 = vmatprep.subr.bf16.mxu1 %v15992_v40  ;;  %v16038_v40 = vcombine.high %v5080_v5, %v5084_v59  ;;  %v16040_v62 = vcombine.high %v5081_v28, %v5085_v44  ;;  %v5125_v37 = vld [vmem:[#allocation10 + $0x19b8] sm:$0xff] }
 0x721   :  { %11330 = vmatpush1.bf16.msra.mxu0 %v15989_v53  ;;  %v5093_v53 = vld [vmem:[#allocation10 + $0x18b8] sm:$0xff] }
 0x722   :  { %11658 = vmatpush1.bf16.msra.mxu1 %v15991_v34  ;;  %11331 = vmatprep.subr.bf16.mxu0 %v15998_v24  ;;  %v16037_v34 = vcombine.low %v5080_v5, %v5084_v59  ;;  %v16039_v24 = vcombine.low %v5081_v28, %v5085_v44  ;;  %v16048_v60 = vcombine.high %v5089_v20, %v5093_v53  ;;  %v5132_v5 = vld [vmem:[#allocation10 + $0x19f0] sm:$0xff]  ;;  %v5129_v59 = vld [vmem:[#allocation10 + $0x19d8] sm:$0xff] }
 0x723   :  { %11659 = vmatprep.subr.bf16.mxu1 %v16000_v45  ;;  %v16046_v45 = vcombine.high %v5088_v16, %v5092_v17  ;;  %v16079_v44 = vcombine.low %v5121_v58, %v5125_v37 }
 0x725   :  { %11332 = vmatpush1.bf16.msra.mxu0 %v15997_v4  ;;  %v5101_v4 = vld [vmem:[#allocation10 + $0x18f8] sm:$0xff] }
 0x726   :  { %11660 = vmatpush1.bf16.msra.mxu1 %v15999_v63  ;;  %11333 = vmatprep.subr.bf16.mxu0 %v16006_v33  ;;  %v16045_v63 = vcombine.low %v5088_v16, %v5092_v17  ;;  %v16054_v33 = vcombine.high %v5096_v32, %v5100_v19  ;;  %v5136_v16 = vld [vmem:[#allocation10 + $0x1a10] sm:$0xff] }
 0x727   :  { %11661 = vmatprep.subr.bf16.mxu1 %v16008_v25  ;;  %v16056_v25 = vcombine.high %v5097_v21, %v5101_v4  ;;  %v5140_v17 = vld [vmem:[#allocation10 + $0x1a30] sm:$0xff] }
 0x729   :  { %11334 = vmatpush1.bf16.msra.mxu0 %v16005_v52  ;;  %v16055_v52 = vcombine.low %v5097_v21, %v5101_v4  ;;  %v5149_v21 = vld [vmem:[#allocation10 + $0x1a78] sm:$0xff]  ;;  %v16093_v4 = vcombine.low %v5136_v16, %v5140_v17 }
 0x72a   :  { %11662 = vmatpush1.bf16.msra.mxu1 %v16007_v57  ;;  %11335 = vmatprep.subr.bf16.mxu0 %v16014_v42  ;;  %v16062_v57 = vcombine.high %v5104_v61, %v5108_v26  ;;  %v16064_v42 = vcombine.high %v5105_v13, %v5109_v54  ;;  %v5156_v61 = vld [vmem:[#allocation10 + $0x1ab0] sm:$0xff]  ;;  %v5153_v26 = vld [vmem:[#allocation10 + $0x1a98] sm:$0xff] }
 0x72b   :  { %11663 = vmatprep.subr.bf16.mxu1 %v16016_v43  ;;  %v5112_v43 = vld [vmem:[#allocation10 + $0x1950] sm:$0xff] }
 0x72c   :  { %v16069_v22 = vcombine.low %v5112_v43, %v5116_v47 }
 0x72d   :  { %11336 = vmatpush1.bf16.msra.mxu0 %v16013_v55  ;;  %v16063_v55 = vcombine.low %v5105_v13, %v5109_v54  ;;  %v5157_v13 = vld [vmem:[#allocation10 + $0x1ab8] sm:$0xff] }
 0x72e   :  { %11664 = vmatpush1.bf16.msra.mxu1 %v16015_v2  ;;  %11337 = vmatprep.subr.bf16.mxu0 %v16022_v56  ;;  %v16070_v2 = vcombine.high %v5112_v43, %v5116_v47  ;;  %v16072_v56 = vcombine.high %v5113_v41, %v5117_v50  ;;  %v5164_v43 = vld [vmem:[#allocation10 + $0x1af0] sm:$0xff]  ;;  %v5161_v47 = vld [vmem:[#allocation10 + $0x1ad8] sm:$0xff] }
 0x72f   :  { %11665 = vmatprep.subr.bf16.mxu1 %v16024_v3  ;;  %v5120_v3 = vld [vmem:[#allocation10 + $0x1990] sm:$0xff] }
 0x730   :  { %v16077_v28 = vcombine.low %v5120_v3, %v5124_v51 }
 0x731   :  { %11338 = vmatpush1.bf16.msra.mxu0 %v16021_v27  ;;  %v16071_v27 = vcombine.low %v5113_v41, %v5117_v50  ;;  %v5165_v41 = vld [vmem:[#allocation10 + $0x1af8] sm:$0xff] }
 0x732   :  { %11666 = vmatpush1.bf16.msra.mxu1 %v16023_v0  ;;  %11348 = vmatprep.subr.bf16.mxu0 %v16030_v1  ;;  %v16078_v0 = vcombine.high %v5120_v3, %v5124_v51  ;;  %v16080_v1 = vcombine.high %v5121_v58, %v5125_v37  ;;  %v5172_v3 = vld [vmem:[#allocation10 + $0x1b30] sm:$0xff]  ;;  %v5169_v51 = vld [vmem:[#allocation10 + $0x1b18] sm:$0xff] }
 0x733   :  { %11676 = vmatprep.subr.bf16.mxu1 %v16032_v8  ;;  %v5128_v8 = vld [vmem:[#allocation10 + $0x19d0] sm:$0xff]  ;;  %v5173_v58 = vld [vmem:[#allocation10 + $0x1b38] sm:$0xff] }
 0x734   :  { %11340 = vmatmul.mubr.bf16.vlgmr.msra.gmra.mrb[20].mxu0 %v18589_v31 }
 0x735   :  { %11668 = vmatmul.mubr.bf16.vlgmr.msra.gmra.mrb[20].mxu1 %v18589_v31  ;;  %11349 = vmatpush1.bf16.msra.mxu0 %v16029_v6  ;;  %v16047_v31 = vcombine.low %v5089_v20, %v5093_v53  ;;  %v5133_v6 = vld [vmem:[#allocation10 + $0x19f8] sm:$0xff]  ;;  %v16085_v53 = vcombine.low %v5128_v8, %v5132_v5 }
 0x736   :  { %11380 = vmatprep.mubr.bf16.mxu0 %v18591_v46  ;;  %11677 = vmatpush1.bf16.msra.mxu1 %v16031_v11  ;;  %v16086_v11 = vcombine.high %v5128_v8, %v5132_v5  ;;  %v5141_v20 = vld [vmem:[#allocation10 + $0x1a38] sm:$0xff]  ;;  %v5180_v8 = vld [vmem:[#allocation10 + $0x1b70] sm:$0xff] }
 0x737   :  { %11708 = vmatprep.mubr.bf16.mxu1 %v18591_v46  ;;  %11350 = vmatprep.subr.bf16.mxu0 %v16038_v40  ;;  %v16053_v46 = vcombine.low %v5096_v32, %v5100_v19  ;;  %v16088_v40 = vcombine.high %v5129_v59, %v5133_v6  ;;  %v5148_v32 = vld [vmem:[#allocation10 + $0x1a70] sm:$0xff]  ;;  %v5145_v19 = vld [vmem:[#allocation10 + $0x1a58] sm:$0xff] }
 0x738   :  { %11678 = vmatprep.subr.bf16.mxu1 %v16040_v62  ;;  %v5137_v62 = vld [vmem:[#allocation10 + $0x1a18] sm:$0xff] }
 0x739   :  { %11351 = vmatpush1.bf16.msra.mxu0 %v16037_v34  ;;  %v16087_v34 = vcombine.low %v5129_v59, %v5133_v6  ;;  %v5177_v5 = vld [vmem:[#allocation10 + $0x1b58] sm:$0xff] }
 0x73a   :  { %11679 = vmatpush1.bf16.msra.mxu1 %v16039_v24  ;;  %11352 = vmatprep.subr.bf16.mxu0 %v16046_v45  ;;  %v16094_v24 = vcombine.high %v5136_v16, %v5140_v17  ;;  %v16096_v45 = vcombine.high %v5137_v62, %v5141_v20  ;;  %v5181_v59 = vld [vmem:[#allocation10 + $0x1b78] sm:$0xff]  ;;  %v5188_v16 = vld [vmem:[#allocation10 + $0x1bb0] sm:$0xff] }
 0x73b   :  { %11680 = vmatprep.subr.bf16.mxu1 %v16048_v60  ;;  %v5144_v60 = vld [vmem:[#allocation10 + $0x1a50] sm:$0xff]  ;;  %v5185_v17 = vld [vmem:[#allocation10 + $0x1b98] sm:$0xff] }
 0x73c   :  { %v16101_v54 = vcombine.low %v5144_v60, %v5148_v32 }
 0x73d   :  { %11353 = vmatpush1.bf16.msra.mxu0 %v16045_v63  ;;  %v16095_v63 = vcombine.low %v5137_v62, %v5141_v20  ;;  %v5189_v62 = vld [vmem:[#allocation10 + $0x1bb8] sm:$0xff] }
 0x73e   :  { %11681 = vmatpush1.bf16.msra.mxu1 %v16047_v31  ;;  %11354 = vmatprep.subr.bf16.mxu0 %v16054_v33  ;;  %v16102_v31 = vcombine.high %v5144_v60, %v5148_v32  ;;  %v16104_v33 = vcombine.high %v5145_v19, %v5149_v21  ;;  %v5196_v60 = vld [vmem:[#allocation10 + $0x1bf0] sm:$0xff]  ;;  %v5193_v32 = vld [vmem:[#allocation10 + $0x1bd8] sm:$0xff] }
 0x73f   :  { %11682 = vmatprep.subr.bf16.mxu1 %v16056_v25  ;;  %v5152_v25 = vld [vmem:[#allocation10 + $0x1a90] sm:$0xff] }
 0x740   :  { %v16109_v50 = vcombine.low %v5152_v25, %v5156_v61 }
 0x741   :  { %11355 = vmatpush1.bf16.msra.mxu0 %v16053_v46  ;;  %v16103_v46 = vcombine.low %v5145_v19, %v5149_v21  ;;  %v5197_v19 = vld [vmem:[#allocation10 + $0x1bf8] sm:$0xff] }
 0x742   :  { %11683 = vmatpush1.bf16.msra.mxu1 %v16055_v52  ;;  %11356 = vmatprep.subr.bf16.mxu0 %v16062_v57  ;;  %v16110_v52 = vcombine.high %v5152_v25, %v5156_v61  ;;  %v16112_v57 = vcombine.high %v5153_v26, %v5157_v13  ;;  %v5204_v25 = vld [vmem:[#allocation10 + $0x1c30] sm:$0xff]  ;;  %v5201_v61 = vld [vmem:[#allocation10 + $0x1c18] sm:$0xff] }
 0x743   :  { %11684 = vmatprep.subr.bf16.mxu1 %v16064_v42  ;;  %v5160_v42 = vld [vmem:[#allocation10 + $0x1ad0] sm:$0xff] }
 0x744   :  { %v16117_v37 = vcombine.low %v5160_v42, %v5164_v43 }
 0x745   :  { %11357 = vmatpush1.bf16.msra.mxu0 %v16061_v10  ;;  %v16111_v10 = vcombine.low %v5153_v26, %v5157_v13  ;;  %v5205_v26 = vld [vmem:[#allocation10 + $0x1c38] sm:$0xff] }
 0x746   :  { %11685 = vmatpush1.bf16.msra.mxu1 %v16063_v55  ;;  %11358 = vmatprep.subr.bf16.mxu0 %v16070_v2  ;;  %v16118_v55 = vcombine.high %v5160_v42, %v5164_v43  ;;  %v16120_v2 = vcombine.high %v5161_v47, %v5165_v41  ;;  %v5212_v42 = vld [vmem:[#allocation10 + $0x1c70] sm:$0xff] }
 0x747   :  { %11686 = vmatprep.subr.bf16.mxu1 %v16072_v56  ;;  %v5168_v56 = vld [vmem:[#allocation10 + $0x1b10] sm:$0xff] }
 0x748   :  { %v16125_v6 = vcombine.low %v5168_v56, %v5172_v3 }
 0x749   :  { %11359 = vmatpush1.bf16.msra.mxu0 %v16069_v22  ;;  %v16119_v22 = vcombine.low %v5161_v47, %v5165_v41  ;;  %v5209_v47 = vld [vmem:[#allocation10 + $0x1c58] sm:$0xff] }
 0x74a   :  { %11687 = vmatpush1.bf16.msra.mxu1 %v16071_v27  ;;  %11360 = vmatprep.subr.bf16.mxu0 %v16078_v0  ;;  %v16126_v27 = vcombine.high %v5168_v56, %v5172_v3  ;;  %v16128_v0 = vcombine.high %v5169_v51, %v5173_v58  ;;  %v5213_v41 = vld [vmem:[#allocation10 + $0x1c78] sm:$0xff] }
 0x74b   :  { %11688 = vmatprep.subr.bf16.mxu1 %v16080_v1  ;;  %v5176_v1 = vld [vmem:[#allocation10 + $0x1b50] sm:$0xff]  ;;  %v16168_v56 = vcombine.high %v5209_v47, %v5213_v41  ;;  %v5217_v3 = vld [vmem:[#allocation10 + $0x1c98] sm:$0xff] }
 0x74c   :  { %v16133_v20 = vcombine.low %v5176_v1, %v5180_v8 }
 0x74d   :  { %11361 = vmatpush1.bf16.msra.mxu0 %v16077_v28  ;;  %v16127_v28 = vcombine.low %v5169_v51, %v5173_v58  ;;  %v5221_v51 = vld [vmem:[#allocation10 + $0x1cb8] sm:$0xff] }
 0x74e   :  { %11689 = vmatpush1.bf16.msra.mxu1 %v16079_v44  ;;  %11362 = vmatprep.subr.bf16.mxu0 %v16086_v11  ;;  %v16134_v44 = vcombine.high %v5176_v1, %v5180_v8  ;;  %v16136_v11 = vcombine.high %v5177_v5, %v5181_v59  ;;  %v5228_v1 = vld [vmem:[#allocation10 + $0x1cf0] sm:$0xff]  ;;  %v5225_v8 = vld [vmem:[#allocation10 + $0x1cd8] sm:$0xff] }
 0x74f   :  { %11690 = vmatprep.subr.bf16.mxu1 %v16088_v40  ;;  %v5184_v40 = vld [vmem:[#allocation10 + $0x1b90] sm:$0xff] }
 0x750   :  { %v16141_v21 = vcombine.low %v5184_v40, %v5188_v16 }
 0x751   :  { %11363 = vmatpush1.bf16.msra.mxu0 %v16085_v53  ;;  %v16135_v53 = vcombine.low %v5177_v5, %v5181_v59  ;;  %v5229_v5 = vld [vmem:[#allocation10 + $0x1cf8] sm:$0xff] }
 0x752   :  { %11691 = vmatpush1.bf16.msra.mxu1 %v16087_v34  ;;  %11364 = vmatprep.subr.bf16.mxu0 %v16094_v24  ;;  %v16142_v34 = vcombine.high %v5184_v40, %v5188_v16  ;;  %v16144_v24 = vcombine.high %v5185_v17, %v5189_v62  ;;  %v5233_v40 = vld [vmem:[#allocation10 + $0x1d18] sm:$0xff] }
 0x753   :  { %11692 = vmatprep.subr.bf16.mxu1 %v16096_v45  ;;  %v5192_v45 = vld [vmem:[#allocation10 + $0x1bd0] sm:$0xff]  ;;  %v5237_v16 = vld [vmem:[#allocation10 + $0x1d38] sm:$0xff] }
 0x754   :  { %v16149_v13 = vcombine.low %v5192_v45, %v5196_v60 }
 0x755   :  { %11365 = vmatpush1.bf16.msra.mxu0 %v16093_v4  ;;  %v16143_v4 = vcombine.low %v5185_v17, %v5189_v62  ;;  %v16183_v17 = vcombine.low %v5225_v8, %v5229_v5 }
 0x756   :  { %11693 = vmatpush1.bf16.msra.mxu1 %v16095_v63  ;;  %11366 = vmatprep.subr.bf16.mxu0 %v16102_v31  ;;  %v16150_v63 = vcombine.high %v5192_v45, %v5196_v60  ;;  %v16152_v31 = vcombine.high %v5193_v32, %v5197_v19  ;;  %v5245_v45 = vld [vmem:[#allocation10 + $0x1d78] sm:$0xff] }
 0x757   :  { %11694 = vmatprep.subr.bf16.mxu1 %v16104_v33  ;;  %v5200_v33 = vld [vmem:[#allocation10 + $0x1c10] sm:$0xff] }
 0x758   :  { %v16157_v43 = vcombine.low %v5200_v33, %v5204_v25 }
 0x759   :  { %11367 = vmatpush1.bf16.msra.mxu0 %v16101_v54  ;;  %v16151_v54 = vcombine.low %v5193_v32, %v5197_v19  ;;  %v16191_v32 = vcombine.low %v5233_v40, %v5237_v16 }
 0x75a   :  { %11695 = vmatpush1.bf16.msra.mxu1 %v16103_v46  ;;  %11368 = vmatprep.subr.bf16.mxu0 %v16110_v52  ;;  %v16158_v46 = vcombine.high %v5200_v33, %v5204_v25  ;;  %v16160_v52 = vcombine.high %v5201_v61, %v5205_v26  ;;  %v5253_v33 = vld [vmem:[#allocation10 + $0x1db8] sm:$0xff] }
 0x75b   :  { %11696 = vmatprep.subr.bf16.mxu1 %v16112_v57  ;;  %v5208_v57 = vld [vmem:[#allocation10 + $0x1c50] sm:$0xff] }
 0x75c   :  { %v16165_v58 = vcombine.low %v5208_v57, %v5212_v42 }
 0x75d   :  { %11369 = vmatpush1.bf16.msra.mxu0 %v16109_v50  ;;  %v16159_v50 = vcombine.low %v5201_v61, %v5205_v26 }
 0x75e   :  { %11697 = vmatpush1.bf16.msra.mxu1 %v16111_v10  ;;  %11370 = vmatprep.subr.bf16.mxu0 %v16118_v55  ;;  %v16166_v10 = vcombine.high %v5208_v57, %v5212_v42  ;;  %v5216_v55 = vld [vmem:[#allocation10 + $0x1c90] sm:$0xff]  ;;  %v5261_v57 = vld [vmem:[#allocation10 + $0x1df8] sm:$0xff] }
 0x75f   :  { %11698 = vmatprep.subr.bf16.mxu1 %v16120_v2  ;;  %v5220_v2 = vld [vmem:[#allocation10 + $0x1cb0] sm:$0xff] }
 0x760   :  { %v16173_v59 = vcombine.low %v5216_v55, %v5220_v2 }
 0x761   :  { %11371 = vmatpush1.bf16.msra.mxu0 %v16117_v37  ;;  %v16167_v37 = vcombine.low %v5209_v47, %v5213_v41 }
 0x762   :  { %11699 = vmatpush1.bf16.msra.mxu1 %v16119_v22  ;;  %11372 = vmatprep.subr.bf16.mxu0 %v16126_v27  ;;  %v16174_v22 = vcombine.high %v5216_v55, %v5220_v2  ;;  %v16176_v27 = vcombine.high %v5217_v3, %v5221_v51  ;;  %v5265_v55 = vld [vmem:[#allocation10 + $0x1e18] sm:$0xff] }
 0x763   :  { %11700 = vmatprep.subr.bf16.mxu1 %v16128_v0  ;;  %v5224_v0 = vld [vmem:[#allocation10 + $0x1cd0] sm:$0xff]  ;;  %v5269_v2 = vld [vmem:[#allocation10 + $0x1e38] sm:$0xff] }
 0x765   :  { %11373 = vmatpush1.bf16.msra.mxu0 %v16125_v6  ;;  %v16182_v6 = vcombine.high %v5224_v0, %v5228_v1 }
 0x766   :  { %11701 = vmatpush1.bf16.msra.mxu1 %v16127_v28  ;;  %11374 = vmatprep.subr.bf16.mxu0 %v16134_v44  ;;  %v16184_v28 = vcombine.high %v5225_v8, %v5229_v5  ;;  %v5232_v44 = vld [vmem:[#allocation10 + $0x1d10] sm:$0xff]  ;;  %v16223_v8 = vcombine.low %v5265_v55, %v5269_v2 }
 0x767   :  { %11702 = vmatprep.subr.bf16.mxu1 %v16136_v11  ;;  %v5236_v11 = vld [vmem:[#allocation10 + $0x1d30] sm:$0xff] }
 0x768   :  { %v16190_v62 = vcombine.high %v5232_v44, %v5236_v11  ;;  %v16189_v60 = vcombine.low %v5232_v44, %v5236_v11  ;;  %v5285_v44 = vld [vmem:[#allocation10 + $0x1eb8] sm:$0xff] }
 0x769   :  { %11375 = vmatpush1.bf16.msra.mxu0 %v16133_v20  ;;  %v16192_v20 = vcombine.high %v5233_v40, %v5237_v16 }
 0x76a   :  { %11703 = vmatpush1.bf16.msra.mxu1 %v16135_v53  ;;  %11376 = vmatprep.subr.bf16.mxu0 %v16142_v34  ;;  %v5240_v53 = vld [vmem:[#allocation10 + $0x1d50] sm:$0xff] }
 0x76b   :  { %11704 = vmatprep.subr.bf16.mxu1 %v16144_v24  ;;  %v5244_v34 = vld [vmem:[#allocation10 + $0x1d70] sm:$0xff]  ;;  %v5241_v24 = vld [vmem:[#allocation10 + $0x1d58] sm:$0xff] }
 0x76c   :  { %v16198_v19 = vcombine.high %v5240_v53, %v5244_v34  ;;  %v16197_v25 = vcombine.low %v5240_v53, %v5244_v34  ;;  %v16199_v61 = vcombine.low %v5241_v24, %v5245_v45  ;;  %v5293_v53 = vld [vmem:[#allocation10 + $0x1ef8] sm:$0xff] }
 0x76d   :  { %11377 = vmatpush1.bf16.msra.mxu0 %v16141_v21  ;;  %v16200_v21 = vcombine.high %v5241_v24, %v5245_v45 }
 0x76e   :  { %11705 = vmatpush1.bf16.msra.mxu1 %v16143_v4  ;;  %11378 = vmatprep.subr.bf16.mxu0 %v16150_v63  ;;  %v5248_v4 = vld [vmem:[#allocation10 + $0x1d90] sm:$0xff] }
 0x76f   :  { %11706 = vmatprep.subr.bf16.mxu1 %v16152_v31  ;;  %v5252_v63 = vld [vmem:[#allocation10 + $0x1db0] sm:$0xff]  ;;  %v5249_v31 = vld [vmem:[#allocation10 + $0x1d98] sm:$0xff] }
 0x770   :  { %v16206_v26 = vcombine.high %v5248_v4, %v5252_v63  ;;  %v16205_v42 = vcombine.low %v5248_v4, %v5252_v63  ;;  %v5301_v4 = vld [vmem:[#allocation10 + $0x1f38] sm:$0xff] }
 0x771   :  { %11379 = vmatpush1.bf16.msra.mxu0 %v16149_v13  ;;  %v16208_v13 = vcombine.high %v5249_v31, %v5253_v33 }
 0x772   :  { %11707 = vmatpush1.bf16.msra.mxu1 %v16151_v54  ;;  %11389 = vmatprep.subr.bf16.mxu0 %v16158_v46  ;;  %v5256_v54 = vld [vmem:[#allocation10 + $0x1dd0] sm:$0xff] }
 0x773   :  { %11717 = vmatprep.subr.bf16.mxu1 %v16160_v52  ;;  %v5260_v46 = vld [vmem:[#allocation10 + $0x1df0] sm:$0xff]  ;;  %v5257_v52 = vld [vmem:[#allocation10 + $0x1dd8] sm:$0xff] }
 0x774   :  { %11381 = vmatmul.mubr.bf16.vlgmr.msra.gmra.mrb[20].mxu0 %v18611_v14  ;;  %v16214_v47 = vcombine.high %v5256_v54, %v5260_v46  ;;  %v16216_v41 = vcombine.high %v5257_v52, %v5261_v57 }
 0x775   :  { %11709 = vmatmul.mubr.bf16.vlgmr.msra.gmra.mrb[20].mxu1 %v18611_v14  ;;  %11390 = vmatpush1.bf16.msra.mxu0 %v16157_v43  ;;  %v16175_v14 = vcombine.low %v5217_v3, %v5221_v51  ;;  %v16207_v43 = vcombine.low %v5249_v31, %v5253_v33  ;;  %v16215_v3 = vcombine.low %v5257_v52, %v5261_v57 }
 0x776   :  { %11421 = vmatprep.mubr.bf16.mxu0 %v18613_v35  ;;  %11718 = vmatpush1.bf16.msra.mxu1 %v16159_v50  ;;  %v5264_v50 = vld [vmem:[#allocation10 + $0x1e10] sm:$0xff] }
 0x777   :  { %11749 = vmatprep.mubr.bf16.mxu1 %v18613_v35  ;;  %11391 = vmatprep.subr.bf16.mxu0 %v16166_v10  ;;  %v16181_v35 = vcombine.low %v5224_v0, %v5228_v1  ;;  %v5268_v10 = vld [vmem:[#allocation10 + $0x1e30] sm:$0xff]  ;;  %v5277_v0 = vld [vmem:[#allocation10 + $0x1e78] sm:$0xff] }
 0x778   :  { %11719 = vmatprep.subr.bf16.mxu1 %v16168_v56  ;;  %v16213_v56 = vcombine.low %v5256_v54, %v5260_v46  ;;  %v16222_v51 = vcombine.high %v5264_v50, %v5268_v10  ;;  %v16221_v1 = vcombine.low %v5264_v50, %v5268_v10  ;;  %v5309_v54 = vld [vmem:[#allocation10 + $0x1f78] sm:$0xff]  ;;  %v18666_v46 = vld [vmem:[#allocation11] sm:$0xff] }
 0x779   :  { %11392 = vmatpush1.bf16.msra.mxu0 %v16165_v58  ;;  %v16224_v58 = vcombine.high %v5265_v55, %v5269_v2  ;;  %v11767_v50 = vrot.slane %v18666_v46, %v18427_v7  ;;  %v5313_v10 = vld [vmem:[#allocation10 + $0x1f98] sm:$0xff]  ;;  %v18670_v2 = vld [vmem:[#allocation13] sm:$0xff] }
 0x77a   :  { %11720 = vmatpush1.bf16.msra.mxu1 %v16167_v37  ;;  %11393 = vmatprep.subr.bf16.mxu0 %v16174_v22  ;;  %v5272_v37 = vld [vmem:[#allocation10 + $0x1e50] sm:$0xff]  ;;  %v5317_v55 = vld [vmem:[#allocation10 + $0x1fb8] sm:$0xff] }
 0x77b   :  { %11721 = vmatprep.subr.bf16.mxu1 %v16176_v27  ;;  %v5276_v22 = vld [vmem:[#allocation10 + $0x1e70] sm:$0xff]  ;;  %v5273_v27 = vld [vmem:[#allocation10 + $0x1e58] sm:$0xff] }
 0x77c   :  { %v16230_v5 = vcombine.high %v5272_v37, %v5276_v22  ;;  %v16229_v11 = vcombine.low %v5272_v37, %v5276_v22  ;;  %v16231_v40 = vcombine.low %v5273_v27, %v5277_v0  ;;  %v5320_v37 = vld [vmem:[#allocation10 + $0x1fd0] sm:$0xff] }
 0x77d   :  { %11394 = vmatpush1.bf16.msra.mxu0 %v16173_v59  ;;  %v16232_v59 = vcombine.high %v5273_v27, %v5277_v0  ;;  %v5324_v22 = vld [vmem:[#allocation10 + $0x1ff0] sm:$0xff]  ;;  %v11801_v27 = vmul.f32 %v11767_v50, %v18646_v39  ;;  %v11817_v0 = vrot.slane %v18670_v2, %v18427_v7  ;;  %v16974_v50 = vld [vmem:[#allocation14 + $0xec] ss:$16 sps:$4 sm:$0xff]  }
 0x77e   :  { %11722 = vmatpush1.bf16.msra.mxu1 %v16175_v14  ;;  %11395 = vmatprep.subr.bf16.mxu0 %v16182_v6  ;;  %v5280_v14 = vld [vmem:[#allocation10 + $0x1e90] sm:$0xff] }
 0x77f   :  { %11723 = vmatprep.subr.bf16.mxu1 %v16184_v28  ;;  %v5284_v6 = vld [vmem:[#allocation10 + $0x1eb0] sm:$0xff]  ;;  %v5281_v28 = vld [vmem:[#allocation10 + $0x1e98] sm:$0xff] }
 0x780   :  { %v16238_v16 = vcombine.high %v5280_v14, %v5284_v6  ;;  %v16237_v34 = vcombine.low %v5280_v14, %v5284_v6  ;;  %v16239_v24 = vcombine.low %v5281_v28, %v5285_v44  ;;  %v16278_v14 = vcombine.high %v5320_v37, %v5324_v22  ;;  %v16929_v39 = vld [vmem:[#allocation14 + $0x4] ss:$16 sps:$4 sm:$0xff]  }
 0x781   :  { %11396 = vmatpush1.bf16.msra.mxu0 %v16181_v35  ;;  %v16240_v35 = vcombine.high %v5281_v28, %v5285_v44  ;;  %v11851_v28 = vadd.f32 %v11817_v0, %v11801_v27  ;;  %v16277_v44 = vcombine.low %v5320_v37, %v5324_v22  ;;  %v16983_v37 = vld [vmem:[#allocation14 + $0x124] ss:$16 sps:$4 sm:$0xff]   ;;  %v16986_v22 = vld [vmem:[#allocation14 + $0x12c] ss:$16 sps:$4 sm:$0xff]   ;;  %v16981_v27 = vld [vmem:[#allocation14 + $0x120] ss:$16 sps:$4 sm:$0xff]  }
 0x782   :  { %11724 = vmatpush1.bf16.msra.mxu1 %v16183_v17  ;;  %11397 = vmatprep.subr.bf16.mxu0 %v16190_v62  ;;  %v5288_v17 = vld [vmem:[#allocation10 + $0x1ed0] sm:$0xff]  ;;  %v16984_v0 = vld [vmem:[#allocation14 + $0x128] ss:$16 sps:$4 sm:$0xff]  }
 0x783   :  { %11725 = vmatprep.subr.bf16.mxu1 %v16192_v20  ;;  %v5292_v62 = vld [vmem:[#allocation10 + $0x1ef0] sm:$0xff]  ;;  %v5289_v20 = vld [vmem:[#allocation10 + $0x1ed8] sm:$0xff] }
 0x784   :  { %v16246_v45 = vcombine.high %v5288_v17, %v5292_v62  ;;  %v16245_v63 = vcombine.low %v5288_v17, %v5292_v62  ;;  %v16247_v31 = vcombine.low %v5289_v20, %v5293_v53  ;;  %v16930_v17 = vld [vmem:[#allocation14 + $0x8] ss:$16 sps:$4 sm:$0xff]   ;;  %v16935_v62 = vld [vmem:[#allocation14 + $0x24] ss:$16 sps:$4 sm:$0xff]  }
 0x785   :  { %11398 = vmatpush1.bf16.msra.mxu0 %v16189_v60  ;;  %v16248_v60 = vcombine.high %v5289_v20, %v5293_v53  ;;  %v16938_v53 = vld [vmem:[#allocation14 + $0x2c] ss:$16 sps:$4 sm:$0xff]  }
 0x786   :  { %11726 = vmatpush1.bf16.msra.mxu1 %v16191_v32  ;;  %11399 = vmatprep.subr.bf16.mxu0 %v16198_v19  ;;  %v5296_v32 = vld [vmem:[#allocation10 + $0x1f10] sm:$0xff] }
 0x787   :  { %11727 = vmatprep.subr.bf16.mxu1 %v16200_v21  ;;  %v5300_v19 = vld [vmem:[#allocation10 + $0x1f30] sm:$0xff]  ;;  %v5297_v21 = vld [vmem:[#allocation10 + $0x1f18] sm:$0xff] }
 0x788   :  { %v16254_v33 = vcombine.high %v5296_v32, %v5300_v19  ;;  %v16253_v52 = vcombine.low %v5296_v32, %v5300_v19  ;;  %v16255_v57 = vcombine.low %v5297_v21, %v5301_v4  ;;  %v16939_v32 = vld [vmem:[#allocation14 + $0x40] ss:$16 sps:$4 sm:$0xff]   ;;  %v16942_v19 = vld [vmem:[#allocation14 + $0x48] ss:$16 sps:$4 sm:$0xff]  }
 0x789   :  { %11400 = vmatpush1.bf16.msra.mxu0 %v16197_v25  ;;  %v16256_v25 = vcombine.high %v5297_v21, %v5301_v4  ;;  %v16947_v21 = vld [vmem:[#allocation14 + $0x64] ss:$16 sps:$4 sm:$0xff]   ;;  %v16950_v4 = vld [vmem:[#allocation14 + $0x6c] ss:$16 sps:$4 sm:$0xff]  }
 0x78a   :  { %11728 = vmatpush1.bf16.msra.mxu1 %v16199_v61  ;;  %11401 = vmatprep.subr.bf16.mxu0 %v16206_v26  ;;  %v5304_v61 = vld [vmem:[#allocation10 + $0x1f50] sm:$0xff] }
 0x78b   :  { %11729 = vmatprep.subr.bf16.mxu1 %v16208_v13  ;;  %v5308_v26 = vld [vmem:[#allocation10 + $0x1f70] sm:$0xff]  ;;  %v5305_v13 = vld [vmem:[#allocation10 + $0x1f58] sm:$0xff] }
 0x78d   :  { %11402 = vmatpush1.bf16.msra.mxu0 %v16205_v42  ;;  %v16262_v42 = vcombine.high %v5304_v61, %v5308_v26 }
 0x78e   :  { %11730 = vmatpush1.bf16.msra.mxu1 %v16207_v43  ;;  %11403 = vmatprep.subr.bf16.mxu0 %v16214_v47  ;;  %v16264_v43 = vcombine.high %v5305_v13, %v5309_v54  ;;  %v5312_v47 = vld [vmem:[#allocation10 + $0x1f90] sm:$0xff] }
 0x78f   :  { %11731 = vmatprep.subr.bf16.mxu1 %v16216_v41  ;;  %v5316_v41 = vld [vmem:[#allocation10 + $0x1fb0] sm:$0xff] }
 0x791   :  { %11404 = vmatpush1.bf16.msra.mxu0 %v16213_v56  ;;  %v16261_v56 = vcombine.low %v5304_v61, %v5308_v26  ;;  %v16954_v61 = vld [vmem:[#allocation14 + $0x88] ss:$16 sps:$4 sm:$0xff]   ;;  %v16959_v26 = vld [vmem:[#allocation14 + $0xa4] ss:$16 sps:$4 sm:$0xff]  }
 0x792   :  { %11732 = vmatpush1.bf16.msra.mxu1 %v16215_v3  ;;  %11405 = vmatprep.subr.bf16.mxu0 %v16222_v51  ;;  %v16263_v3 = vcombine.low %v5305_v13, %v5309_v54  ;;  %v16270_v51 = vcombine.high %v5312_v47, %v5316_v41  ;;  %v16962_v13 = vld [vmem:[#allocation14 + $0xac] ss:$16 sps:$4 sm:$0xff]   ;;  %v16957_v54 = vld [vmem:[#allocation14 + $0xa0] ss:$16 sps:$4 sm:$0xff]  }
 0x793   :  { %11733 = vmatprep.subr.bf16.mxu1 %v16224_v58  ;;  %v16272_v58 = vcombine.high %v5313_v10, %v5317_v55 }
 0x795   :  { %11406 = vmatpush1.bf16.msra.mxu0 %v16221_v1  ;;  %v5321_v1 = vld [vmem:[#allocation10 + $0x1fd8] sm:$0xff] }
 0x796   :  { %11734 = vmatpush1.bf16.msra.mxu1 %v16223_v8  ;;  %11407 = vmatprep.subr.bf16.mxu0 %v16230_v5  ;;  %v5325_v8 = vld [vmem:[#allocation10 + $0x1ff8] sm:$0xff]  ;;  %v16269_v5 = vcombine.low %v5312_v47, %v5316_v41  ;;  %v16971_v41 = vld [vmem:[#allocation14 + $0xe4] ss:$16 sps:$4 sm:$0xff]  }
 0x797   :  { %11735 = vmatprep.subr.bf16.mxu1 %v16232_v59  ;;  %v16271_v59 = vcombine.low %v5313_v10, %v5317_v55  ;;  %v16280_v6 = vcombine.high %v5321_v1, %v5325_v8  ;;  %v16966_v47 = vld [vmem:[#allocation14 + $0xc8] ss:$16 sps:$4 sm:$0xff]   ;;  %v16969_v10 = vld [vmem:[#allocation14 + $0xe0] ss:$16 sps:$4 sm:$0xff]  }
 0x798   :  { %v16972_v55 = vld [vmem:[#allocation14 + $0xe8] ss:$16 sps:$4 sm:$0xff]  }
 0x799   :  { %11408 = vmatpush1.bf16.msra.mxu0 %v16229_v11  ;;  %v16279_v11 = vcombine.low %v5321_v1, %v5325_v8  ;;  %v16989_v1 = vld [vmem:[#allocation14 + $0x144] ss:$16 sps:$4 sm:$0xff]   ;;  %v16992_v8 = vld [vmem:[#allocation14 + $0x14c] ss:$16 sps:$4 sm:$0xff]  }
 0x79a   :  { %11736 = vmatpush1.bf16.msra.mxu1 %v16231_v40  ;;  %11409 = vmatprep.subr.bf16.mxu0 %v16238_v16  ;;  %v16932_v40 = vld [vmem:[#allocation14 + $0xc] ss:$16 sps:$4 sm:$0xff]   ;;  %v11859_v16 = vmax.f32 %v11851_v28, 0.0  ;;  %v16993_v28 = vld [vmem:[#allocation14 + $0x160] ss:$16 sps:$4 sm:$0xff]  }
 0x79b   :  { %11737 = vmatprep.subr.bf16.mxu1 %v16240_v35  ;;  %v16927_v35 = vld [vmem:[#allocation14] ss:$16 sps:$4 sm:$0xff]  }
 0x79c   :  { %v11867_v20 = vpack.c.bf16 %v11859_v16, %v11859_v16  ;;  %v11763_v16 = vrot.slane %v18666_v46, %v18445_v12 }
 0x79d   :  { %11410 = vmatpush1.bf16.msra.mxu0 %v16237_v34  ;;  %v16933_v34 = vld [vmem:[#allocation14 + $0x20] ss:$16 sps:$4 sm:$0xff]  }
 0x79e   :  { %11738 = vmatpush1.bf16.msra.mxu1 %v16239_v24  ;;  %11411 = vmatprep.subr.bf16.mxu0 %v16246_v45  ;;  %v16936_v24 = vld [vmem:[#allocation14 + $0x28] ss:$16 sps:$4 sm:$0xff]   ;;  %v16941_v45 = vld [vmem:[#allocation14 + $0x44] ss:$16 sps:$4 sm:$0xff]  }
 0x79f   :  { %11739 = vmatprep.subr.bf16.mxu1 %v16248_v60  ;;  %v16944_v60 = vld [vmem:[#allocation14 + $0x4c] ss:$16 sps:$4 sm:$0xff]  }
 0x7a1   :  { %11412 = vmatpush1.bf16.msra.mxu0 %v16245_v63  ;;  %v16948_v63 = vld [vmem:[#allocation14 + $0x68] ss:$16 sps:$4 sm:$0xff]  }
 0x7a2   :  { %11740 = vmatpush1.bf16.msra.mxu1 %v16247_v31  ;;  %11413 = vmatprep.subr.bf16.mxu0 %v16254_v33  ;;  %v16953_v31 = vld [vmem:[#allocation14 + $0x84] ss:$16 sps:$4 sm:$0xff]   ;;  %v16956_v33 = vld [vmem:[#allocation14 + $0x8c] ss:$16 sps:$4 sm:$0xff]  }
 0x7a3   :  { %11741 = vmatprep.subr.bf16.mxu1 %v16256_v25  ;;  %v16951_v25 = vld [vmem:[#allocation14 + $0x80] ss:$16 sps:$4 sm:$0xff]  }
 0x7a5   :  { %11414 = vmatpush1.bf16.msra.mxu0 %v16253_v52  ;;  %v16960_v52 = vld [vmem:[#allocation14 + $0xa8] ss:$16 sps:$4 sm:$0xff]  }
 0x7a6   :  { %11742 = vmatpush1.bf16.msra.mxu1 %v16255_v57  ;;  %11415 = vmatprep.subr.bf16.mxu0 %v16262_v42  ;;  %v16965_v57 = vld [vmem:[#allocation14 + $0xc4] ss:$16 sps:$4 sm:$0xff]   ;;  %v16968_v42 = vld [vmem:[#allocation14 + $0xcc] ss:$16 sps:$4 sm:$0xff]  }
 0x7a7   :  { %11743 = vmatprep.subr.bf16.mxu1 %v16264_v43  ;;  %v16963_v43 = vld [vmem:[#allocation14 + $0xc0] ss:$16 sps:$4 sm:$0xff]  }
 0x7a9   :  { %11416 = vmatpush1.bf16.msra.mxu0 %v16261_v56  ;;  %v16977_v56 = vld [vmem:[#allocation14 + $0x104] ss:$16 sps:$4 sm:$0xff]  }
 0x7aa   :  { %11744 = vmatpush1.bf16.msra.mxu1 %v16263_v3  ;;  %11417 = vmatprep.subr.bf16.mxu0 %v16270_v51  ;;  %v16980_v3 = vld [vmem:[#allocation14 + $0x10c] ss:$16 sps:$4 sm:$0xff]   ;;  %v16975_v51 = vld [vmem:[#allocation14 + $0x100] ss:$16 sps:$4 sm:$0xff]  }
 0x7ab   :  { %11745 = vmatprep.subr.bf16.mxu1 %v16272_v58  ;;  %v16978_v58 = vld [vmem:[#allocation14 + $0x108] ss:$16 sps:$4 sm:$0xff]  }
 0x7ad   :  { %11418 = vmatpush1.bf16.msra.mxu0 %v16269_v5  ;;  %v16987_v5 = vld [vmem:[#allocation14 + $0x140] ss:$16 sps:$4 sm:$0xff]  }
 0x7ae   :  { %11746 = vmatpush1.bf16.msra.mxu1 %v16271_v59  ;;  %11419 = vmatprep.subr.bf16.mxu0 %v16278_v14  ;;  %v16990_v59 = vld [vmem:[#allocation14 + $0x148] ss:$16 sps:$4 sm:$0xff]   ;;  %v16995_v14 = vld [vmem:[#allocation14 + $0x164] ss:$16 sps:$4 sm:$0xff]  }
 0x7af   :  { %11747 = vmatprep.subr.bf16.mxu1 %v16280_v6  ;;  %v16998_v6 = vld [vmem:[#allocation14 + $0x16c] ss:$16 sps:$4 sm:$0xff]  }
 0x7b1   :  { %11420 = vmatpush1.bf16.msra.mxu0 %v16277_v44  ;;  %v16996_v44 = vld [vmem:[#allocation14 + $0x168] ss:$16 sps:$4 sm:$0xff]  }
 0x7b2   :  { %11748 = vmatpush1.bf16.msra.mxu1 %v16279_v11  ;;  %13410 = vmatprep.subr.bf16.mxu0 %v16929_v39  ;;  %v17001_v11 = vld [vmem:[#allocation14 + $0x184] ss:$16 sps:$4 sm:$0xff]   ;;  %v17004_v39 = vld [vmem:[#allocation14 + $0x18c] ss:$16 sps:$4 sm:$0xff]  }
 0x7b3   :  { %13574 = vmatprep.subr.bf16.mxu1 %v16932_v40  ;;  %v16999_v40 = vld [vmem:[#allocation14 + $0x180] ss:$16 sps:$4 sm:$0xff]  }
 0x7b4   :  { %11422 = vmatmul.mubr.bf16.vlgmr.msra.gmra.mrb[20].mxu0 %v18624_v29 }
 0x7b5   :  { %11750 = vmatmul.mubr.bf16.vlgmr.msra.gmra.mrb[20].mxu1 %v18624_v29  ;;  %13411 = vmatpush1.bf16.msra.mxu0 %v16927_v35  ;;  %v16945_v29 = vld [vmem:[#allocation14 + $0x60] ss:$16 sps:$4 sm:$0xff]   ;;  %v17002_v35 = vld [vmem:[#allocation14 + $0x188] ss:$16 sps:$4 sm:$0xff]  }
 0x7b6   :  { %13442 = vmatprep.mubr.bf16.mxu0 %v11867_v20  ;;  %13575 = vmatpush1.bf16.msra.mxu1 %v16930_v17  ;;  %v17007_v17 = vld [vmem:[#allocation14 + $0x1a4] ss:$16 sps:$4 sm:$0xff]  }
 0x7b7   :  { %13606 = vmatprep.mubr.bf16.mxu1 %v11867_v20  ;;  %13412 = vmatprep.subr.bf16.mxu0 %v16935_v62  ;;  %v17010_v62 = vld [vmem:[#allocation14 + $0x1ac] ss:$16 sps:$4 sm:$0xff]   ;;  %v11775_v20 = vrot.slane %v18666_v46, %v18448_v36 }
 0x7b8   :  { %13576 = vmatprep.subr.bf16.mxu1 %v16938_v53  ;;  %v17005_v53 = vld [vmem:[#allocation14 + $0x1a0] ss:$16 sps:$4 sm:$0xff]  }
 0x7b9   :  { %13413 = vmatpush1.bf16.msra.mxu0 %v16933_v34  ;;  %v11800_v34 = vmul.f32 %v11763_v16, %v18642_v23  ;;  %v17014_v23 = vld [vmem:[#allocation14 + $0x1c8] ss:$16 sps:$4 sm:$0xff]   ;;  %v17067_v16 = vld [vmem:[#allocation14 + $0x2e4] ss:$16 sps:$4 sm:$0xff]  }
 0x7ba   :  { %13577 = vmatpush1.bf16.msra.mxu1 %v16936_v24  ;;  %13414 = vmatprep.subr.bf16.mxu0 %v16941_v45  ;;  %v11813_v24 = vrot.slane %v18670_v2, %v18445_v12  ;;  %v17008_v45 = vld [vmem:[#allocation14 + $0x1a8] ss:$16 sps:$4 sm:$0xff]  }
 0x7bb   :  { %13578 = vmatprep.subr.bf16.mxu1 %v16944_v60  ;;  %v17013_v60 = vld [vmem:[#allocation14 + $0x1c4] ss:$16 sps:$4 sm:$0xff]  }
 0x7bd   :  { %13415 = vmatpush1.bf16.msra.mxu0 %v16939_v32  ;;  %v17016_v32 = vld [vmem:[#allocation14 + $0x1cc] ss:$16 sps:$4 sm:$0xff]  }
 0x7be   :  { %13579 = vmatpush1.bf16.msra.mxu1 %v16942_v19  ;;  %13416 = vmatprep.subr.bf16.mxu0 %v16947_v21  ;;  %v11803_v19 = vmul.f32 %v11775_v20, %v18648_v30  ;;  %v11825_v21 = vrot.slane %v18670_v2, %v18448_v36  ;;  %v17025_v30 = vld [vmem:[#allocation14 + $0x204] ss:$16 sps:$4 sm:$0xff]  }
 0x7bf   :  { %13580 = vmatprep.subr.bf16.mxu1 %v16950_v4  ;;  %v17011_v4 = vld [vmem:[#allocation14 + $0x1c0] ss:$16 sps:$4 sm:$0xff]   ;;  %v17073_v20 = vld [vmem:[#allocation14 + $0x304] ss:$16 sps:$4 sm:$0xff]  }
 0x7c1   :  { %13417 = vmatpush1.bf16.msra.mxu0 %v16945_v29  ;;  %v11850_v29 = vadd.f32 %v11813_v24, %v11800_v34  ;;  %v17071_v34 = vld [vmem:[#allocation14 + $0x300] ss:$16 sps:$4 sm:$0xff]   ;;  %v17074_v24 = vld [vmem:[#allocation14 + $0x308] ss:$16 sps:$4 sm:$0xff]  }
 0x7c2   :  { %13581 = vmatpush1.bf16.msra.mxu1 %v16948_v63  ;;  %13418 = vmatprep.subr.bf16.mxu0 %v16953_v31  ;;  %v17019_v63 = vld [vmem:[#allocation14 + $0x1e4] ss:$16 sps:$4 sm:$0xff]   ;;  %v17022_v31 = vld [vmem:[#allocation14 + $0x1ec] ss:$16 sps:$4 sm:$0xff]  }
 0x7c3   :  { %13582 = vmatprep.subr.bf16.mxu1 %v16956_v33  ;;  %v11853_v33 = vadd.f32 %v11825_v21, %v11803_v19  ;;  %v17080_v19 = vld [vmem:[#allocation14 + $0x328] ss:$16 sps:$4 sm:$0xff]   ;;  %v17085_v21 = vld [vmem:[#allocation14 + $0x344] ss:$16 sps:$4 sm:$0xff]  }
 0x7c5   :  { %13419 = vmatpush1.bf16.msra.mxu0 %v16951_v25  ;;  %v17017_v25 = vld [vmem:[#allocation14 + $0x1e0] ss:$16 sps:$4 sm:$0xff]  }
 0x7c6   :  { %13583 = vmatpush1.bf16.msra.mxu1 %v16954_v61  ;;  %13420 = vmatprep.subr.bf16.mxu0 %v16959_v26  ;;  %v11858_v61 = vmax.f32 %v11850_v29, 0.0  ;;  %v17020_v26 = vld [vmem:[#allocation14 + $0x1e8] ss:$16 sps:$4 sm:$0xff]   ;;  %v17083_v29 = vld [vmem:[#allocation14 + $0x340] ss:$16 sps:$4 sm:$0xff]  }
 0x7c7   :  { %13584 = vmatprep.subr.bf16.mxu1 %v16962_v13  ;;  %v17028_v13 = vld [vmem:[#allocation14 + $0x20c] ss:$16 sps:$4 sm:$0xff]  }
 0x7c9   :  { %13421 = vmatpush1.bf16.msra.mxu0 %v16957_v54  ;;  %v11861_v54 = vmax.f32 %v11853_v33, 0.0  ;;  %v17089_v33 = vld [vmem:[#allocation14 + $0x360] ss:$16 sps:$4 sm:$0xff]  }
 0x7ca   :  { %13585 = vmatpush1.bf16.msra.mxu1 %v16960_v52  ;;  %13422 = vmatprep.subr.bf16.mxu0 %v16965_v57  ;;  %v17023_v52 = vld [vmem:[#allocation14 + $0x200] ss:$16 sps:$4 sm:$0xff]   ;;  %v11866_v57 = vpack.c.bf16 %v11858_v61, %v11858_v61  ;;  %v17097_v61 = vld [vmem:[#allocation14 + $0x384] ss:$16 sps:$4 sm:$0xff]  }
 0x7cb   :  { %13586 = vmatprep.subr.bf16.mxu1 %v16968_v42  ;;  %v17026_v42 = vld [vmem:[#allocation14 + $0x208] ss:$16 sps:$4 sm:$0xff]  }
 0x7cd   :  { %13423 = vmatpush1.bf16.msra.mxu0 %v16963_v43  ;;  %v17031_v43 = vld [vmem:[#allocation14 + $0x224] ss:$16 sps:$4 sm:$0xff]  }
 0x7ce   :  { %13587 = vmatpush1.bf16.msra.mxu1 %v16966_v47  ;;  %13424 = vmatprep.subr.bf16.mxu0 %v16971_v41  ;;  %v11869_v47 = vpack.c.bf16 %v11861_v54, %v11861_v54  ;;  %v17034_v41 = vld [vmem:[#allocation14 + $0x22c] ss:$16 sps:$4 sm:$0xff]   ;;  %v17098_v54 = vld [vmem:[#allocation14 + $0x388] ss:$16 sps:$4 sm:$0xff]  }
 0x7cf   :  { %13588 = vmatprep.subr.bf16.mxu1 %v16974_v50  ;;  %v17029_v50 = vld [vmem:[#allocation14 + $0x220] ss:$16 sps:$4 sm:$0xff]  }
 0x7d1   :  { %13425 = vmatpush1.bf16.msra.mxu0 %v16969_v10  ;;  %v17032_v10 = vld [vmem:[#allocation14 + $0x228] ss:$16 sps:$4 sm:$0xff]  }
 0x7d2   :  { %13589 = vmatpush1.bf16.msra.mxu1 %v16972_v55  ;;  %13426 = vmatprep.subr.bf16.mxu0 %v16977_v56  ;;  %v17037_v55 = vld [vmem:[#allocation14 + $0x244] ss:$16 sps:$4 sm:$0xff]   ;;  %v17040_v56 = vld [vmem:[#allocation14 + $0x24c] ss:$16 sps:$4 sm:$0xff]  }
 0x7d3   :  { %13590 = vmatprep.subr.bf16.mxu1 %v16980_v3  ;;  %v17035_v3 = vld [vmem:[#allocation14 + $0x240] ss:$16 sps:$4 sm:$0xff]  }
 0x7d5   :  { %13427 = vmatpush1.bf16.msra.mxu0 %v16975_v51  ;;  %v17038_v51 = vld [vmem:[#allocation14 + $0x248] ss:$16 sps:$4 sm:$0xff]  }
 0x7d6   :  { %13591 = vmatpush1.bf16.msra.mxu1 %v16978_v58  ;;  %13428 = vmatprep.subr.bf16.mxu0 %v16983_v37  ;;  %v17043_v58 = vld [vmem:[#allocation14 + $0x264] ss:$16 sps:$4 sm:$0xff]   ;;  %v17046_v37 = vld [vmem:[#allocation14 + $0x26c] ss:$16 sps:$4 sm:$0xff]  }
 0x7d7   :  { %13592 = vmatprep.subr.bf16.mxu1 %v16986_v22  ;;  %v17041_v22 = vld [vmem:[#allocation14 + $0x260] ss:$16 sps:$4 sm:$0xff]  }
 0x7d9   :  { %13429 = vmatpush1.bf16.msra.mxu0 %v16981_v27  ;;  %v17044_v27 = vld [vmem:[#allocation14 + $0x268] ss:$16 sps:$4 sm:$0xff]  }
 0x7da   :  { %13593 = vmatpush1.bf16.msra.mxu1 %v16984_v0  ;;  %13430 = vmatprep.subr.bf16.mxu0 %v16989_v1  ;;  %v17049_v0 = vld [vmem:[#allocation14 + $0x284] ss:$16 sps:$4 sm:$0xff]   ;;  %v17052_v1 = vld [vmem:[#allocation14 + $0x28c] ss:$16 sps:$4 sm:$0xff]  }
 0x7db   :  { %13594 = vmatprep.subr.bf16.mxu1 %v16992_v8  ;;  %v17047_v8 = vld [vmem:[#allocation14 + $0x280] ss:$16 sps:$4 sm:$0xff]  }
 0x7dd   :  { %13431 = vmatpush1.bf16.msra.mxu0 %v16987_v5  ;;  %v17050_v5 = vld [vmem:[#allocation14 + $0x288] ss:$16 sps:$4 sm:$0xff]  }
 0x7de   :  { %13595 = vmatpush1.bf16.msra.mxu1 %v16990_v59  ;;  %13432 = vmatprep.subr.bf16.mxu0 %v16995_v14  ;;  %v17055_v59 = vld [vmem:[#allocation14 + $0x2a4] ss:$16 sps:$4 sm:$0xff]   ;;  %v17058_v14 = vld [vmem:[#allocation14 + $0x2ac] ss:$16 sps:$4 sm:$0xff]  }
 0x7df   :  { %13596 = vmatprep.subr.bf16.mxu1 %v16998_v6  ;;  %v17053_v6 = vld [vmem:[#allocation14 + $0x2a0] ss:$16 sps:$4 sm:$0xff]  }
 0x7e1   :  { %13433 = vmatpush1.bf16.msra.mxu0 %v16993_v28  ;;  %v17056_v28 = vld [vmem:[#allocation14 + $0x2a8] ss:$16 sps:$4 sm:$0xff]  }
 0x7e2   :  { %13597 = vmatpush1.bf16.msra.mxu1 %v16996_v44  ;;  %13434 = vmatprep.subr.bf16.mxu0 %v17001_v11  ;;  %v17061_v44 = vld [vmem:[#allocation14 + $0x2c4] ss:$16 sps:$4 sm:$0xff]   ;;  %v17064_v11 = vld [vmem:[#allocation14 + $0x2cc] ss:$16 sps:$4 sm:$0xff]  }
 0x7e3   :  { %13598 = vmatprep.subr.bf16.mxu1 %v17004_v39  ;;  %v17059_v39 = vld [vmem:[#allocation14 + $0x2c0] ss:$16 sps:$4 sm:$0xff]  }
 0x7e5   :  { %13435 = vmatpush1.bf16.msra.mxu0 %v16999_v40  ;;  %v17062_v40 = vld [vmem:[#allocation14 + $0x2c8] ss:$16 sps:$4 sm:$0xff]  }
 0x7e6   :  { %13599 = vmatpush1.bf16.msra.mxu1 %v17002_v35  ;;  %13436 = vmatprep.subr.bf16.mxu0 %v17007_v17  ;;  %v17070_v35 = vld [vmem:[#allocation14 + $0x2ec] ss:$16 sps:$4 sm:$0xff]   ;;  %v17065_v17 = vld [vmem:[#allocation14 + $0x2e0] ss:$16 sps:$4 sm:$0xff]  }
 0x7e7   :  { %13600 = vmatprep.subr.bf16.mxu1 %v17010_v62  ;;  %v17068_v62 = vld [vmem:[#allocation14 + $0x2e8] ss:$16 sps:$4 sm:$0xff]  }
 0x7e9   :  { %13437 = vmatpush1.bf16.msra.mxu0 %v17005_v53  ;;  %v17076_v53 = vld [vmem:[#allocation14 + $0x30c] ss:$16 sps:$4 sm:$0xff]  }
 0x7ea   :  { %13601 = vmatpush1.bf16.msra.mxu1 %v17008_v45  ;;  %13438 = vmatprep.subr.bf16.mxu0 %v17013_v60  ;;  %v17079_v45 = vld [vmem:[#allocation14 + $0x324] ss:$16 sps:$4 sm:$0xff]   ;;  %v17082_v60 = vld [vmem:[#allocation14 + $0x32c] ss:$16 sps:$4 sm:$0xff]  }
 0x7eb   :  { %13602 = vmatprep.subr.bf16.mxu1 %v17016_v32  ;;  %v17077_v32 = vld [vmem:[#allocation14 + $0x320] ss:$16 sps:$4 sm:$0xff]  }
 0x7ed   :  { %13439 = vmatpush1.bf16.msra.mxu0 %v17011_v4  ;;  %v17088_v4 = vld [vmem:[#allocation14 + $0x34c] ss:$16 sps:$4 sm:$0xff]  }
 0x7ee   :  { %13603 = vmatpush1.bf16.msra.mxu1 %v17014_v23  ;;  %13440 = vmatprep.subr.bf16.mxu0 %v17019_v63  ;;  %v17086_v23 = vld [vmem:[#allocation14 + $0x348] ss:$16 sps:$4 sm:$0xff]   ;;  %v17091_v63 = vld [vmem:[#allocation14 + $0x364] ss:$16 sps:$4 sm:$0xff]  }
 0x7ef   :  { %13604 = vmatprep.subr.bf16.mxu1 %v17022_v31  ;;  %v17094_v31 = vld [vmem:[#allocation14 + $0x36c] ss:$16 sps:$4 sm:$0xff]  }
 0x7f1   :  { %13441 = vmatpush1.bf16.msra.mxu0 %v17017_v25  ;;  %v17092_v25 = vld [vmem:[#allocation14 + $0x368] ss:$16 sps:$4 sm:$0xff]  }
 0x7f2   :  { %13605 = vmatpush1.bf16.msra.mxu1 %v17020_v26  ;;  %13451 = vmatprep.subr.bf16.mxu0 %v17025_v30  ;;  %v17100_v26 = vld [vmem:[#allocation14 + $0x38c] ss:$16 sps:$4 sm:$0xff]   ;;  %v17095_v30 = vld [vmem:[#allocation14 + $0x380] ss:$16 sps:$4 sm:$0xff]  }
 0x7f3   :  { %13615 = vmatprep.subr.bf16.mxu1 %v17028_v13  ;;  %v11771_v13 = vrot.slane %v18666_v46, %v18477_v38 }
 0x7f4   :  { %13443 = vmatmul.mubr.bf16.vlgmr.msra.gmra.mrb[24].mxu0 %v11866_v57 }
 0x7f5   :  { %13607 = vmatmul.mubr.bf16.vlgmr.msra.gmra.mrb[24].mxu1 %v11866_v57  ;;  %13452 = vmatpush1.bf16.msra.mxu0 %v17023_v52  ;;  %v17103_v52 = vld [vmem:[#allocation14 + $0x3a4] ss:$16 sps:$4 sm:$0xff]   ;;  %v17106_v57 = vld [vmem:[#allocation14 + $0x3ac] ss:$16 sps:$4 sm:$0xff]  }
 0x7f6   :  { %13483 = vmatprep.mubr.bf16.mxu0 %v11869_v47  ;;  %13616 = vmatpush1.bf16.msra.mxu1 %v17026_v42  ;;  %v17101_v42 = vld [vmem:[#allocation14 + $0x3a0] ss:$16 sps:$4 sm:$0xff]  }
 0x7f7   :  { %13647 = vmatprep.mubr.bf16.mxu1 %v11869_v47  ;;  %13453 = vmatprep.subr.bf16.mxu0 %v17031_v43  ;;  %v11802_v43 = vmul.f32 %v11771_v13, %v18644_v9  ;;  %v11821_v47 = vrot.slane %v18670_v2, %v18477_v38  ;;  %v17113_v9 = vld [vmem:[#allocation14 + $0x3e0] ss:$16 sps:$4 sm:$0xff]   ;;  %v17170_v13 = vld [vmem:[#allocation14 + $0x508] ss:$16 sps:$4 sm:$0xff]  }
 0x7f8   :  { %13617 = vmatprep.subr.bf16.mxu1 %v17034_v41  ;;  %v17104_v41 = vld [vmem:[#allocation14 + $0x3a8] ss:$16 sps:$4 sm:$0xff]  }
 0x7f9   :  { %13454 = vmatpush1.bf16.msra.mxu0 %v17029_v50  ;;  %v17109_v50 = vld [vmem:[#allocation14 + $0x3c4] ss:$16 sps:$4 sm:$0xff]  }
 0x7fa   :  { %13618 = vmatpush1.bf16.msra.mxu1 %v17032_v10  ;;  %13455 = vmatprep.subr.bf16.mxu0 %v17037_v55  ;;  %v17112_v10 = vld [vmem:[#allocation14 + $0x3cc] ss:$16 sps:$4 sm:$0xff]   ;;  %v17107_v55 = vld [vmem:[#allocation14 + $0x3c0] ss:$16 sps:$4 sm:$0xff]  }
 0x7fb   :  { %13619 = vmatprep.subr.bf16.mxu1 %v17040_v56  ;;  %v11852_v56 = vadd.f32 %v11821_v47, %v11802_v43  ;;  %v17181_v43 = vld [vmem:[#allocation14 + $0x544] ss:$16 sps:$4 sm:$0xff]   ;;  %v17184_v47 = vld [vmem:[#allocation14 + $0x54c] ss:$16 sps:$4 sm:$0xff]  }
 0x7fd   :  { %13456 = vmatpush1.bf16.msra.mxu0 %v17035_v3  ;;  %v17110_v3 = vld [vmem:[#allocation14 + $0x3c8] ss:$16 sps:$4 sm:$0xff]  }
 0x7fe   :  { %13620 = vmatpush1.bf16.msra.mxu1 %v17038_v51  ;;  %13457 = vmatprep.subr.bf16.mxu0 %v17043_v58  ;;  %v17115_v51 = vld [vmem:[#allocation14 + $0x3e4] ss:$16 sps:$4 sm:$0xff]   ;;  %v17118_v58 = vld [vmem:[#allocation14 + $0x3ec] ss:$16 sps:$4 sm:$0xff]  }
 0x7ff   :  { %13621 = vmatprep.subr.bf16.mxu1 %v17046_v37  ;;  %v11860_v37 = vmax.f32 %v11852_v56, 0.0  ;;  %v17185_v56 = vld [vmem:[#allocation14 + $0x560] ss:$16 sps:$4 sm:$0xff]  }
 0x801   :  { %13458 = vmatpush1.bf16.msra.mxu0 %v17041_v22  ;;  %v17116_v22 = vld [vmem:[#allocation14 + $0x3e8] ss:$16 sps:$4 sm:$0xff]  }
 0x802   :  { %13622 = vmatpush1.bf16.msra.mxu1 %v17044_v27  ;;  %13459 = vmatprep.subr.bf16.mxu0 %v17049_v0  ;;  %v17121_v27 = vld [vmem:[#allocation14 + $0x404] ss:$16 sps:$4 sm:$0xff]   ;;  %v17124_v0 = vld [vmem:[#allocation14 + $0x40c] ss:$16 sps:$4 sm:$0xff]  }
 0x803   :  { %13623 = vmatprep.subr.bf16.mxu1 %v17052_v1  ;;  %v17119_v1 = vld [vmem:[#allocation14 + $0x400] ss:$16 sps:$4 sm:$0xff]  }
 0x805   :  { %13460 = vmatpush1.bf16.msra.mxu0 %v17047_v8  ;;  %v11868_v8 = vpack.c.bf16 %v11860_v37, %v11860_v37  ;;  %v17194_v37 = vld [vmem:[#allocation14 + $0x588] ss:$16 sps:$4 sm:$0xff]  }
 0x806   :  { %13624 = vmatpush1.bf16.msra.mxu1 %v17050_v5  ;;  %13461 = vmatprep.subr.bf16.mxu0 %v17055_v59  ;;  %v17122_v5 = vld [vmem:[#allocation14 + $0x408] ss:$16 sps:$4 sm:$0xff]   ;;  %v17127_v59 = vld [vmem:[#allocation14 + $0x424] ss:$16 sps:$4 sm:$0xff]  }
 0x807   :  { %13625 = vmatprep.subr.bf16.mxu1 %v17058_v14  ;;  %v17130_v14 = vld [vmem:[#allocation14 + $0x42c] ss:$16 sps:$4 sm:$0xff]  }
 0x809   :  { %13462 = vmatpush1.bf16.msra.mxu0 %v17053_v6  ;;  %v17125_v6 = vld [vmem:[#allocation14 + $0x420] ss:$16 sps:$4 sm:$0xff]  }
 0x80a   :  { %13626 = vmatpush1.bf16.msra.mxu1 %v17056_v28  ;;  %13463 = vmatprep.subr.bf16.mxu0 %v17061_v44  ;;  %v17128_v28 = vld [vmem:[#allocation14 + $0x428] ss:$16 sps:$4 sm:$0xff]   ;;  %v17133_v44 = vld [vmem:[#allocation14 + $0x444] ss:$16 sps:$4 sm:$0xff]  }
 0x80b   :  { %13627 = vmatprep.subr.bf16.mxu1 %v17064_v11  ;;  %v17136_v11 = vld [vmem:[#allocation14 + $0x44c] ss:$16 sps:$4 sm:$0xff]  }
 0x80d   :  { %13464 = vmatpush1.bf16.msra.mxu0 %v17059_v39  ;;  %v17131_v39 = vld [vmem:[#allocation14 + $0x440] ss:$16 sps:$4 sm:$0xff]  }
 0x80e   :  { %13628 = vmatpush1.bf16.msra.mxu1 %v17062_v40  ;;  %13465 = vmatprep.subr.bf16.mxu0 %v17067_v16  ;;  %v17134_v40 = vld [vmem:[#allocation14 + $0x448] ss:$16 sps:$4 sm:$0xff]   ;;  %v17139_v16 = vld [vmem:[#allocation14 + $0x464] ss:$16 sps:$4 sm:$0xff]  }
 0x80f   :  { %13629 = vmatprep.subr.bf16.mxu1 %v17070_v35  ;;  %v17142_v35 = vld [vmem:[#allocation14 + $0x46c] ss:$16 sps:$4 sm:$0xff]  }
 0x811   :  { %13466 = vmatpush1.bf16.msra.mxu0 %v17065_v17  ;;  %v17137_v17 = vld [vmem:[#allocation14 + $0x460] ss:$16 sps:$4 sm:$0xff]  }
 0x812   :  { %13630 = vmatpush1.bf16.msra.mxu1 %v17068_v62  ;;  %13467 = vmatprep.subr.bf16.mxu0 %v17073_v20  ;;  %v17140_v62 = vld [vmem:[#allocation14 + $0x468] ss:$16 sps:$4 sm:$0xff]   ;;  %v17145_v20 = vld [vmem:[#allocation14 + $0x484] ss:$16 sps:$4 sm:$0xff]  }
 0x813   :  { %13631 = vmatprep.subr.bf16.mxu1 %v17076_v53  ;;  %v17148_v53 = vld [vmem:[#allocation14 + $0x48c] ss:$16 sps:$4 sm:$0xff]  }
 0x815   :  { %13468 = vmatpush1.bf16.msra.mxu0 %v17071_v34  ;;  %v17143_v34 = vld [vmem:[#allocation14 + $0x480] ss:$16 sps:$4 sm:$0xff]  }
 0x816   :  { %13632 = vmatpush1.bf16.msra.mxu1 %v17074_v24  ;;  %13469 = vmatprep.subr.bf16.mxu0 %v17079_v45  ;;  %v17146_v24 = vld [vmem:[#allocation14 + $0x488] ss:$16 sps:$4 sm:$0xff]   ;;  %v17151_v45 = vld [vmem:[#allocation14 + $0x4a4] ss:$16 sps:$4 sm:$0xff]  }
 0x817   :  { %13633 = vmatprep.subr.bf16.mxu1 %v17082_v60  ;;  %v17154_v60 = vld [vmem:[#allocation14 + $0x4ac] ss:$16 sps:$4 sm:$0xff]  }
 0x819   :  { %13470 = vmatpush1.bf16.msra.mxu0 %v17077_v32  ;;  %v17149_v32 = vld [vmem:[#allocation14 + $0x4a0] ss:$16 sps:$4 sm:$0xff]  }
 0x81a   :  { %13634 = vmatpush1.bf16.msra.mxu1 %v17080_v19  ;;  %13471 = vmatprep.subr.bf16.mxu0 %v17085_v21  ;;  %v17152_v19 = vld [vmem:[#allocation14 + $0x4a8] ss:$16 sps:$4 sm:$0xff]   ;;  %v17157_v21 = vld [vmem:[#allocation14 + $0x4c4] ss:$16 sps:$4 sm:$0xff]  }
 0x81b   :  { %13635 = vmatprep.subr.bf16.mxu1 %v17088_v4  ;;  %v17160_v4 = vld [vmem:[#allocation14 + $0x4cc] ss:$16 sps:$4 sm:$0xff]  }
 0x81d   :  { %13472 = vmatpush1.bf16.msra.mxu0 %v17083_v29  ;;  %v17155_v29 = vld [vmem:[#allocation14 + $0x4c0] ss:$16 sps:$4 sm:$0xff]  }
 0x81e   :  { %13636 = vmatpush1.bf16.msra.mxu1 %v17086_v23  ;;  %13473 = vmatprep.subr.bf16.mxu0 %v17091_v63  ;;  %v17158_v23 = vld [vmem:[#allocation14 + $0x4c8] ss:$16 sps:$4 sm:$0xff]   ;;  %v17163_v63 = vld [vmem:[#allocation14 + $0x4e4] ss:$16 sps:$4 sm:$0xff]  }
 0x81f   :  { %13637 = vmatprep.subr.bf16.mxu1 %v17094_v31  ;;  %v17166_v31 = vld [vmem:[#allocation14 + $0x4ec] ss:$16 sps:$4 sm:$0xff]  }
 0x821   :  { %13474 = vmatpush1.bf16.msra.mxu0 %v17089_v33  ;;  %v17161_v33 = vld [vmem:[#allocation14 + $0x4e0] ss:$16 sps:$4 sm:$0xff]  }
 0x822   :  { %13638 = vmatpush1.bf16.msra.mxu1 %v17092_v25  ;;  %13475 = vmatprep.subr.bf16.mxu0 %v17097_v61  ;;  %v17164_v25 = vld [vmem:[#allocation14 + $0x4e8] ss:$16 sps:$4 sm:$0xff]   ;;  %v17169_v61 = vld [vmem:[#allocation14 + $0x504] ss:$16 sps:$4 sm:$0xff]  }
 0x823   :  { %13639 = vmatprep.subr.bf16.mxu1 %v17100_v26  ;;  %v17172_v26 = vld [vmem:[#allocation14 + $0x50c] ss:$16 sps:$4 sm:$0xff]  }
 0x825   :  { %13476 = vmatpush1.bf16.msra.mxu0 %v17095_v30  ;;  %v17167_v30 = vld [vmem:[#allocation14 + $0x500] ss:$16 sps:$4 sm:$0xff]  }
 0x826   :  { %13640 = vmatpush1.bf16.msra.mxu1 %v17098_v54  ;;  %13477 = vmatprep.subr.bf16.mxu0 %v17103_v52  ;;  %v17175_v54 = vld [vmem:[#allocation14 + $0x524] ss:$16 sps:$4 sm:$0xff]   ;;  %v17178_v52 = vld [vmem:[#allocation14 + $0x52c] ss:$16 sps:$4 sm:$0xff]  }
 0x827   :  { %13641 = vmatprep.subr.bf16.mxu1 %v17106_v57  ;;  %v17173_v57 = vld [vmem:[#allocation14 + $0x520] ss:$16 sps:$4 sm:$0xff]  }
 0x829   :  { %13478 = vmatpush1.bf16.msra.mxu0 %v17101_v42  ;;  %v17176_v42 = vld [vmem:[#allocation14 + $0x528] ss:$16 sps:$4 sm:$0xff]  }
 0x82a   :  { %13642 = vmatpush1.bf16.msra.mxu1 %v17104_v41  ;;  %13479 = vmatprep.subr.bf16.mxu0 %v17109_v50  ;;  %v17179_v41 = vld [vmem:[#allocation14 + $0x540] ss:$16 sps:$4 sm:$0xff]   ;;  %v17182_v50 = vld [vmem:[#allocation14 + $0x548] ss:$16 sps:$4 sm:$0xff]  }
 0x82b   :  { %13643 = vmatprep.subr.bf16.mxu1 %v17112_v10  ;;  %v17187_v10 = vld [vmem:[#allocation14 + $0x564] ss:$16 sps:$4 sm:$0xff]  }
 0x82d   :  { %13480 = vmatpush1.bf16.msra.mxu0 %v17107_v55  ;;  %v17190_v55 = vld [vmem:[#allocation14 + $0x56c] ss:$16 sps:$4 sm:$0xff]  }
 0x82e   :  { %13644 = vmatpush1.bf16.msra.mxu1 %v17110_v3  ;;  %13481 = vmatprep.subr.bf16.mxu0 %v17115_v51  ;;  %v17188_v3 = vld [vmem:[#allocation14 + $0x568] ss:$16 sps:$4 sm:$0xff]   ;;  %v17193_v51 = vld [vmem:[#allocation14 + $0x584] ss:$16 sps:$4 sm:$0xff]  }
 0x82f   :  { %13645 = vmatprep.subr.bf16.mxu1 %v17118_v58  ;;  %v17196_v58 = vld [vmem:[#allocation14 + $0x58c] ss:$16 sps:$4 sm:$0xff]  }
 0x831   :  { %13482 = vmatpush1.bf16.msra.mxu0 %v17113_v9  ;;  %v17191_v9 = vld [vmem:[#allocation14 + $0x580] ss:$16 sps:$4 sm:$0xff]  }
 0x832   :  { %13646 = vmatpush1.bf16.msra.mxu1 %v17116_v22  ;;  %13492 = vmatprep.subr.bf16.mxu0 %v17121_v27  ;;  %v17199_v22 = vld [vmem:[#allocation14 + $0x5a4] ss:$16 sps:$4 sm:$0xff]   ;;  %v17202_v27 = vld [vmem:[#allocation14 + $0x5ac] ss:$16 sps:$4 sm:$0xff]  }
 0x833   :  { %13656 = vmatprep.subr.bf16.mxu1 %v17124_v0  ;;  %v17197_v0 = vld [vmem:[#allocation14 + $0x5a0] ss:$16 sps:$4 sm:$0xff]  }
 0x834   :  { %13484 = vmatmul.mubr.bf16.vlgmr.msra.gmra.mrb[24].mxu0 %v11868_v8 }
 0x835   :  { %13648 = vmatmul.mubr.bf16.vlgmr.msra.gmra.mrb[24].mxu1 %v11868_v8  ;;  %13493 = vmatpush1.bf16.msra.mxu0 %v17119_v1  ;;  %v17200_v1 = vld [vmem:[#allocation14 + $0x5a8] ss:$16 sps:$4 sm:$0xff]   ;;  %v17205_v8 = vld [vmem:[#allocation14 + $0x5c4] ss:$16 sps:$4 sm:$0xff]  }
 0x836   :  { %13657 = vmatpush1.bf16.msra.mxu1 %v17122_v5  ;;  %13494 = vmatprep.subr.bf16.mxu0 %v17127_v59  ;;  %v17208_v5 = vld [vmem:[#allocation14 + $0x5cc] ss:$16 sps:$4 sm:$0xff]   ;;  %v17203_v59 = vld [vmem:[#allocation14 + $0x5c0] ss:$16 sps:$4 sm:$0xff]  }
 0x837   :  { %13658 = vmatprep.subr.bf16.mxu1 %v17130_v14  ;;  %v17206_v14 = vld [vmem:[#allocation14 + $0x5c8] ss:$16 sps:$4 sm:$0xff]  }
 0x839   :  { %13495 = vmatpush1.bf16.msra.mxu0 %v17125_v6  ;;  %v17211_v6 = vld [vmem:[#allocation14 + $0x5e4] ss:$16 sps:$4 sm:$0xff]  }
 0x83a   :  { %13659 = vmatpush1.bf16.msra.mxu1 %v17128_v28  ;;  %13496 = vmatprep.subr.bf16.mxu0 %v17133_v44  ;;  %v17214_v28 = vld [vmem:[#allocation14 + $0x5ec] ss:$16 sps:$4 sm:$0xff]   ;;  %v17209_v44 = vld [vmem:[#allocation14 + $0x5e0] ss:$16 sps:$4 sm:$0xff]  }
 0x83b   :  { %13660 = vmatprep.subr.bf16.mxu1 %v17136_v11  ;;  %v17212_v11 = vld [vmem:[#allocation14 + $0x5e8] ss:$16 sps:$4 sm:$0xff]  }
 0x83d   :  { %13497 = vmatpush1.bf16.msra.mxu0 %v17131_v39  ;;  %v17217_v39 = vld [vmem:[#allocation14 + $0x604] ss:$16 sps:$4 sm:$0xff]  }
 0x83e   :  { %13661 = vmatpush1.bf16.msra.mxu1 %v17134_v40  ;;  %13498 = vmatprep.subr.bf16.mxu0 %v17139_v16  ;;  %v17220_v40 = vld [vmem:[#allocation14 + $0x60c] ss:$16 sps:$4 sm:$0xff]   ;;  %v11779_v16 = vrot.slane %v18666_v46, %v18501_v15 }
 0x83f   :  { %13662 = vmatprep.subr.bf16.mxu1 %v17142_v35  ;;  %v11783_v35 = vrot.slane %v18666_v46, %v18480_v48 }
 0x841   :  { %13499 = vmatpush1.bf16.msra.mxu0 %v17137_v17  ;;  %v11829_v17 = vrot.slane %v18670_v2, %v18501_v15 }
 0x842   :  { %13663 = vmatpush1.bf16.msra.mxu1 %v17140_v62  ;;  %13500 = vmatprep.subr.bf16.mxu0 %v17145_v20  ;;  %v11791_v62 = vrot.slane %v18666_v46, %v18504_v49 }
 0x843   :  { %13664 = vmatprep.subr.bf16.mxu1 %v17148_v53  ;;  %v11833_v53 = vrot.slane %v18670_v2, %v18480_v48 }
 0x845   :  { %13501 = vmatpush1.bf16.msra.mxu0 %v17143_v34 }
 0x846   :  { %13665 = vmatpush1.bf16.msra.mxu1 %v17146_v24  ;;  %13502 = vmatprep.subr.bf16.mxu0 %v17151_v45 }
 0x847   :  { %13666 = vmatprep.subr.bf16.mxu1 %v17154_v60  ;;  %v11841_v60 = vrot.slane %v18670_v2, %v18504_v49  ;;  %v17223_v49 = vld [vmem:[#allocation14 + $0x624] ss:$16 sps:$4 sm:$0xff]   ;;  %v17226_v2 = vld [vmem:[#allocation14 + $0x62c] ss:$16 sps:$4 sm:$0xff]  }
 0x849   :  { %13503 = vmatpush1.bf16.msra.mxu0 %v17149_v32 }
 0x84a   :  { %13667 = vmatpush1.bf16.msra.mxu1 %v17152_v19  ;;  %13504 = vmatprep.subr.bf16.mxu0 %v17157_v21 }
 0x84b   :  { %13668 = vmatprep.subr.bf16.mxu1 %v17160_v4 }
 0x84d   :  { %13505 = vmatpush1.bf16.msra.mxu0 %v17155_v29 }
 0x84e   :  { %13669 = vmatpush1.bf16.msra.mxu1 %v17158_v23  ;;  %13506 = vmatprep.subr.bf16.mxu0 %v17163_v63 }
 0x84f   :  { %13670 = vmatprep.subr.bf16.mxu1 %v17166_v31 }
 0x851   :  { %13507 = vmatpush1.bf16.msra.mxu0 %v17161_v33 }
 0x852   :  { %13671 = vmatpush1.bf16.msra.mxu1 %v17164_v25  ;;  %13508 = vmatprep.subr.bf16.mxu0 %v17169_v61 }
 0x853   :  { %13672 = vmatprep.subr.bf16.mxu1 %v17172_v26  ;;  %v17215_v26 = vld [vmem:[#allocation14 + $0x600] ss:$16 sps:$4 sm:$0xff]  }
 0x855   :  { %13509 = vmatpush1.bf16.msra.mxu0 %v17167_v30  ;;  %v17218_v30 = vld [vmem:[#allocation14 + $0x608] ss:$16 sps:$4 sm:$0xff]  }
 0x856   :  { %13673 = vmatpush1.bf16.msra.mxu1 %v17170_v13  ;;  %13510 = vmatprep.subr.bf16.mxu0 %v17175_v54 }
 0x857   :  { %13674 = vmatprep.subr.bf16.mxu1 %v17178_v52  ;;  %v17221_v52 = vld [vmem:[#allocation14 + $0x620] ss:$16 sps:$4 sm:$0xff]  }
 0x859   :  { %13511 = vmatpush1.bf16.msra.mxu0 %v17173_v57  ;;  %v17224_v57 = vld [vmem:[#allocation14 + $0x628] ss:$16 sps:$4 sm:$0xff]  }
 0x85a   :  { %13675 = vmatpush1.bf16.msra.mxu1 %v17176_v42  ;;  %13512 = vmatprep.subr.bf16.mxu0 %v17181_v43  ;;  %v17229_v42 = vld [vmem:[#allocation14 + $0x644] ss:$16 sps:$4 sm:$0xff]   ;;  %v17232_v43 = vld [vmem:[#allocation14 + $0x64c] ss:$16 sps:$4 sm:$0xff]  }
 0x85b   :  { %13676 = vmatprep.subr.bf16.mxu1 %v17184_v47  ;;  %v17227_v47 = vld [vmem:[#allocation14 + $0x640] ss:$16 sps:$4 sm:$0xff]  }
 0x85d   :  { %13513 = vmatpush1.bf16.msra.mxu0 %v17179_v41  ;;  %v17230_v41 = vld [vmem:[#allocation14 + $0x648] ss:$16 sps:$4 sm:$0xff]  }
 0x85e   :  { %13677 = vmatpush1.bf16.msra.mxu1 %v17182_v50  ;;  %13514 = vmatprep.subr.bf16.mxu0 %v17187_v10  ;;  %v17235_v50 = vld [vmem:[#allocation14 + $0x664] ss:$16 sps:$4 sm:$0xff]   ;;  %v17238_v10 = vld [vmem:[#allocation14 + $0x66c] ss:$16 sps:$4 sm:$0xff]  }
 0x85f   :  { %13678 = vmatprep.subr.bf16.mxu1 %v17190_v55  ;;  %v17233_v55 = vld [vmem:[#allocation14 + $0x660] ss:$16 sps:$4 sm:$0xff]  }
 0x861   :  { %13515 = vmatpush1.bf16.msra.mxu0 %v17185_v56  ;;  %v17236_v56 = vld [vmem:[#allocation14 + $0x668] ss:$16 sps:$4 sm:$0xff]  }
 0x862   :  { %13679 = vmatpush1.bf16.msra.mxu1 %v17188_v3  ;;  %13516 = vmatprep.subr.bf16.mxu0 %v17193_v51  ;;  %v17241_v3 = vld [vmem:[#allocation14 + $0x684] ss:$16 sps:$4 sm:$0xff]   ;;  %v17244_v51 = vld [vmem:[#allocation14 + $0x68c] ss:$16 sps:$4 sm:$0xff]  }
 0x863   :  { %13680 = vmatprep.subr.bf16.mxu1 %v17196_v58  ;;  %v17239_v58 = vld [vmem:[#allocation14 + $0x680] ss:$16 sps:$4 sm:$0xff]  }
 0x865   :  { %13517 = vmatpush1.bf16.msra.mxu0 %v17191_v9  ;;  %v17242_v9 = vld [vmem:[#allocation14 + $0x688] ss:$16 sps:$4 sm:$0xff]  }
 0x866   :  { %13681 = vmatpush1.bf16.msra.mxu1 %v17194_v37  ;;  %13518 = vmatprep.subr.bf16.mxu0 %v17199_v22  ;;  %v17247_v37 = vld [vmem:[#allocation14 + $0x6a4] ss:$16 sps:$4 sm:$0xff]   ;;  %v17250_v22 = vld [vmem:[#allocation14 + $0x6ac] ss:$16 sps:$4 sm:$0xff]  }
 0x867   :  { %13682 = vmatprep.subr.bf16.mxu1 %v17202_v27  ;;  %v17245_v27 = vld [vmem:[#allocation14 + $0x6a0] ss:$16 sps:$4 sm:$0xff]  }
 0x869   :  { %13519 = vmatpush1.bf16.msra.mxu0 %v17197_v0  ;;  %v17248_v0 = vld [vmem:[#allocation14 + $0x6a8] ss:$16 sps:$4 sm:$0xff]  }
 0x86a   :  { %13683 = vmatpush1.bf16.msra.mxu1 %v17200_v1  ;;  %13520 = vmatprep.subr.bf16.mxu0 %v17205_v8  ;;  %v17253_v1 = vld [vmem:[#allocation14 + $0x6c4] ss:$16 sps:$4 sm:$0xff]   ;;  %v17256_v8 = vld [vmem:[#allocation14 + $0x6cc] ss:$16 sps:$4 sm:$0xff]  }
 0x86b   :  { %13684 = vmatprep.subr.bf16.mxu1 %v17208_v5  ;;  %v17251_v5 = vld [vmem:[#allocation14 + $0x6c0] ss:$16 sps:$4 sm:$0xff]  }
 0x86d   :  { %13521 = vmatpush1.bf16.msra.mxu0 %v17203_v59  ;;  %v17254_v59 = vld [vmem:[#allocation14 + $0x6c8] ss:$16 sps:$4 sm:$0xff]  }
 0x86e   :  { %13685 = vmatpush1.bf16.msra.mxu1 %v17206_v14  ;;  %13522 = vmatprep.subr.bf16.mxu0 %v17211_v6  ;;  %v17259_v14 = vld [vmem:[#allocation14 + $0x6e4] ss:$16 sps:$4 sm:$0xff]   ;;  %v17262_v6 = vld [vmem:[#allocation14 + $0x6ec] ss:$16 sps:$4 sm:$0xff]  }
 0x86f   :  { %13686 = vmatprep.subr.bf16.mxu1 %v17214_v28  ;;  %v17257_v28 = vld [vmem:[#allocation14 + $0x6e0] ss:$16 sps:$4 sm:$0xff]  }
 0x871   :  { %13523 = vmatpush1.bf16.msra.mxu0 %v17209_v44  ;;  %v17260_v44 = vld [vmem:[#allocation14 + $0x6e8] ss:$16 sps:$4 sm:$0xff]  }
 0x872   :  { %13687 = vmatpush1.bf16.msra.mxu1 %v17212_v11  ;;  %13533 = vmatprep.subr.bf16.mxu0 %v17217_v39  ;;  %v17265_v11 = vld [vmem:[#allocation14 + $0x704] ss:$16 sps:$4 sm:$0xff]   ;;  %v17268_v39 = vld [vmem:[#allocation14 + $0x70c] ss:$16 sps:$4 sm:$0xff]  }
 0x873   :  { %13697 = vmatprep.subr.bf16.mxu1 %v17220_v40  ;;  %v17263_v40 = vld [vmem:[#allocation14 + $0x700] ss:$16 sps:$4 sm:$0xff]  }
 0x887   :  { %v11423_v20 = vpop.f32.mrb[20].mxu0 }
 0x888   :  { %v11804_v34 = vmul.f32 %v11779_v16, %v11423_v20  ;;  %v18702_v24 = vpop.f32.mrb[20].mxu1  ;;  %v11425_v45 = vpop.f32.mrb[21].mxu0  ;;  %v17266_v16 = vld [vmem:[#allocation14 + $0x708] ss:$16 sps:$4 sm:$0xff]  }
 0x889   :  { %v11805_v32 = vmul.f32 %v11783_v35, %v11425_v45  ;;  %v11753_v19 = vpop.f32.mrb[21].mxu1  ;;  %v11427_v21 = vpop.f32.mrb[22].mxu0  ;;  %v17271_v35 = vld [vmem:[#allocation14 + $0x724] ss:$16 sps:$4 sm:$0xff]   ;;  %v17272_v20 = vld [vmem:[#allocation14 + $0x728] ss:$16 sps:$4 sm:$0xff]  }
 0x88a   :  { %v11854_v4 = vadd.f32 %v11829_v17, %v11804_v34  ;;  %v11807_v29 = vmul.f32 %v11791_v62, %v11753_v19  ;;  %v11755_v15 = vpop.f32.mrb[22].mxu1  ;;  %v11428_v23 = vpop.f32.mrb[23].mxu0  ;;  %v17274_v17 = vld [vmem:[#allocation14 + $0x72c] ss:$16 sps:$4 sm:$0xff]   ;;  %v17269_v62 = vld [vmem:[#allocation14 + $0x720] ss:$16 sps:$4 sm:$0xff]  }
 0x88b   :  { %v11855_v63 = vadd.f32 %v11833_v53, %v11805_v32  ;;  %v11756_v46 = vpop.f32.mrb[23].mxu1  ;;  %v17277_v53 = vld [vmem:[#allocation14 + $0x744] ss:$16 sps:$4 sm:$0xff]   ;;  %v17280_v34 = vld [vmem:[#allocation14 + $0x74c] ss:$16 sps:$4 sm:$0xff]  }
 0x88c   :  { %v11862_v31 = vmax.f32 %v11854_v4, 0.0  ;;  %v11857_v33 = vadd.f32 %v11841_v60, %v11807_v29  ;;  %v17275_v45 = vld [vmem:[#allocation14 + $0x740] ss:$16 sps:$4 sm:$0xff]   ;;  %v17278_v60 = vld [vmem:[#allocation14 + $0x748] ss:$16 sps:$4 sm:$0xff]  }
 0x88d   :  { %v11863_v25 = vmax.f32 %v11855_v63, 0.0  ;;  %v17283_v32 = vld [vmem:[#allocation14 + $0x764] ss:$16 sps:$4 sm:$0xff]   ;;  %v17286_v19 = vld [vmem:[#allocation14 + $0x76c] ss:$16 sps:$4 sm:$0xff]  }
 0x88e   :  { %v11865_v48 = vmax.f32 %v11857_v33, 0.0  ;;  %v11870_v13 = vpack.c.bf16 %v11862_v31, %v11862_v31  ;;  %v17281_v21 = vld [vmem:[#allocation14 + $0x760] ss:$16 sps:$4 sm:$0xff]   ;;  %v17284_v4 = vld [vmem:[#allocation14 + $0x768] ss:$16 sps:$4 sm:$0xff]  }
 0x88f   :  { %v11871_v61 = vpack.c.bf16 %v11863_v25, %v11863_v25  ;;  %v17289_v29 = vld [vmem:[#allocation14 + $0x784] ss:$16 sps:$4 sm:$0xff]   ;;  %v17292_v15 = vld [vmem:[#allocation14 + $0x78c] ss:$16 sps:$4 sm:$0xff]   ;;  %v17287_v23 = vld [vmem:[#allocation14 + $0x780] ss:$16 sps:$4 sm:$0xff]  }
 0x890   :  { %v11873_v54 = vpack.c.bf16 %v11865_v48, %v11865_v48  ;;  %v17290_v63 = vld [vmem:[#allocation14 + $0x788] ss:$16 sps:$4 sm:$0xff]   ;;  %v17443_v46 = vld [vmem:[#allocation11] sm:$0xff]  ;;  %v17298_v25 = vld [vmem:[#allocation14 + $0x7ac] ss:$16 sps:$4 sm:$0xff]  }
 0x891   :  { %13524 = vmatprep.mubr.bf16.mxu0 %v11871_v61  ;;  %13688 = vmatprep.mubr.bf16.mxu1 %v11871_v61  ;;  %v11787_v31 = vrot.slane %v17443_v46, %v18537_v18  ;;  %v17295_v33 = vld [vmem:[#allocation14 + $0x7a4] ss:$16 sps:$4 sm:$0xff]   ;;  %v17293_v48 = vld [vmem:[#allocation14 + $0x7a0] ss:$16 sps:$4 sm:$0xff]   ;;  %v17296_v61 = vld [vmem:[#allocation14 + $0x7a8] ss:$16 sps:$4 sm:$0xff]  }
 0x892   :  { %13525 = vmatmul.mubr.bf16.vlgmr.msra.gmra.mrb[24].mxu0 %v11870_v13  ;;  %13689 = vmatmul.mubr.bf16.vlgmr.msra.gmra.mrb[24].mxu1 %v11870_v13  ;;  %v17414_v46 = vld [vmem:[#allocation23 + $0x18] sm:$0xff]  }
 0x893   :  { %13534 = vmatpush1.bf16.msra.mxu0 %v17215_v26  ;;  %13698 = vmatpush1.bf16.msra.mxu1 %v17218_v30  ;;  %v11806_v26 = vmul.f32 %v11787_v31, %v18702_v24  ;;  %v17444_v30 = vld [vmem:[#allocation13] sm:$0xff]  ;;  %v17415_v31 = vld [vmem:[#allocation23 + $0x60] sm:$0xff]  }
 0x894   :  { %13565 = vmatprep.mubr.bf16.mxu0 %v11873_v54  ;;  %13729 = vmatprep.mubr.bf16.mxu1 %v11873_v54  ;;  %v11837_v13 = vrot.slane %v17444_v30, %v18537_v18  ;;  %v17299_v54 = vld [vmem:[#allocation14 + $0x7c0] ss:$16 sps:$4 sm:$0xff]   ;;  %v17308_v24 = vld [vmem:[#allocation14 + $0x7e8] ss:$16 sps:$4 sm:$0xff]   ;;  %v17313_v18 = vld [vmem:[#allocation19 + $0x4] ss:$8 sps:$4 sm:$0xff]  }
 0x895   :  { %13535 = vmatprep.subr.bf16.mxu0 %v17223_v49  ;;  %13699 = vmatprep.subr.bf16.mxu1 %v17226_v2  ;;  %v17301_v49 = vld [vmem:[#allocation14 + $0x7c4] ss:$16 sps:$4 sm:$0xff]   ;;  %v17304_v2 = vld [vmem:[#allocation14 + $0x7cc] ss:$16 sps:$4 sm:$0xff]  }
 0x897   :  { %13536 = vmatpush1.bf16.msra.mxu0 %v17221_v52  ;;  %13700 = vmatpush1.bf16.msra.mxu1 %v17224_v57  ;;  %v17302_v52 = vld [vmem:[#allocation14 + $0x7c8] ss:$16 sps:$4 sm:$0xff]   ;;  %v11856_v57 = vadd.f32 %v11837_v13, %v11806_v26 }
 0x898   :  { %13537 = vmatprep.subr.bf16.mxu0 %v17229_v42  ;;  %13701 = vmatprep.subr.bf16.mxu1 %v17232_v43  ;;  %v17307_v42 = vld [vmem:[#allocation14 + $0x7e4] ss:$16 sps:$4 sm:$0xff]   ;;  %v17310_v43 = vld [vmem:[#allocation14 + $0x7ec] ss:$16 sps:$4 sm:$0xff]  }
 0x89b   :  { %13538 = vmatpush1.bf16.msra.mxu0 %v17227_v47  ;;  %13702 = vmatpush1.bf16.msra.mxu1 %v17230_v41  ;;  %v17305_v47 = vld [vmem:[#allocation14 + $0x7e0] ss:$16 sps:$4 sm:$0xff]   ;;  %v11864_v41 = vmax.f32 %v11856_v57, 0.0 }
 0x89c   :  { %13539 = vmatprep.subr.bf16.mxu0 %v17235_v50  ;;  %13703 = vmatprep.subr.bf16.mxu1 %v17238_v10  ;;  %v17311_v50 = vld [vmem:[#allocation19] ss:$8 sps:$4 sm:$0xff]  }
 0x89d   :  { %v11872_v10 = vpack.c.bf16 %v11864_v41, %v11864_v41 }
 0x89f   :  { %13540 = vmatpush1.bf16.msra.mxu0 %v17233_v55  ;;  %13704 = vmatpush1.bf16.msra.mxu1 %v17236_v56  ;;  %v17316_v55 = vld [vmem:[#allocation19 + $0x14] ss:$8 sps:$4 sm:$0xff]   ;;  %v17314_v56 = vld [vmem:[#allocation19 + $0x10] ss:$8 sps:$4 sm:$0xff]  }
 0x8a0   :  { %13541 = vmatprep.subr.bf16.mxu0 %v17241_v3  ;;  %13705 = vmatprep.subr.bf16.mxu1 %v17244_v51  ;;  %v17319_v3 = vld [vmem:[#allocation19 + $0x24] ss:$8 sps:$4 sm:$0xff]   ;;  %v17317_v51 = vld [vmem:[#allocation19 + $0x20] ss:$8 sps:$4 sm:$0xff]  }
 0x8a3   :  { %13542 = vmatpush1.bf16.msra.mxu0 %v17239_v58  ;;  %13706 = vmatpush1.bf16.msra.mxu1 %v17242_v9  ;;  %v17322_v58 = vld [vmem:[#allocation19 + $0x34] ss:$8 sps:$4 sm:$0xff]   ;;  %v17320_v9 = vld [vmem:[#allocation19 + $0x30] ss:$8 sps:$4 sm:$0xff]  }
 0x8a4   :  { %13543 = vmatprep.subr.bf16.mxu0 %v17247_v37  ;;  %13707 = vmatprep.subr.bf16.mxu1 %v17250_v22  ;;  %v17325_v37 = vld [vmem:[#allocation19 + $0x44] ss:$8 sps:$4 sm:$0xff]   ;;  %v17323_v22 = vld [vmem:[#allocation19 + $0x40] ss:$8 sps:$4 sm:$0xff]  }
 0x8a7   :  { %13544 = vmatpush1.bf16.msra.mxu0 %v17245_v27  ;;  %13708 = vmatpush1.bf16.msra.mxu1 %v17248_v0  ;;  %v17328_v27 = vld [vmem:[#allocation19 + $0x54] ss:$8 sps:$4 sm:$0xff]   ;;  %v17326_v0 = vld [vmem:[#allocation19 + $0x50] ss:$8 sps:$4 sm:$0xff]  }
 0x8a8   :  { %13545 = vmatprep.subr.bf16.mxu0 %v17253_v1  ;;  %13709 = vmatprep.subr.bf16.mxu1 %v17256_v8  ;;  %v17331_v1 = vld [vmem:[#allocation19 + $0x64] ss:$8 sps:$4 sm:$0xff]   ;;  %v17329_v8 = vld [vmem:[#allocation19 + $0x60] ss:$8 sps:$4 sm:$0xff]  }
 0x8ab   :  { %13546 = vmatpush1.bf16.msra.mxu0 %v17251_v5  ;;  %13710 = vmatpush1.bf16.msra.mxu1 %v17254_v59  ;;  %v17334_v5 = vld [vmem:[#allocation19 + $0x74] ss:$8 sps:$4 sm:$0xff]   ;;  %v17332_v59 = vld [vmem:[#allocation19 + $0x70] ss:$8 sps:$4 sm:$0xff]  }
 0x8ac   :  { %13547 = vmatprep.subr.bf16.mxu0 %v17259_v14  ;;  %13711 = vmatprep.subr.bf16.mxu1 %v17262_v6  ;;  %v17337_v14 = vld [vmem:[#allocation19 + $0x84] ss:$8 sps:$4 sm:$0xff]   ;;  %v17335_v6 = vld [vmem:[#allocation19 + $0x80] ss:$8 sps:$4 sm:$0xff]  }
 0x8af   :  { %13548 = vmatpush1.bf16.msra.mxu0 %v17257_v28  ;;  %13712 = vmatpush1.bf16.msra.mxu1 %v17260_v44  ;;  %v17340_v28 = vld [vmem:[#allocation19 + $0x94] ss:$8 sps:$4 sm:$0xff]   ;;  %v17338_v44 = vld [vmem:[#allocation19 + $0x90] ss:$8 sps:$4 sm:$0xff]  }
 0x8b0   :  { %13549 = vmatprep.subr.bf16.mxu0 %v17265_v11  ;;  %13713 = vmatprep.subr.bf16.mxu1 %v17268_v39  ;;  %v17343_v11 = vld [vmem:[#allocation19 + $0xa4] ss:$8 sps:$4 sm:$0xff]   ;;  %v17341_v39 = vld [vmem:[#allocation19 + $0xa0] ss:$8 sps:$4 sm:$0xff]  }
 0x8b3   :  { %13550 = vmatpush1.bf16.msra.mxu0 %v17263_v40  ;;  %13714 = vmatpush1.bf16.msra.mxu1 %v17266_v16  ;;  %v17346_v40 = vld [vmem:[#allocation19 + $0xb4] ss:$8 sps:$4 sm:$0xff]   ;;  %v17344_v16 = vld [vmem:[#allocation19 + $0xb0] ss:$8 sps:$4 sm:$0xff]  }
 0x8b4   :  { %13551 = vmatprep.subr.bf16.mxu0 %v17271_v35  ;;  %13715 = vmatprep.subr.bf16.mxu1 %v17274_v17  ;;  %v17349_v35 = vld [vmem:[#allocation19 + $0xc4] ss:$8 sps:$4 sm:$0xff]   ;;  %v17347_v17 = vld [vmem:[#allocation19 + $0xc0] ss:$8 sps:$4 sm:$0xff]  }
 0x8b7   :  { %13552 = vmatpush1.bf16.msra.mxu0 %v17269_v62  ;;  %13716 = vmatpush1.bf16.msra.mxu1 %v17272_v20  ;;  %v17352_v62 = vld [vmem:[#allocation19 + $0xd4] ss:$8 sps:$4 sm:$0xff]   ;;  %v17350_v20 = vld [vmem:[#allocation19 + $0xd0] ss:$8 sps:$4 sm:$0xff]  }
 0x8b8   :  { %13553 = vmatprep.subr.bf16.mxu0 %v17277_v53  ;;  %13717 = vmatprep.subr.bf16.mxu1 %v17280_v34  ;;  %v17355_v53 = vld [vmem:[#allocation19 + $0xe4] ss:$8 sps:$4 sm:$0xff]   ;;  %v17353_v34 = vld [vmem:[#allocation19 + $0xe0] ss:$8 sps:$4 sm:$0xff]  }
 0x8bb   :  { %13554 = vmatpush1.bf16.msra.mxu0 %v17275_v45  ;;  %13718 = vmatpush1.bf16.msra.mxu1 %v17278_v60  ;;  %v17358_v45 = vld [vmem:[#allocation19 + $0xf4] ss:$8 sps:$4 sm:$0xff]   ;;  %v17356_v60 = vld [vmem:[#allocation19 + $0xf0] ss:$8 sps:$4 sm:$0xff]  }
 0x8bc   :  { %13555 = vmatprep.subr.bf16.mxu0 %v17283_v32  ;;  %13719 = vmatprep.subr.bf16.mxu1 %v17286_v19  ;;  %v17361_v32 = vld [vmem:[#allocation19 + $0x104] ss:$8 sps:$4 sm:$0xff]  }
 0x8bd   :  { %v17407_v19 = vld [vmem:[#allocation23 + $0x40] sm:$0xff]  }
 0x8bf   :  { %13556 = vmatpush1.bf16.msra.mxu0 %v17281_v21  ;;  %13720 = vmatpush1.bf16.msra.mxu1 %v17284_v4  ;;  %v17408_v21 = vld [vmem:[#allocation23] sm:$0xff]   ;;  %v17409_v4 = vld [vmem:[#allocation23 + $0x48] sm:$0xff]  }
 0x8c0   :  { %13557 = vmatprep.subr.bf16.mxu0 %v17289_v29  ;;  %13721 = vmatprep.subr.bf16.mxu1 %v17292_v15  ;;  %v17410_v29 = vld [vmem:[#allocation23 + $0x8] sm:$0xff]   ;;  %v17411_v15 = vld [vmem:[#allocation23 + $0x50] sm:$0xff]  }
 0x8c3   :  { %13558 = vmatpush1.bf16.msra.mxu0 %v17287_v23  ;;  %13722 = vmatpush1.bf16.msra.mxu1 %v17290_v63  ;;  %v17412_v23 = vld [vmem:[#allocation23 + $0x10] sm:$0xff]   ;;  %v17413_v63 = vld [vmem:[#allocation23 + $0x58] sm:$0xff]  }
 0x8c4   :  { %13559 = vmatprep.subr.bf16.mxu0 %v17295_v33  ;;  %13723 = vmatprep.subr.bf16.mxu1 %v17298_v25  ;;  %v17416_v33 = vld [vmem:[#allocation23 + $0x20] sm:$0xff]   ;;  %v17417_v25 = vld [vmem:[#allocation23 + $0x68] sm:$0xff]  }
 0x8c7   :  { %13560 = vmatpush1.bf16.msra.mxu0 %v17293_v48  ;;  %13724 = vmatpush1.bf16.msra.mxu1 %v17296_v61  ;;  %v13738_v48 = vld [vmem:[#allocation16] sm:$0xf]  ;;  %v13764_v61 = vld [vmem:[#allocation17] sm:$0xf] }
 0x8c8   :  { %13561 = vmatprep.subr.bf16.mxu0 %v17301_v49  ;;  %13725 = vmatprep.subr.bf16.mxu1 %v17304_v2  ;;  %v13743_v26 = vrot.slane %v13738_v48, %v18445_v12  ;;  %v13751_v30 = vrot.slane %v13738_v48, %v18477_v38  ;;  %v13747_v13 = vrot.slane %v13738_v48, %v18427_v7 }
 0x8c9   :  { %v13755_v49 = vrot.slane %v13738_v48, %v18448_v36  ;;  %v13769_v2 = vrot.slane %v13764_v61, %v18445_v12  ;;  %v17404_v48 = vld [vmem:[#allocation19 + $0x1f0] ss:$8 sps:$4 sm:$0xff]  }
 0x8cb   :  { %13562 = vmatpush1.bf16.msra.mxu0 %v17299_v54  ;;  %13726 = vmatpush1.bf16.msra.mxu1 %v17302_v52  ;;  %v13777_v54 = vrot.slane %v13764_v61, %v18477_v38 }
 0x8cc   :  { %13563 = vmatprep.subr.bf16.mxu0 %v17307_v42  ;;  %13727 = vmatprep.subr.bf16.mxu1 %v17310_v43  ;;  %v13773_v42 = vrot.slane %v13764_v61, %v18427_v7  ;;  %v13781_v43 = vrot.slane %v13764_v61, %v18448_v36  ;;  %v17359_v36 = vld [vmem:[#allocation19 + $0x100] ss:$8 sps:$4 sm:$0xff]  }
 0x8cf   :  { %13564 = vmatpush1.bf16.msra.mxu0 %v17305_v47  ;;  %13728 = vmatpush1.bf16.msra.mxu1 %v17308_v24 }
 0x8d0   :  { %14182 = vmatprep.subr.bf16.mxu0 %v17313_v18  ;;  %16638 = vmatprep.subr.bf16.mxu1 %v17407_v19  ;;  %v17391_v19 = vld [vmem:[#allocation19 + $0x1a4] ss:$8 sps:$4 sm:$0xff]  }
 0x8d2   :  { %13566 = vmatmul.mubr.bf16.vlgmr.msra.gmra.mrb[24].mxu0 %v11872_v10  ;;  %13730 = vmatmul.mubr.bf16.vlgmr.msra.gmra.mrb[24].mxu1 %v11872_v10 }
 0x8d3   :  { %14183 = vmatpush1.bf16.msra.mxu0 %v17311_v50  ;;  %16639 = vmatpush3.bf16.msra.mxu1 %v17408_v21  ;;  %v17389_v21 = vld [vmem:[#allocation19 + $0x1a0] ss:$8 sps:$4 sm:$0xff]  }
 0x8d4   :  { %14184 = vmatprep.subr.bf16.mxu0 %v17316_v55  ;;  %16640 = vmatprep.subr.bf16.mxu1 %v17409_v4  ;;  %v17394_v4 = vld [vmem:[#allocation19 + $0x1b4] ss:$8 sps:$4 sm:$0xff]  }
 0x8d7   :  { %14185 = vmatpush1.bf16.msra.mxu0 %v17314_v56  ;;  %16641 = vmatpush3.bf16.msra.mxu1 %v17410_v29  ;;  %v17392_v29 = vld [vmem:[#allocation19 + $0x1b0] ss:$8 sps:$4 sm:$0xff]  }
 0x8d8   :  { %14186 = vmatprep.subr.bf16.mxu0 %v17319_v3  ;;  %16642 = vmatprep.subr.bf16.mxu1 %v17411_v15  ;;  %v17397_v15 = vld [vmem:[#allocation19 + $0x1c4] ss:$8 sps:$4 sm:$0xff]  }
 0x8db   :  { %14187 = vmatpush1.bf16.msra.mxu0 %v17317_v51  ;;  %16643 = vmatpush3.bf16.msra.mxu1 %v17412_v23  ;;  %v17395_v23 = vld [vmem:[#allocation19 + $0x1c0] ss:$8 sps:$4 sm:$0xff]  }
 0x8dc   :  { %14188 = vmatprep.subr.bf16.mxu0 %v17322_v58  ;;  %16644 = vmatprep.subr.bf16.mxu1 %v17413_v63  ;;  %v17400_v63 = vld [vmem:[#allocation19 + $0x1d4] ss:$8 sps:$4 sm:$0xff]  }
 0x8df   :  { %14189 = vmatpush1.bf16.msra.mxu0 %v17320_v9  ;;  %16645 = vmatpush3.bf16.msra.mxu1 %v17414_v46  ;;  %v17398_v46 = vld [vmem:[#allocation19 + $0x1d0] ss:$8 sps:$4 sm:$0xff]  }
 0x8e0   :  { %14190 = vmatprep.subr.bf16.mxu0 %v17325_v37  ;;  %16646 = vmatprep.subr.bf16.mxu1 %v17415_v31  ;;  %v17403_v31 = vld [vmem:[#allocation19 + $0x1e4] ss:$8 sps:$4 sm:$0xff]  }
 0x8e3   :  { %14191 = vmatpush1.bf16.msra.mxu0 %v17323_v22  ;;  %16647 = vmatpush3.bf16.msra.mxu1 %v17416_v33  ;;  %v17401_v33 = vld [vmem:[#allocation19 + $0x1e0] ss:$8 sps:$4 sm:$0xff]  }
 0x8e4   :  { %14192 = vmatprep.subr.bf16.mxu0 %v17328_v27  ;;  %16648 = vmatprep.subr.bf16.mxu1 %v17417_v25  ;;  %v17406_v25 = vld [vmem:[#allocation19 + $0x1f4] ss:$8 sps:$4 sm:$0xff]  }
 0x8e7   :  { %14193 = vmatpush1.bf16.msra.mxu0 %v17326_v0 }
 0x8e8   :  { %14194 = vmatprep.subr.bf16.mxu0 %v17331_v1 }
 0x8eb   :  { %14195 = vmatpush1.bf16.msra.mxu0 %v17329_v8 }
 0x8ec   :  { %14196 = vmatprep.subr.bf16.mxu0 %v17334_v5  ;;  %v17364_v5 = vld [vmem:[#allocation19 + $0x114] ss:$8 sps:$4 sm:$0xff]  }
 0x8ef   :  { %14197 = vmatpush1.bf16.msra.mxu0 %v17332_v59 }
 0x8f0   :  { %14198 = vmatprep.subr.bf16.mxu0 %v17337_v14  ;;  %v17362_v14 = vld [vmem:[#allocation19 + $0x110] ss:$8 sps:$4 sm:$0xff]  }
 0x8f3   :  { %14199 = vmatpush1.bf16.msra.mxu0 %v17335_v6  ;;  %v17367_v6 = vld [vmem:[#allocation19 + $0x124] ss:$8 sps:$4 sm:$0xff]  }
 0x8f4   :  { %14200 = vmatprep.subr.bf16.mxu0 %v17340_v28  ;;  %v17365_v28 = vld [vmem:[#allocation19 + $0x120] ss:$8 sps:$4 sm:$0xff]  }
 0x8f7   :  { %14201 = vmatpush1.bf16.msra.mxu0 %v17338_v44  ;;  %v17370_v44 = vld [vmem:[#allocation19 + $0x134] ss:$8 sps:$4 sm:$0xff]  }
 0x8f8   :  { %14202 = vmatprep.subr.bf16.mxu0 %v17343_v11  ;;  %v17368_v11 = vld [vmem:[#allocation19 + $0x130] ss:$8 sps:$4 sm:$0xff]  }
 0x8fb   :  { %14203 = vmatpush1.bf16.msra.mxu0 %v17341_v39  ;;  %v17373_v39 = vld [vmem:[#allocation19 + $0x144] ss:$8 sps:$4 sm:$0xff]  }
 0x8fc   :  { %14204 = vmatprep.subr.bf16.mxu0 %v17346_v40  ;;  %v17371_v40 = vld [vmem:[#allocation19 + $0x140] ss:$8 sps:$4 sm:$0xff]  }
 0x8ff   :  { %14205 = vmatpush1.bf16.msra.mxu0 %v17344_v16  ;;  %v17376_v16 = vld [vmem:[#allocation19 + $0x154] ss:$8 sps:$4 sm:$0xff]  }
 0x900   :  { %14206 = vmatprep.subr.bf16.mxu0 %v17349_v35  ;;  %v17374_v35 = vld [vmem:[#allocation19 + $0x150] ss:$8 sps:$4 sm:$0xff]  }
 0x903   :  { %14207 = vmatpush1.bf16.msra.mxu0 %v17347_v17  ;;  %v17379_v17 = vld [vmem:[#allocation19 + $0x164] ss:$8 sps:$4 sm:$0xff]  }
 0x904   :  { %14208 = vmatprep.subr.bf16.mxu0 %v17352_v62  ;;  %v17377_v62 = vld [vmem:[#allocation19 + $0x160] ss:$8 sps:$4 sm:$0xff]  }
 0x907   :  { %14209 = vmatpush1.bf16.msra.mxu0 %v17350_v20  ;;  %v17382_v20 = vld [vmem:[#allocation19 + $0x174] ss:$8 sps:$4 sm:$0xff]  }
 0x908   :  { %14210 = vmatprep.subr.bf16.mxu0 %v17355_v53  ;;  %v17380_v53 = vld [vmem:[#allocation19 + $0x170] ss:$8 sps:$4 sm:$0xff]  }
 0x90b   :  { %14211 = vmatpush1.bf16.msra.mxu0 %v17353_v34  ;;  %v17385_v34 = vld [vmem:[#allocation19 + $0x184] ss:$8 sps:$4 sm:$0xff]  }
 0x90c   :  { %14212 = vmatprep.subr.bf16.mxu0 %v17358_v45  ;;  %v17383_v45 = vld [vmem:[#allocation19 + $0x180] ss:$8 sps:$4 sm:$0xff]  }
 0x90f   :  { %14213 = vmatpush1.bf16.msra.mxu0 %v17356_v60  ;;  %v17388_v60 = vld [vmem:[#allocation19 + $0x194] ss:$8 sps:$4 sm:$0xff]  }
 0x910   :  { %14223 = vmatprep.subr.bf16.mxu0 %v17361_v32  ;;  %v17386_v32 = vld [vmem:[#allocation19 + $0x190] ss:$8 sps:$4 sm:$0xff]  }
 0x9a5   :  { %v13567_v52 = vpop.f32.mrb[24].mxu0  ;;  %v13731_v57 = vpop.f32.mrb[24].mxu1 }
 0x9a6   :  { %v13760_v47 = vmul.f32 %v13743_v26, %v13567_v52  ;;  %v13762_v24 = vmul.f32 %v13751_v30, %v13731_v57  ;;  %v13569_v41 = vpop.f32.mrb[25].mxu0  ;;  %v13733_v18 = vpop.f32.mrb[25].mxu1  ;;  %v17418_v30 = vld [vmem:[#allocation23 + $0x28] sm:$0xff]   ;;  %v17983_v52 = vmov 0.0   ;;  %v14264_v57 = vld [vmem:[#allocation20] sm:$0x3] }
 0x9a7   :  { %v13761_v50 = vmul.f32 %v13747_v13, %v13569_v41  ;;  %v13763_v10 = vmul.f32 %v13755_v49, %v13733_v18  ;;  %v13571_v55 = vpop.f32.mrb[26].mxu0  ;;  %v13735_v56 = vpop.f32.mrb[26].mxu1  ;;  %16649 = vmatpush3.bf16.msra.mxu1 %v17418_v30  ;;  %v17419_v13 = vld [vmem:[#allocation23 + $0x70] sm:$0xff]  }
 0x9a8   :  { %v13786_v3 = vadd.f32 %v13769_v2, %v13760_v47  ;;  %v18717_v51 = vadd.f32 %v13777_v54, %v13762_v24  ;;  %v13572_v58 = vpop.f32.mrb[27].mxu0  ;;  %v13736_v9 = vpop.f32.mrb[27].mxu1  ;;  %v17420_v49 = vld [vmem:[#allocation23 + $0x30] sm:$0xff]   ;;  %16650 = vmatprep.subr.bf16.mxu1 %v17419_v13  ;;  %v17421_v2 = vld [vmem:[#allocation23 + $0x78] sm:$0xff]   ;;  %v14273_v47 = vrot.slane %v14264_v57, %v18427_v7 }
 0x9a9   :  { %v13787_v38 = vadd.f32 %v13773_v42, %v13761_v50  ;;  %v13789_v37 = vadd.f32 %v13781_v43, %v13763_v10  ;;  %v17422_v54 = vld [vmem:[#allocation23 + $0x38] sm:$0xff]   ;;  %v14269_v43 = vrot.slane %v14264_v57, %v18445_v12 }
 0x9aa   :  { %v13790_v22 = vmax.f32 %v13786_v3, 0.0  ;;  %v13792_v61 = vmax.f32 %v18717_v51, 0.0  ;;  %v14278_v42 = vld [vmem:[#allocation22] sm:$0x3] }
 0x9ab   :  { %v13791_v27 = vmax.f32 %v13787_v38, 0.0  ;;  %v13793_v0 = vmax.f32 %v13789_v37, 0.0  ;;  %16651 = vmatpush3.bf16.msra.mxu1 %v17420_v49  ;;  %v14283_v24 = vrot.slane %v14278_v42, %v18445_v12  ;;  %v14287_v18 = vrot.slane %v14278_v42, %v18427_v7  ;;  %v17425_v7 = vld [vmem:[#allocation28 + $0x10] sm:$0xff]   ;;  %v17426_v12 = vld [vmem:[#allocation28 + $0x18] sm:$0xff]  }
 0x9ac   :  { %v13794_v8 = vpack.c.bf16 %v13790_v22, %v13790_v22  ;;  %v13796_v26 = vpack.c.bf16 %v13792_v61, %v13792_v61  ;;  %16652 = vmatprep.subr.bf16.mxu1 %v17421_v2  ;;  %v17423_v22 = vld [vmem:[#allocation28] sm:$0xff]  }
 0x9ad   :  { %v13795_v1 = vpack.c.bf16 %v13791_v27, %v13791_v27  ;;  %v13797_v59 = vpack.c.bf16 %v13793_v0, %v13793_v0  ;;  %v17424_v0 = vld [vmem:[#allocation28 + $0x8] sm:$0xff]  }
 0x9af   :  { %14214 = vmatprep.mubr.bf16.mxu0 %v13795_v1  ;;  %16653 = vmatpush3.bf16.msra.mxu1 %v17422_v54  ;;  %v17427_v1 = vld [vmem:[#allocation28 + $0x20] sm:$0xff]  }
 0x9b0   :  { %14215 = vmatmul.mubr.bf16.vlgmr.msra.gmra.mrb[28].mxu0 %v13794_v8  ;;  %16678 = vmatprep.subr.bf16.mxu1 %v17983_v52  ;;  %v17429_v8 = vld [vmem:[#allocation28 + $0x30] sm:$0xff]  }
 0x9b1   :  { %14224 = vmatpush1.bf16.msra.mxu0 %v17359_v36  ;;  %14255 = vmatprep.mubr.bf16.mxu0 %v13797_v59  ;;  %v17428_v36 = vld [vmem:[#allocation28 + $0x28] sm:$0xff]  }
 0x9b2   :  { %14225 = vmatprep.subr.bf16.mxu0 %v17364_v5  ;;  %v17430_v5 = vld [vmem:[#allocation28 + $0x38] sm:$0xff]  }
 0x9b5   :  { %14226 = vmatpush1.bf16.msra.mxu0 %v17362_v14 }
 0x9b6   :  { %14227 = vmatprep.subr.bf16.mxu0 %v17367_v6  ;;  %v16617_v6 = vld [vmem:[#allocation25] ss:$0 sm:$0xff] }
 0x9b9   :  { %14228 = vmatpush1.bf16.msra.mxu0 %v17365_v28 }
 0x9ba   :  { %14229 = vmatprep.subr.bf16.mxu0 %v17370_v44 }
 0x9bd   :  { %14230 = vmatpush1.bf16.msra.mxu0 %v17368_v11  ;;  %v16618_v11 = vld [vmem:[#allocation26] ss:$0 sm:$0xff] }
 0x9be   :  { %14231 = vmatprep.subr.bf16.mxu0 %v17373_v39 }
 0x9c1   :  { %14232 = vmatpush1.bf16.msra.mxu0 %v17371_v40 }
 0x9c2   :  { %14233 = vmatprep.subr.bf16.mxu0 %v17376_v16 }
 0x9c5   :  { %14234 = vmatpush1.bf16.msra.mxu0 %v17374_v35 }
 0x9c6   :  { %14235 = vmatprep.subr.bf16.mxu0 %v17379_v17  ;;  %v17431_v17 = vld [vmem:[#allocation32] sm:$0xff]  }
 0x9c9   :  { %14236 = vmatpush1.bf16.msra.mxu0 %v17377_v62 }
 0x9ca   :  { %14237 = vmatprep.subr.bf16.mxu0 %v17382_v20  ;;  %v17432_v20 = vld [vmem:[#allocation32 + $0x8] sm:$0xff]  }
 0x9cd   :  { %14238 = vmatpush1.bf16.msra.mxu0 %v17380_v53  ;;  %v17433_v53 = vld [vmem:[#allocation32 + $0x10] sm:$0xff]  }
 0x9ce   :  { %14239 = vmatprep.subr.bf16.mxu0 %v17385_v34  ;;  %v17434_v34 = vld [vmem:[#allocation32 + $0x18] sm:$0xff]  }
 0x9d1   :  { %14240 = vmatpush1.bf16.msra.mxu0 %v17383_v45  ;;  %v17435_v45 = vld [vmem:[#allocation32 + $0x20] sm:$0xff]  }
 0x9d2   :  { %14241 = vmatprep.subr.bf16.mxu0 %v17388_v60  ;;  %v17436_v60 = vld [vmem:[#allocation32 + $0x28] sm:$0xff]  }
 0x9d5   :  { %14242 = vmatpush1.bf16.msra.mxu0 %v17386_v32  ;;  %v17437_v32 = vld [vmem:[#allocation32 + $0x30] sm:$0xff]  }
 0x9d6   :  { %14243 = vmatprep.subr.bf16.mxu0 %v17391_v19  ;;  %v17438_v19 = vld [vmem:[#allocation32 + $0x38] sm:$0xff]  }
 0x9d9   :  { %14244 = vmatpush1.bf16.msra.mxu0 %v17389_v21  ;;  %v16627_v21 = vld [vmem:[#allocation29] ss:$0 sm:$0xff] }
 0x9da   :  { %14245 = vmatprep.subr.bf16.mxu0 %v17394_v4 }
 0x9dd   :  { %14246 = vmatpush1.bf16.msra.mxu0 %v17392_v29  ;;  %v16628_v29 = vld [vmem:[#allocation31] ss:$0 sm:$0xff] }
 0x9de   :  { %14247 = vmatprep.subr.bf16.mxu0 %v17397_v15 }
 0x9e1   :  { %14248 = vmatpush1.bf16.msra.mxu0 %v17395_v23 }
 0x9e2   :  { %14249 = vmatprep.subr.bf16.mxu0 %v17400_v63 }
 0x9e5   :  { %14250 = vmatpush1.bf16.msra.mxu0 %v17398_v46 }
 0x9e6   :  { %14251 = vmatprep.subr.bf16.mxu0 %v17403_v31 }
 0x9e9   :  { %14252 = vmatpush1.bf16.msra.mxu0 %v17401_v33 }
 0x9ea   :  { %14253 = vmatprep.subr.bf16.mxu0 %v17406_v25 }
 0x9ed   :  { %14254 = vmatpush1.bf16.msra.mxu0 %v17404_v48  ;;  %v16629_v48 = vld [vmem:[#allocation34] ss:$0 sm:$0xff] }
 0x9f0   :  { %14256 = vmatmul.mubr.bf16.vlgmr.msra.gmra.mrb[28].mxu0 %v13796_v26 }
 0xac3   :  { %v14257_v41 = vpop.f32.mrb[28].mxu0 }
 0xac4   :  { %v14276_v50 = vmul.f32 %v14269_v43, %v14257_v41  ;;  %v14259_v10 = vpop.f32.mrb[29].mxu0 }
 0xac5   :  { %v14277_v55 = vmul.f32 %v14273_v47, %v14259_v10  ;;  %v14261_v56 = vpop.f32.mrb[30].mxu0 }
 0xac6   :  { %v14290_v3 = vadd.f32 %v14283_v24, %v14276_v50  ;;  %v14262_v51 = vpop.f32.mrb[31].mxu0 }
 0xac7   :  { %v14291_v58 = vadd.f32 %v14287_v18, %v14277_v55 }
 0xac8   :  { %v14292_v9 = vmax.f32 %v14290_v3, 0.0 }
 0xac9   :  { %v14293_v38 = vmax.f32 %v14291_v58, 0.0 }
 0xaca   :  { %v14294_v27 = vpack.c.bf16 %v14292_v9, %v14292_v9 }
 0xacb   :  { %v14295_v37 = vpack.c.bf16 %v14293_v38, %v14293_v38 }
 0xacd   :  { %14456 = vmatprep.mubr.bf16.mxu1 %v14295_v37 }
 0xace   :  { %14457 = vmatmul.mubr.bf16.vlgmr.msra.gmra.mrb[28].mxu1 %v14294_v27 }
 0xacf   :  { %16679 = vmatpush3.bf16.msra.mxu1 %v17423_v22  ;;  %16694 = vmatprep.mubr.msk.bf16.mxu1 %vm17984_vm0, %v17983_v52 }
 0xad0   :  { %16680 = vmatprep.subr.bf16.mxu1 %v17983_v52 }
 0xad3   :  { %16681 = vmatpush3.bf16.msra.mxu1 %v17424_v0 }
 0xad4   :  { %16682 = vmatprep.subr.bf16.mxu1 %v17983_v52 }
 0xad7   :  { %16683 = vmatpush3.bf16.msra.mxu1 %v17425_v7 }
 0xad8   :  { %16684 = vmatprep.subr.bf16.mxu1 %v17983_v52 }
 0xadb   :  { %16685 = vmatpush3.bf16.msra.mxu1 %v17426_v12 }
 0xadc   :  { %16686 = vmatprep.subr.bf16.mxu1 %v17983_v52 }
 0xadf   :  { %16687 = vmatpush3.bf16.msra.mxu1 %v17427_v1 }
 0xae0   :  { %16688 = vmatprep.subr.bf16.mxu1 %v17983_v52 }
 0xae3   :  { %16689 = vmatpush3.bf16.msra.mxu1 %v17428_v36 }
 0xae4   :  { %16690 = vmatprep.subr.bf16.mxu1 %v17983_v52 }
 0xae7   :  { %16691 = vmatpush3.bf16.msra.mxu1 %v17429_v8 }
 0xae8   :  { %16692 = vmatprep.subr.bf16.mxu1 %v17983_v52 }
 0xaeb   :  { %16693 = vmatpush3.bf16.msra.mxu1 %v17430_v5 }
 0xaec   :  { %16698 = vmatprep.subr.bf16.mxu1 %v17983_v52 }
 0xba1   :  { %v16654_v59 = vpop.f32.mrb[28].mxu1 }
 0xba2   :  { %v16655_v14 = vpop.f32.mrb[29].mxu1 }
 0xba3   :  { %v16656_v28 = vadd.f32 %v16655_v14, %v16654_v59  ;;  %v16657_v44 = vpop.f32.mrb[30].mxu1 }
 0xba4   :  { %v16658_v39 = vpop.f32.mrb[31].mxu1 }
 0xba5   :  { %v14471_v40 = vmul.f32 %v16656_v28, %v16617_v6 }
 0xba7   :  { %v14479_v16 = vadd.f32 %v16618_v11, %v14471_v40 }
 0xba9   :  { %v14480_v35 = vmax.f32 %v14479_v16, 0.0 }
 0xbab   :  { %v14481_v62 = vpack.c.bf16 %v14480_v35, %v14480_v35 }
 0xbad   :  { %16695 = vmatmul.mubr.bf16.vlgmr.msra.gmra.mrb[32].mxu1 %v14481_v62 }
 0xbae   :  { %16699 = vmatpush3.bf16.msra.mxu1 %v17431_v17  ;;  %16714 = vmatprep.mubr.msk.bf16.mxu1 %vm17984_vm0, %v17983_v52 }
 0xbaf   :  { %16700 = vmatprep.subr.bf16.mxu1 %v17983_v52 }
 0xbb2   :  { %16701 = vmatpush3.bf16.msra.mxu1 %v17432_v20 }
 0xbb3   :  { %16702 = vmatprep.subr.bf16.mxu1 %v17983_v52 }
 0xbb6   :  { %16703 = vmatpush3.bf16.msra.mxu1 %v17433_v53 }
 0xbb7   :  { %16704 = vmatprep.subr.bf16.mxu1 %v17983_v52 }
 0xbba   :  { %16705 = vmatpush3.bf16.msra.mxu1 %v17434_v34 }
 0xbbb   :  { %16706 = vmatprep.subr.bf16.mxu1 %v17983_v52 }
 0xbbe   :  { %16707 = vmatpush3.bf16.msra.mxu1 %v17435_v45 }
 0xbbf   :  { %16708 = vmatprep.subr.bf16.mxu1 %v17983_v52 }
 0xbc2   :  { %16709 = vmatpush3.bf16.msra.mxu1 %v17436_v60 }
 0xbc3   :  { %16710 = vmatprep.subr.bf16.mxu1 %v17983_v52 }
 0xbc6   :  { %16711 = vmatpush3.bf16.msra.mxu1 %v17437_v32 }
 0xbc7   :  { %16712 = vmatprep.subr.bf16.mxu1 %v17983_v52 }
 0xbca   :  { %16713 = vmatpush3.bf16.msra.mxu1 %v17438_v19 }
 0xc80   :  { %v14580_v4 = vpop.f32.mrb[32].mxu1 }
 0xc81   :  { %v14593_v15 = vmul.f32 %v16627_v21, %v14580_v4  ;;  %v16696_v23 = vpop.f32.mrb[33].mxu1 }
 0xc82   :  { %v14583_v63 = vpop.f32.mrb[34].mxu1 }
 0xc83   :  { %v14601_v46 = vadd.f32 %v16628_v29, %v14593_v15  ;;  %v16697_v31 = vpop.f32.mrb[35].mxu1 }
 0xc85   :  { %v14602_v33 = vmax.f32 %v14601_v46, 0.0 }
 0xc87   :  { %v14603_v25 = vpack.c.bf16 %v14602_v33, %v14602_v33 }
 0xc89   :  { %16715 = vmatmul.mubr.bf16.vlgmr.msra.gmra.mrb[36].mxu1 %v14603_v25 }
 0xd5c   :  { %v14709_v61 = vpop.f32.mrb[36].mxu1 }
 0xd5d   :  { %v14710_v26 = vadd.f32 %v16629_v48, %v14709_v61  ;;  %v16716_v30 = vpop.f32.mrb[37].mxu1 }
 0xd5e   :  { %v14712_v13 = vpop.f32.mrb[38].mxu1 }
 0xd5f   :  { %14715 = vst [vmem:[#allocation35] sm:$0xff] %v14710_v26  ;;  %v16717_v49 = vpop.f32.mrb[39].mxu1 }
 0xd60   :  { %17918 = shalt.err (!%p17915_p4)
}
 0xd61   :  { %s18804_s10 = sld [smem:[#allocation56_spill]] }
 0xd67   :  { %s17919_s21 = scalar_lea.hbm %s18804_s10, 128 }
 0xd68   :  { %p17920_p5 = scmp.ne.s32.totalorder %s18804_s10, %s17919_s21  ;;  %p17923_p6 = scmp.lt.u32.totalorder %s17919_s21, %s18804_s10 }
 0xd6a   :  { %p17925_p7 = pnand %p17923_p6, %p17920_p5 }
 0xd6c   :  { %17928 = shalt.err (!%p17925_p7)
}
 0xd6d   :  { %14725 = dma.vmem_to_hbm [thread:$0]  %s14723_s6, 128, %s18804_s10, [#allocation4]  }
 0xd6e   :  { %17951 = dma.done.wait [#allocation4], 128  }
 0xd6f   :  { %17952 = vsyncadd [#allocation4], 4294967168 }
 0xd70   :  { %14729 = vsyncpa [#allocation3], 1 }
 0xd71   :  { %14730 = vsyncpa [#allocation6], 1 }
 0xd72   :  { %14731 = vsyncpa [#allocation9], 1 }
 0xd73   :  { %14732 = vsyncpa [#allocation12], 1 }
 0xd74   :  { %14733 = vsyncpa [#allocation15], 1 }
 0xd75   :  { %14734 = vsyncpa [#allocation18], 1 }
 0xd76   :  { %14735 = vsyncpa [#allocation21], 1 }
 0xd77   :  { %14736 = vsyncpa [#allocation24], 1 }
 0xd78   :  { %14737 = vsyncpa [#allocation27], 1 }
 0xd79   :  { %14738 = vsyncpa [#allocation30], 1 }
 0xd7a   :  { %14739 = vsyncpa [#allocation33], 1 }
 0xd7b   :  { %14740 = vsyncpa [#allocation4], 1 }

</bundles_post_ra>
